<compile_context>
chip_gen: v5e
topology: v5e:2x2
jax: 0.10.0
libtpu: 0.0.40
codegen_flags: <defaults>
</compile_context>

<pallas_src>
import functools

import numpy as np
import jax
import jax.numpy as jnp
from jax.experimental import pallas as pl
from jax.experimental.pallas import tpu as pltpu


K_FEAT = 7 * 7 * 64          # 3136
K_PAD = 3200                 # 25 * 128 (lane-aligned padding of the l1 contraction)
TK = 640                     # 5 * 128 -> 5 K-steps for the fused head kernel
N_PAD = 128                  # conv matmul outputs padded to a full vreg lane width
HID = 512


# --------------------------- conv matmul kernel ------------------------------

def _conv_mm_kernel(x_ref, w_ref, b_ref, o_ref, *, act):
    # x: (M, K) bf16, w: (K, N) bf16, b: (1, N) f32 -> o: (M, N) f32
    y = jnp.dot(x_ref[...], w_ref[...], preferred_element_type=jnp.float32)
    y = y + b_ref[...]                       # epilogue stays f32 (v5e-friendly)
    if act == "leaky_relu":
        y = jnp.where(y > 0, y, 0.01 * y)    # PyTorch default negative_slope
    elif act == "relu":
        y = jnp.maximum(y, 0.0)
    o_ref[...] = y.astype(o_ref.dtype)


def conv_matmul(x_s, w_s, b_s, act="none"):
    """Fused y = act(x @ w + b) over a stacked leading axis (one grid step per stack)."""
    S, M, K = x_s.shape
    _, _, N = w_s.shape
    kernel = functools.partial(_conv_mm_kernel, act=act)
    return pl.pallas_call(
        kernel,
        out_shape=jax.ShapeDtypeStruct((S, M, N), jnp.float32),
        grid=(S,),
        in_specs=[
            pl.BlockSpec((None, M, K), lambda s: (s, 0, 0)),
            pl.BlockSpec((None, K, N), lambda s: (s, 0, 0)),
            pl.BlockSpec((None, 1, N), lambda s: (s, 0, 0)),
        ],
        out_specs=pl.BlockSpec((None, M, N), lambda s: (s, 0, 0)),
        compiler_params=pltpu.CompilerParams(dimension_semantics=("parallel",)),
    )(x_s, w_s, b_s)


# ------------------------- fused MLP-head kernel ------------------------------

def _head_kernel(t_ref, q_ref, tw1_ref, tb1_ref, pw1_ref, pb1_ref,
                 pw2_ref, pb2_ref, pw3_ref, pb3_ref,
                 tfeat_ref, pfeat_ref, acc_t_ref, acc_p_ref):
    k = pl.program_id(0)

    @pl.when(k == 0)
    def _():
        acc_t_ref[...] = jnp.zeros_like(acc_t_ref)
        acc_p_ref[...] = jnp.zeros_like(acc_p_ref)

    # K-tiled l1 matmuls for both heads (weights stream in 640x512 bf16 chunks).
    t_blk = t_ref[...].astype(jnp.bfloat16)
    q_blk = q_ref[...].astype(jnp.bfloat16)
    acc_t_ref[...] += jnp.dot(t_blk, tw1_ref[...], preferred_element_type=jnp.float32)
    acc_p_ref[...] += jnp.dot(q_blk, pw1_ref[...], preferred_element_type=jnp.float32)

    @pl.when(k == pl.num_programs(0) - 1)
    def _():
        # target head: single Linear (no activation)
        tfeat_ref[...] = (acc_t_ref[...] + tb1_ref[...]).astype(tfeat_ref.dtype)
        # predictor head: ReLU -> Linear -> ReLU -> Linear (bias/act in f32)
        h = jnp.maximum(acc_p_ref[...] + pb1_ref[...], 0.0)
        h = jnp.dot(h.astype(jnp.bfloat16), pw2_ref[...],
                    preferred_element_type=jnp.float32) + pb2_ref[...]
        h = jnp.maximum(h, 0.0)
        h = jnp.dot(h.astype(jnp.bfloat16), pw3_ref[...],
                    preferred_element_type=jnp.float32) + pb3_ref[...]
        pfeat_ref[...] = h.astype(pfeat_ref.dtype)


def head_forward(t, q, hp):
    """Run all four head Linears (target l1; predictor l1/l2/l3) in one pallas_call."""
    B = t.shape[0]
    t_p = jnp.pad(t, ((0, 0), (0, K_PAD - t.shape[1])))
    q_p = jnp.pad(q, ((0, 0), (0, K_PAD - q.shape[1])))
    kt = K_PAD // TK
    target_feature, predict_feature = pl.pallas_call(
        _head_kernel,
        out_shape=(jax.ShapeDtypeStruct((B, HID), jnp.float32),
                   jax.ShapeDtypeStruct((B, HID), jnp.float32)),
        grid=(kt,),
        in_specs=[
            pl.BlockSpec((B, TK), lambda k: (0, k)),        # target trunk features
            pl.BlockSpec((B, TK), lambda k: (0, k)),        # predictor trunk features
            pl.BlockSpec((TK, HID), lambda k: (k, 0)),      # target l1 weight (streamed)
            pl.BlockSpec((1, HID), lambda k: (0, 0)),       # target l1 bias (resident)
            pl.BlockSpec((TK, HID), lambda k: (k, 0)),      # pred l1 weight (streamed)
            pl.BlockSpec((1, HID), lambda k: (0, 0)),       # pred l1 bias
            pl.BlockSpec((HID, HID), lambda k: (0, 0)),     # pred l2 weight (resident)
            pl.BlockSpec((1, HID), lambda k: (0, 0)),
            pl.BlockSpec((HID, HID), lambda k: (0, 0)),     # pred l3 weight (resident)
            pl.BlockSpec((1, HID), lambda k: (0, 0)),
        ],
        out_specs=(pl.BlockSpec((B, HID), lambda k: (0, 0)),
                   pl.BlockSpec((B, HID), lambda k: (0, 0))),
        scratch_shapes=[pltpu.VMEM((B, HID), jnp.float32),
                        pltpu.VMEM((B, HID), jnp.float32)],
        compiler_params=pltpu.CompilerParams(dimension_semantics=("arbitrary",)),
    )(t_p, q_p, hp["l1_tw"], hp["l1_tb"], hp["l1_pw"], hp["l1_pb"],
      hp["l2_pw"], hp["l2_pb"], hp["l3_pw"], hp["l3_pb"])
    return predict_feature, target_feature


# ------------------------------- conv glue -----------------------------------

# TODO(synk): fuse the im2col patch gather into the conv kernel (BlockSpec /
# manual DMA windows over the NHWC activation) instead of materializing the
# patch matrix in XLA; the current glue costs one extra HBM round-trip per conv.
def _im2col(x_nhwc, kh, kw, stride):
    """Extract valid-conv patches; returns (B*oh*ow, kh*kw*C) in (kh, kw, C) order."""
    B, H, W, C = x_nhwc.shape
    oh = (H - kh) // stride + 1
    ow = (W - kw) // stride + 1
    patches = []
    for i in range(kh):
        for j in range(kw):
            patches.append(
                x_nhwc[:, i:i + stride * oh:stride, j:j + stride * ow:stride, :]
            )
    p = jnp.stack(patches, axis=3)                 # (B, oh, ow, kh*kw, C)
    return p.reshape(B * oh * ow, kh * kw * C), oh, ow


# ------------------------------ parameters -----------------------------------

def init_params(key):
    """Generate orthogonal(sqrt(2)) weights and pack them kernel-ready (bf16)."""
    gain = float(np.sqrt(2.0))
    ortho = jax.nn.initializers.orthogonal(scale=gain, column_axis=-1)
    ks = jax.random.split(key, 10)

    def conv_w(k, kh, kw, cin, cout):
        return ortho(k, (kh, kw, cin, cout), jnp.float32)     # HWIO

    def lin_w(k, fin, fout):
        return ortho(k, (fin, fout), jnp.float32)

    pred_c1, targ_c1 = conv_w(ks[0], 8, 8, 1, 32), conv_w(ks[6], 8, 8, 1, 32)
    pred_c2, targ_c2 = conv_w(ks[1], 4, 4, 32, 64), conv_w(ks[7], 4, 4, 32, 64)
    pred_c3, targ_c3 = conv_w(ks[2], 3, 3, 64, 64), conv_w(ks[8], 3, 3, 64, 64)
    pred_l1, targ_l1 = lin_w(ks[3], K_FEAT, HID), lin_w(ks[9], K_FEAT, HID)
    pred_l2 = lin_w(ks[4], HID, HID)
    pred_l3 = lin_w(ks[5], HID, HID)
    # All biases are zero-initialized in the reference module.

    def flat_conv(w):                       # HWIO -> (kh*kw*cin, cout), matches im2col
        kh, kw, cin, cout = w.shape
        return w.reshape(kh * kw * cin, cout)

    def pad_n(w2d):                         # zero-pad cout up to a full 128-lane slab
        return jnp.pad(w2d, ((0, 0), (0, N_PAD - w2d.shape[1])))

    def pad_k(w2d):                         # zero-pad the l1 contraction dim to 3200
        return jnp.pad(w2d, ((0, K_PAD - w2d.shape[0]), (0, 0)))

    conv = {
        # conv1: pred & targ fused along cout (32+32=64), padded to 128 lanes
        "c1_w": pad_n(jnp.concatenate([flat_conv(pred_c1), flat_conv(targ_c1)],
                                      axis=1))[None].astype(jnp.bfloat16),   # (1,64,128)
        "c1_b": jnp.zeros((1, 1, N_PAD), jnp.float32),
        # conv2 / conv3: stacked [pred, targ] along the leading grid axis
        "c2_w": jnp.stack([pad_n(flat_conv(pred_c2)),
                           pad_n(flat_conv(targ_c2))]).astype(jnp.bfloat16),  # (2,512,128)
        "c2_b": jnp.zeros((2, 1, N_PAD), jnp.float32),
        "c3_w": jnp.stack([pad_n(flat_conv(pred_c3)),
                           pad_n(flat_conv(targ_c3))]).astype(jnp.bfloat16),  # (2,576,128)
        "c3_b": jnp.zeros((2, 1, N_PAD), jnp.float32),
    }
    head = {
        "l1_tw": pad_k(targ_l1).astype(jnp.bfloat16),   # (3200, 512)
        "l1_tb": jnp.zeros((1, HID), jnp.float32),
        "l1_pw": pad_k(pred_l1).astype(jnp.bfloat16),
        "l1_pb": jnp.zeros((1, HID), jnp.float32),
        "l2_pw": pred_l2.astype(jnp.bfloat16),
        "l2_pb": jnp.zeros((1, HID), jnp.float32),
        "l3_pw": pred_l3.astype(jnp.bfloat16),
        "l3_pb": jnp.zeros((1, HID), jnp.float32),
    }
    return {"conv": conv, "head": head}


# -------------------------------- forward ------------------------------------

@jax.jit
def rnd_forward(params, next_obs):
    cp, hp = params["conv"], params["head"]
    x = jnp.transpose(next_obs, (0, 2, 3, 1))                  # NCHW -> NHWC (B,84,84,1)
    B = x.shape[0]

    # conv1: shared im2col, pred+targ weights fused along cout
    p1, oh1, ow1 = _im2col(x, 8, 8, 4)                          # (B*400, 64)
    y1 = conv_matmul(p1.astype(jnp.bfloat16)[None], cp["c1_w"], cp["c1_b"],
                     act="leaky_relu")[0]                       # (B*400, 128)
    pred1 = y1[:, :32].reshape(B, oh1, ow1, 32)
    targ1 = y1[:, 32:64].reshape(B, oh1, ow1, 32)

    # conv2: both trunks in one call (stacked grid axis)
    p2p, oh2, ow2 = _im2col(pred1, 4, 4, 2)                     # (B*81, 512)
    p2t, _, _ = _im2col(targ1, 4, 4, 2)
    x2 = jnp.stack([p2p, p2t]).astype(jnp.bfloat16)             # (2, B*81, 512)
    y2 = conv_matmul(x2, cp["c2_w"], cp["c2_b"], act="leaky_relu")
    pred2 = y2[0, :, :64].reshape(B, oh2, ow2, 64)
    targ2 = y2[1, :, :64].reshape(B, oh2, ow2, 64)

    # conv3: both trunks in one call
    p3p, oh3, ow3 = _im2col(pred2, 3, 3, 1)                     # (B*49, 576)
    p3t, _, _ = _im2col(targ2, 3, 3, 1)
    x3 = jnp.stack([p3p, p3t]).astype(jnp.bfloat16)             # (2, B*49, 576)
    y3 = conv_matmul(x3, cp["c3_w"], cp["c3_b"], act="leaky_relu")
    pred3 = y3[0, :, :64].reshape(B, oh3, ow3, 64)
    targ3 = y3[1, :, :64].reshape(B, oh3, ow3, 64)

    # torch Flatten on NCHW => (c, h, w) order
    q = jnp.transpose(pred3, (0, 3, 1, 2)).reshape(B, -1)       # (B, 3136)
    t = jnp.transpose(targ3, (0, 3, 1, 2)).reshape(B, -1)

    # fused MLP heads: target l1 + predictor l1/ReLU/l2/ReLU/l3 in one kernel
    predict_feature, target_feature = head_forward(t, q, hp)
    return predict_feature, target_feature


# --------------------------------- main ---------------------------------------

if __name__ == "__main__":
    key = jax.random.PRNGKey(0)
    k_param, k_data = jax.random.split(key)
    params = init_params(k_param)
    # RNDModel's conv stack hard-codes 84x84 -> 7x7x64 features; batch=2, 1 channel.
    next_obs = jax.random.normal(k_data, (2, 1, 84, 84), dtype=jnp.float32)

    predict_feature, target_feature = rnd_forward(params, next_obs)
    jax.block_until_ready((predict_feature, target_feature))

    assert predict_feature.shape == (2, 512) and predict_feature.dtype == jnp.float32
    assert target_feature.shape == (2, 512) and target_feature.dtype == jnp.float32
    assert bool(jnp.all(jnp.isfinite(predict_feature)))
    assert bool(jnp.all(jnp.isfinite(target_feature)))
    print("KERNEL_OK")
</pallas_src>

<mosaic_0001>
module attributes {stable_mosaic.version = 11 : i64} {
  func.func @_conv_mm_kernel(%arg0: i32, %arg1: memref<1x800x64xbf16, #tpu.memory_space<vmem>>, %arg2: memref<1x64x128xbf16, #tpu.memory_space<vmem>>, %arg3: memref<1x1x128xf32, #tpu.memory_space<vmem>>, %arg4: memref<1x800x128xf32, #tpu.memory_space<vmem>>) attributes {dimension_semantics = [#tpu.dimension_semantics<parallel>], iteration_bounds = array<i64: 1>, scalar_prefetch = 0 : i64, scratch_operands = 0 : i64, tpu.core_type = #tpu.core_type<tc>, window_params = [{transform_indices = @transform_0, window_bounds = array<i64: 1, 800, 64>}, {transform_indices = @transform_1, window_bounds = array<i64: 1, 64, 128>}, {transform_indices = @transform_2, window_bounds = array<i64: 1, 1, 128>}, {transform_indices = @transform_3, window_bounds = array<i64: 1, 800, 128>}]} {
    %c0 = arith.constant 0 : index
    %c0_0 = arith.constant 0 : index
    %c0_1 = arith.constant 0 : index
    %0 = vector.load %arg1[%c0, %c0_0, %c0_1] : memref<1x800x64xbf16, #tpu.memory_space<vmem>>, vector<1x800x64xbf16>
    %1 = vector.shape_cast %0 : vector<1x800x64xbf16> to vector<800x64xbf16>
    %c0_2 = arith.constant 0 : index
    %c0_3 = arith.constant 0 : index
    %c0_4 = arith.constant 0 : index
    %2 = vector.load %arg2[%c0_2, %c0_3, %c0_4] : memref<1x64x128xbf16, #tpu.memory_space<vmem>>, vector<1x64x128xbf16>
    %3 = vector.shape_cast %2 : vector<1x64x128xbf16> to vector<64x128xbf16>
    %cst = arith.constant dense<0.000000e+00> : vector<800x128xf32>
    %4 = tpu.matmul %1, %3, %cst {dimension_numbers = #tpu.dot_dimension_numbers<[1], [0], [0], [1], [0, 0, 1, 1], [], []>} : vector<800x64xbf16>, vector<64x128xbf16>, vector<800x128xf32> -> vector<800x128xf32>
    %c0_5 = arith.constant 0 : index
    %c0_6 = arith.constant 0 : index
    %c0_7 = arith.constant 0 : index
    %5 = vector.load %arg3[%c0_5, %c0_6, %c0_7] : memref<1x1x128xf32, #tpu.memory_space<vmem>>, vector<1x1x128xf32>
    %6 = vector.shape_cast %5 : vector<1x1x128xf32> to vector<1x128xf32>
    %7 = vector.broadcast %6 : vector<1x128xf32> to vector<800x128xf32>
    %8 = arith.addf %4, %7 : vector<800x128xf32>
    %cst_8 = arith.constant 0.000000e+00 : f32
    %9 = vector.broadcast %cst_8 : f32 to vector<800x128xf32>
    %10 = arith.cmpf ogt, %8, %9 : vector<800x128xf32>
    %cst_9 = arith.constant 0.00999999977 : f32
    %11 = vector.broadcast %cst_9 : f32 to vector<800x128xf32>
    %12 = arith.mulf %11, %8 : vector<800x128xf32>
    %13 = arith.select %10, %8, %12 : vector<800x128xi1>, vector<800x128xf32>
    %c0_10 = arith.constant 0 : index
    %c0_11 = arith.constant 0 : index
    %c0_12 = arith.constant 0 : index
    %14 = vector.load %arg4[%c0_10, %c0_11, %c0_12] : memref<1x800x128xf32, #tpu.memory_space<vmem>>, vector<1x800x128xf32>
    %15 = vector.shape_cast %14 : vector<1x800x128xf32> to vector<800x128xf32>
    %16 = vector.shape_cast %13 : vector<800x128xf32> to vector<1x800x128xf32>
    tpu.vector_store %arg4[%c0_10, %c0_11, %c0_12], %16 {strides = array<i32>} : memref<1x800x128xf32, #tpu.memory_space<vmem>>, vector<1x800x128xf32>,
    return
  }
  func.func @transform_0(%arg0: i32) -> (i32, i32, i32) {
    %c0_i32 = arith.constant 0 : i32
    %c0_i32_0 = arith.constant 0 : i32
    %c0_i32_1 = arith.constant 0 : i32
    return %arg0, %c0_i32, %c0_i32_0 : i32, i32, i32
  }
  func.func @transform_1(%arg0: i32) -> (i32, i32, i32) {
    %c0_i32 = arith.constant 0 : i32
    %c0_i32_0 = arith.constant 0 : i32
    %c0_i32_1 = arith.constant 0 : i32
    return %arg0, %c0_i32, %c0_i32_0 : i32, i32, i32
  }
  func.func @transform_2(%arg0: i32) -> (i32, i32, i32) {
    %c0_i32 = arith.constant 0 : i32
    %c0_i32_0 = arith.constant 0 : i32
    %c0_i32_1 = arith.constant 0 : i32
    return %arg0, %c0_i32, %c0_i32_0 : i32, i32, i32
  }
  func.func @transform_3(%arg0: i32) -> (i32, i32, i32) {
    %c0_i32 = arith.constant 0 : i32
    %c0_i32_0 = arith.constant 0 : i32
    %c0_i32_1 = arith.constant 0 : i32
    return %arg0, %c0_i32, %c0_i32_0 : i32, i32, i32
  }
}

module attributes {stable_mosaic.version = 11 : i64} {
  func.func @_conv_mm_kernel(%arg0: i32, %arg1: memref<1x162x512xbf16, #tpu.memory_space<vmem>>, %arg2: memref<1x512x128xbf16, #tpu.memory_space<vmem>>, %arg3: memref<1x1x128xf32, #tpu.memory_space<vmem>>, %arg4: memref<1x162x128xf32, #tpu.memory_space<vmem>>) attributes {dimension_semantics = [#tpu.dimension_semantics<parallel>], iteration_bounds = array<i64: 2>, scalar_prefetch = 0 : i64, scratch_operands = 0 : i64, tpu.core_type = #tpu.core_type<tc>, window_params = [{transform_indices = @transform_0, window_bounds = array<i64: 1, 162, 512>}, {transform_indices = @transform_1, window_bounds = array<i64: 1, 512, 128>}, {transform_indices = @transform_2, window_bounds = array<i64: 1, 1, 128>}, {transform_indices = @transform_3, window_bounds = array<i64: 1, 162, 128>}]} {
    %c0 = arith.constant 0 : index
    %c0_0 = arith.constant 0 : index
    %c0_1 = arith.constant 0 : index
    %0 = vector.load %arg1[%c0, %c0_0, %c0_1] : memref<1x162x512xbf16, #tpu.memory_space<vmem>>, vector<1x162x512xbf16>
    %1 = vector.shape_cast %0 : vector<1x162x512xbf16> to vector<162x512xbf16>
    %c0_2 = arith.constant 0 : index
    %c0_3 = arith.constant 0 : index
    %c0_4 = arith.constant 0 : index
    %2 = vector.load %arg2[%c0_2, %c0_3, %c0_4] : memref<1x512x128xbf16, #tpu.memory_space<vmem>>, vector<1x512x128xbf16>
    %3 = vector.shape_cast %2 : vector<1x512x128xbf16> to vector<512x128xbf16>
    %cst = arith.constant dense<0.000000e+00> : vector<162x128xf32>
    %4 = tpu.matmul %1, %3, %cst {dimension_numbers = #tpu.dot_dimension_numbers<[1], [0], [0], [1], [0, 0, 1, 1], [], []>} : vector<162x512xbf16>, vector<512x128xbf16>, vector<162x128xf32> -> vector<162x128xf32>
    %c0_5 = arith.constant 0 : index
    %c0_6 = arith.constant 0 : index
    %c0_7 = arith.constant 0 : index
    %5 = vector.load %arg3[%c0_5, %c0_6, %c0_7] : memref<1x1x128xf32, #tpu.memory_space<vmem>>, vector<1x1x128xf32>
    %6 = vector.shape_cast %5 : vector<1x1x128xf32> to vector<1x128xf32>
    %7 = vector.broadcast %6 : vector<1x128xf32> to vector<162x128xf32>
    %8 = arith.addf %4, %7 : vector<162x128xf32>
    %cst_8 = arith.constant 0.000000e+00 : f32
    %9 = vector.broadcast %cst_8 : f32 to vector<162x128xf32>
    %10 = arith.cmpf ogt, %8, %9 : vector<162x128xf32>
    %cst_9 = arith.constant 0.00999999977 : f32
    %11 = vector.broadcast %cst_9 : f32 to vector<162x128xf32>
    %12 = arith.mulf %11, %8 : vector<162x128xf32>
    %13 = arith.select %10, %8, %12 : vector<162x128xi1>, vector<162x128xf32>
    %c0_10 = arith.constant 0 : index
    %c0_11 = arith.constant 0 : index
    %c0_12 = arith.constant 0 : index
    %14 = vector.load %arg4[%c0_10, %c0_11, %c0_12] : memref<1x162x128xf32, #tpu.memory_space<vmem>>, vector<1x162x128xf32>
    %15 = vector.shape_cast %14 : vector<1x162x128xf32> to vector<162x128xf32>
    %16 = vector.shape_cast %13 : vector<162x128xf32> to vector<1x162x128xf32>
    tpu.vector_store %arg4[%c0_10, %c0_11, %c0_12], %16 {strides = array<i32>} : memref<1x162x128xf32, #tpu.memory_space<vmem>>, vector<1x162x128xf32>,
    return
  }
  func.func @transform_0(%arg0: i32) -> (i32, i32, i32) {
    %c0_i32 = arith.constant 0 : i32
    %c0_i32_0 = arith.constant 0 : i32
    %c0_i32_1 = arith.constant 0 : i32
    return %arg0, %c0_i32, %c0_i32_0 : i32, i32, i32
  }
  func.func @transform_1(%arg0: i32) -> (i32, i32, i32) {
    %c0_i32 = arith.constant 0 : i32
    %c0_i32_0 = arith.constant 0 : i32
    %c0_i32_1 = arith.constant 0 : i32
    return %arg0, %c0_i32, %c0_i32_0 : i32, i32, i32
  }
  func.func @transform_2(%arg0: i32) -> (i32, i32, i32) {
    %c0_i32 = arith.constant 0 : i32
    %c0_i32_0 = arith.constant 0 : i32
    %c0_i32_1 = arith.constant 0 : i32
    return %arg0, %c0_i32, %c0_i32_0 : i32, i32, i32
  }
  func.func @transform_3(%arg0: i32) -> (i32, i32, i32) {
    %c0_i32 = arith.constant 0 : i32
    %c0_i32_0 = arith.constant 0 : i32
    %c0_i32_1 = arith.constant 0 : i32
    return %arg0, %c0_i32, %c0_i32_0 : i32, i32, i32
  }
}

module attributes {stable_mosaic.version = 11 : i64} {
  func.func @_conv_mm_kernel(%arg0: i32, %arg1: memref<1x98x576xbf16, #tpu.memory_space<vmem>>, %arg2: memref<1x576x128xbf16, #tpu.memory_space<vmem>>, %arg3: memref<1x1x128xf32, #tpu.memory_space<vmem>>, %arg4: memref<1x98x128xf32, #tpu.memory_space<vmem>>) attributes {dimension_semantics = [#tpu.dimension_semantics<parallel>], iteration_bounds = array<i64: 2>, scalar_prefetch = 0 : i64, scratch_operands = 0 : i64, tpu.core_type = #tpu.core_type<tc>, window_params = [{transform_indices = @transform_0, window_bounds = array<i64: 1, 98, 576>}, {transform_indices = @transform_1, window_bounds = array<i64: 1, 576, 128>}, {transform_indices = @transform_2, window_bounds = array<i64: 1, 1, 128>}, {transform_indices = @transform_3, window_bounds = array<i64: 1, 98, 128>}]} {
    %c0 = arith.constant 0 : index
    %c0_0 = arith.constant 0 : index
    %c0_1 = arith.constant 0 : index
    %0 = vector.load %arg1[%c0, %c0_0, %c0_1] : memref<1x98x576xbf16, #tpu.memory_space<vmem>>, vector<1x98x576xbf16>
    %1 = vector.shape_cast %0 : vector<1x98x576xbf16> to vector<98x576xbf16>
    %c0_2 = arith.constant 0 : index
    %c0_3 = arith.constant 0 : index
    %c0_4 = arith.constant 0 : index
    %2 = vector.load %arg2[%c0_2, %c0_3, %c0_4] : memref<1x576x128xbf16, #tpu.memory_space<vmem>>, vector<1x576x128xbf16>
    %3 = vector.shape_cast %2 : vector<1x576x128xbf16> to vector<576x128xbf16>
    %cst = arith.constant dense<0.000000e+00> : vector<98x128xf32>
    %4 = tpu.matmul %1, %3, %cst {dimension_numbers = #tpu.dot_dimension_numbers<[1], [0], [0], [1], [0, 0, 1, 1], [], []>} : vector<98x576xbf16>, vector<576x128xbf16>, vector<98x128xf32> -> vector<98x128xf32>
    %c0_5 = arith.constant 0 : index
    %c0_6 = arith.constant 0 : index
    %c0_7 = arith.constant 0 : index
    %5 = vector.load %arg3[%c0_5, %c0_6, %c0_7] : memref<1x1x128xf32, #tpu.memory_space<vmem>>, vector<1x1x128xf32>
    %6 = vector.shape_cast %5 : vector<1x1x128xf32> to vector<1x128xf32>
    %7 = vector.broadcast %6 : vector<1x128xf32> to vector<98x128xf32>
    %8 = arith.addf %4, %7 : vector<98x128xf32>
    %cst_8 = arith.constant 0.000000e+00 : f32
    %9 = vector.broadcast %cst_8 : f32 to vector<98x128xf32>
    %10 = arith.cmpf ogt, %8, %9 : vector<98x128xf32>
    %cst_9 = arith.constant 0.00999999977 : f32
    %11 = vector.broadcast %cst_9 : f32 to vector<98x128xf32>
    %12 = arith.mulf %11, %8 : vector<98x128xf32>
    %13 = arith.select %10, %8, %12 : vector<98x128xi1>, vector<98x128xf32>
    %c0_10 = arith.constant 0 : index
    %c0_11 = arith.constant 0 : index
    %c0_12 = arith.constant 0 : index
    %14 = vector.load %arg4[%c0_10, %c0_11, %c0_12] : memref<1x98x128xf32, #tpu.memory_space<vmem>>, vector<1x98x128xf32>
    %15 = vector.shape_cast %14 : vector<1x98x128xf32> to vector<98x128xf32>
    %16 = vector.shape_cast %13 : vector<98x128xf32> to vector<1x98x128xf32>
    tpu.vector_store %arg4[%c0_10, %c0_11, %c0_12], %16 {strides = array<i32>} : memref<1x98x128xf32, #tpu.memory_space<vmem>>, vector<1x98x128xf32>,
    return
  }
  func.func @transform_0(%arg0: i32) -> (i32, i32, i32) {
    %c0_i32 = arith.constant 0 : i32
    %c0_i32_0 = arith.constant 0 : i32
    %c0_i32_1 = arith.constant 0 : i32
    return %arg0, %c0_i32, %c0_i32_0 : i32, i32, i32
  }
  func.func @transform_1(%arg0: i32) -> (i32, i32, i32) {
    %c0_i32 = arith.constant 0 : i32
    %c0_i32_0 = arith.constant 0 : i32
    %c0_i32_1 = arith.constant 0 : i32
    return %arg0, %c0_i32, %c0_i32_0 : i32, i32, i32
  }
  func.func @transform_2(%arg0: i32) -> (i32, i32, i32) {
    %c0_i32 = arith.constant 0 : i32
    %c0_i32_0 = arith.constant 0 : i32
    %c0_i32_1 = arith.constant 0 : i32
    return %arg0, %c0_i32, %c0_i32_0 : i32, i32, i32
  }
  func.func @transform_3(%arg0: i32) -> (i32, i32, i32) {
    %c0_i32 = arith.constant 0 : i32
    %c0_i32_0 = arith.constant 0 : i32
    %c0_i32_1 = arith.constant 0 : i32
    return %arg0, %c0_i32, %c0_i32_0 : i32, i32, i32
  }
}

module attributes {stable_mosaic.version = 11 : i64} {
  func.func @_head_kernel(%arg0: i32, %arg1: memref<2x640xf32, #tpu.memory_space<vmem>>, %arg2: memref<2x640xf32, #tpu.memory_space<vmem>>, %arg3: memref<640x512xbf16, #tpu.memory_space<vmem>>, %arg4: memref<1x512xf32, #tpu.memory_space<vmem>>, %arg5: memref<640x512xbf16, #tpu.memory_space<vmem>>, %arg6: memref<1x512xf32, #tpu.memory_space<vmem>>, %arg7: memref<512x512xbf16, #tpu.memory_space<vmem>>, %arg8: memref<1x512xf32, #tpu.memory_space<vmem>>, %arg9: memref<512x512xbf16, #tpu.memory_space<vmem>>, %arg10: memref<1x512xf32, #tpu.memory_space<vmem>>, %arg11: memref<2x512xf32, #tpu.memory_space<vmem>>, %arg12: memref<2x512xf32, #tpu.memory_space<vmem>>, %arg13: memref<2x512xf32, #tpu.memory_space<vmem>>, %arg14: memref<2x512xf32, #tpu.memory_space<vmem>>) attributes {dimension_semantics = [#tpu.dimension_semantics<arbitrary>], iteration_bounds = array<i64: 5>, scalar_prefetch = 0 : i64, scratch_operands = 2 : i64, tpu.core_type = #tpu.core_type<tc>, window_params = [{transform_indices = @transform_0, window_bounds = array<i64: 2, 640>}, {transform_indices = @transform_1, window_bounds = array<i64: 2, 640>}, {transform_indices = @transform_2, window_bounds = array<i64: 640, 512>}, {pipeline_mode = #tpu.pipeline_mode<synchronous>, transform_indices = @transform_3, window_bounds = array<i64: 1, 512>}, {transform_indices = @transform_4, window_bounds = array<i64: 640, 512>}, {pipeline_mode = #tpu.pipeline_mode<synchronous>, transform_indices = @transform_5, window_bounds = array<i64: 1, 512>}, {pipeline_mode = #tpu.pipeline_mode<synchronous>, transform_indices = @transform_6, window_bounds = array<i64: 512, 512>}, {pipeline_mode = #tpu.pipeline_mode<synchronous>, transform_indices = @transform_7, window_bounds = array<i64: 1, 512>}, {pipeline_mode = #tpu.pipeline_mode<synchronous>, transform_indices = @transform_8, window_bounds = array<i64: 512, 512>}, {pipeline_mode = #tpu.pipeline_mode<synchronous>, transform_indices = @transform_9, window_bounds = array<i64: 1, 512>}, {pipeline_mode = #tpu.pipeline_mode<synchronous>, transform_indices = @transform_10, window_bounds = array<i64: 2, 512>}, {pipeline_mode = #tpu.pipeline_mode<synchronous>, transform_indices = @transform_11, window_bounds = array<i64: 2, 512>}]} {
    %c0_i32 = arith.constant 0 : i32
    %0 = arith.cmpi eq, %arg0, %c0_i32 : i32
    %1 = arith.extui %0 : i1 to i32
    %c0_i32_0 = arith.constant 0 : i32
    %2 = arith.cmpi ne, %1, %c0_i32_0 : i32
    scf.if %2 {
      %cst_18 = arith.constant 0.000000e+00 : f32
      %20 = vector.broadcast %cst_18 : f32 to vector<2x512xf32>
      %c0_19 = arith.constant 0 : index
      %c0_20 = arith.constant 0 : index
      %21 = vector.load %arg13[%c0_19, %c0_20] : memref<2x512xf32, #tpu.memory_space<vmem>>, vector<2x512xf32>
      tpu.vector_store %arg13[%c0_19, %c0_20], %20 {strides = array<i32>} : memref<2x512xf32, #tpu.memory_space<vmem>>, vector<2x512xf32>,
      %cst_21 = arith.constant 0.000000e+00 : f32
      %22 = vector.broadcast %cst_21 : f32 to vector<2x512xf32>
      %c0_22 = arith.constant 0 : index
      %c0_23 = arith.constant 0 : index
      %23 = vector.load %arg14[%c0_22, %c0_23] : memref<2x512xf32, #tpu.memory_space<vmem>>, vector<2x512xf32>
      tpu.vector_store %arg14[%c0_22, %c0_23], %22 {strides = array<i32>} : memref<2x512xf32, #tpu.memory_space<vmem>>, vector<2x512xf32>,
    } else {
    }
    %c0 = arith.constant 0 : index
    %c0_1 = arith.constant 0 : index
    %3 = vector.load %arg1[%c0, %c0_1] : memref<2x640xf32, #tpu.memory_space<vmem>>, vector<2x640xf32>
    %4 = arith.truncf %3 : vector<2x640xf32> to vector<2x640xbf16>
    %c0_2 = arith.constant 0 : index
    %c0_3 = arith.constant 0 : index
    %5 = vector.load %arg2[%c0_2, %c0_3] : memref<2x640xf32, #tpu.memory_space<vmem>>, vector<2x640xf32>
    %6 = arith.truncf %5 : vector<2x640xf32> to vector<2x640xbf16>
    %c0_4 = arith.constant 0 : index
    %c0_5 = arith.constant 0 : index
    %7 = vector.load %arg13[%c0_4, %c0_5] : memref<2x512xf32, #tpu.memory_space<vmem>>, vector<2x512xf32>
    %c0_6 = arith.constant 0 : index
    %c0_7 = arith.constant 0 : index
    %8 = vector.load %arg3[%c0_6, %c0_7] : memref<640x512xbf16, #tpu.memory_space<vmem>>, vector<640x512xbf16>
    %cst = arith.constant dense<0.000000e+00> : vector<2x512xf32>
    %9 = tpu.matmul %4, %8, %cst {dimension_numbers = #tpu.dot_dimension_numbers<[1], [0], [0], [1], [0, 0, 1, 1], [], []>} : vector<2x640xbf16>, vector<640x512xbf16>, vector<2x512xf32> -> vector<2x512xf32>
    %10 = arith.addf %7, %9 : vector<2x512xf32>
    %c0_8 = arith.constant 0 : index
    %c0_9 = arith.constant 0 : index
    %11 = vector.load %arg13[%c0_8, %c0_9] : memref<2x512xf32, #tpu.memory_space<vmem>>, vector<2x512xf32>
    tpu.vector_store %arg13[%c0_8, %c0_9], %10 {strides = array<i32>} : memref<2x512xf32, #tpu.memory_space<vmem>>, vector<2x512xf32>,
    %c0_10 = arith.constant 0 : index
    %c0_11 = arith.constant 0 : index
    %12 = vector.load %arg14[%c0_10, %c0_11] : memref<2x512xf32, #tpu.memory_space<vmem>>, vector<2x512xf32>
    %c0_12 = arith.constant 0 : index
    %c0_13 = arith.constant 0 : index
    %13 = vector.load %arg5[%c0_12, %c0_13] : memref<640x512xbf16, #tpu.memory_space<vmem>>, vector<640x512xbf16>
    %cst_14 = arith.constant dense<0.000000e+00> : vector<2x512xf32>
    %14 = tpu.matmul %6, %13, %cst_14 {dimension_numbers = #tpu.dot_dimension_numbers<[1], [0], [0], [1], [0, 0, 1, 1], [], []>} : vector<2x640xbf16>, vector<640x512xbf16>, vector<2x512xf32> -> vector<2x512xf32>
    %15 = arith.addf %12, %14 : vector<2x512xf32>
    %c0_15 = arith.constant 0 : index
    %c0_16 = arith.constant 0 : index
    %16 = vector.load %arg14[%c0_15, %c0_16] : memref<2x512xf32, #tpu.memory_space<vmem>>, vector<2x512xf32>
    tpu.vector_store %arg14[%c0_15, %c0_16], %15 {strides = array<i32>} : memref<2x512xf32, #tpu.memory_space<vmem>>, vector<2x512xf32>,
    %c4_i32 = arith.constant 4 : i32
    %17 = arith.cmpi eq, %arg0, %c4_i32 : i32
    %18 = arith.extui %17 : i1 to i32
    %c0_i32_17 = arith.constant 0 : i32
    %19 = arith.cmpi ne, %18, %c0_i32_17 : i32
    scf.if %19 {
      %c0_18 = arith.constant 0 : index
      %c0_19 = arith.constant 0 : index
      %20 = vector.load %arg13[%c0_18, %c0_19] : memref<2x512xf32, #tpu.memory_space<vmem>>, vector<2x512xf32>
      %c0_20 = arith.constant 0 : index
      %c0_21 = arith.constant 0 : index
      %21 = vector.load %arg4[%c0_20, %c0_21] : memref<1x512xf32, #tpu.memory_space<vmem>>, vector<1x512xf32>
      %22 = vector.broadcast %21 : vector<1x512xf32> to vector<2x512xf32>
      %23 = arith.addf %20, %22 : vector<2x512xf32>
      %c0_22 = arith.constant 0 : index
      %c0_23 = arith.constant 0 : index
      %24 = vector.load %arg11[%c0_22, %c0_23] : memref<2x512xf32, #tpu.memory_space<vmem>>, vector<2x512xf32>
      tpu.vector_store %arg11[%c0_22, %c0_23], %23 {strides = array<i32>} : memref<2x512xf32, #tpu.memory_space<vmem>>, vector<2x512xf32>,
      %c0_24 = arith.constant 0 : index
      %c0_25 = arith.constant 0 : index
      %25 = vector.load %arg14[%c0_24, %c0_25] : memref<2x512xf32, #tpu.memory_space<vmem>>, vector<2x512xf32>
      %c0_26 = arith.constant 0 : index
      %c0_27 = arith.constant 0 : index
      %26 = vector.load %arg6[%c0_26, %c0_27] : memref<1x512xf32, #tpu.memory_space<vmem>>, vector<1x512xf32>
      %27 = vector.broadcast %26 : vector<1x512xf32> to vector<2x512xf32>
      %28 = arith.addf %25, %27 : vector<2x512xf32>
      %cst_28 = arith.constant 0.000000e+00 : f32
      %29 = vector.broadcast %cst_28 : f32 to vector<2x512xf32>
      %30 = arith.maximumf %28, %29 : vector<2x512xf32>
      %31 = arith.truncf %30 : vector<2x512xf32> to vector<2x512xbf16>
      %c0_29 = arith.constant 0 : index
      %c0_30 = arith.constant 0 : index
      %32 = vector.load %arg7[%c0_29, %c0_30] : memref<512x512xbf16, #tpu.memory_space<vmem>>, vector<512x512xbf16>
      %cst_31 = arith.constant dense<0.000000e+00> : vector<2x512xf32>
      %33 = tpu.matmul %31, %32, %cst_31 {dimension_numbers = #tpu.dot_dimension_numbers<[1], [0], [0], [1], [0, 0, 1, 1], [], []>} : vector<2x512xbf16>, vector<512x512xbf16>, vector<2x512xf32> -> vector<2x512xf32>
      %c0_32 = arith.constant 0 : index
      %c0_33 = arith.constant 0 : index
      %34 = vector.load %arg8[%c0_32, %c0_33] : memref<1x512xf32, #tpu.memory_space<vmem>>, vector<1x512xf32>
      %35 = vector.broadcast %34 : vector<1x512xf32> to vector<2x512xf32>
      %36 = arith.addf %33, %35 : vector<2x512xf32>
      %cst_34 = arith.constant 0.000000e+00 : f32
      %37 = vector.broadcast %cst_34 : f32 to vector<2x512xf32>
      %38 = arith.maximumf %36, %37 : vector<2x512xf32>
      %39 = arith.truncf %38 : vector<2x512xf32> to vector<2x512xbf16>
      %c0_35 = arith.constant 0 : index
      %c0_36 = arith.constant 0 : index
      %40 = vector.load %arg9[%c0_35, %c0_36] : memref<512x512xbf16, #tpu.memory_space<vmem>>, vector<512x512xbf16>
      %cst_37 = arith.constant dense<0.000000e+00> : vector<2x512xf32>
      %41 = tpu.matmul %39, %40, %cst_37 {dimension_numbers = #tpu.dot_dimension_numbers<[1], [0], [0], [1], [0, 0, 1, 1], [], []>} : vector<2x512xbf16>, vector<512x512xbf16>, vector<2x512xf32> -> vector<2x512xf32>
      %c0_38 = arith.constant 0 : index
      %c0_39 = arith.constant 0 : index
      %42 = vector.load %arg10[%c0_38, %c0_39] : memref<1x512xf32, #tpu.memory_space<vmem>>, vector<1x512xf32>
      %43 = vector.broadcast %42 : vector<1x512xf32> to vector<2x512xf32>
      %44 = arith.addf %41, %43 : vector<2x512xf32>
      %c0_40 = arith.constant 0 : index
      %c0_41 = arith.constant 0 : index
      %45 = vector.load %arg12[%c0_40, %c0_41] : memref<2x512xf32, #tpu.memory_space<vmem>>, vector<2x512xf32>
      tpu.vector_store %arg12[%c0_40, %c0_41], %44 {strides = array<i32>} : memref<2x512xf32, #tpu.memory_space<vmem>>, vector<2x512xf32>,
    } else {
    }
    return
  }
  func.func @transform_0(%arg0: i32) -> (i32, i32) {
    %c0_i32 = arith.constant 0 : i32
    %c0_i32_0 = arith.constant 0 : i32
    return %c0_i32, %arg0 : i32, i32
  }
  func.func @transform_1(%arg0: i32) -> (i32, i32) {
    %c0_i32 = arith.constant 0 : i32
    %c0_i32_0 = arith.constant 0 : i32
    return %c0_i32, %arg0 : i32, i32
  }
  func.func @transform_2(%arg0: i32) -> (i32, i32) {
    %c0_i32 = arith.constant 0 : i32
    %c0_i32_0 = arith.constant 0 : i32
    return %arg0, %c0_i32 : i32, i32
  }
  func.func @transform_3(%arg0: i32) -> (i32, i32) {
    %c0_i32 = arith.constant 0 : i32
    %c0_i32_0 = arith.constant 0 : i32
    %c0_i32_1 = arith.constant 0 : i32
    return %c0_i32, %c0_i32_0 : i32, i32
  }
  func.func @transform_4(%arg0: i32) -> (i32, i32) {
    %c0_i32 = arith.constant 0 : i32
    %c0_i32_0 = arith.constant 0 : i32
    return %arg0, %c0_i32 : i32, i32
  }
  func.func @transform_5(%arg0: i32) -> (i32, i32) {
    %c0_i32 = arith.constant 0 : i32
    %c0_i32_0 = arith.constant 0 : i32
    %c0_i32_1 = arith.constant 0 : i32
    return %c0_i32, %c0_i32_0 : i32, i32
  }
  func.func @transform_6(%arg0: i32) -> (i32, i32) {
    %c0_i32 = arith.constant 0 : i32
    %c0_i32_0 = arith.constant 0 : i32
    %c0_i32_1 = arith.constant 0 : i32
    return %c0_i32, %c0_i32_0 : i32, i32
  }
  func.func @transform_7(%arg0: i32) -> (i32, i32) {
    %c0_i32 = arith.constant 0 : i32
    %c0_i32_0 = arith.constant 0 : i32
    %c0_i32_1 = arith.constant 0 : i32
    return %c0_i32, %c0_i32_0 : i32, i32
  }
  func.func @transform_8(%arg0: i32) -> (i32, i32) {
    %c0_i32 = arith.constant 0 : i32
    %c0_i32_0 = arith.constant 0 : i32
    %c0_i32_1 = arith.constant 0 : i32
    return %c0_i32, %c0_i32_0 : i32, i32
  }
  func.func @transform_9(%arg0: i32) -> (i32, i32) {
    %c0_i32 = arith.constant 0 : i32
    %c0_i32_0 = arith.constant 0 : i32
    %c0_i32_1 = arith.constant 0 : i32
    return %c0_i32, %c0_i32_0 : i32, i32
  }
  func.func @transform_10(%arg0: i32) -> (i32, i32) {
    %c0_i32 = arith.constant 0 : i32
    %c0_i32_0 = arith.constant 0 : i32
    %c0_i32_1 = arith.constant 0 : i32
    return %c0_i32, %c0_i32_0 : i32, i32
  }
  func.func @transform_11(%arg0: i32) -> (i32, i32) {
    %c0_i32 = arith.constant 0 : i32
    %c0_i32_0 = arith.constant 0 : i32
    %c0_i32_1 = arith.constant 0 : i32
    return %c0_i32, %c0_i32_0 : i32, i32
  }
}

</mosaic_0001>

<bundles_post_ra>
// kernel: rnd_forward.4
= control target key start
LH: loop header
LB: loop body
LE: loop exit
PB: predicated region body
PF: predicated region fallthrough
CT: control target
= control target key end

     0   :  { %vm401_vm0 = vcmask 523264   ;;  %s2191_s1 = inlined_call_operand.vmem [shape: bf16[1,64,128], index: 1, kind: input, shape index: {}]   ;;  %s2192_s2 = inlined_call_operand.vmem [shape: f32[1,1,128], index: 2, kind: input, shape index: {}]   ;;  %s2193_s0 = inlined_call_operand.vmem [shape: bf16[1,800,64], index: 0, kind: input, shape index: {}]   ;;  %s2194_s3 = inlined_call_operand.vmem [shape: f32[1,800,128], index: 3, kind: output, shape index: {}]  }
   0x1   :  { %v1534_v0 = vld [vmem:[%s2191_s1 + $0x18] sm:$0xff]  ;;  %v1533_v1 = vld [vmem:[%s2191_s1 + $0x10] sm:$0xff]  ;;  %v1532_v2 = vld [vmem:[%s2191_s1 + $0x8] sm:$0xff] }
   0x2   :  { %1535 = vmatpush.bf16.msra.mxu1 %v1534_v0  ;;  %1536 = vmatpush.bf16.msra.mxu2 %v1534_v0  ;;  %v1531_v3 = vld [vmem:[%s2191_s1] sm:$0xff]  ;;  %v1506_v5 = vld [vmem:[%s2193_s0 + $0xc8] sm:$0xff]  ;;  %v1519_v6 = vld [vmem:[%s2193_s0 + $0x130] sm:$0xff] }
   0x3   :  { %1537 = vmatpush.bf16.msra.mxu3 %v1534_v0  ;;  %556 = vmatpush.bf16.msra.mxu0 %v1534_v0  ;;  %v1493_v4 = vld [vmem:[%s2193_s0 + $0x60] sm:$0xff]  ;;  %v1494_v8 = vld [vmem:[%s2193_s0 + $0x68] sm:$0xff]  ;;  %v1507_v9 = vld [vmem:[%s2193_s0 + $0xd0] sm:$0xff] }
   0x4   :  { %v1481_v7 = vld [vmem:[%s2193_s0] sm:$0xff]  ;;  %v1520_v10 = vld [vmem:[%s2193_s0 + $0x138] sm:$0xff]  ;;  %v1482_v11 = vld [vmem:[%s2193_s0 + $0x8] sm:$0xff] }
   0x5   :  { %v1495_v12 = vld [vmem:[%s2193_s0 + $0x70] sm:$0xff]  ;;  %v1508_v13 = vld [vmem:[%s2193_s0 + $0xd8] sm:$0xff]  ;;  %v1521_v14 = vld [vmem:[%s2193_s0 + $0x140] sm:$0xff] }
   0x6   :  { %1538 = vmatpush.bf16.msra.mxu1 %v1533_v1  ;;  %1539 = vmatpush.bf16.msra.mxu2 %v1533_v1  ;;  %v1483_v15 = vld [vmem:[%s2193_s0 + $0x10] sm:$0xff]  ;;  %v1496_v16 = vld [vmem:[%s2193_s0 + $0x78] sm:$0xff]  ;;  %v1509_v17 = vld [vmem:[%s2193_s0 + $0xe0] sm:$0xff] }
   0x7   :  { %1540 = vmatpush.bf16.msra.mxu3 %v1533_v1  ;;  %557 = vmatpush.bf16.msra.mxu0 %v1533_v1  ;;  %v1522_v18 = vld [vmem:[%s2193_s0 + $0x148] sm:$0xff]  ;;  %v1484_v19 = vld [vmem:[%s2193_s0 + $0x18] sm:$0xff]  ;;  %v1497_v20 = vld [vmem:[%s2193_s0 + $0x80] sm:$0xff] }
   0x8   :  { %v1510_v21 = vld [vmem:[%s2193_s0 + $0xe8] sm:$0xff]  ;;  %v1523_v22 = vld [vmem:[%s2193_s0 + $0x150] sm:$0xff]  ;;  %v1485_v23 = vld [vmem:[%s2193_s0 + $0x20] sm:$0xff] }
   0x9   :  { %v1498_v24 = vld [vmem:[%s2193_s0 + $0x88] sm:$0xff]  ;;  %v1511_v25 = vld [vmem:[%s2193_s0 + $0xf0] sm:$0xff]  ;;  %v1524_v26 = vld [vmem:[%s2193_s0 + $0x158] sm:$0xff] }
   0xa   :  { %1541 = vmatpush.bf16.msra.mxu1 %v1532_v2  ;;  %1542 = vmatpush.bf16.msra.mxu2 %v1532_v2  ;;  %v1486_v27 = vld [vmem:[%s2193_s0 + $0x28] sm:$0xff]  ;;  %v1499_v28 = vld [vmem:[%s2193_s0 + $0x90] sm:$0xff]  ;;  %v1512_v29 = vld [vmem:[%s2193_s0 + $0xf8] sm:$0xff] }
   0xb   :  { %1543 = vmatpush.bf16.msra.mxu3 %v1532_v2  ;;  %558 = vmatpush.bf16.msra.mxu0 %v1532_v2  ;;  %v1525_v30 = vld [vmem:[%s2193_s0 + $0x160] sm:$0xff]  ;;  %v1487_v31 = vld [vmem:[%s2193_s0 + $0x30] sm:$0xff]  ;;  %v1500_v32 = vld [vmem:[%s2193_s0 + $0x98] sm:$0xff] }
   0xc   :  { %v1513_v33 = vld [vmem:[%s2193_s0 + $0x100] sm:$0xff]  ;;  %v1526_v34 = vld [vmem:[%s2193_s0 + $0x168] sm:$0xff]  ;;  %v1488_v35 = vld [vmem:[%s2193_s0 + $0x38] sm:$0xff] }
   0xd   :  { %v1712_v36 = vld [vmem:[%s2192_s2] ss:$0 sm:$0xff]  ;;  %v1514_v38 = vld [vmem:[%s2193_s0 + $0x108] sm:$0xff]  ;;  %v1527_v40 = vld [vmem:[%s2193_s0 + $0x170] sm:$0xff] }
   0xe   :  { %1544 = vmatpush.bf16.msra.mxu1 %v1531_v3  ;;  %1545 = vmatpush.bf16.msra.mxu2 %v1531_v3  ;;  %v1501_v37 = vld [vmem:[%s2193_s0 + $0xa0] sm:$0xff] }
   0xf   :  { %1546 = vmatpush.bf16.msra.mxu3 %v1531_v3  ;;  %559 = vmatpush.bf16.msra.mxu0 %v1531_v3  ;;  %v1489_v41 = vld [vmem:[%s2193_s0 + $0x40] sm:$0xff]  ;;  %v1502_v3 = vld [vmem:[%s2193_s0 + $0xa8] sm:$0xff] }
  0x11   :  { %1443 = vmatmul.msk.bf16.vlgmr.msra.gmra.mxu1 %vm401_vm0, %v1493_v4  ;;  %1456 = vmatmul.msk.bf16.vlgmr.msra.gmra.mxu2 %vm401_vm0, %v1506_v5  ;;  %v1515_v4 = vld [vmem:[%s2193_s0 + $0x110] sm:$0xff] }
  0x12   :  { %1469 = vmatmul.msk.bf16.vlgmr.msra.gmra.mxu3 %vm401_vm0, %v1519_v6  ;;  %1431 = vmatmul.msk.bf16.vlgmr.msra.gmra.mxu0 %vm401_vm0, %v1481_v7 }
  0x21   :  { %1444 = vmatmul.msk.bf16.gmra.mxu1 %vm401_vm0, %v1494_v8  ;;  %1457 = vmatmul.msk.bf16.gmra.mxu2 %vm401_vm0, %v1507_v9  ;;  %v1528_v8 = vld [vmem:[%s2193_s0 + $0x178] sm:$0xff]  ;;  %v1490_v9 = vld [vmem:[%s2193_s0 + $0x48] sm:$0xff] }
  0x22   :  { %1470 = vmatmul.msk.bf16.gmra.mxu3 %vm401_vm0, %v1520_v10  ;;  %1432 = vmatmul.msk.bf16.gmra.mxu0 %vm401_vm0, %v1482_v11 }
  0x31   :  { %1445 = vmatmul.msk.bf16.gmra.mxu1 %vm401_vm0, %v1495_v12  ;;  %1458 = vmatmul.msk.bf16.gmra.mxu2 %vm401_vm0, %v1508_v13 }
  0x32   :  { %1471 = vmatmul.msk.bf16.gmra.mxu3 %vm401_vm0, %v1521_v14  ;;  %1433 = vmatmul.msk.bf16.gmra.mxu0 %vm401_vm0, %v1483_v15 }
  0x41   :  { %1446 = vmatmul.msk.bf16.gmra.mxu1 %vm401_vm0, %v1496_v16  ;;  %1459 = vmatmul.msk.bf16.gmra.mxu2 %vm401_vm0, %v1509_v17 }
  0x42   :  { %1472 = vmatmul.msk.bf16.gmra.mxu3 %vm401_vm0, %v1522_v18  ;;  %1434 = vmatmul.msk.bf16.gmra.mxu0 %vm401_vm0, %v1484_v19 }
  0x51   :  { %1447 = vmatmul.msk.bf16.gmra.mxu1 %vm401_vm0, %v1497_v20  ;;  %1460 = vmatmul.msk.bf16.gmra.mxu2 %vm401_vm0, %v1510_v21 }
  0x52   :  { %1473 = vmatmul.msk.bf16.gmra.mxu3 %vm401_vm0, %v1523_v22  ;;  %1435 = vmatmul.msk.bf16.gmra.mxu0 %vm401_vm0, %v1485_v23 }
  0x61   :  { %1448 = vmatmul.msk.bf16.gmra.mxu1 %vm401_vm0, %v1498_v24  ;;  %1461 = vmatmul.msk.bf16.gmra.mxu2 %vm401_vm0, %v1511_v25 }
  0x62   :  { %1474 = vmatmul.msk.bf16.gmra.mxu3 %vm401_vm0, %v1524_v26  ;;  %1436 = vmatmul.msk.bf16.gmra.mxu0 %vm401_vm0, %v1486_v27 }
  0x71   :  { %1449 = vmatmul.msk.bf16.gmra.mxu1 %vm401_vm0, %v1499_v28  ;;  %1462 = vmatmul.msk.bf16.gmra.mxu2 %vm401_vm0, %v1512_v29 }
  0x72   :  { %1475 = vmatmul.msk.bf16.gmra.mxu3 %vm401_vm0, %v1525_v30  ;;  %1437 = vmatmul.msk.bf16.gmra.mxu0 %vm401_vm0, %v1487_v31 }
  0x81   :  { %1450 = vmatmul.msk.bf16.gmra.mxu1 %vm401_vm0, %v1500_v32  ;;  %1463 = vmatmul.msk.bf16.gmra.mxu2 %vm401_vm0, %v1513_v33 }
  0x82   :  { %1476 = vmatmul.msk.bf16.gmra.mxu3 %vm401_vm0, %v1526_v34  ;;  %1438 = vmatmul.msk.bf16.gmra.mxu0 %vm401_vm0, %v1488_v35 }
  0x8e   :  { %v621_v39 = vpop.f32.mrf.mxu1 }
  0x8f   :  { %v622_v42 = vadd.f32 %v1712_v36, %v621_v39  ;;  %v561_v43 = vpop.f32.mrf.mxu0 }
  0x90   :  { %v562_v44 = vadd.f32 %v1712_v36, %v561_v43 }
  0x91   :  { %vm835_vm1 = vcmp.gt.f32.partialorder %v622_v42, 0.0  ;;  %v935_v45 = vmul.f32 0.01, %v622_v42  ;;  %1451 = vmatmul.msk.bf16.gmra.mxu1 %vm401_vm0, %v1501_v37  ;;  %1464 = vmatmul.msk.bf16.gmra.mxu2 %vm401_vm0, %v1514_v38 }
  0x92   :  { %1477 = vmatmul.msk.bf16.gmra.mxu3 %vm401_vm0, %v1527_v40  ;;  %vm811_vm2 = vcmp.gt.f32.partialorder %v562_v44, 0.0  ;;  %v911_v46 = vmul.f32 0.01, %v562_v44  ;;  %1439 = vmatmul.msk.bf16.gmra.mxu0 %vm401_vm0, %v1489_v41  ;;  %v1503_v40 = vld [vmem:[%s2193_s0 + $0xb0] sm:$0xff]  ;;  %v1516_v41 = vld [vmem:[%s2193_s0 + $0x118] sm:$0xff] }
  0x93   :  { %v1035_v47 = vsel %vm835_vm1, %v622_v42, %v935_v45  ;;  %v1529_v45 = vld [vmem:[%s2193_s0 + $0x180] sm:$0xff] }
  0x94   :  { %1135 = vst [vmem:[%s2194_s3 + $0xc0] sm:$0xff] %v1035_v47  ;;  %v686_v48 = vpop.f32.mrf.mxu2  ;;  %v1011_v49 = vsel %vm811_vm2, %v562_v44, %v911_v46  ;;  %v1491_v46 = vld [vmem:[%s2193_s0 + $0x50] sm:$0xff] }
  0x95   :  { %v687_v50 = vadd.f32 %v1712_v36, %v686_v48  ;;  %1111 = vst [vmem:[%s2194_s3] sm:$0xff] %v1011_v49  ;;  %v751_v51 = vpop.f32.mrf.mxu3 }
  0x96   :  { %v623_v52 = vpop.f32.mrf.mxu1  ;;  %v752_v53 = vadd.f32 %v1712_v36, %v751_v51 }
  0x97   :  { %vm861_vm3 = vcmp.gt.f32.partialorder %v687_v50, 0.0  ;;  %v961_v54 = vmul.f32 0.01, %v687_v50  ;;  %v624_v55 = vadd.f32 %v1712_v36, %v623_v52  ;;  %v563_v56 = vpop.f32.mrf.mxu0 }
  0x98   :  { %vm887_vm4 = vcmp.gt.f32.partialorder %v752_v53, 0.0  ;;  %v987_v57 = vmul.f32 0.01, %v752_v53  ;;  %v564_v58 = vadd.f32 %v1712_v36, %v563_v56 }
  0x99   :  { %v1061_v59 = vsel %vm861_vm3, %v687_v50, %v961_v54  ;;  %vm836_vm5 = vcmp.gt.f32.partialorder %v624_v55, 0.0  ;;  %v936_v60 = vmul.f32 0.01, %v624_v55 }
  0x9a   :  { %1161 = vst [vmem:[%s2194_s3 + $0x190] sm:$0xff] %v1061_v59  ;;  %v1087_v61 = vsel %vm887_vm4, %v752_v53, %v987_v57  ;;  %vm812_vm6 = vcmp.gt.f32.partialorder %v564_v58, 0.0  ;;  %v912_v62 = vmul.f32 0.01, %v564_v58 }
  0x9b   :  { %v1036_v63 = vsel %vm836_vm5, %v624_v55, %v936_v60  ;;  %1187 = vst [vmem:[%s2194_s3 + $0x260] sm:$0xff] %v1087_v61 }
  0x9c   :  { %1136 = vst [vmem:[%s2194_s3 + $0xc8] sm:$0xff] %v1036_v63  ;;  %v688_v0 = vpop.f32.mrf.mxu2  ;;  %v1012_v1 = vsel %vm812_vm6, %v564_v58, %v912_v62 }
  0x9d   :  { %v689_v2 = vadd.f32 %v1712_v36, %v688_v0  ;;  %1112 = vst [vmem:[%s2194_s3 + $0x8] sm:$0xff] %v1012_v1  ;;  %v753_v5 = vpop.f32.mrf.mxu3 }
  0x9e   :  { %v626_v6 = vpop.f32.mrf.mxu1  ;;  %v754_v7 = vadd.f32 %v1712_v36, %v753_v5 }
  0x9f   :  { %vm862_vm7 = vcmp.gt.f32.partialorder %v689_v2, 0.0  ;;  %v962_v10 = vmul.f32 0.01, %v689_v2  ;;  %v627_v11 = vadd.f32 %v1712_v36, %v626_v6  ;;  %v566_v12 = vpop.f32.mrf.mxu0 }
  0xa0   :  { %vm888_vm8 = vcmp.gt.f32.partialorder %v754_v7, 0.0  ;;  %v988_v13 = vmul.f32 0.01, %v754_v7  ;;  %v567_v14 = vadd.f32 %v1712_v36, %v566_v12  ;;  %v1504_v12 = vld [vmem:[%s2193_s0 + $0xb8] sm:$0xff] }
  0xa1   :  { %v1062_v15 = vsel %vm862_vm7, %v689_v2, %v962_v10  ;;  %vm837_vm9 = vcmp.gt.f32.partialorder %v627_v11, 0.0  ;;  %v937_v16 = vmul.f32 0.01, %v627_v11  ;;  %1452 = vmatmul.msk.bf16.gmra.mxu1 %vm401_vm0, %v1502_v3  ;;  %1465 = vmatmul.msk.bf16.gmra.mxu2 %vm401_vm0, %v1515_v4 }
  0xa2   :  { %1162 = vst [vmem:[%s2194_s3 + $0x198] sm:$0xff] %v1062_v15  ;;  %v1088_v17 = vsel %vm888_vm8, %v754_v7, %v988_v13  ;;  %1478 = vmatmul.msk.bf16.gmra.mxu3 %vm401_vm0, %v1528_v8  ;;  %vm813_vm10 = vcmp.gt.f32.partialorder %v567_v14, 0.0  ;;  %v913_v18 = vmul.f32 0.01, %v567_v14  ;;  %1440 = vmatmul.msk.bf16.gmra.mxu0 %vm401_vm0, %v1490_v9  ;;  %v1517_v13 = vld [vmem:[%s2193_s0 + $0x120] sm:$0xff] }
  0xa3   :  { %v1037_v19 = vsel %vm837_vm9, %v627_v11, %v937_v16  ;;  %1188 = vst [vmem:[%s2194_s3 + $0x268] sm:$0xff] %v1088_v17  ;;  %v1530_v17 = vld [vmem:[%s2193_s0 + $0x188] sm:$0xff] }
  0xa4   :  { %1137 = vst [vmem:[%s2194_s3 + $0xd0] sm:$0xff] %v1037_v19  ;;  %v691_v20 = vpop.f32.mrf.mxu2  ;;  %v1013_v21 = vsel %vm813_vm10, %v567_v14, %v913_v18  ;;  %v1492_v18 = vld [vmem:[%s2193_s0 + $0x58] sm:$0xff] }
  0xa5   :  { %v692_v22 = vadd.f32 %v1712_v36, %v691_v20  ;;  %1113 = vst [vmem:[%s2194_s3 + $0x10] sm:$0xff] %v1013_v21  ;;  %v756_v23 = vpop.f32.mrf.mxu3 }
  0xa6   :  { %v628_v24 = vpop.f32.mrf.mxu1  ;;  %v757_v25 = vadd.f32 %v1712_v36, %v756_v23 }
  0xa7   :  { %vm863_vm11 = vcmp.gt.f32.partialorder %v692_v22, 0.0  ;;  %v963_v26 = vmul.f32 0.01, %v692_v22  ;;  %v629_v27 = vadd.f32 %v1712_v36, %v628_v24  ;;  %v568_v28 = vpop.f32.mrf.mxu0 }
  0xa8   :  { %vm889_vm12 = vcmp.gt.f32.partialorder %v757_v25, 0.0  ;;  %v989_v29 = vmul.f32 0.01, %v757_v25  ;;  %v569_v30 = vadd.f32 %v1712_v36, %v568_v28 }
  0xa9   :  { %v1063_v31 = vsel %vm863_vm11, %v692_v22, %v963_v26  ;;  %vm838_vm13 = vcmp.gt.f32.partialorder %v629_v27, 0.0  ;;  %v938_v32 = vmul.f32 0.01, %v629_v27 }
  0xaa   :  { %1163 = vst [vmem:[%s2194_s3 + $0x1a0] sm:$0xff] %v1063_v31  ;;  %v1089_v33 = vsel %vm889_vm12, %v757_v25, %v989_v29  ;;  %vm814_vm14 = vcmp.gt.f32.partialorder %v569_v30, 0.0  ;;  %v914_v34 = vmul.f32 0.01, %v569_v30 }
  0xab   :  { %v1038_v35 = vsel %vm838_vm13, %v629_v27, %v938_v32  ;;  %1189 = vst [vmem:[%s2194_s3 + $0x270] sm:$0xff] %v1089_v33 }
  0xac   :  { %1138 = vst [vmem:[%s2194_s3 + $0xd8] sm:$0xff] %v1038_v35  ;;  %v693_v37 = vpop.f32.mrf.mxu2  ;;  %v1014_v38 = vsel %vm814_vm14, %v569_v30, %v914_v34 }
  0xad   :  { %v694_v39 = vadd.f32 %v1712_v36, %v693_v37  ;;  %1114 = vst [vmem:[%s2194_s3 + $0x18] sm:$0xff] %v1014_v38  ;;  %v758_v42 = vpop.f32.mrf.mxu3 }
  0xae   :  { %v631_v43 = vpop.f32.mrf.mxu1  ;;  %v759_v44 = vadd.f32 %v1712_v36, %v758_v42 }
  0xaf   :  { %vm864_vm15 = vcmp.gt.f32.partialorder %v694_v39, 0.0  ;;  %v964_v47 = vmul.f32 0.01, %v694_v39  ;;  %v632_v48 = vadd.f32 %v1712_v36, %v631_v43  ;;  %v571_v49 = vpop.f32.mrf.mxu0 }
  0xb0   :  { %vm890_vm1 = vcmp.gt.f32.partialorder %v759_v44, 0.0  ;;  %v990_v50 = vmul.f32 0.01, %v759_v44  ;;  %v572_v51 = vadd.f32 %v1712_v36, %v571_v49  ;;  %v1505_v49 = vld [vmem:[%s2193_s0 + $0xc0] sm:$0xff] }
  0xb1   :  { %v1064_v52 = vsel %vm864_vm15, %v694_v39, %v964_v47  ;;  %vm839_vm2 = vcmp.gt.f32.partialorder %v632_v48, 0.0  ;;  %v939_v53 = vmul.f32 0.01, %v632_v48  ;;  %1453 = vmatmul.msk.bf16.gmra.mxu1 %vm401_vm0, %v1503_v40  ;;  %1466 = vmatmul.msk.bf16.gmra.mxu2 %vm401_vm0, %v1516_v41 }
  0xb2   :  { %1164 = vst [vmem:[%s2194_s3 + $0x1a8] sm:$0xff] %v1064_v52  ;;  %v1090_v54 = vsel %vm890_vm1, %v759_v44, %v990_v50  ;;  %1479 = vmatmul.msk.bf16.gmra.mxu3 %vm401_vm0, %v1529_v45  ;;  %vm815_vm3 = vcmp.gt.f32.partialorder %v572_v51, 0.0  ;;  %v915_v55 = vmul.f32 0.01, %v572_v51  ;;  %1441 = vmatmul.msk.bf16.gmra.mxu0 %vm401_vm0, %v1491_v46  ;;  %v1518_v50 = vld [vmem:[%s2193_s0 + $0x128] sm:$0xff] }
  0xb3   :  { %v1039_v56 = vsel %vm839_vm2, %v632_v48, %v939_v53  ;;  %1190 = vst [vmem:[%s2194_s3 + $0x278] sm:$0xff] %v1090_v54 }
  0xb4   :  { %1139 = vst [vmem:[%s2194_s3 + $0xe0] sm:$0xff] %v1039_v56  ;;  %v696_v57 = vpop.f32.mrf.mxu2  ;;  %v1015_v58 = vsel %vm815_vm3, %v572_v51, %v915_v55 }
  0xb5   :  { %v697_v59 = vadd.f32 %v1712_v36, %v696_v57  ;;  %1115 = vst [vmem:[%s2194_s3 + $0x20] sm:$0xff] %v1015_v58  ;;  %v761_v60 = vpop.f32.mrf.mxu3 }
  0xb6   :  { %v633_v61 = vpop.f32.mrf.mxu1  ;;  %v762_v62 = vadd.f32 %v1712_v36, %v761_v60 }
  0xb7   :  { %vm865_vm4 = vcmp.gt.f32.partialorder %v697_v59, 0.0  ;;  %v965_v63 = vmul.f32 0.01, %v697_v59  ;;  %v634_v0 = vadd.f32 %v1712_v36, %v633_v61  ;;  %v573_v1 = vpop.f32.mrf.mxu0 }
  0xb8   :  { %vm891_vm5 = vcmp.gt.f32.partialorder %v762_v62, 0.0  ;;  %v991_v2 = vmul.f32 0.01, %v762_v62  ;;  %v574_v3 = vadd.f32 %v1712_v36, %v573_v1 }
  0xb9   :  { %v1065_v4 = vsel %vm865_vm4, %v697_v59, %v965_v63  ;;  %vm840_vm6 = vcmp.gt.f32.partialorder %v634_v0, 0.0  ;;  %v940_v5 = vmul.f32 0.01, %v634_v0 }
  0xba   :  { %1165 = vst [vmem:[%s2194_s3 + $0x1b0] sm:$0xff] %v1065_v4  ;;  %v1091_v6 = vsel %vm891_vm5, %v762_v62, %v991_v2  ;;  %vm816_vm7 = vcmp.gt.f32.partialorder %v574_v3, 0.0  ;;  %v916_v7 = vmul.f32 0.01, %v574_v3 }
  0xbb   :  { %v1040_v8 = vsel %vm840_vm6, %v634_v0, %v940_v5  ;;  %1191 = vst [vmem:[%s2194_s3 + $0x280] sm:$0xff] %v1091_v6 }
  0xbc   :  { %1140 = vst [vmem:[%s2194_s3 + $0xe8] sm:$0xff] %v1040_v8  ;;  %v698_v9 = vpop.f32.mrf.mxu2  ;;  %v1016_v10 = vsel %vm816_vm7, %v574_v3, %v916_v7 }
  0xbd   :  { %v699_v11 = vadd.f32 %v1712_v36, %v698_v9  ;;  %1116 = vst [vmem:[%s2194_s3 + $0x28] sm:$0xff] %v1016_v10  ;;  %v763_v14 = vpop.f32.mrf.mxu3 }
  0xbe   :  { %v636_v15 = vpop.f32.mrf.mxu1  ;;  %v764_v16 = vadd.f32 %v1712_v36, %v763_v14 }
  0xbf   :  { %vm866_vm8 = vcmp.gt.f32.partialorder %v699_v11, 0.0  ;;  %v966_v19 = vmul.f32 0.01, %v699_v11  ;;  %v637_v20 = vadd.f32 %v1712_v36, %v636_v15  ;;  %v576_v21 = vpop.f32.mrf.mxu0 }
  0xc0   :  { %vm892_vm9 = vcmp.gt.f32.partialorder %v764_v16, 0.0  ;;  %v992_v22 = vmul.f32 0.01, %v764_v16  ;;  %v577_v23 = vadd.f32 %v1712_v36, %v576_v21 }
  0xc1   :  { %v1066_v24 = vsel %vm866_vm8, %v699_v11, %v966_v19  ;;  %vm841_vm10 = vcmp.gt.f32.partialorder %v637_v20, 0.0  ;;  %v941_v25 = vmul.f32 0.01, %v637_v20  ;;  %1454 = vmatmul.msk.bf16.gmra.mxu1 %vm401_vm0, %v1504_v12  ;;  %1467 = vmatmul.msk.bf16.gmra.mxu2 %vm401_vm0, %v1517_v13 }
  0xc2   :  { %1166 = vst [vmem:[%s2194_s3 + $0x1b8] sm:$0xff] %v1066_v24  ;;  %v1092_v26 = vsel %vm892_vm9, %v764_v16, %v992_v22  ;;  %1480 = vmatmul.msk.bf16.gmra.mxu3 %vm401_vm0, %v1530_v17  ;;  %vm817_vm11 = vcmp.gt.f32.partialorder %v577_v23, 0.0  ;;  %v917_v27 = vmul.f32 0.01, %v577_v23  ;;  %1442 = vmatmul.msk.bf16.gmra.mxu0 %vm401_vm0, %v1492_v18 }
  0xc3   :  { %v1041_v28 = vsel %vm841_vm10, %v637_v20, %v941_v25  ;;  %1192 = vst [vmem:[%s2194_s3 + $0x288] sm:$0xff] %v1092_v26 }
  0xc4   :  { %1141 = vst [vmem:[%s2194_s3 + $0xf0] sm:$0xff] %v1041_v28  ;;  %v701_v29 = vpop.f32.mrf.mxu2  ;;  %v1017_v30 = vsel %vm817_vm11, %v577_v23, %v917_v27 }
  0xc5   :  { %v702_v31 = vadd.f32 %v1712_v36, %v701_v29  ;;  %1117 = vst [vmem:[%s2194_s3 + $0x30] sm:$0xff] %v1017_v30  ;;  %v766_v32 = vpop.f32.mrf.mxu3 }
  0xc6   :  { %v638_v33 = vpop.f32.mrf.mxu1  ;;  %v767_v34 = vadd.f32 %v1712_v36, %v766_v32 }
  0xc7   :  { %vm867_vm12 = vcmp.gt.f32.partialorder %v702_v31, 0.0  ;;  %v967_v35 = vmul.f32 0.01, %v702_v31  ;;  %v639_v37 = vadd.f32 %v1712_v36, %v638_v33  ;;  %v578_v38 = vpop.f32.mrf.mxu0 }
  0xc8   :  { %vm893_vm13 = vcmp.gt.f32.partialorder %v767_v34, 0.0  ;;  %v993_v39 = vmul.f32 0.01, %v767_v34  ;;  %v579_v40 = vadd.f32 %v1712_v36, %v578_v38 }
  0xc9   :  { %v1067_v41 = vsel %vm867_vm12, %v702_v31, %v967_v35  ;;  %vm842_vm14 = vcmp.gt.f32.partialorder %v639_v37, 0.0  ;;  %v942_v42 = vmul.f32 0.01, %v639_v37 }
  0xca   :  { %1167 = vst [vmem:[%s2194_s3 + $0x1c0] sm:$0xff] %v1067_v41  ;;  %v1093_v43 = vsel %vm893_vm13, %v767_v34, %v993_v39  ;;  %vm818_vm15 = vcmp.gt.f32.partialorder %v579_v40, 0.0  ;;  %v918_v44 = vmul.f32 0.01, %v579_v40 }
  0xcb   :  { %v1042_v45 = vsel %vm842_vm14, %v639_v37, %v942_v42  ;;  %1193 = vst [vmem:[%s2194_s3 + $0x290] sm:$0xff] %v1093_v43 }
  0xcc   :  { %1142 = vst [vmem:[%s2194_s3 + $0xf8] sm:$0xff] %v1042_v45  ;;  %v703_v46 = vpop.f32.mrf.mxu2  ;;  %v1018_v47 = vsel %vm818_vm15, %v579_v40, %v918_v44 }
  0xcd   :  { %v704_v48 = vadd.f32 %v1712_v36, %v703_v46  ;;  %1118 = vst [vmem:[%s2194_s3 + $0x38] sm:$0xff] %v1018_v47  ;;  %v768_v51 = vpop.f32.mrf.mxu3 }
  0xce   :  { %v641_v52 = vpop.f32.mrf.mxu1  ;;  %v769_v53 = vadd.f32 %v1712_v36, %v768_v51 }
  0xcf   :  { %vm868_vm1 = vcmp.gt.f32.partialorder %v704_v48, 0.0  ;;  %v968_v54 = vmul.f32 0.01, %v704_v48  ;;  %v642_v55 = vadd.f32 %v1712_v36, %v641_v52  ;;  %v581_v56 = vpop.f32.mrf.mxu0 }
  0xd0   :  { %vm894_vm2 = vcmp.gt.f32.partialorder %v769_v53, 0.0  ;;  %v994_v57 = vmul.f32 0.01, %v769_v53  ;;  %v582_v58 = vadd.f32 %v1712_v36, %v581_v56 }
  0xd1   :  { %v1068_v59 = vsel %vm868_vm1, %v704_v48, %v968_v54  ;;  %vm843_vm3 = vcmp.gt.f32.partialorder %v642_v55, 0.0  ;;  %v943_v60 = vmul.f32 0.01, %v642_v55  ;;  %1455 = vmatmul.msk.bf16.gmra.mxu1 %vm401_vm0, %v1505_v49  ;;  %1468 = vmatmul.msk.bf16.gmra.mxu2 %vm401_vm0, %v1518_v50 }
  0xd2   :  { %1168 = vst [vmem:[%s2194_s3 + $0x1c8] sm:$0xff] %v1068_v59  ;;  %v1094_v61 = vsel %vm894_vm2, %v769_v53, %v994_v57  ;;  %vm819_vm4 = vcmp.gt.f32.partialorder %v582_v58, 0.0  ;;  %v919_v62 = vmul.f32 0.01, %v582_v58 }
  0xd3   :  { %v1043_v63 = vsel %vm843_vm3, %v642_v55, %v943_v60  ;;  %1194 = vst [vmem:[%s2194_s3 + $0x298] sm:$0xff] %v1094_v61 }
  0xd4   :  { %1143 = vst [vmem:[%s2194_s3 + $0x100] sm:$0xff] %v1043_v63  ;;  %v706_v0 = vpop.f32.mrf.mxu2  ;;  %v1019_v1 = vsel %vm819_vm4, %v582_v58, %v919_v62 }
  0xd5   :  { %v707_v2 = vadd.f32 %v1712_v36, %v706_v0  ;;  %1119 = vst [vmem:[%s2194_s3 + $0x40] sm:$0xff] %v1019_v1  ;;  %v771_v3 = vpop.f32.mrf.mxu3 }
  0xd6   :  { %v643_v4 = vpop.f32.mrf.mxu1  ;;  %v772_v5 = vadd.f32 %v1712_v36, %v771_v3 }
  0xd7   :  { %vm869_vm0 = vcmp.gt.f32.partialorder %v707_v2, 0.0  ;;  %v969_v6 = vmul.f32 0.01, %v707_v2  ;;  %v644_v7 = vadd.f32 %v1712_v36, %v643_v4  ;;  %v583_v8 = vpop.f32.mrf.mxu0 }
  0xd8   :  { %vm895_vm5 = vcmp.gt.f32.partialorder %v772_v5, 0.0  ;;  %v995_v9 = vmul.f32 0.01, %v772_v5  ;;  %v584_v10 = vadd.f32 %v1712_v36, %v583_v8 }
  0xd9   :  { %v1069_v11 = vsel %vm869_vm0, %v707_v2, %v969_v6  ;;  %vm844_vm6 = vcmp.gt.f32.partialorder %v644_v7, 0.0  ;;  %v944_v12 = vmul.f32 0.01, %v644_v7 }
  0xda   :  { %1169 = vst [vmem:[%s2194_s3 + $0x1d0] sm:$0xff] %v1069_v11  ;;  %v1095_v13 = vsel %vm895_vm5, %v772_v5, %v995_v9  ;;  %vm820_vm7 = vcmp.gt.f32.partialorder %v584_v10, 0.0  ;;  %v920_v14 = vmul.f32 0.01, %v584_v10 }
  0xdb   :  { %v1044_v15 = vsel %vm844_vm6, %v644_v7, %v944_v12  ;;  %1195 = vst [vmem:[%s2194_s3 + $0x2a0] sm:$0xff] %v1095_v13 }
  0xdc   :  { %1144 = vst [vmem:[%s2194_s3 + $0x108] sm:$0xff] %v1044_v15  ;;  %v708_v16 = vpop.f32.mrf.mxu2  ;;  %v1020_v17 = vsel %vm820_vm7, %v584_v10, %v920_v14 }
  0xdd   :  { %v709_v18 = vadd.f32 %v1712_v36, %v708_v16  ;;  %1120 = vst [vmem:[%s2194_s3 + $0x48] sm:$0xff] %v1020_v17  ;;  %v773_v19 = vpop.f32.mrf.mxu3 }
  0xde   :  { %v646_v20 = vpop.f32.mrf.mxu1  ;;  %v774_v21 = vadd.f32 %v1712_v36, %v773_v19 }
  0xdf   :  { %vm870_vm8 = vcmp.gt.f32.partialorder %v709_v18, 0.0  ;;  %v970_v22 = vmul.f32 0.01, %v709_v18  ;;  %v647_v23 = vadd.f32 %v1712_v36, %v646_v20  ;;  %v586_v24 = vpop.f32.mrf.mxu0 }
  0xe0   :  { %vm896_vm9 = vcmp.gt.f32.partialorder %v774_v21, 0.0  ;;  %v996_v25 = vmul.f32 0.01, %v774_v21  ;;  %v587_v26 = vadd.f32 %v1712_v36, %v586_v24 }
  0xe1   :  { %v1070_v27 = vsel %vm870_vm8, %v709_v18, %v970_v22  ;;  %vm845_vm10 = vcmp.gt.f32.partialorder %v647_v23, 0.0  ;;  %v945_v28 = vmul.f32 0.01, %v647_v23 }
  0xe2   :  { %1170 = vst [vmem:[%s2194_s3 + $0x1d8] sm:$0xff] %v1070_v27  ;;  %v1096_v29 = vsel %vm896_vm9, %v774_v21, %v996_v25  ;;  %vm821_vm11 = vcmp.gt.f32.partialorder %v587_v26, 0.0  ;;  %v921_v30 = vmul.f32 0.01, %v587_v26 }
  0xe3   :  { %v1045_v31 = vsel %vm845_vm10, %v647_v23, %v945_v28  ;;  %1196 = vst [vmem:[%s2194_s3 + $0x2a8] sm:$0xff] %v1096_v29 }
  0xe4   :  { %1145 = vst [vmem:[%s2194_s3 + $0x110] sm:$0xff] %v1045_v31  ;;  %v711_v32 = vpop.f32.mrf.mxu2  ;;  %v1021_v33 = vsel %vm821_vm11, %v587_v26, %v921_v30 }
  0xe5   :  { %v712_v34 = vadd.f32 %v1712_v36, %v711_v32  ;;  %1121 = vst [vmem:[%s2194_s3 + $0x50] sm:$0xff] %v1021_v33  ;;  %v776_v35 = vpop.f32.mrf.mxu3 }
  0xe6   :  { %v648_v37 = vpop.f32.mrf.mxu1  ;;  %v777_v38 = vadd.f32 %v1712_v36, %v776_v35 }
  0xe7   :  { %vm871_vm12 = vcmp.gt.f32.partialorder %v712_v34, 0.0  ;;  %v971_v39 = vmul.f32 0.01, %v712_v34  ;;  %v649_v40 = vadd.f32 %v1712_v36, %v648_v37  ;;  %v588_v41 = vpop.f32.mrf.mxu0 }
  0xe8   :  { %vm897_vm13 = vcmp.gt.f32.partialorder %v777_v38, 0.0  ;;  %v997_v42 = vmul.f32 0.01, %v777_v38  ;;  %v589_v43 = vadd.f32 %v1712_v36, %v588_v41 }
  0xe9   :  { %v1071_v44 = vsel %vm871_vm12, %v712_v34, %v971_v39  ;;  %vm846_vm14 = vcmp.gt.f32.partialorder %v649_v40, 0.0  ;;  %v946_v45 = vmul.f32 0.01, %v649_v40 }
  0xea   :  { %1171 = vst [vmem:[%s2194_s3 + $0x1e0] sm:$0xff] %v1071_v44  ;;  %v1097_v46 = vsel %vm897_vm13, %v777_v38, %v997_v42  ;;  %vm822_vm15 = vcmp.gt.f32.partialorder %v589_v43, 0.0  ;;  %v922_v47 = vmul.f32 0.01, %v589_v43 }
  0xeb   :  { %v1046_v48 = vsel %vm846_vm14, %v649_v40, %v946_v45  ;;  %1197 = vst [vmem:[%s2194_s3 + $0x2b0] sm:$0xff] %v1097_v46 }
  0xec   :  { %1146 = vst [vmem:[%s2194_s3 + $0x118] sm:$0xff] %v1046_v48  ;;  %v713_v49 = vpop.f32.mrf.mxu2  ;;  %v1022_v50 = vsel %vm822_vm15, %v589_v43, %v922_v47 }
  0xed   :  { %v714_v51 = vadd.f32 %v1712_v36, %v713_v49  ;;  %1122 = vst [vmem:[%s2194_s3 + $0x58] sm:$0xff] %v1022_v50  ;;  %v778_v52 = vpop.f32.mrf.mxu3 }
  0xee   :  { %v651_v53 = vpop.f32.mrf.mxu1  ;;  %v779_v54 = vadd.f32 %v1712_v36, %v778_v52 }
  0xef   :  { %vm872_vm1 = vcmp.gt.f32.partialorder %v714_v51, 0.0  ;;  %v972_v55 = vmul.f32 0.01, %v714_v51  ;;  %v652_v56 = vadd.f32 %v1712_v36, %v651_v53  ;;  %v591_v57 = vpop.f32.mrf.mxu0 }
  0xf0   :  { %vm898_vm2 = vcmp.gt.f32.partialorder %v779_v54, 0.0  ;;  %v998_v58 = vmul.f32 0.01, %v779_v54  ;;  %v592_v59 = vadd.f32 %v1712_v36, %v591_v57 }
  0xf1   :  { %v1072_v60 = vsel %vm872_vm1, %v714_v51, %v972_v55  ;;  %vm847_vm3 = vcmp.gt.f32.partialorder %v652_v56, 0.0  ;;  %v947_v61 = vmul.f32 0.01, %v652_v56 }
  0xf2   :  { %1172 = vst [vmem:[%s2194_s3 + $0x1e8] sm:$0xff] %v1072_v60  ;;  %v1098_v62 = vsel %vm898_vm2, %v779_v54, %v998_v58  ;;  %vm823_vm4 = vcmp.gt.f32.partialorder %v592_v59, 0.0  ;;  %v923_v63 = vmul.f32 0.01, %v592_v59 }
  0xf3   :  { %v1047_v0 = vsel %vm847_vm3, %v652_v56, %v947_v61  ;;  %1198 = vst [vmem:[%s2194_s3 + $0x2b8] sm:$0xff] %v1098_v62 }
  0xf4   :  { %1147 = vst [vmem:[%s2194_s3 + $0x120] sm:$0xff] %v1047_v0  ;;  %v716_v1 = vpop.f32.mrf.mxu2  ;;  %v1023_v2 = vsel %vm823_vm4, %v592_v59, %v923_v63 }
  0xf5   :  { %v717_v3 = vadd.f32 %v1712_v36, %v716_v1  ;;  %1123 = vst [vmem:[%s2194_s3 + $0x60] sm:$0xff] %v1023_v2  ;;  %v781_v4 = vpop.f32.mrf.mxu3 }
  0xf6   :  { %v653_v5 = vpop.f32.mrf.mxu1  ;;  %v782_v6 = vadd.f32 %v1712_v36, %v781_v4 }
  0xf7   :  { %vm873_vm0 = vcmp.gt.f32.partialorder %v717_v3, 0.0  ;;  %v973_v7 = vmul.f32 0.01, %v717_v3  ;;  %v654_v8 = vadd.f32 %v1712_v36, %v653_v5  ;;  %v593_v9 = vpop.f32.mrf.mxu0 }
  0xf8   :  { %vm899_vm5 = vcmp.gt.f32.partialorder %v782_v6, 0.0  ;;  %v999_v10 = vmul.f32 0.01, %v782_v6  ;;  %v594_v11 = vadd.f32 %v1712_v36, %v593_v9 }
  0xf9   :  { %v1073_v12 = vsel %vm873_vm0, %v717_v3, %v973_v7  ;;  %vm848_vm6 = vcmp.gt.f32.partialorder %v654_v8, 0.0  ;;  %v948_v13 = vmul.f32 0.01, %v654_v8 }
  0xfa   :  { %1173 = vst [vmem:[%s2194_s3 + $0x1f0] sm:$0xff] %v1073_v12  ;;  %v1099_v14 = vsel %vm899_vm5, %v782_v6, %v999_v10  ;;  %vm824_vm7 = vcmp.gt.f32.partialorder %v594_v11, 0.0  ;;  %v924_v15 = vmul.f32 0.01, %v594_v11 }
  0xfb   :  { %v1048_v16 = vsel %vm848_vm6, %v654_v8, %v948_v13  ;;  %1199 = vst [vmem:[%s2194_s3 + $0x2c0] sm:$0xff] %v1099_v14 }
  0xfc   :  { %1148 = vst [vmem:[%s2194_s3 + $0x128] sm:$0xff] %v1048_v16  ;;  %v718_v17 = vpop.f32.mrf.mxu2  ;;  %v1024_v18 = vsel %vm824_vm7, %v594_v11, %v924_v15 }
  0xfd   :  { %v719_v19 = vadd.f32 %v1712_v36, %v718_v17  ;;  %1124 = vst [vmem:[%s2194_s3 + $0x68] sm:$0xff] %v1024_v18  ;;  %v783_v20 = vpop.f32.mrf.mxu3 }
  0xfe   :  { %v656_v21 = vpop.f32.mrf.mxu1  ;;  %v784_v22 = vadd.f32 %v1712_v36, %v783_v20 }
  0xff   :  { %vm874_vm8 = vcmp.gt.f32.partialorder %v719_v19, 0.0  ;;  %v974_v23 = vmul.f32 0.01, %v719_v19  ;;  %v657_v24 = vadd.f32 %v1712_v36, %v656_v21  ;;  %v596_v25 = vpop.f32.mrf.mxu0 }
 0x100   :  { %vm900_vm9 = vcmp.gt.f32.partialorder %v784_v22, 0.0  ;;  %v1000_v26 = vmul.f32 0.01, %v784_v22  ;;  %v597_v27 = vadd.f32 %v1712_v36, %v596_v25 }
 0x101   :  { %v1074_v28 = vsel %vm874_vm8, %v719_v19, %v974_v23  ;;  %vm849_vm10 = vcmp.gt.f32.partialorder %v657_v24, 0.0  ;;  %v949_v29 = vmul.f32 0.01, %v657_v24 }
 0x102   :  { %1174 = vst [vmem:[%s2194_s3 + $0x1f8] sm:$0xff] %v1074_v28  ;;  %v1100_v30 = vsel %vm900_vm9, %v784_v22, %v1000_v26  ;;  %vm825_vm11 = vcmp.gt.f32.partialorder %v597_v27, 0.0  ;;  %v925_v31 = vmul.f32 0.01, %v597_v27 }
 0x103   :  { %v1049_v32 = vsel %vm849_vm10, %v657_v24, %v949_v29  ;;  %1200 = vst [vmem:[%s2194_s3 + $0x2c8] sm:$0xff] %v1100_v30 }
 0x104   :  { %1149 = vst [vmem:[%s2194_s3 + $0x130] sm:$0xff] %v1049_v32  ;;  %v721_v33 = vpop.f32.mrf.mxu2  ;;  %v1025_v34 = vsel %vm825_vm11, %v597_v27, %v925_v31 }
 0x105   :  { %v722_v35 = vadd.f32 %v1712_v36, %v721_v33  ;;  %1125 = vst [vmem:[%s2194_s3 + $0x70] sm:$0xff] %v1025_v34  ;;  %v786_v37 = vpop.f32.mrf.mxu3 }
 0x106   :  { %v658_v38 = vpop.f32.mrf.mxu1  ;;  %v787_v39 = vadd.f32 %v1712_v36, %v786_v37 }
 0x107   :  { %vm875_vm12 = vcmp.gt.f32.partialorder %v722_v35, 0.0  ;;  %v975_v40 = vmul.f32 0.01, %v722_v35  ;;  %v659_v41 = vadd.f32 %v1712_v36, %v658_v38  ;;  %v598_v42 = vpop.f32.mrf.mxu0 }
 0x108   :  { %vm901_vm13 = vcmp.gt.f32.partialorder %v787_v39, 0.0  ;;  %v1001_v43 = vmul.f32 0.01, %v787_v39  ;;  %v599_v44 = vadd.f32 %v1712_v36, %v598_v42 }
 0x109   :  { %v1075_v45 = vsel %vm875_vm12, %v722_v35, %v975_v40  ;;  %vm850_vm14 = vcmp.gt.f32.partialorder %v659_v41, 0.0  ;;  %v950_v46 = vmul.f32 0.01, %v659_v41 }
 0x10a   :  { %1175 = vst [vmem:[%s2194_s3 + $0x200] sm:$0xff] %v1075_v45  ;;  %v1101_v47 = vsel %vm901_vm13, %v787_v39, %v1001_v43  ;;  %vm826_vm15 = vcmp.gt.f32.partialorder %v599_v44, 0.0  ;;  %v926_v48 = vmul.f32 0.01, %v599_v44 }
 0x10b   :  { %v1050_v49 = vsel %vm850_vm14, %v659_v41, %v950_v46  ;;  %1201 = vst [vmem:[%s2194_s3 + $0x2d0] sm:$0xff] %v1101_v47 }
 0x10c   :  { %1150 = vst [vmem:[%s2194_s3 + $0x138] sm:$0xff] %v1050_v49  ;;  %v723_v50 = vpop.f32.mrf.mxu2  ;;  %v1026_v51 = vsel %vm826_vm15, %v599_v44, %v926_v48 }
 0x10d   :  { %v724_v52 = vadd.f32 %v1712_v36, %v723_v50  ;;  %1126 = vst [vmem:[%s2194_s3 + $0x78] sm:$0xff] %v1026_v51  ;;  %v788_v53 = vpop.f32.mrf.mxu3 }
 0x10e   :  { %v661_v54 = vpop.f32.mrf.mxu1  ;;  %v789_v55 = vadd.f32 %v1712_v36, %v788_v53 }
 0x10f   :  { %vm876_vm1 = vcmp.gt.f32.partialorder %v724_v52, 0.0  ;;  %v976_v56 = vmul.f32 0.01, %v724_v52  ;;  %v662_v57 = vadd.f32 %v1712_v36, %v661_v54  ;;  %v601_v58 = vpop.f32.mrf.mxu0 }
 0x110   :  { %vm902_vm2 = vcmp.gt.f32.partialorder %v789_v55, 0.0  ;;  %v1002_v59 = vmul.f32 0.01, %v789_v55  ;;  %v602_v60 = vadd.f32 %v1712_v36, %v601_v58  ;;  %v2103_v58 = vld [vmem:[%s2192_s2] ss:$0 sm:$0xff] }
 0x111   :  { %v1076_v61 = vsel %vm876_vm1, %v724_v52, %v976_v56  ;;  %vm851_vm3 = vcmp.gt.f32.partialorder %v662_v57, 0.0  ;;  %v951_v62 = vmul.f32 0.01, %v662_v57 }
 0x112   :  { %1176 = vst [vmem:[%s2194_s3 + $0x208] sm:$0xff] %v1076_v61  ;;  %v1102_v63 = vsel %vm902_vm2, %v789_v55, %v1002_v59  ;;  %vm827_vm4 = vcmp.gt.f32.partialorder %v602_v60, 0.0  ;;  %v927_v0 = vmul.f32 0.01, %v602_v60 }
 0x113   :  { %v1051_v1 = vsel %vm851_vm3, %v662_v57, %v951_v62  ;;  %1202 = vst [vmem:[%s2194_s3 + $0x2d8] sm:$0xff] %v1102_v63 }
 0x114   :  { %1151 = vst [vmem:[%s2194_s3 + $0x140] sm:$0xff] %v1051_v1  ;;  %v726_v2 = vpop.f32.mrf.mxu2  ;;  %v1027_v3 = vsel %vm827_vm4, %v602_v60, %v927_v0 }
 0x115   :  { %v727_v4 = vadd.f32 %v1712_v36, %v726_v2  ;;  %1127 = vst [vmem:[%s2194_s3 + $0x80] sm:$0xff] %v1027_v3  ;;  %v791_v5 = vpop.f32.mrf.mxu3 }
 0x116   :  { %v663_v6 = vpop.f32.mrf.mxu1  ;;  %v792_v7 = vadd.f32 %v1712_v36, %v791_v5 }
 0x117   :  { %vm877_vm0 = vcmp.gt.f32.partialorder %v727_v4, 0.0  ;;  %v977_v8 = vmul.f32 0.01, %v727_v4  ;;  %v664_v9 = vadd.f32 %v1712_v36, %v663_v6  ;;  %v603_v10 = vpop.f32.mrf.mxu0 }
 0x118   :  { %vm903_vm5 = vcmp.gt.f32.partialorder %v792_v7, 0.0  ;;  %v1003_v11 = vmul.f32 0.01, %v792_v7  ;;  %v604_v12 = vadd.f32 %v1712_v36, %v603_v10 }
 0x119   :  { %v1077_v13 = vsel %vm877_vm0, %v727_v4, %v977_v8  ;;  %vm852_vm6 = vcmp.gt.f32.partialorder %v664_v9, 0.0  ;;  %v952_v14 = vmul.f32 0.01, %v664_v9 }
 0x11a   :  { %1177 = vst [vmem:[%s2194_s3 + $0x210] sm:$0xff] %v1077_v13  ;;  %v1103_v15 = vsel %vm903_vm5, %v792_v7, %v1003_v11  ;;  %vm828_vm7 = vcmp.gt.f32.partialorder %v604_v12, 0.0  ;;  %v928_v16 = vmul.f32 0.01, %v604_v12 }
 0x11b   :  { %v1052_v17 = vsel %vm852_vm6, %v664_v9, %v952_v14  ;;  %1203 = vst [vmem:[%s2194_s3 + $0x2e0] sm:$0xff] %v1103_v15 }
 0x11c   :  { %1152 = vst [vmem:[%s2194_s3 + $0x148] sm:$0xff] %v1052_v17  ;;  %v728_v18 = vpop.f32.mrf.mxu2  ;;  %v1028_v19 = vsel %vm828_vm7, %v604_v12, %v928_v16 }
 0x11d   :  { %v729_v20 = vadd.f32 %v1712_v36, %v728_v18  ;;  %1128 = vst [vmem:[%s2194_s3 + $0x88] sm:$0xff] %v1028_v19  ;;  %v793_v21 = vpop.f32.mrf.mxu3 }
 0x11e   :  { %v666_v22 = vpop.f32.mrf.mxu1  ;;  %v794_v23 = vadd.f32 %v1712_v36, %v793_v21 }
 0x11f   :  { %vm878_vm8 = vcmp.gt.f32.partialorder %v729_v20, 0.0  ;;  %v978_v24 = vmul.f32 0.01, %v729_v20  ;;  %v667_v25 = vadd.f32 %v1712_v36, %v666_v22  ;;  %v606_v26 = vpop.f32.mrf.mxu0 }
 0x120   :  { %vm904_vm9 = vcmp.gt.f32.partialorder %v794_v23, 0.0  ;;  %v1004_v27 = vmul.f32 0.01, %v794_v23  ;;  %v607_v28 = vadd.f32 %v1712_v36, %v606_v26 }
 0x121   :  { %v1078_v29 = vsel %vm878_vm8, %v729_v20, %v978_v24  ;;  %vm853_vm10 = vcmp.gt.f32.partialorder %v667_v25, 0.0  ;;  %v953_v30 = vmul.f32 0.01, %v667_v25 }
 0x122   :  { %1178 = vst [vmem:[%s2194_s3 + $0x218] sm:$0xff] %v1078_v29  ;;  %v1104_v31 = vsel %vm904_vm9, %v794_v23, %v1004_v27  ;;  %vm829_vm11 = vcmp.gt.f32.partialorder %v607_v28, 0.0  ;;  %v929_v32 = vmul.f32 0.01, %v607_v28 }
 0x123   :  { %v1053_v33 = vsel %vm853_vm10, %v667_v25, %v953_v30  ;;  %1204 = vst [vmem:[%s2194_s3 + $0x2e8] sm:$0xff] %v1104_v31 }
 0x124   :  { %1153 = vst [vmem:[%s2194_s3 + $0x150] sm:$0xff] %v1053_v33  ;;  %v731_v34 = vpop.f32.mrf.mxu2  ;;  %v1029_v35 = vsel %vm829_vm11, %v607_v28, %v929_v32 }
 0x125   :  { %v732_v37 = vadd.f32 %v1712_v36, %v731_v34  ;;  %1129 = vst [vmem:[%s2194_s3 + $0x90] sm:$0xff] %v1029_v35  ;;  %v796_v38 = vpop.f32.mrf.mxu3 }
 0x126   :  { %v668_v39 = vpop.f32.mrf.mxu1  ;;  %v797_v40 = vadd.f32 %v1712_v36, %v796_v38 }
 0x127   :  { %vm879_vm12 = vcmp.gt.f32.partialorder %v732_v37, 0.0  ;;  %v979_v41 = vmul.f32 0.01, %v732_v37  ;;  %v669_v42 = vadd.f32 %v1712_v36, %v668_v39  ;;  %v608_v43 = vpop.f32.mrf.mxu0 }
 0x128   :  { %vm905_vm13 = vcmp.gt.f32.partialorder %v797_v40, 0.0  ;;  %v1005_v44 = vmul.f32 0.01, %v797_v40  ;;  %v609_v45 = vadd.f32 %v1712_v36, %v608_v43 }
 0x129   :  { %v1079_v46 = vsel %vm879_vm12, %v732_v37, %v979_v41  ;;  %vm854_vm14 = vcmp.gt.f32.partialorder %v669_v42, 0.0  ;;  %v954_v47 = vmul.f32 0.01, %v669_v42 }
 0x12a   :  { %1179 = vst [vmem:[%s2194_s3 + $0x220] sm:$0xff] %v1079_v46  ;;  %v1105_v48 = vsel %vm905_vm13, %v797_v40, %v1005_v44  ;;  %vm830_vm15 = vcmp.gt.f32.partialorder %v609_v45, 0.0  ;;  %v930_v49 = vmul.f32 0.01, %v609_v45 }
 0x12b   :  { %v1054_v50 = vsel %vm854_vm14, %v669_v42, %v954_v47  ;;  %1205 = vst [vmem:[%s2194_s3 + $0x2f0] sm:$0xff] %v1105_v48 }
 0x12c   :  { %1154 = vst [vmem:[%s2194_s3 + $0x158] sm:$0xff] %v1054_v50  ;;  %v733_v51 = vpop.f32.mrf.mxu2  ;;  %v1030_v52 = vsel %vm830_vm15, %v609_v45, %v930_v49 }
 0x12d   :  { %v734_v53 = vadd.f32 %v1712_v36, %v733_v51  ;;  %1130 = vst [vmem:[%s2194_s3 + $0x98] sm:$0xff] %v1030_v52  ;;  %v798_v54 = vpop.f32.mrf.mxu3 }
 0x12e   :  { %v671_v55 = vpop.f32.mrf.mxu1  ;;  %v799_v56 = vadd.f32 %v1712_v36, %v798_v54 }
 0x12f   :  { %vm880_vm1 = vcmp.gt.f32.partialorder %v734_v53, 0.0  ;;  %v980_v57 = vmul.f32 0.01, %v734_v53  ;;  %v672_v59 = vadd.f32 %v2103_v58, %v671_v55  ;;  %v611_v60 = vpop.f32.mrf.mxu0 }
 0x130   :  { %vm906_vm2 = vcmp.gt.f32.partialorder %v799_v56, 0.0  ;;  %v1006_v61 = vmul.f32 0.01, %v799_v56  ;;  %v612_v62 = vadd.f32 %v2103_v58, %v611_v60 }
 0x131   :  { %v1080_v63 = vsel %vm880_vm1, %v734_v53, %v980_v57  ;;  %vm855_vm3 = vcmp.gt.f32.partialorder %v672_v59, 0.0  ;;  %v955_v0 = vmul.f32 0.01, %v672_v59 }
 0x132   :  { %1180 = vst [vmem:[%s2194_s3 + $0x228] sm:$0xff] %v1080_v63  ;;  %v1106_v36 = vsel %vm906_vm2, %v799_v56, %v1006_v61  ;;  %vm831_vm4 = vcmp.gt.f32.partialorder %v612_v62, 0.0  ;;  %v931_v1 = vmul.f32 0.01, %v612_v62 }
 0x133   :  { %v1055_v2 = vsel %vm855_vm3, %v672_v59, %v955_v0  ;;  %1206 = vst [vmem:[%s2194_s3 + $0x2f8] sm:$0xff] %v1106_v36 }
 0x134   :  { %1155 = vst [vmem:[%s2194_s3 + $0x160] sm:$0xff] %v1055_v2  ;;  %v736_v3 = vpop.f32.mrf.mxu2  ;;  %v1031_v4 = vsel %vm831_vm4, %v612_v62, %v931_v1 }
 0x135   :  { %v737_v5 = vadd.f32 %v2103_v58, %v736_v3  ;;  %1131 = vst [vmem:[%s2194_s3 + $0xa0] sm:$0xff] %v1031_v4  ;;  %v801_v6 = vpop.f32.mrf.mxu3 }
 0x136   :  { %v673_v7 = vpop.f32.mrf.mxu1  ;;  %v802_v8 = vadd.f32 %v2103_v58, %v801_v6 }
 0x137   :  { %vm881_vm0 = vcmp.gt.f32.partialorder %v737_v5, 0.0  ;;  %v981_v9 = vmul.f32 0.01, %v737_v5  ;;  %v674_v10 = vadd.f32 %v2103_v58, %v673_v7  ;;  %v613_v11 = vpop.f32.mrf.mxu0 }
 0x138   :  { %vm907_vm5 = vcmp.gt.f32.partialorder %v802_v8, 0.0  ;;  %v1007_v12 = vmul.f32 0.01, %v802_v8  ;;  %v614_v13 = vadd.f32 %v2103_v58, %v613_v11 }
 0x139   :  { %v1081_v14 = vsel %vm881_vm0, %v737_v5, %v981_v9  ;;  %vm856_vm6 = vcmp.gt.f32.partialorder %v674_v10, 0.0  ;;  %v956_v15 = vmul.f32 0.01, %v674_v10 }
 0x13a   :  { %1181 = vst [vmem:[%s2194_s3 + $0x230] sm:$0xff] %v1081_v14  ;;  %v1107_v16 = vsel %vm907_vm5, %v802_v8, %v1007_v12  ;;  %vm832_vm7 = vcmp.gt.f32.partialorder %v614_v13, 0.0  ;;  %v932_v17 = vmul.f32 0.01, %v614_v13 }
 0x13b   :  { %v1056_v18 = vsel %vm856_vm6, %v674_v10, %v956_v15  ;;  %1207 = vst [vmem:[%s2194_s3 + $0x300] sm:$0xff] %v1107_v16 }
 0x13c   :  { %1156 = vst [vmem:[%s2194_s3 + $0x168] sm:$0xff] %v1056_v18  ;;  %v738_v19 = vpop.f32.mrf.mxu2  ;;  %v1032_v20 = vsel %vm832_vm7, %v614_v13, %v932_v17 }
 0x13d   :  { %v739_v21 = vadd.f32 %v2103_v58, %v738_v19  ;;  %1132 = vst [vmem:[%s2194_s3 + $0xa8] sm:$0xff] %v1032_v20  ;;  %v803_v22 = vpop.f32.mrf.mxu3 }
 0x13e   :  { %v676_v23 = vpop.f32.mrf.mxu1  ;;  %v804_v24 = vadd.f32 %v2103_v58, %v803_v22 }
 0x13f   :  { %vm882_vm8 = vcmp.gt.f32.partialorder %v739_v21, 0.0  ;;  %v982_v25 = vmul.f32 0.01, %v739_v21  ;;  %v677_v26 = vadd.f32 %v2103_v58, %v676_v23  ;;  %v616_v27 = vpop.f32.mrf.mxu0 }
 0x140   :  { %vm908_vm9 = vcmp.gt.f32.partialorder %v804_v24, 0.0  ;;  %v1008_v28 = vmul.f32 0.01, %v804_v24  ;;  %v617_v29 = vadd.f32 %v2103_v58, %v616_v27 }
 0x141   :  { %v1082_v30 = vsel %vm882_vm8, %v739_v21, %v982_v25  ;;  %vm857_vm10 = vcmp.gt.f32.partialorder %v677_v26, 0.0  ;;  %v957_v31 = vmul.f32 0.01, %v677_v26 }
 0x142   :  { %1182 = vst [vmem:[%s2194_s3 + $0x238] sm:$0xff] %v1082_v30  ;;  %v1108_v32 = vsel %vm908_vm9, %v804_v24, %v1008_v28  ;;  %vm833_vm11 = vcmp.gt.f32.partialorder %v617_v29, 0.0  ;;  %v933_v33 = vmul.f32 0.01, %v617_v29 }
 0x143   :  { %v1057_v34 = vsel %vm857_vm10, %v677_v26, %v957_v31  ;;  %1208 = vst [vmem:[%s2194_s3 + $0x308] sm:$0xff] %v1108_v32 }
 0x144   :  { %1157 = vst [vmem:[%s2194_s3 + $0x170] sm:$0xff] %v1057_v34  ;;  %v741_v35 = vpop.f32.mrf.mxu2  ;;  %v1033_v37 = vsel %vm833_vm11, %v617_v29, %v933_v33 }
 0x145   :  { %v742_v38 = vadd.f32 %v2103_v58, %v741_v35  ;;  %1133 = vst [vmem:[%s2194_s3 + $0xb0] sm:$0xff] %v1033_v37  ;;  %v806_v39 = vpop.f32.mrf.mxu3 }
 0x146   :  { %v678_v40 = vpop.f32.mrf.mxu1  ;;  %v807_v41 = vadd.f32 %v2103_v58, %v806_v39 }
 0x147   :  { %vm883_vm12 = vcmp.gt.f32.partialorder %v742_v38, 0.0  ;;  %v983_v42 = vmul.f32 0.01, %v742_v38  ;;  %v679_v43 = vadd.f32 %v2103_v58, %v678_v40  ;;  %v618_v44 = vpop.f32.mrf.mxu0 }
 0x148   :  { %vm909_vm13 = vcmp.gt.f32.partialorder %v807_v41, 0.0  ;;  %v1009_v45 = vmul.f32 0.01, %v807_v41  ;;  %v619_v46 = vadd.f32 %v2103_v58, %v618_v44 }
 0x149   :  { %v1083_v47 = vsel %vm883_vm12, %v742_v38, %v983_v42  ;;  %vm858_vm14 = vcmp.gt.f32.partialorder %v679_v43, 0.0  ;;  %v958_v48 = vmul.f32 0.01, %v679_v43 }
 0x14a   :  { %1183 = vst [vmem:[%s2194_s3 + $0x240] sm:$0xff] %v1083_v47  ;;  %v1109_v49 = vsel %vm909_vm13, %v807_v41, %v1009_v45  ;;  %vm834_vm15 = vcmp.gt.f32.partialorder %v619_v46, 0.0  ;;  %v934_v50 = vmul.f32 0.01, %v619_v46 }
 0x14b   :  { %v1058_v51 = vsel %vm858_vm14, %v679_v43, %v958_v48  ;;  %1209 = vst [vmem:[%s2194_s3 + $0x310] sm:$0xff] %v1109_v49 }
 0x14c   :  { %1158 = vst [vmem:[%s2194_s3 + $0x178] sm:$0xff] %v1058_v51  ;;  %v743_v52 = vpop.f32.mrf.mxu2  ;;  %v1034_v53 = vsel %vm834_vm15, %v619_v46, %v934_v50 }
 0x14d   :  { %v744_v54 = vadd.f32 %v2103_v58, %v743_v52  ;;  %1134 = vst [vmem:[%s2194_s3 + $0xb8] sm:$0xff] %v1034_v53  ;;  %v808_v55 = vpop.f32.mrf.mxu3 }
 0x14e   :  { %v681_v56 = vpop.f32.mrf.mxu1  ;;  %v809_v57 = vadd.f32 %v2103_v58, %v808_v55 }
 0x14f   :  { %vm884_vm1 = vcmp.gt.f32.partialorder %v744_v54, 0.0  ;;  %v984_v59 = vmul.f32 0.01, %v744_v54  ;;  %v682_v60 = vadd.f32 %v2103_v58, %v681_v56 }
 0x150   :  { %vm910_vm2 = vcmp.gt.f32.partialorder %v809_v57, 0.0  ;;  %v1010_v61 = vmul.f32 0.01, %v809_v57 }
 0x151   :  { %v1084_v62 = vsel %vm884_vm1, %v744_v54, %v984_v59  ;;  %vm859_vm3 = vcmp.gt.f32.partialorder %v682_v60, 0.0  ;;  %v959_v63 = vmul.f32 0.01, %v682_v60 }
 0x152   :  { %1184 = vst [vmem:[%s2194_s3 + $0x248] sm:$0xff] %v1084_v62  ;;  %v1110_v0 = vsel %vm910_vm2, %v809_v57, %v1010_v61 }
 0x153   :  { %v1059_v36 = vsel %vm859_vm3, %v682_v60, %v959_v63  ;;  %1210 = vst [vmem:[%s2194_s3 + $0x318] sm:$0xff] %v1110_v0 }
 0x154   :  { %1159 = vst [vmem:[%s2194_s3 + $0x180] sm:$0xff] %v1059_v36  ;;  %v746_v1 = vpop.f32.mrf.mxu2 }
 0x155   :  { %v747_v2 = vadd.f32 %v2103_v58, %v746_v1 }
 0x156   :  { %v683_v3 = vpop.f32.mrf.mxu1 }
 0x157   :  { %vm885_vm4 = vcmp.gt.f32.partialorder %v747_v2, 0.0  ;;  %v985_v4 = vmul.f32 0.01, %v747_v2  ;;  %v684_v5 = vadd.f32 %v2103_v58, %v683_v3 }
 0x159   :  { %v1085_v6 = vsel %vm885_vm4, %v747_v2, %v985_v4  ;;  %vm860_vm0 = vcmp.gt.f32.partialorder %v684_v5, 0.0  ;;  %v960_v7 = vmul.f32 0.01, %v684_v5 }
 0x15a   :  { %1185 = vst [vmem:[%s2194_s3 + $0x250] sm:$0xff] %v1085_v6 }
 0x15b   :  { %v1060_v8 = vsel %vm860_vm0, %v684_v5, %v960_v7 }
 0x15c   :  { %1160 = vst [vmem:[%s2194_s3 + $0x188] sm:$0xff] %v1060_v8  ;;  %v748_v9 = vpop.f32.mrf.mxu2 }
 0x15d   :  { %v749_v10 = vadd.f32 %v2103_v58, %v748_v9 }
 0x15f   :  { %vm886_vm5 = vcmp.gt.f32.partialorder %v749_v10, 0.0  ;;  %v986_v11 = vmul.f32 0.01, %v749_v10 }
 0x161   :  { %v1086_v12 = vsel %vm886_vm5, %v749_v10, %v986_v11 }
 0x162   :  { %1186 = vst [vmem:[%s2194_s3 + $0x258] sm:$0xff] %v1086_v12 }

// kernel: rnd_forward.5
= control target key start
LH: loop header
LB: loop body
LE: loop exit
PB: predicated region body
PF: predicated region fallthrough
CT: control target
= control target key end

     0   :  { %s1544_s12 = smov 0   ;;  %s1742_s0 = inlined_call_operand.vmem [shape: bf16[2,162,512], index: 0, kind: input, shape index: {}]   ;;  %s1743_s1 = inlined_call_operand.vmem [shape: bf16[2,512,128], index: 1, kind: input, shape index: {}]   ;;  %s1744_s2 = inlined_call_operand.vmem [shape: f32[2,1,128], index: 2, kind: input, shape index: {}]   ;;  %s1745_s3 = inlined_call_operand.vmem [shape: f32[2,162,128], index: 3, kind: output, shape index: {}]  }
   0x1 LB: > { %s1133_s13 = sadd.s32 4294967295, %s1522_s12   ;;  %p1137_p0 = scmp.ge.s32.totalorder %s1522_s12, 1  ;;  %s1522_s12 = sphi %s1544_s12, %s13_s12  }
   0x2   : > { %p155_p1 = scmp.lt.s32.totalorder %s1522_s12, 3 }
   0x4   : > { %p156_p2 = pnand %p1137_p0, %p155_p1 }
   0x5   : > { %p187_p3 = scmp.lt.s32.totalorder (!%p156_p2), %s1133_s13, 1 }
   0x6   : > { %159 = sbr.rel (%p156_p2) target bundleno = 349 (0x15d), region = 32 }
   0xb   : > { %s1747_s13 = smov (!%p187_p3, %s1133_s13), 1 }
   0xc   : > { %s1432_s14 = sshll.u32 %s1747_s13, 8  ;;  %s1505_s18 = smul.u32 336, %s1747_s13 }
   0xd   : > { %s1558_s17 = scalar_lea.vmem %s1743_s1, %s1432_s14  ;;  %s199_s21 = scalar_lea.vmem %s1744_s2, %s1747_s13 }
   0xe   : > { %v1480_v0 = vld [vmem:[%s1558_s17 + $0x38] sm:$0xff]  ;;  %v1479_v4 = vld [vmem:[%s1558_s17 + $0x30] sm:$0xff]  ;;  %v1478_v8 = vld [vmem:[%s1558_s17 + $0x28] sm:$0xff]  ;;  %s1594_s24 = scalar_lea.vmem %s1742_s0, %s1505_s18  ;;  %s1506_s27 = smul.u32 168, %s1747_s13 }
   0xf   : > { %v1488_v1 = vld [vmem:[%s1558_s17 + $0x78] sm:$0xff]  ;;  %721 = vmatpush.bf16.msra.mxu0 %v1480_v0  ;;  %v1487_v5 = vld [vmem:[%s1558_s17 + $0x70] sm:$0xff]  ;;  %v1486_v9 = vld [vmem:[%s1558_s17 + $0x68] sm:$0xff] }
  0x10   : > { %v1496_v2 = vld [vmem:[%s1558_s17 + $0xb8] sm:$0xff]  ;;  %784 = vmatpush.bf16.msra.mxu1 %v1488_v1  ;;  %v1495_v6 = vld [vmem:[%s1558_s17 + $0xb0] sm:$0xff]  ;;  %v1494_v10 = vld [vmem:[%s1558_s17 + $0xa8] sm:$0xff]  ;;  %s1691_s30 = scalar_lea.vmem %s1745_s3, %s1506_s27 }
  0x11   : > { %v1504_v3 = vld [vmem:[%s1558_s17 + $0xf8] sm:$0xff]  ;;  %847 = vmatpush.bf16.msra.mxu2 %v1496_v2  ;;  %v1503_v7 = vld [vmem:[%s1558_s17 + $0xf0] sm:$0xff]  ;;  %v1502_v11 = vld [vmem:[%s1558_s17 + $0xe8] sm:$0xff] }
  0x12   : > { %910 = vmatpush.bf16.msra.mxu3 %v1504_v3  ;;  %v1477_v12 = vld [vmem:[%s1558_s17 + $0x20] sm:$0xff]  ;;  %v1476_v16 = vld [vmem:[%s1558_s17 + $0x18] sm:$0xff]  ;;  %v1475_v20 = vld [vmem:[%s1558_s17 + $0x10] sm:$0xff] }
  0x13   : > { %722 = vmatpush.bf16.msra.mxu0 %v1479_v4  ;;  %v1485_v13 = vld [vmem:[%s1558_s17 + $0x60] sm:$0xff]  ;;  %v1484_v17 = vld [vmem:[%s1558_s17 + $0x58] sm:$0xff]  ;;  %v1483_v21 = vld [vmem:[%s1558_s17 + $0x50] sm:$0xff] }
  0x14   : > { %785 = vmatpush.bf16.msra.mxu1 %v1487_v5  ;;  %v1493_v14 = vld [vmem:[%s1558_s17 + $0xa0] sm:$0xff]  ;;  %v1492_v18 = vld [vmem:[%s1558_s17 + $0x98] sm:$0xff]  ;;  %v1491_v22 = vld [vmem:[%s1558_s17 + $0x90] sm:$0xff] }
  0x15   : > { %848 = vmatpush.bf16.msra.mxu2 %v1495_v6  ;;  %v1501_v15 = vld [vmem:[%s1558_s17 + $0xe0] sm:$0xff]  ;;  %v1500_v19 = vld [vmem:[%s1558_s17 + $0xd8] sm:$0xff]  ;;  %v1499_v23 = vld [vmem:[%s1558_s17 + $0xd0] sm:$0xff] }
  0x16   : > { %911 = vmatpush.bf16.msra.mxu3 %v1503_v7  ;;  %v1474_v24 = vld [vmem:[%s1558_s17 + $0x8] sm:$0xff]  ;;  %v1473_v28 = vld [vmem:[%s1558_s17] sm:$0xff]  ;;  %v1435_v33 = vld [vmem:[%s1594_s24 + $0xc] sm:$0xf0] }
  0x17   : > { %723 = vmatpush.bf16.msra.mxu0 %v1478_v8  ;;  %v1482_v25 = vld [vmem:[%s1558_s17 + $0x48] sm:$0xff]  ;;  %v1481_v29 = vld [vmem:[%s1558_s17 + $0x40] sm:$0xff]  ;;  %v1146_v35 = vld [vmem:[%s1594_s24 + $0x10] sm:$0xf0] }
  0x18   : > { %786 = vmatpush.bf16.msra.mxu1 %v1486_v9  ;;  %v1490_v26 = vld [vmem:[%s1558_s17 + $0x88] sm:$0xff]  ;;  %v1489_v30 = vld [vmem:[%s1558_s17 + $0x80] sm:$0xff]  ;;  %v1436_v37 = vld [vmem:[%s1594_s24 + $0x14] sm:$0xf0] }
  0x19   : > { %849 = vmatpush.bf16.msra.mxu2 %v1494_v10  ;;  %v1498_v27 = vld [vmem:[%s1558_s17 + $0xc8] sm:$0xff]  ;;  %v1497_v31 = vld [vmem:[%s1558_s17 + $0xc0] sm:$0xff]  ;;  %v1154_v39 = vld [vmem:[%s1594_s24 + $0x18] sm:$0xf0] }
  0x1a   : > { %912 = vmatpush.bf16.msra.mxu3 %v1502_v11  ;;  %v1144_v32 = vld [vmem:[%s1594_s24] sm:$0xf]  ;;  %v1433_v34 = vld [vmem:[%s1594_s24 + $0x4] sm:$0xf]  ;;  %v1152_v36 = vld [vmem:[%s1594_s24 + $0x8] sm:$0xf] }
  0x1b   : > { %724 = vmatpush.bf16.msra.mxu0 %v1477_v12  ;;  %v1434_v38 = vld [vmem:[%s1594_s24 + $0xc] sm:$0xf]  ;;  %v1145_v40 = vor.u32 %v1435_v33, %v1144_v32  ;;  %v1149_v41 = vor.u32 %v1433_v34, %v1146_v35  ;;  %v1153_v42 = vor.u32 %v1436_v37, %v1152_v36  ;;  %v1160_v44 = vld [vmem:[%s1594_s24 + $0x20] sm:$0xf]  ;;  %v1439_v45 = vld [vmem:[%s1594_s24 + $0x2c] sm:$0xf0] }
  0x1c   : > { %787 = vmatpush.bf16.msra.mxu1 %v1485_v13  ;;  %v1157_v43 = vor.u32 %v1434_v38, %v1154_v39  ;;  %v1437_v46 = vld [vmem:[%s1594_s24 + $0x24] sm:$0xf]  ;;  %v1162_v47 = vld [vmem:[%s1594_s24 + $0x30] sm:$0xf0]  ;;  %v1168_v48 = vld [vmem:[%s1594_s24 + $0x28] sm:$0xf]  ;;  %v1161_v52 = vor.u32 %v1439_v45, %v1160_v44 }
  0x1d   : > { %850 = vmatpush.bf16.msra.mxu2 %v1493_v14  ;;  %v1440_v49 = vld [vmem:[%s1594_s24 + $0x34] sm:$0xf0]  ;;  %v1438_v50 = vld [vmem:[%s1594_s24 + $0x2c] sm:$0xf]  ;;  %v1170_v51 = vld [vmem:[%s1594_s24 + $0x38] sm:$0xf0]  ;;  %v1165_v53 = vor.u32 %v1437_v46, %v1162_v47 }
  0x1e   : > { %913 = vmatpush.bf16.msra.mxu3 %v1501_v15  ;;  %v1169_v54 = vor.u32 %v1440_v49, %v1168_v48  ;;  %v1173_v55 = vor.u32 %v1438_v50, %v1170_v51  ;;  %v1176_v56 = vld [vmem:[%s1594_s24 + $0x40] sm:$0xf]  ;;  %v1443_v57 = vld [vmem:[%s1594_s24 + $0x4c] sm:$0xf0]  ;;  %v1441_v58 = vld [vmem:[%s1594_s24 + $0x44] sm:$0xf] }
  0x1f   : > { %725 = vmatpush.bf16.msra.mxu0 %v1476_v16  ;;  %v1178_v59 = vld [vmem:[%s1594_s24 + $0x50] sm:$0xf0]  ;;  %v1184_v60 = vld [vmem:[%s1594_s24 + $0x48] sm:$0xf]  ;;  %v1444_v61 = vld [vmem:[%s1594_s24 + $0x54] sm:$0xf0]  ;;  %v1177_v0 = vor.u32 %v1443_v57, %v1176_v56 }
  0x20   : > { %788 = vmatpush.bf16.msra.mxu1 %v1484_v17  ;;  %v1442_v62 = vld [vmem:[%s1594_s24 + $0x4c] sm:$0xf]  ;;  %v1186_v63 = vld [vmem:[%s1594_s24 + $0x58] sm:$0xf0]  ;;  %v1181_v1 = vor.u32 %v1441_v58, %v1178_v59  ;;  %v1185_v2 = vor.u32 %v1444_v61, %v1184_v60  ;;  %v1192_v4 = vld [vmem:[%s1594_s24 + $0x60] sm:$0xf] }
  0x21   : > { %851 = vmatpush.bf16.msra.mxu2 %v1492_v18  ;;  %v1189_v3 = vor.u32 %v1442_v62, %v1186_v63  ;;  %v1447_v5 = vld [vmem:[%s1594_s24 + $0x6c] sm:$0xf0]  ;;  %v1445_v6 = vld [vmem:[%s1594_s24 + $0x64] sm:$0xf]  ;;  %v1194_v7 = vld [vmem:[%s1594_s24 + $0x70] sm:$0xf0] }
  0x22   : > { %914 = vmatpush.bf16.msra.mxu3 %v1500_v19  ;;  %v1200_v8 = vld [vmem:[%s1594_s24 + $0x68] sm:$0xf]  ;;  %v1448_v9 = vld [vmem:[%s1594_s24 + $0x74] sm:$0xf0]  ;;  %v1446_v10 = vld [vmem:[%s1594_s24 + $0x6c] sm:$0xf]  ;;  %v1193_v12 = vor.u32 %v1447_v5, %v1192_v4  ;;  %v1197_v13 = vor.u32 %v1445_v6, %v1194_v7 }
  0x23   : > { %726 = vmatpush.bf16.msra.mxu0 %v1475_v20  ;;  %v1202_v11 = vld [vmem:[%s1594_s24 + $0x78] sm:$0xf0]  ;;  %v1201_v14 = vor.u32 %v1448_v9, %v1200_v8  ;;  %v1208_v16 = vld [vmem:[%s1594_s24 + $0x80] sm:$0xf]  ;;  %v1451_v17 = vld [vmem:[%s1594_s24 + $0x8c] sm:$0xf0] }
  0x24   : > { %789 = vmatpush.bf16.msra.mxu1 %v1483_v21  ;;  %v1205_v15 = vor.u32 %v1446_v10, %v1202_v11  ;;  %v1449_v18 = vld [vmem:[%s1594_s24 + $0x84] sm:$0xf]  ;;  %v1210_v19 = vld [vmem:[%s1594_s24 + $0x90] sm:$0xf0]  ;;  %v1216_v20 = vld [vmem:[%s1594_s24 + $0x88] sm:$0xf] }
  0x25   : > { %852 = vmatpush.bf16.msra.mxu2 %v1491_v22  ;;  %v1452_v21 = vld [vmem:[%s1594_s24 + $0x94] sm:$0xf0]  ;;  %v1450_v22 = vld [vmem:[%s1594_s24 + $0x8c] sm:$0xf]  ;;  %v1232_v32 = vld [vmem:[%s1594_s24 + $0xa8] sm:$0xf] }
  0x26   : > { %915 = vmatpush.bf16.msra.mxu3 %v1499_v23  ;;  %v1218_v23 = vld [vmem:[%s1594_s24 + $0x98] sm:$0xf0]  ;;  %v1456_v33 = vld [vmem:[%s1594_s24 + $0xb4] sm:$0xf0]  ;;  %v1454_v34 = vld [vmem:[%s1594_s24 + $0xac] sm:$0xf] }
  0x27   : > { %727 = vmatpush.bf16.msra.mxu0 %v1474_v24  ;;  %v1209_v24 = vor.u32 %v1451_v17, %v1208_v16  ;;  %v1234_v35 = vld [vmem:[%s1594_s24 + $0xb8] sm:$0xf0]  ;;  %v1233_v38 = vor.u32 %v1456_v33, %v1232_v32  ;;  %v1248_v44 = vld [vmem:[%s1594_s24 + $0xc8] sm:$0xf]  ;;  %v1460_v45 = vld [vmem:[%s1594_s24 + $0xd4] sm:$0xf0] }
  0x28   : > { %790 = vmatpush.bf16.msra.mxu1 %v1482_v25  ;;  %v1213_v25 = vor.u32 %v1449_v18, %v1210_v19  ;;  %v1237_v39 = vor.u32 %v1454_v34, %v1234_v35  ;;  %v1458_v46 = vld [vmem:[%s1594_s24 + $0xcc] sm:$0xf]  ;;  %v1250_v47 = vld [vmem:[%s1594_s24 + $0xd8] sm:$0xf0]  ;;  %v1249_v50 = vor.u32 %v1460_v45, %v1248_v44  ;;  %v1264_v56 = vld [vmem:[%s1594_s24 + $0xe8] sm:$0xf] }
  0x29   : > { %853 = vmatpush.bf16.msra.mxu2 %v1490_v26  ;;  %v1217_v26 = vor.u32 %v1452_v21, %v1216_v20  ;;  %v1253_v51 = vor.u32 %v1458_v46, %v1250_v47  ;;  %v1464_v57 = vld [vmem:[%s1594_s24 + $0xf4] sm:$0xf0]  ;;  %v1462_v58 = vld [vmem:[%s1594_s24 + $0xec] sm:$0xf]  ;;  %v1266_v59 = vld [vmem:[%s1594_s24 + $0xf8] sm:$0xf0] }
  0x2a   : > { %916 = vmatpush.bf16.msra.mxu3 %v1498_v27  ;;  %v1221_v27 = vor.u32 %v1450_v22, %v1218_v23  ;;  %v1265_v62 = vor.u32 %v1464_v57, %v1264_v56  ;;  %v1269_v63 = vor.u32 %v1462_v58, %v1266_v59  ;;  %v1274_v4 = vld [vmem:[%s1594_s24 + $0x110] sm:$0xf0]  ;;  %v1280_v5 = vld [vmem:[%s1594_s24 + $0x108] sm:$0xf]  ;;  %v1468_v6 = vld [vmem:[%s1594_s24 + $0x114] sm:$0xf0] }
  0x2b   : > { %728 = vmatpush.bf16.msra.mxu0 %v1473_v28  ;;  %v1224_v28 = vld [vmem:[%s1594_s24 + $0xa0] sm:$0xf]  ;;  %v1466_v7 = vld [vmem:[%s1594_s24 + $0x10c] sm:$0xf]  ;;  %v1282_v8 = vld [vmem:[%s1594_s24 + $0x118] sm:$0xf0] }
  0x2c   : > { %791 = vmatpush.bf16.msra.mxu1 %v1481_v29  ;;  %v1455_v29 = vld [vmem:[%s1594_s24 + $0xac] sm:$0xf0]  ;;  %v1298_v32 = vld [vmem:[%s1594_s24 + $0x138] sm:$0xf0] }
  0x2d   : > { %854 = vmatpush.bf16.msra.mxu2 %v1489_v30  ;;  %v1453_v30 = vld [vmem:[%s1594_s24 + $0xa4] sm:$0xf]  ;;  %v1225_v36 = vor.u32 %v1455_v29, %v1224_v28  ;;  %v1296_v29 = vld [vmem:[%s1594_s24 + $0x128] sm:$0xf] }
  0x2e   : > { %917 = vmatpush.bf16.msra.mxu3 %v1497_v31  ;;  %729 = vmatmul.bf16.vlgmr.msra.gmra.mxu0 %v1145_v40  ;;  %v1226_v31 = vld [vmem:[%s1594_s24 + $0xb0] sm:$0xf0]  ;;  %v1240_v40 = vld [vmem:[%s1594_s24 + $0xc0] sm:$0xf] }
  0x2f   : > { %792 = vmatmul.bf16.vlgmr.msra.gmra.mxu1 %v1149_v41  ;;  %v1229_v37 = vor.u32 %v1453_v30, %v1226_v31  ;;  %v1459_v41 = vld [vmem:[%s1594_s24 + $0xcc] sm:$0xf0]  ;;  %v1472_v30 = vld [vmem:[%s1594_s24 + $0x134] sm:$0xf0]  ;;  %v1470_v31 = vld [vmem:[%s1594_s24 + $0x12c] sm:$0xf] }
  0x30   : > { %855 = vmatmul.bf16.vlgmr.msra.gmra.mxu2 %v1153_v42  ;;  %v1457_v42 = vld [vmem:[%s1594_s24 + $0xc4] sm:$0xf]  ;;  %v1241_v48 = vor.u32 %v1459_v41, %v1240_v40 }
  0x31   : > { %918 = vmatmul.bf16.vlgmr.msra.gmra.mxu3 %v1157_v43  ;;  %v1242_v43 = vld [vmem:[%s1594_s24 + $0xd0] sm:$0xf0] }
  0x32   : > { %v1245_v49 = vor.u32 %v1457_v42, %v1242_v43  ;;  %v1297_v42 = vor.u32 %v1472_v30, %v1296_v29  ;;  %v1301_v43 = vor.u32 %v1470_v31, %v1298_v32 }
  0x3e   : > { %734 = vmatmul.bf16.gmra.mxu0 %v1161_v52  ;;  %v1256_v52 = vld [vmem:[%s1594_s24 + $0xe0] sm:$0xf] }
  0x3f   : > { %797 = vmatmul.bf16.gmra.mxu1 %v1165_v53  ;;  %v1463_v53 = vld [vmem:[%s1594_s24 + $0xec] sm:$0xf0] }
  0x40   : > { %860 = vmatmul.bf16.gmra.mxu2 %v1169_v54  ;;  %v1461_v54 = vld [vmem:[%s1594_s24 + $0xe4] sm:$0xf]  ;;  %v1257_v60 = vor.u32 %v1463_v53, %v1256_v52 }
  0x41   : > { %923 = vmatmul.bf16.gmra.mxu3 %v1173_v55  ;;  %v1258_v55 = vld [vmem:[%s1594_s24 + $0xf0] sm:$0xf0] }
  0x42   : > { %v1261_v61 = vor.u32 %v1461_v54, %v1258_v55  ;;  %v245_v54 = vld [vmem:[%s1594_s24 + $0x140] sm:$0x11]  ;;  %v246_v55 = vld [vmem:[%s1594_s24 + $0x148] sm:$0x11] }
  0x43   : > { %v437_v58 = vunpack.c.l.b16 %v245_v54  ;;  %v438_v59 = vunpack.c.h.b16 %v245_v54 }
  0x4e   : > { %739 = vmatmul.bf16.gmra.mxu0 %v1177_v0  ;;  %v1671_v0 = vld [vmem:[%s199_s21] ss:$0 sm:$0xff] }
  0x4f   : > { %802 = vmatmul.bf16.gmra.mxu1 %v1181_v1  ;;  %v1272_v1 = vld [vmem:[%s1594_s24 + $0x100] sm:$0xf] }
  0x50   : > { %865 = vmatmul.bf16.gmra.mxu2 %v1185_v2  ;;  %v1467_v2 = vld [vmem:[%s1594_s24 + $0x10c] sm:$0xf0] }
  0x51   : > { %928 = vmatmul.bf16.gmra.mxu3 %v1189_v3  ;;  %v1465_v3 = vld [vmem:[%s1594_s24 + $0x104] sm:$0xf]  ;;  %v1273_v9 = vor.u32 %v1467_v2, %v1272_v1 }
  0x52   : > { %v1277_v10 = vor.u32 %v1465_v3, %v1274_v4  ;;  %v481_v4 = vpack.c.b16 %v437_v58, %v437_v58 }
  0x5e   : > { %744 = vmatmul.bf16.gmra.mxu0 %v1193_v12 }
  0x5f   : > { %807 = vmatmul.bf16.gmra.mxu1 %v1197_v13  ;;  %v1281_v13 = vor.u32 %v1468_v6, %v1280_v5  ;;  %v482_v5 = vpack.c.b16 %v438_v59, %v438_v59 }
  0x60   : > { %870 = vmatmul.bf16.gmra.mxu2 %v1201_v14  ;;  %v1285_v14 = vor.u32 %v1466_v7, %v1282_v8 }
  0x61   : > { %933 = vmatmul.bf16.gmra.mxu3 %v1205_v15 }
  0x6e   : > { %749 = vmatmul.bf16.gmra.mxu0 %v1209_v24  ;;  %v1288_v24 = vld [vmem:[%s1594_s24 + $0x120] sm:$0xf] }
  0x6f   : > { %812 = vmatmul.bf16.gmra.mxu1 %v1213_v25  ;;  %v1471_v25 = vld [vmem:[%s1594_s24 + $0x12c] sm:$0xf0] }
  0x70   : > { %875 = vmatmul.bf16.gmra.mxu2 %v1217_v26  ;;  %v1469_v26 = vld [vmem:[%s1594_s24 + $0x124] sm:$0xf] }
  0x71   : > { %938 = vmatmul.bf16.gmra.mxu3 %v1221_v27  ;;  %v1290_v27 = vld [vmem:[%s1594_s24 + $0x130] sm:$0xf0] }
  0x7e   : > { %754 = vmatmul.bf16.gmra.mxu0 %v1225_v36 }
  0x7f   : > { %817 = vmatmul.bf16.gmra.mxu1 %v1229_v37  ;;  %v1289_v37 = vor.u32 %v1471_v25, %v1288_v24 }
  0x80   : > { %880 = vmatmul.bf16.gmra.mxu2 %v1233_v38  ;;  %v1293_v38 = vor.u32 %v1469_v26, %v1290_v27 }
  0x81   : > { %943 = vmatmul.bf16.gmra.mxu3 %v1237_v39 }
  0x8e   : > { %759 = vmatmul.bf16.gmra.mxu0 %v1241_v48 }
  0x8f   : > { %822 = vmatmul.bf16.gmra.mxu1 %v1245_v49 }
  0x90   : > { %885 = vmatmul.bf16.gmra.mxu2 %v1249_v50 }
  0x91   : > { %948 = vmatmul.bf16.gmra.mxu3 %v1253_v51 }
  0x9e   : > { %764 = vmatmul.bf16.gmra.mxu0 %v1257_v60 }
  0x9f   : > { %827 = vmatmul.bf16.gmra.mxu1 %v1261_v61  ;;  %v439_v61 = vunpack.c.l.b16 %v246_v55 }
  0xa0   : > { %890 = vmatmul.bf16.gmra.mxu2 %v1265_v62  ;;  %v440_v62 = vunpack.c.h.b16 %v246_v55 }
  0xa1   : > { %953 = vmatmul.bf16.gmra.mxu3 %v1269_v63 }
  0xab   : > { %v730_v11 = vpop.f32.mrf.mxu0 }
  0xac   : > { %v793_v12 = vpop.f32.mrf.mxu1  ;;  %v731_v15 = vadd.f32 %v1671_v0, %v730_v11 }
  0xae   : > { %769 = vmatmul.bf16.gmra.mxu0 %v1273_v9  ;;  %v794_v16 = vadd.f32 %v793_v12, %v731_v15  ;;  %v483_v9 = vpack.c.b16 %v439_v61, %v439_v61 }
  0xaf   : > { %832 = vmatmul.bf16.gmra.mxu1 %v1277_v10  ;;  %v484_v10 = vpack.c.b16 %v440_v62, %v440_v62 }
  0xb0   : > { %895 = vmatmul.bf16.gmra.mxu2 %v1281_v13 }
  0xb1   : > { %958 = vmatmul.bf16.gmra.mxu3 %v1285_v14 }
  0xb3   : > { %v856_v17 = vpop.f32.mrf.mxu2  ;;  %v732_v20 = vpop.f32.mrf.mxu0 }
  0xb4   : > { %v919_v18 = vpop.f32.mrf.mxu3  ;;  %v857_v19 = vadd.f32 %v856_v17, %v794_v16  ;;  %v795_v21 = vpop.f32.mrf.mxu1  ;;  %v733_v23 = vadd.f32 %v1671_v0, %v732_v20 }
  0xb6   : > { %v920_v22 = vadd.f32 %v919_v18, %v857_v19  ;;  %v796_v34 = vadd.f32 %v795_v21, %v733_v23 }
  0xb8   : > { %vm973_vm0 = vcmp.gt.f32.partialorder %v920_v22, 0.0  ;;  %v994_v28 = vmul.f32 0.01, %v920_v22 }
  0xba   : > { %v1015_v33 = vsel %vm973_vm0, %v920_v22, %v994_v28 }
  0xbb   : > { %1036 = vst [vmem:[%s1691_s30] sm:$0xff] %v1015_v33  ;;  %v858_v35 = vpop.f32.mrf.mxu2  ;;  %v735_v40 = vpop.f32.mrf.mxu0 }
  0xbc   : > { %v921_v36 = vpop.f32.mrf.mxu3  ;;  %v859_v39 = vadd.f32 %v858_v35, %v796_v34  ;;  %v798_v41 = vpop.f32.mrf.mxu1  ;;  %v736_v44 = vadd.f32 %v1671_v0, %v735_v40 }
  0xbe   : > { %v922_v45 = vadd.f32 %v921_v36, %v859_v39  ;;  %774 = vmatmul.bf16.gmra.mxu0 %v1289_v37  ;;  %v799_v47 = vadd.f32 %v798_v41, %v736_v44 }
  0xbf   : > { %837 = vmatmul.bf16.gmra.mxu1 %v1293_v38 }
  0xc0   : > { %vm974_vm1 = vcmp.gt.f32.partialorder %v922_v45, 0.0  ;;  %v995_v46 = vmul.f32 0.01, %v922_v45  ;;  %900 = vmatmul.bf16.gmra.mxu2 %v1297_v42 }
  0xc1   : > { %963 = vmatmul.bf16.gmra.mxu3 %v1301_v43 }
  0xc2   : > { %v1016_v48 = vsel %vm974_vm1, %v922_v45, %v995_v46 }
  0xc3   : > { %1037 = vst [vmem:[%s1691_s30 + $0x8] sm:$0xff] %v1016_v48  ;;  %v861_v49 = vpop.f32.mrf.mxu2  ;;  %v737_v52 = vpop.f32.mrf.mxu0 }
  0xc4   : > { %v924_v50 = vpop.f32.mrf.mxu3  ;;  %v862_v51 = vadd.f32 %v861_v49, %v799_v47  ;;  %v800_v53 = vpop.f32.mrf.mxu1  ;;  %v738_v57 = vadd.f32 %v1671_v0, %v737_v52 }
  0xc6   : > { %v925_v56 = vadd.f32 %v924_v50, %v862_v51  ;;  %v801_v1 = vadd.f32 %v800_v53, %v738_v57 }
  0xc8   : > { %vm975_vm2 = vcmp.gt.f32.partialorder %v925_v56, 0.0  ;;  %v996_v60 = vmul.f32 0.01, %v925_v56 }
  0xca   : > { %v1017_v63 = vsel %vm975_vm2, %v925_v56, %v996_v60 }
  0xcb   : > { %1038 = vst [vmem:[%s1691_s30 + $0x10] sm:$0xff] %v1017_v63  ;;  %v863_v2 = vpop.f32.mrf.mxu2  ;;  %v740_v7 = vpop.f32.mrf.mxu0 }
  0xcc   : > { %v926_v3 = vpop.f32.mrf.mxu3  ;;  %v864_v6 = vadd.f32 %v863_v2, %v801_v1  ;;  %v803_v8 = vpop.f32.mrf.mxu1  ;;  %v741_v11 = vadd.f32 %v1671_v0, %v740_v7 }
  0xce   : > { %v927_v12 = vadd.f32 %v926_v3, %v864_v6  ;;  %779 = vmatmul.bf16.gmra.mxu0 %v481_v4  ;;  %v804_v14 = vadd.f32 %v803_v8, %v741_v11 }
  0xcf   : > { %842 = vmatmul.bf16.gmra.mxu1 %v482_v5 }
  0xd0   : > { %vm976_vm3 = vcmp.gt.f32.partialorder %v927_v12, 0.0  ;;  %v997_v13 = vmul.f32 0.01, %v927_v12  ;;  %905 = vmatmul.bf16.gmra.mxu2 %v483_v9 }
  0xd1   : > { %968 = vmatmul.bf16.gmra.mxu3 %v484_v10 }
  0xd2   : > { %v1018_v15 = vsel %vm976_vm3, %v927_v12, %v997_v13 }
  0xd3   : > { %1039 = vst [vmem:[%s1691_s30 + $0x18] sm:$0xff] %v1018_v15  ;;  %v866_v16 = vpop.f32.mrf.mxu2  ;;  %v742_v19 = vpop.f32.mrf.mxu0 }
  0xd4   : > { %v929_v17 = vpop.f32.mrf.mxu3  ;;  %v867_v18 = vadd.f32 %v866_v16, %v804_v14  ;;  %v805_v20 = vpop.f32.mrf.mxu1  ;;  %v743_v22 = vadd.f32 %v1671_v0, %v742_v19 }
  0xd6   : > { %v930_v21 = vadd.f32 %v929_v17, %v867_v18  ;;  %v806_v25 = vadd.f32 %v805_v20, %v743_v22 }
  0xd8   : > { %vm977_vm4 = vcmp.gt.f32.partialorder %v930_v21, 0.0  ;;  %v998_v23 = vmul.f32 0.01, %v930_v21 }
  0xda   : > { %v1019_v24 = vsel %vm977_vm4, %v930_v21, %v998_v23 }
  0xdb   : > { %1040 = vst [vmem:[%s1691_s30 + $0x20] sm:$0xff] %v1019_v24  ;;  %v868_v26 = vpop.f32.mrf.mxu2  ;;  %v745_v29 = vpop.f32.mrf.mxu0 }
  0xdc   : > { %v931_v27 = vpop.f32.mrf.mxu3  ;;  %v869_v28 = vadd.f32 %v868_v26, %v806_v25  ;;  %v808_v30 = vpop.f32.mrf.mxu1  ;;  %v746_v31 = vadd.f32 %v1671_v0, %v745_v29 }
  0xde   : > { %v932_v32 = vadd.f32 %v931_v27, %v869_v28  ;;  %v809_v34 = vadd.f32 %v808_v30, %v746_v31 }
  0xe0   : > { %vm978_vm5 = vcmp.gt.f32.partialorder %v932_v32, 0.0  ;;  %v999_v33 = vmul.f32 0.01, %v932_v32 }
  0xe2   : > { %v1020_v35 = vsel %vm978_vm5, %v932_v32, %v999_v33 }
  0xe3   : > { %1041 = vst [vmem:[%s1691_s30 + $0x28] sm:$0xff] %v1020_v35  ;;  %v871_v36 = vpop.f32.mrf.mxu2  ;;  %v747_v39 = vpop.f32.mrf.mxu0 }
  0xe4   : > { %v934_v37 = vpop.f32.mrf.mxu3  ;;  %v872_v38 = vadd.f32 %v871_v36, %v809_v34  ;;  %v810_v40 = vpop.f32.mrf.mxu1  ;;  %v748_v42 = vadd.f32 %v1671_v0, %v747_v39 }
  0xe6   : > { %v935_v41 = vadd.f32 %v934_v37, %v872_v38  ;;  %v811_v45 = vadd.f32 %v810_v40, %v748_v42 }
  0xe8   : > { %vm979_vm6 = vcmp.gt.f32.partialorder %v935_v41, 0.0  ;;  %v1000_v43 = vmul.f32 0.01, %v935_v41 }
  0xea   : > { %v1021_v44 = vsel %vm979_vm6, %v935_v41, %v1000_v43 }
  0xeb   : > { %1042 = vst [vmem:[%s1691_s30 + $0x30] sm:$0xff] %v1021_v44  ;;  %v873_v46 = vpop.f32.mrf.mxu2  ;;  %v750_v49 = vpop.f32.mrf.mxu0 }
  0xec   : > { %v936_v47 = vpop.f32.mrf.mxu3  ;;  %v874_v48 = vadd.f32 %v873_v46, %v811_v45  ;;  %v813_v50 = vpop.f32.mrf.mxu1  ;;  %v751_v51 = vadd.f32 %v1671_v0, %v750_v49 }
  0xee   : > { %v937_v52 = vadd.f32 %v936_v47, %v874_v48  ;;  %v814_v54 = vadd.f32 %v813_v50, %v751_v51 }
  0xf0   : > { %vm980_vm7 = vcmp.gt.f32.partialorder %v937_v52, 0.0  ;;  %v1001_v53 = vmul.f32 0.01, %v937_v52 }
  0xf2   : > { %v1022_v55 = vsel %vm980_vm7, %v937_v52, %v1001_v53 }
  0xf3   : > { %1043 = vst [vmem:[%s1691_s30 + $0x38] sm:$0xff] %v1022_v55  ;;  %v876_v56 = vpop.f32.mrf.mxu2  ;;  %v752_v59 = vpop.f32.mrf.mxu0 }
  0xf4   : > { %v939_v57 = vpop.f32.mrf.mxu3  ;;  %v877_v58 = vadd.f32 %v876_v56, %v814_v54  ;;  %v815_v60 = vpop.f32.mrf.mxu1  ;;  %v753_v62 = vadd.f32 %v1671_v0, %v752_v59 }
  0xf6   : > { %v940_v61 = vadd.f32 %v939_v57, %v877_v58  ;;  %v816_v2 = vadd.f32 %v815_v60, %v753_v62 }
  0xf8   : > { %vm981_vm8 = vcmp.gt.f32.partialorder %v940_v61, 0.0  ;;  %v1002_v63 = vmul.f32 0.01, %v940_v61 }
  0xfa   : > { %v1023_v1 = vsel %vm981_vm8, %v940_v61, %v1002_v63 }
  0xfb   : > { %1044 = vst [vmem:[%s1691_s30 + $0x40] sm:$0xff] %v1023_v1  ;;  %v878_v3 = vpop.f32.mrf.mxu2  ;;  %v755_v6 = vpop.f32.mrf.mxu0 }
  0xfc   : > { %v941_v4 = vpop.f32.mrf.mxu3  ;;  %v879_v5 = vadd.f32 %v878_v3, %v816_v2  ;;  %v818_v7 = vpop.f32.mrf.mxu1  ;;  %v756_v8 = vadd.f32 %v1671_v0, %v755_v6 }
  0xfe   : > { %v942_v9 = vadd.f32 %v941_v4, %v879_v5  ;;  %v819_v11 = vadd.f32 %v818_v7, %v756_v8 }
 0x100   : > { %vm982_vm9 = vcmp.gt.f32.partialorder %v942_v9, 0.0  ;;  %v1003_v10 = vmul.f32 0.01, %v942_v9 }
 0x102   : > { %v1024_v12 = vsel %vm982_vm9, %v942_v9, %v1003_v10 }
 0x103   : > { %1045 = vst [vmem:[%s1691_s30 + $0x48] sm:$0xff] %v1024_v12  ;;  %v881_v13 = vpop.f32.mrf.mxu2  ;;  %v757_v16 = vpop.f32.mrf.mxu0 }
 0x104   : > { %v944_v14 = vpop.f32.mrf.mxu3  ;;  %v882_v15 = vadd.f32 %v881_v13, %v819_v11  ;;  %v820_v17 = vpop.f32.mrf.mxu1  ;;  %v758_v19 = vadd.f32 %v1671_v0, %v757_v16 }
 0x106   : > { %v945_v18 = vadd.f32 %v944_v14, %v882_v15  ;;  %v821_v22 = vadd.f32 %v820_v17, %v758_v19 }
 0x108   : > { %vm983_vm10 = vcmp.gt.f32.partialorder %v945_v18, 0.0  ;;  %v1004_v20 = vmul.f32 0.01, %v945_v18 }
 0x10a   : > { %v1025_v21 = vsel %vm983_vm10, %v945_v18, %v1004_v20 }
 0x10b   : > { %1046 = vst [vmem:[%s1691_s30 + $0x50] sm:$0xff] %v1025_v21  ;;  %v883_v23 = vpop.f32.mrf.mxu2  ;;  %v760_v26 = vpop.f32.mrf.mxu0 }
 0x10c   : > { %v946_v24 = vpop.f32.mrf.mxu3  ;;  %v884_v25 = vadd.f32 %v883_v23, %v821_v22  ;;  %v823_v27 = vpop.f32.mrf.mxu1  ;;  %v761_v28 = vadd.f32 %v1671_v0, %v760_v26 }
 0x10e   : > { %v947_v29 = vadd.f32 %v946_v24, %v884_v25  ;;  %v824_v31 = vadd.f32 %v823_v27, %v761_v28 }
 0x110   : > { %vm984_vm11 = vcmp.gt.f32.partialorder %v947_v29, 0.0  ;;  %v1005_v30 = vmul.f32 0.01, %v947_v29 }
 0x112   : > { %v1026_v32 = vsel %vm984_vm11, %v947_v29, %v1005_v30 }
 0x113   : > { %1047 = vst [vmem:[%s1691_s30 + $0x58] sm:$0xff] %v1026_v32  ;;  %v886_v33 = vpop.f32.mrf.mxu2  ;;  %v762_v36 = vpop.f32.mrf.mxu0 }
 0x114   : > { %v949_v34 = vpop.f32.mrf.mxu3  ;;  %v887_v35 = vadd.f32 %v886_v33, %v824_v31  ;;  %v825_v37 = vpop.f32.mrf.mxu1  ;;  %v763_v39 = vadd.f32 %v1671_v0, %v762_v36 }
 0x116   : > { %v950_v38 = vadd.f32 %v949_v34, %v887_v35  ;;  %v826_v42 = vadd.f32 %v825_v37, %v763_v39 }
 0x118   : > { %vm985_vm12 = vcmp.gt.f32.partialorder %v950_v38, 0.0  ;;  %v1006_v40 = vmul.f32 0.01, %v950_v38 }
 0x11a   : > { %v1027_v41 = vsel %vm985_vm12, %v950_v38, %v1006_v40 }
 0x11b   : > { %1048 = vst [vmem:[%s1691_s30 + $0x60] sm:$0xff] %v1027_v41  ;;  %v888_v43 = vpop.f32.mrf.mxu2  ;;  %v765_v46 = vpop.f32.mrf.mxu0 }
 0x11c   : > { %v951_v44 = vpop.f32.mrf.mxu3  ;;  %v889_v45 = vadd.f32 %v888_v43, %v826_v42  ;;  %v828_v47 = vpop.f32.mrf.mxu1  ;;  %v766_v48 = vadd.f32 %v1671_v0, %v765_v46 }
 0x11e   : > { %v952_v49 = vadd.f32 %v951_v44, %v889_v45  ;;  %v829_v51 = vadd.f32 %v828_v47, %v766_v48 }
 0x120   : > { %vm986_vm13 = vcmp.gt.f32.partialorder %v952_v49, 0.0  ;;  %v1007_v50 = vmul.f32 0.01, %v952_v49 }
 0x122   : > { %v1028_v52 = vsel %vm986_vm13, %v952_v49, %v1007_v50 }
 0x123   : > { %1049 = vst [vmem:[%s1691_s30 + $0x68] sm:$0xff] %v1028_v52  ;;  %v891_v53 = vpop.f32.mrf.mxu2  ;;  %v767_v56 = vpop.f32.mrf.mxu0 }
 0x124   : > { %v954_v54 = vpop.f32.mrf.mxu3  ;;  %v892_v55 = vadd.f32 %v891_v53, %v829_v51  ;;  %v830_v57 = vpop.f32.mrf.mxu1  ;;  %v768_v59 = vadd.f32 %v1671_v0, %v767_v56 }
 0x126   : > { %v955_v58 = vadd.f32 %v954_v54, %v892_v55  ;;  %v831_v62 = vadd.f32 %v830_v57, %v768_v59 }
 0x128   : > { %vm987_vm14 = vcmp.gt.f32.partialorder %v955_v58, 0.0  ;;  %v1008_v60 = vmul.f32 0.01, %v955_v58 }
 0x12a   : > { %v1029_v61 = vsel %vm987_vm14, %v955_v58, %v1008_v60 }
 0x12b   : > { %1050 = vst [vmem:[%s1691_s30 + $0x70] sm:$0xff] %v1029_v61  ;;  %v893_v63 = vpop.f32.mrf.mxu2  ;;  %v770_v3 = vpop.f32.mrf.mxu0 }
 0x12c   : > { %v956_v1 = vpop.f32.mrf.mxu3  ;;  %v894_v2 = vadd.f32 %v893_v63, %v831_v62  ;;  %v833_v4 = vpop.f32.mrf.mxu1  ;;  %v771_v5 = vadd.f32 %v1671_v0, %v770_v3 }
 0x12e   : > { %v957_v6 = vadd.f32 %v956_v1, %v894_v2  ;;  %v834_v8 = vadd.f32 %v833_v4, %v771_v5 }
 0x130   : > { %vm988_vm15 = vcmp.gt.f32.partialorder %v957_v6, 0.0  ;;  %v1009_v7 = vmul.f32 0.01, %v957_v6 }
 0x132   : > { %v1030_v9 = vsel %vm988_vm15, %v957_v6, %v1009_v7 }
 0x133   : > { %1051 = vst [vmem:[%s1691_s30 + $0x78] sm:$0xff] %v1030_v9  ;;  %v896_v10 = vpop.f32.mrf.mxu2  ;;  %v772_v13 = vpop.f32.mrf.mxu0 }
 0x134   : > { %v959_v11 = vpop.f32.mrf.mxu3  ;;  %v897_v12 = vadd.f32 %v896_v10, %v834_v8  ;;  %v835_v14 = vpop.f32.mrf.mxu1  ;;  %v773_v16 = vadd.f32 %v1671_v0, %v772_v13 }
 0x136   : > { %v960_v15 = vadd.f32 %v959_v11, %v897_v12  ;;  %v836_v19 = vadd.f32 %v835_v14, %v773_v16 }
 0x138   : > { %vm989_vm0 = vcmp.gt.f32.partialorder %v960_v15, 0.0  ;;  %v1010_v17 = vmul.f32 0.01, %v960_v15 }
 0x13a   : > { %v1031_v18 = vsel %vm989_vm0, %v960_v15, %v1010_v17 }
 0x13b   : > { %1052 = vst [vmem:[%s1691_s30 + $0x80] sm:$0xff] %v1031_v18  ;;  %v898_v20 = vpop.f32.mrf.mxu2  ;;  %v775_v23 = vpop.f32.mrf.mxu0 }
 0x13c   : > { %v961_v21 = vpop.f32.mrf.mxu3  ;;  %v899_v22 = vadd.f32 %v898_v20, %v836_v19  ;;  %v838_v24 = vpop.f32.mrf.mxu1  ;;  %v776_v25 = vadd.f32 %v1671_v0, %v775_v23 }
 0x13e   : > { %v962_v26 = vadd.f32 %v961_v21, %v899_v22  ;;  %v839_v28 = vadd.f32 %v838_v24, %v776_v25 }
 0x140   : > { %vm990_vm1 = vcmp.gt.f32.partialorder %v962_v26, 0.0  ;;  %v1011_v27 = vmul.f32 0.01, %v962_v26 }
 0x142   : > { %v1032_v29 = vsel %vm990_vm1, %v962_v26, %v1011_v27 }
 0x143   : > { %1053 = vst [vmem:[%s1691_s30 + $0x88] sm:$0xff] %v1032_v29  ;;  %v901_v30 = vpop.f32.mrf.mxu2  ;;  %v777_v33 = vpop.f32.mrf.mxu0 }
 0x144   : > { %v964_v31 = vpop.f32.mrf.mxu3  ;;  %v902_v32 = vadd.f32 %v901_v30, %v839_v28  ;;  %v840_v34 = vpop.f32.mrf.mxu1  ;;  %v778_v36 = vadd.f32 %v1671_v0, %v777_v33 }
 0x146   : > { %v965_v35 = vadd.f32 %v964_v31, %v902_v32  ;;  %v841_v39 = vadd.f32 %v840_v34, %v778_v36 }
 0x148   : > { %vm991_vm2 = vcmp.gt.f32.partialorder %v965_v35, 0.0  ;;  %v1012_v37 = vmul.f32 0.01, %v965_v35 }
 0x14a   : > { %v1033_v38 = vsel %vm991_vm2, %v965_v35, %v1012_v37 }
 0x14b   : > { %1054 = vst [vmem:[%s1691_s30 + $0x90] sm:$0xff] %v1033_v38  ;;  %v903_v40 = vpop.f32.mrf.mxu2  ;;  %v780_v43 = vpop.f32.mrf.mxu0 }
 0x14c   : > { %v966_v41 = vpop.f32.mrf.mxu3  ;;  %v904_v42 = vadd.f32 %v903_v40, %v841_v39  ;;  %v843_v44 = vpop.f32.mrf.mxu1  ;;  %v781_v45 = vadd.f32 %v1671_v0, %v780_v43 }
 0x14e   : > { %v967_v46 = vadd.f32 %v966_v41, %v904_v42  ;;  %v844_v48 = vadd.f32 %v843_v44, %v781_v45 }
 0x150   : > { %vm992_vm3 = vcmp.gt.f32.partialorder %v967_v46, 0.0  ;;  %v1013_v47 = vmul.f32 0.01, %v967_v46 }
 0x152   : > { %v1034_v49 = vsel %vm992_vm3, %v967_v46, %v1013_v47 }
 0x153   : > { %1055 = vst [vmem:[%s1691_s30 + $0x98] sm:$0xff] %v1034_v49  ;;  %v906_v50 = vpop.f32.mrf.mxu2  ;;  %v782_v53 = vpop.f32.mrf.mxu0 }
 0x154   : > { %v969_v51 = vpop.f32.mrf.mxu3  ;;  %v907_v52 = vadd.f32 %v906_v50, %v844_v48  ;;  %v845_v54 = vpop.f32.mrf.mxu1 }
 0x156   : > { %v970_v55 = vadd.f32 %v969_v51, %v907_v52 }
 0x158   : > { %vm993_vm4 = vcmp.gt.f32.partialorder %v970_v55, 0.0  ;;  %v1014_v56 = vmul.f32 0.01, %v970_v55 }
 0x15a   : > { %v1035_v57 = vsel %vm993_vm4, %v970_v55, %v1014_v56 }
 0x15b   : > { %1056 = vst [vmem:[%s1691_s30 + $0xa0] sm:$0x3] %v1035_v57  ;;  %v908_v58 = vpop.f32.mrf.mxu2 }
 0x15c   : > { %v971_v59 = vpop.f32.mrf.mxu3 }
 0x15d PF: > { %s13_s12 = sadd.s32 1, %s1522_s12  }
 0x15e   : > { %p10_p4 = scmp.ge.s32.totalorder %s13_s12, 4  }
 0x160   :  { %12 = sbr.rel (!%p10_p4) target bundleno = 1 (0x1), region = 68 }

// kernel: squeeze.8
= control target key start
LH: loop header
LB: loop body
LE: loop exit
PB: predicated region body
PF: predicated region fallthrough
CT: control target
= control target key end

     0   :  { %vm3_vm0 = vcmask 523264   ;;  %s274_s0 = inlined_call_operand.vmem [shape: f32[1,98,64], index: 0, kind: input, shape index: {}]   ;;  %s275_s1 = inlined_call_operand.vmem [shape: f32[2,7,7,64], index: 1, kind: output, shape index: {}]  }
   0x1   :  { %v2_v0 = vld [vmem:[%s274_s0] sm:$0xff]   ;;  %v90_v1 = vld [vmem:[%s274_s0 + $0x8] sm:$0xff]   ;;  %v93_v2 = vld [vmem:[%s274_s0 + $0x10] sm:$0xff]  }
   0x2   :  { %4 = vst.msk [vmem:[%s275_s1] sm:$0x7f] %vm3_vm0, %v2_v0   ;;  %v96_v3 = vld [vmem:[%s274_s0 + $0x18] sm:$0xff]   ;;  %v99_v4 = vld [vmem:[%s274_s0 + $0x20] sm:$0xff]   ;;  %v102_v5 = vld [vmem:[%s274_s0 + $0x28] sm:$0xff]  }
   0x3   :  { %89 = vst.msk [vmem:[%s275_s1 + $0x1] sm:$0x80] %vm3_vm0, %v2_v0   ;;  %v105_v6 = vld [vmem:[%s274_s0 + $0x30] sm:$0xff]   ;;  %v108_v7 = vld [vmem:[%s274_s0 + $0x38] sm:$0xff]   ;;  %v111_v8 = vld [vmem:[%s274_s0 + $0x40] sm:$0xff]  }
   0x4   :  { %91 = vst.msk [vmem:[%s275_s1 + $0x9] sm:$0x3f] %vm3_vm0, %v90_v1   ;;  %v114_v9 = vld [vmem:[%s274_s0 + $0x48] sm:$0xff]   ;;  %v117_v10 = vld [vmem:[%s274_s0 + $0x50] sm:$0xff]   ;;  %v120_v11 = vld [vmem:[%s274_s0 + $0x58] sm:$0xff]  }
   0x5   :  { %92 = vst.msk [vmem:[%s275_s1 + $0xa] sm:$0xc0] %vm3_vm0, %v90_v1   ;;  %v123_v12 = vld [vmem:[%s274_s0 + $0x60] sm:$0x3]  }
   0x6   :  { %94 = vst.msk [vmem:[%s275_s1 + $0x12] sm:$0x1f] %vm3_vm0, %v93_v2  }
   0x7   :  { %95 = vst.msk [vmem:[%s275_s1 + $0x13] sm:$0xe0] %vm3_vm0, %v93_v2  }
   0x8   :  { %97 = vst.msk [vmem:[%s275_s1 + $0x1b] sm:$0xf] %vm3_vm0, %v96_v3  }
   0x9   :  { %98 = vst.msk [vmem:[%s275_s1 + $0x1c] sm:$0xf0] %vm3_vm0, %v96_v3  }
   0xa   :  { %100 = vst.msk [vmem:[%s275_s1 + $0x24] sm:$0x7] %vm3_vm0, %v99_v4  }
   0xb   :  { %101 = vst.msk [vmem:[%s275_s1 + $0x25] sm:$0xf8] %vm3_vm0, %v99_v4  }
   0xc   :  { %103 = vst.msk [vmem:[%s275_s1 + $0x2d] sm:$0x3] %vm3_vm0, %v102_v5  }
   0xd   :  { %104 = vst.msk [vmem:[%s275_s1 + $0x2e] sm:$0xfc] %vm3_vm0, %v102_v5  }
   0xe   :  { %106 = vst.msk [vmem:[%s275_s1 + $0x36] ss:$2 sm:$0x3] %vm3_vm0, %v105_v6  }
   0xf   :  { %107 = vst.msk [vmem:[%s275_s1 + $0x37] sm:$0xfc] %vm3_vm0, %v105_v6  }
  0x10   :  { %109 = vst.msk [vmem:[%s275_s1 + $0x40] sm:$0x7f] %vm3_vm0, %v108_v7  }
  0x11   :  { %110 = vst.msk [vmem:[%s275_s1 + $0x41] sm:$0x80] %vm3_vm0, %v108_v7  }
  0x12   :  { %112 = vst.msk [vmem:[%s275_s1 + $0x49] sm:$0x3f] %vm3_vm0, %v111_v8  }
  0x13   :  { %113 = vst.msk [vmem:[%s275_s1 + $0x4a] sm:$0xc0] %vm3_vm0, %v111_v8  }
  0x14   :  { %115 = vst.msk [vmem:[%s275_s1 + $0x52] sm:$0x1f] %vm3_vm0, %v114_v9  }
  0x15   :  { %116 = vst.msk [vmem:[%s275_s1 + $0x53] sm:$0xe0] %vm3_vm0, %v114_v9  }
  0x16   :  { %118 = vst.msk [vmem:[%s275_s1 + $0x5b] sm:$0xf] %vm3_vm0, %v117_v10  }
  0x17   :  { %119 = vst.msk [vmem:[%s275_s1 + $0x5c] sm:$0xf0] %vm3_vm0, %v117_v10  }
  0x18   :  { %121 = vst.msk [vmem:[%s275_s1 + $0x64] sm:$0x7] %vm3_vm0, %v120_v11  }
  0x19   :  { %122 = vst.msk [vmem:[%s275_s1 + $0x65] sm:$0xf8] %vm3_vm0, %v120_v11  }
  0x1a   :  { %124 = vst.msk [vmem:[%s275_s1 + $0x6d] sm:$0x3] %vm3_vm0, %v123_v12  }

// kernel: rnd_forward.6
= control target key start
LH: loop header
LB: loop body
LE: loop exit
PB: predicated region body
PF: predicated region fallthrough
CT: control target
= control target key end

     0   :  { %s1480_s12 = smov 0   ;;  %s1685_s0 = inlined_call_operand.vmem [shape: bf16[2,98,576], index: 0, kind: input, shape index: {}]   ;;  %s1686_s1 = inlined_call_operand.vmem [shape: bf16[2,576,128], index: 1, kind: input, shape index: {}]   ;;  %s1687_s2 = inlined_call_operand.vmem [shape: f32[2,1,128], index: 2, kind: input, shape index: {}]   ;;  %s1688_s3 = inlined_call_operand.vmem [shape: f32[2,98,128], index: 3, kind: output, shape index: {}]  }
   0x1 LB: > { %s1069_s13 = sadd.s32 4294967295, %s1458_s12   ;;  %p1073_p0 = scmp.ge.s32.totalorder %s1458_s12, 1  ;;  %s1458_s12 = sphi %s1480_s12, %s13_s12  }
   0x2   : > { %p155_p1 = scmp.lt.s32.totalorder %s1458_s12, 3 }
   0x4   : > { %p156_p2 = pnand %p1073_p0, %p155_p1 }
   0x5   : > { %p187_p3 = scmp.lt.s32.totalorder (!%p156_p2), %s1069_s13, 1 }
   0x6   : > { %159 = sbr.rel (%p156_p2) target bundleno = 318 (0x13e), region = 32 }
   0xb   : > { %s1690_s13 = smov (!%p187_p3, %s1069_s13), 1  ;;  %vm704_vm0 = vcmask 523264  }
   0xc   : > { %s1441_s14 = smul.u32 288, %s1690_s13  ;;  %s199_s21 = scalar_lea.vmem %s1687_s2, %s1690_s13 }
   0xd   : > { %s1440_s18 = smul.u32 260, %s1690_s13 }
   0xe   : > { %s1494_s17 = scalar_lea.vmem %s1686_s1, %s1441_s14  ;;  %s1442_s27 = smul.u32 104, %s1690_s13 }
   0xf   : > { %v1387_v0 = vld [vmem:[%s1494_s17 + $0x38] sm:$0xff]  ;;  %v1386_v1 = vld [vmem:[%s1494_s17 + $0x30] sm:$0xff]  ;;  %v1385_v2 = vld [vmem:[%s1494_s17 + $0x28] sm:$0xff]  ;;  %s1511_s24 = scalar_lea.vmem %s1685_s0, %s1440_s18 }
  0x10   : > { %726 = vmatpush.bf16.msra.mxu0 %v1387_v0  ;;  %1416 = vmatpush.bf16.msra.mxu1 %v1387_v0  ;;  %v1384_v3 = vld [vmem:[%s1494_s17 + $0x20] sm:$0xff]  ;;  %v1383_v4 = vld [vmem:[%s1494_s17 + $0x18] sm:$0xff]  ;;  %v1382_v5 = vld [vmem:[%s1494_s17 + $0x10] sm:$0xff]  ;;  %s1652_s30 = scalar_lea.vmem %s1688_s3, %s1442_s27 }
  0x11   : > { %1417 = vmatpush.bf16.msra.mxu2 %v1387_v0  ;;  %1418 = vmatpush.bf16.msra.mxu3 %v1387_v0  ;;  %v1381_v6 = vld [vmem:[%s1494_s17 + $0x8] sm:$0xff]  ;;  %v1514_v7 = vld [vmem:[%s1511_s24 + $0xf0] sm:$0x11]  ;;  %v1380_v8 = vld [vmem:[%s1494_s17] sm:$0xff] }
  0x12   : > { %v1079_v9 = vld [vmem:[%s1511_s24] sm:$0xf]  ;;  %v1352_v10 = vld [vmem:[%s1511_s24 + $0x10] sm:$0xf0]  ;;  %v1119_v11 = vld [vmem:[%s1511_s24 + $0x50] sm:$0xf]  ;;  %v420_v15 = vunpack.c.l.b16 %v1514_v7 }
  0x13   : > { %v1362_v12 = vld [vmem:[%s1511_s24 + $0x60] sm:$0xf0]  ;;  %v1159_v13 = vld [vmem:[%s1511_s24 + $0xa0] sm:$0xf]  ;;  %v1372_v14 = vld [vmem:[%s1511_s24 + $0xb0] sm:$0xf0]  ;;  %v1080_v18 = vor.u32 %v1352_v10, %v1079_v9 }
  0x14   : > { %727 = vmatpush.bf16.msra.mxu0 %v1386_v1  ;;  %1419 = vmatpush.bf16.msra.mxu1 %v1386_v1  ;;  %v1411_v16 = vld [vmem:[%s1494_s17 + $0xf8] sm:$0xff]  ;;  %v1120_v19 = vor.u32 %v1362_v12, %v1119_v11  ;;  %v1160_v20 = vor.u32 %v1372_v14, %v1159_v13  ;;  %v455_v23 = vpack.c.b16 %v420_v15, %v420_v15  ;;  %v1410_v24 = vld [vmem:[%s1494_s17 + $0xf0] sm:$0xff]  ;;  %v1409_v28 = vld [vmem:[%s1494_s17 + $0xe8] sm:$0xff] }
  0x15   : > { %1420 = vmatpush.bf16.msra.mxu2 %v1386_v1  ;;  %1421 = vmatpush.bf16.msra.mxu3 %v1386_v1  ;;  %v1403_v17 = vld [vmem:[%s1494_s17 + $0xb8] sm:$0xff]  ;;  %v1402_v25 = vld [vmem:[%s1494_s17 + $0xb0] sm:$0xff]  ;;  %v1401_v29 = vld [vmem:[%s1494_s17 + $0xa8] sm:$0xff] }
  0x16   : > { %v1395_v21 = vld [vmem:[%s1494_s17 + $0x78] sm:$0xff]  ;;  %v1394_v26 = vld [vmem:[%s1494_s17 + $0x70] sm:$0xff]  ;;  %v1393_v30 = vld [vmem:[%s1494_s17 + $0x68] sm:$0xff] }
  0x17   : > { %v1415_v22 = vld [vmem:[%s1494_s17 + $0x118] sm:$0xff]  ;;  %v1414_v27 = vld [vmem:[%s1494_s17 + $0x110] sm:$0xff]  ;;  %v1413_v31 = vld [vmem:[%s1494_s17 + $0x108] sm:$0xff] }
  0x18   : > { %728 = vmatpush.bf16.msra.mxu0 %v1385_v2  ;;  %1422 = vmatpush.bf16.msra.mxu1 %v1385_v2  ;;  %v1408_v32 = vld [vmem:[%s1494_s17 + $0xe0] sm:$0xff]  ;;  %v1099_v35 = vld [vmem:[%s1511_s24 + $0x28] sm:$0xf]  ;;  %v1357_v36 = vld [vmem:[%s1511_s24 + $0x38] sm:$0xf0] }
  0x19   : > { %1423 = vmatpush.bf16.msra.mxu2 %v1385_v2  ;;  %1424 = vmatpush.bf16.msra.mxu3 %v1385_v2  ;;  %v1400_v33 = vld [vmem:[%s1494_s17 + $0xa0] sm:$0xff]  ;;  %v1139_v37 = vld [vmem:[%s1511_s24 + $0x78] sm:$0xf]  ;;  %v1367_v38 = vld [vmem:[%s1511_s24 + $0x88] sm:$0xf0]  ;;  %v1100_v44 = vor.u32 %v1357_v36, %v1099_v35 }
  0x1a   : > { %v1392_v34 = vld [vmem:[%s1494_s17 + $0x60] sm:$0xff]  ;;  %v1179_v39 = vld [vmem:[%s1511_s24 + $0xc8] sm:$0xf]  ;;  %v1377_v40 = vld [vmem:[%s1511_s24 + $0xd8] sm:$0xf0]  ;;  %v1140_v45 = vor.u32 %v1367_v38, %v1139_v37 }
  0x1b   : > { %v1412_v41 = vld [vmem:[%s1494_s17 + $0x100] sm:$0xff]  ;;  %v1407_v42 = vld [vmem:[%s1494_s17 + $0xd8] sm:$0xff]  ;;  %v1180_v46 = vor.u32 %v1377_v40, %v1179_v39  ;;  %v1406_v48 = vld [vmem:[%s1494_s17 + $0xd0] sm:$0xff] }
  0x1c   : > { %729 = vmatpush.bf16.msra.mxu0 %v1384_v3  ;;  %1425 = vmatpush.bf16.msra.mxu1 %v1384_v3  ;;  %v1399_v43 = vld [vmem:[%s1494_s17 + $0x98] sm:$0xff]  ;;  %v1398_v49 = vld [vmem:[%s1494_s17 + $0x90] sm:$0xff]  ;;  %v1405_v51 = vld [vmem:[%s1494_s17 + $0xc8] sm:$0xff] }
  0x1d   : > { %1426 = vmatpush.bf16.msra.mxu2 %v1384_v3  ;;  %1427 = vmatpush.bf16.msra.mxu3 %v1384_v3  ;;  %v1391_v47 = vld [vmem:[%s1494_s17 + $0x58] sm:$0xff]  ;;  %v1390_v50 = vld [vmem:[%s1494_s17 + $0x50] sm:$0xff]  ;;  %v1397_v52 = vld [vmem:[%s1494_s17 + $0x88] sm:$0xff] }
  0x1e   : > { %v1389_v53 = vld [vmem:[%s1494_s17 + $0x48] sm:$0xff]  ;;  %v1404_v54 = vld [vmem:[%s1494_s17 + $0xc0] sm:$0xff]  ;;  %v1081_v60 = vld [vmem:[%s1511_s24 + $0x14] sm:$0xf0] }
  0x1f   : > { %v1396_v55 = vld [vmem:[%s1494_s17 + $0x80] sm:$0xff]  ;;  %v1351_v56 = vld [vmem:[%s1511_s24 + $0xc] sm:$0xf]  ;;  %v1095_v61 = vld [vmem:[%s1511_s24 + $0x10] sm:$0xf] }
  0x20   : > { %730 = vmatpush.bf16.msra.mxu0 %v1383_v4  ;;  %1428 = vmatpush.bf16.msra.mxu1 %v1383_v4  ;;  %v1089_v57 = vld [vmem:[%s1511_s24 + $0x1c] sm:$0xf0]  ;;  %v1350_v59 = vld [vmem:[%s1511_s24 + $0x4] sm:$0xf]  ;;  %v1087_v0 = vld [vmem:[%s1511_s24 + $0x8] sm:$0xf] }
  0x21   : > { %1429 = vmatpush.bf16.msra.mxu2 %v1383_v4  ;;  %1430 = vmatpush.bf16.msra.mxu3 %v1383_v4  ;;  %v1388_v58 = vld [vmem:[%s1494_s17 + $0x40] sm:$0xff]  ;;  %v1092_v63 = vor.u32 %v1351_v56, %v1089_v57  ;;  %v1353_v1 = vld [vmem:[%s1511_s24 + $0x18] sm:$0xf0]  ;;  %v1084_v2 = vor.u32 %v1350_v59, %v1081_v60  ;;  %v1115_v10 = vld [vmem:[%s1511_s24 + $0x38] sm:$0xf] }
  0x22   : > { %v1354_v62 = vld [vmem:[%s1511_s24 + $0x20] sm:$0xf0]  ;;  %v1088_v4 = vor.u32 %v1353_v1, %v1087_v0  ;;  %v1101_v9 = vld [vmem:[%s1511_s24 + $0x3c] sm:$0xf0]  ;;  %v1359_v11 = vld [vmem:[%s1511_s24 + $0x48] sm:$0xf0] }
  0x23   : > { %v1096_v3 = vor.u32 %v1354_v62, %v1095_v61  ;;  %v1107_v13 = vld [vmem:[%s1511_s24 + $0x30] sm:$0xf]  ;;  %v1358_v14 = vld [vmem:[%s1511_s24 + $0x40] sm:$0xf0]  ;;  %v1369_v35 = vld [vmem:[%s1511_s24 + $0x98] sm:$0xf0] }
  0x24   : > { %731 = vmatpush.bf16.msra.mxu0 %v1382_v5  ;;  %1431 = vmatpush.bf16.msra.mxu1 %v1382_v5  ;;  %v1147_v37 = vld [vmem:[%s1511_s24 + $0x80] sm:$0xf]  ;;  %v1368_v38 = vld [vmem:[%s1511_s24 + $0x90] sm:$0xf0]  ;;  %v1375_v56 = vld [vmem:[%s1511_s24 + $0xcc] sm:$0xf] }
  0x25   : > { %1432 = vmatpush.bf16.msra.mxu2 %v1382_v5  ;;  %1433 = vmatpush.bf16.msra.mxu3 %v1382_v5  ;;  %v1356_v5 = vld [vmem:[%s1511_s24 + $0x34] sm:$0xf]  ;;  %v1181_v57 = vld [vmem:[%s1511_s24 + $0xdc] sm:$0xf0]  ;;  %v1379_v59 = vld [vmem:[%s1511_s24 + $0xe8] sm:$0xf0] }
  0x26   : > { %v1187_v61 = vld [vmem:[%s1511_s24 + $0xd0] sm:$0xf]  ;;  %v1378_v62 = vld [vmem:[%s1511_s24 + $0xe0] sm:$0xf0] }
  0x27   : > { %v1188_v1 = vor.u32 %v1378_v62, %v1187_v61 }
  0x28   : > { %732 = vmatpush.bf16.msra.mxu0 %v1381_v6  ;;  %1434 = vmatpush.bf16.msra.mxu1 %v1381_v6 }
  0x29   : > { %1435 = vmatpush.bf16.msra.mxu2 %v1381_v6  ;;  %1436 = vmatpush.bf16.msra.mxu3 %v1381_v6  ;;  %v1109_v6 = vld [vmem:[%s1511_s24 + $0x44] sm:$0xf0] }
  0x2a   : > { %v1112_v12 = vor.u32 %v1356_v5, %v1109_v6  ;;  %v421_v5 = vunpack.c.h.b16 %v1514_v7 }
  0x2c   : > { %733 = vmatpush.bf16.msra.mxu0 %v1380_v8  ;;  %1437 = vmatpush.bf16.msra.mxu1 %v1380_v8 }
  0x2d   : > { %1438 = vmatpush.bf16.msra.mxu2 %v1380_v8  ;;  %1439 = vmatpush.bf16.msra.mxu3 %v1380_v8  ;;  %v1355_v8 = vld [vmem:[%s1511_s24 + $0x2c] sm:$0xf] }
  0x2e   : > { %v1104_v15 = vor.u32 %v1355_v8, %v1101_v9 }
  0x2f   : > { %734 = vmatmul.bf16.vlgmr.msra.gmra.mxu0 %v1080_v18  ;;  %744 = vmatmul.bf16.vlgmr.msra.gmra.mxu1 %v1120_v19  ;;  %v1361_v18 = vld [vmem:[%s1511_s24 + $0x5c] sm:$0xf]  ;;  %v1129_v19 = vld [vmem:[%s1511_s24 + $0x6c] sm:$0xf0] }
  0x30   : > { %754 = vmatmul.bf16.vlgmr.msra.gmra.mxu2 %v1160_v20  ;;  %769 = vmatpush.bf16.msrb.mxu1 %v1395_v21  ;;  %v1360_v20 = vld [vmem:[%s1511_s24 + $0x54] sm:$0xf]  ;;  %v1121_v21 = vld [vmem:[%s1511_s24 + $0x64] sm:$0xf0] }
  0x31   : > { %855 = vmatpush.bf16.msrb.mxu3 %v1411_v16  ;;  %812 = vmatpush.bf16.msrb.mxu2 %v1403_v17  ;;  %v1116_v16 = vor.u32 %v1359_v11, %v1115_v10  ;;  %v1108_v17 = vor.u32 %v1358_v14, %v1107_v13  ;;  %v456_v10 = vpack.c.b16 %v421_v5, %v421_v5 }
  0x32   : > { %902 = vmatpush.bf16.msrb.mxu0 %v1415_v22  ;;  %764 = vmatmul.bf16.vlgmr.msra.gmra.mxu3 %v455_v23  ;;  %v1135_v22 = vld [vmem:[%s1511_s24 + $0x60] sm:$0xf]  ;;  %v1364_v23 = vld [vmem:[%s1511_s24 + $0x70] sm:$0xf0] }
  0x34   : > { %770 = vmatpush.bf16.msrb.mxu1 %v1394_v26  ;;  %v1363_v26 = vld [vmem:[%s1511_s24 + $0x68] sm:$0xf0] }
  0x35   : > { %856 = vmatpush.bf16.msrb.mxu3 %v1410_v24  ;;  %813 = vmatpush.bf16.msrb.mxu2 %v1402_v25  ;;  %v1132_v24 = vor.u32 %v1361_v18, %v1129_v19  ;;  %v1127_v25 = vld [vmem:[%s1511_s24 + $0x58] sm:$0xf] }
  0x36   : > { %903 = vmatpush.bf16.msrb.mxu0 %v1414_v27  ;;  %v1124_v27 = vor.u32 %v1360_v20, %v1121_v21 }
  0x38   : > { %771 = vmatpush.bf16.msrb.mxu1 %v1393_v30  ;;  %v1366_v30 = vld [vmem:[%s1511_s24 + $0x84] sm:$0xf] }
  0x39   : > { %857 = vmatpush.bf16.msrb.mxu3 %v1409_v28  ;;  %814 = vmatpush.bf16.msrb.mxu2 %v1401_v29  ;;  %v1136_v28 = vor.u32 %v1364_v23, %v1135_v22  ;;  %v1128_v29 = vor.u32 %v1363_v26, %v1127_v25 }
  0x3a   : > { %904 = vmatpush.bf16.msrb.mxu0 %v1413_v31  ;;  %v1149_v31 = vld [vmem:[%s1511_s24 + $0x94] sm:$0xf0] }
  0x3b   : > { %v1152_v36 = vor.u32 %v1366_v30, %v1149_v31 }
  0x3c   : > { %772 = vmatpush.bf16.msrb.mxu1 %v1392_v34  ;;  %v1155_v34 = vld [vmem:[%s1511_s24 + $0x88] sm:$0xf] }
  0x3d   : > { %858 = vmatpush.bf16.msrb.mxu3 %v1408_v32  ;;  %815 = vmatpush.bf16.msrb.mxu2 %v1400_v33  ;;  %v1365_v32 = vld [vmem:[%s1511_s24 + $0x7c] sm:$0xf]  ;;  %v1141_v33 = vld [vmem:[%s1511_s24 + $0x8c] sm:$0xf0]  ;;  %v1156_v40 = vor.u32 %v1369_v35, %v1155_v34 }
  0x3e   : > { %905 = vmatpush.bf16.msrb.mxu0 %v1412_v41  ;;  %v1144_v39 = vor.u32 %v1365_v32, %v1141_v33  ;;  %v1148_v41 = vor.u32 %v1368_v38, %v1147_v37 }
  0x3f   : > { %739 = vmatmul.bf16.gmra.mxu0 %v1100_v44  ;;  %749 = vmatmul.bf16.gmra.mxu1 %v1140_v45  ;;  %v1370_v44 = vld [vmem:[%s1511_s24 + $0xa4] sm:$0xf]  ;;  %v1161_v45 = vld [vmem:[%s1511_s24 + $0xb4] sm:$0xf0] }
  0x40   : > { %759 = vmatmul.bf16.gmra.mxu2 %v1180_v46  ;;  %773 = vmatpush.bf16.msrb.mxu1 %v1391_v47  ;;  %v1175_v46 = vld [vmem:[%s1511_s24 + $0xb0] sm:$0xf]  ;;  %v1374_v47 = vld [vmem:[%s1511_s24 + $0xc0] sm:$0xf0] }
  0x41   : > { %859 = vmatpush.bf16.msrb.mxu3 %v1407_v42  ;;  %816 = vmatpush.bf16.msrb.mxu2 %v1399_v43  ;;  %v1371_v42 = vld [vmem:[%s1511_s24 + $0xac] sm:$0xf]  ;;  %v1169_v43 = vld [vmem:[%s1511_s24 + $0xbc] sm:$0xf0] }
  0x44   : > { %774 = vmatpush.bf16.msrb.mxu1 %v1390_v50  ;;  %v1373_v50 = vld [vmem:[%s1511_s24 + $0xb8] sm:$0xf0] }
  0x45   : > { %860 = vmatpush.bf16.msrb.mxu3 %v1406_v48  ;;  %817 = vmatpush.bf16.msrb.mxu2 %v1398_v49  ;;  %v1172_v48 = vor.u32 %v1371_v42, %v1169_v43  ;;  %v1167_v49 = vld [vmem:[%s1511_s24 + $0xa8] sm:$0xf] }
  0x48   : > { %775 = vmatpush.bf16.msrb.mxu1 %v1389_v53  ;;  %v1168_v53 = vor.u32 %v1373_v50, %v1167_v49 }
  0x49   : > { %861 = vmatpush.bf16.msrb.mxu3 %v1405_v51  ;;  %818 = vmatpush.bf16.msrb.mxu2 %v1397_v52  ;;  %v1164_v51 = vor.u32 %v1370_v44, %v1161_v45  ;;  %v1176_v52 = vor.u32 %v1374_v47, %v1175_v46 }
  0x4c   : > { %776 = vmatpush.bf16.msrb.mxu1 %v1388_v58  ;;  %v1195_v58 = vld [vmem:[%s1511_s24 + $0xd8] sm:$0xf] }
  0x4d   : > { %862 = vmatpush.bf16.msrb.mxu3 %v1404_v54  ;;  %819 = vmatpush.bf16.msrb.mxu2 %v1396_v55  ;;  %v1376_v54 = vld [vmem:[%s1511_s24 + $0xd4] sm:$0xf]  ;;  %v1189_v55 = vld [vmem:[%s1511_s24 + $0xe4] sm:$0xf0]  ;;  %v1196_v0 = vor.u32 %v1379_v59, %v1195_v58 }
  0x4e   : > { %v1192_v60 = vor.u32 %v1376_v54, %v1189_v55 }
  0x4f   : > { %777 = vmatmul.bf16.vlgmr.msrb.gmra.mxu1 %v1084_v2  ;;  %1341 = vmatmul.msk.bf16.vlgmr.msrb.gmra.mxu0 %vm704_vm0, %v1096_v3  ;;  %v243_v2 = vld [vmem:[%s1511_s24 + $0xf8] sm:$0x11]  ;;  %v244_v3 = vld [vmem:[%s1511_s24 + $0x100] sm:$0x1] }
  0x50   : > { %863 = vmatmul.bf16.vlgmr.msrb.gmra.mxu3 %v1092_v63  ;;  %820 = vmatmul.bf16.vlgmr.msrb.gmra.mxu2 %v1088_v4  ;;  %v1184_v63 = vor.u32 %v1375_v56, %v1181_v57  ;;  %v423_v4 = vunpack.c.h.b16 %v243_v2  ;;  %v424_v6 = vunpack.c.l.b16 %v244_v3  ;;  %v422_v8 = vunpack.c.l.b16 %v243_v2 }
  0x52   : > { %v458_v9 = vpack.c.b16 %v423_v4, %v423_v4  ;;  %v459_v11 = vpack.c.b16 %v424_v6, %v424_v6  ;;  %v457_v14 = vpack.c.b16 %v422_v8, %v422_v8 }
  0x5f   : > { %782 = vmatmul.bf16.gmra.mxu1 %v1104_v15  ;;  %1342 = vmatmul.msk.bf16.gmra.mxu0 %vm704_vm0, %v1116_v16  ;;  %v1623_v15 = vld [vmem:[%s199_s21] ss:$0 sm:$0xff] }
  0x60   : > { %868 = vmatmul.bf16.gmra.mxu3 %v1112_v12  ;;  %825 = vmatmul.bf16.gmra.mxu2 %v1108_v17 }
  0x6f   : > { %787 = vmatmul.bf16.gmra.mxu1 %v1124_v27  ;;  %1343 = vmatmul.msk.bf16.gmra.mxu0 %vm704_vm0, %v1136_v28 }
  0x70   : > { %873 = vmatmul.bf16.gmra.mxu3 %v1132_v24  ;;  %830 = vmatmul.bf16.gmra.mxu2 %v1128_v29 }
  0x7f   : > { %792 = vmatmul.bf16.gmra.mxu1 %v1144_v39  ;;  %1344 = vmatmul.msk.bf16.gmra.mxu0 %vm704_vm0, %v1156_v40 }
  0x80   : > { %878 = vmatmul.bf16.gmra.mxu3 %v1152_v36  ;;  %835 = vmatmul.bf16.gmra.mxu2 %v1148_v41 }
  0x8f   : > { %797 = vmatmul.bf16.gmra.mxu1 %v1164_v51  ;;  %1345 = vmatmul.msk.bf16.gmra.mxu0 %vm704_vm0, %v1176_v52 }
  0x90   : > { %883 = vmatmul.bf16.gmra.mxu3 %v1172_v48  ;;  %840 = vmatmul.bf16.gmra.mxu2 %v1168_v53 }
  0x9f   : > { %802 = vmatmul.bf16.gmra.mxu1 %v1184_v63  ;;  %1346 = vmatmul.msk.bf16.gmra.mxu0 %vm704_vm0, %v1196_v0 }
  0xa0   : > { %888 = vmatmul.bf16.gmra.mxu3 %v1192_v60  ;;  %845 = vmatmul.bf16.gmra.mxu2 %v1188_v1 }
  0xac   : > { %v735_v12 = vpop.f32.mrf.mxu0  ;;  %v1615_v13 = vpop.f32.mrf.mxu1 }
  0xad   : > { %v736_v34 = vadd.f32 %v1623_v15, %v735_v12  ;;  %v746_v12 = vadd.f32 %v1623_v15, %v1615_v13 }
  0xaf   : > { %807 = vmatmul.bf16.gmra.mxu1 %v456_v10  ;;  %1347 = vmatmul.msk.bf16.gmra.mxu0 %vm704_vm0, %v459_v11 }
  0xb0   : > { %893 = vmatmul.bf16.gmra.mxu3 %v458_v9  ;;  %850 = vmatmul.bf16.gmra.mxu2 %v457_v14 }
  0xb3   : > { %v755_v7 = vpop.f32.mrf.mxu2 }
  0xb4   : > { %v1626_v16 = vadd.f32 %v1623_v15, %v755_v7  ;;  %v737_v17 = vpop.f32.mrf.mxu0  ;;  %v1628_v18 = vpop.f32.mrf.mxu1 }
  0xb5   : > { %v765_v19 = vpop.f32.mrf.mxu3  ;;  %v738_v42 = vadd.f32 %v1623_v15, %v737_v17 }
  0xb6   : > { %v1631_v20 = vadd.f32 %v1623_v15, %v765_v19 }
  0xbb   : > { %v757_v21 = vpop.f32.mrf.mxu2 }
  0xbc   : > { %v1634_v22 = vadd.f32 %v1623_v15, %v757_v21  ;;  %v740_v23 = vpop.f32.mrf.mxu0  ;;  %v1636_v24 = vpop.f32.mrf.mxu1 }
  0xbd   : > { %v767_v25 = vpop.f32.mrf.mxu3  ;;  %v741_v53 = vadd.f32 %v1623_v15, %v740_v23 }
  0xc3   : > { %v760_v26 = vpop.f32.mrf.mxu2 }
  0xc4   : > { %v1639_v27 = vadd.f32 %v1623_v15, %v760_v26  ;;  %v742_v28 = vpop.f32.mrf.mxu0  ;;  %v1641_v29 = vpop.f32.mrf.mxu1 }
  0xc5   : > { %v743_v0 = vadd.f32 %v1623_v15, %v742_v28 }
  0xcb   : > { %v762_v30 = vpop.f32.mrf.mxu2 }
  0xcc   : > { %v1644_v31 = vadd.f32 %v1623_v15, %v762_v30  ;;  %v778_v32 = vpop.f32.mrf.mxu1  ;;  %v907_v33 = vpop.f32.mrf.mxu0 }
  0xcd   : > { %v779_v36 = vadd.f32 %v778_v32, %v736_v34  ;;  %v748_v32 = vadd.f32 %v1623_v15, %v1628_v18 }
  0xd3   : > { %v864_v35 = vpop.f32.mrf.mxu3  ;;  %v821_v37 = vpop.f32.mrf.mxu2 }
  0xd4   : > { %v822_v38 = vadd.f32 %v821_v37, %v779_v36  ;;  %v780_v39 = vpop.f32.mrf.mxu1  ;;  %v909_v40 = vpop.f32.mrf.mxu0 }
  0xd5   : > { %v781_v46 = vadd.f32 %v780_v39, %v738_v42  ;;  %v751_v42 = vadd.f32 %v1623_v15, %v1636_v24 }
  0xd6   : > { %v865_v41 = vadd.f32 %v864_v35, %v822_v38 }
  0xd8   : > { %v908_v43 = vadd.f32 %v907_v33, %v865_v41 }
  0xda   : > { %vm941_vm1 = vcmp.gt.f32.partialorder %v908_v43, 0.0  ;;  %v954_v45 = vmul.f32 0.01, %v908_v43 }
  0xdb   : > { %v866_v44 = vpop.f32.mrf.mxu3  ;;  %v823_v47 = vpop.f32.mrf.mxu2 }
  0xdc   : > { %v967_v48 = vsel %vm941_vm1, %v908_v43, %v954_v45  ;;  %v824_v49 = vadd.f32 %v823_v47, %v781_v46  ;;  %v783_v50 = vpop.f32.mrf.mxu1  ;;  %v912_v51 = vpop.f32.mrf.mxu0 }
  0xdd   : > { %980 = vst [vmem:[%s1652_s30] sm:$0xff] %v967_v48  ;;  %v784_v57 = vadd.f32 %v783_v50, %v741_v53 }
  0xde   : > { %v867_v52 = vadd.f32 %v866_v44, %v824_v49 }
  0xe0   : > { %v910_v54 = vadd.f32 %v909_v40, %v867_v52  ;;  %v753_v52 = vadd.f32 %v1623_v15, %v1641_v29 }
  0xe2   : > { %vm942_vm2 = vcmp.gt.f32.partialorder %v910_v54, 0.0  ;;  %v955_v56 = vmul.f32 0.01, %v910_v54 }
  0xe3   : > { %v869_v55 = vpop.f32.mrf.mxu3  ;;  %v826_v58 = vpop.f32.mrf.mxu2 }
  0xe4   : > { %v968_v59 = vsel %vm942_vm2, %v910_v54, %v955_v56  ;;  %v827_v60 = vadd.f32 %v826_v58, %v784_v57  ;;  %v785_v61 = vpop.f32.mrf.mxu1  ;;  %v914_v62 = vpop.f32.mrf.mxu0 }
  0xe5   : > { %981 = vst [vmem:[%s1652_s30 + $0x8] sm:$0xff] %v968_v59  ;;  %v786_v4 = vadd.f32 %v785_v61, %v743_v0 }
  0xe6   : > { %v870_v63 = vadd.f32 %v869_v55, %v827_v60 }
  0xe8   : > { %v913_v1 = vadd.f32 %v912_v51, %v870_v63 }
  0xea   : > { %vm943_vm3 = vcmp.gt.f32.partialorder %v913_v1, 0.0  ;;  %v956_v3 = vmul.f32 0.01, %v913_v1 }
  0xeb   : > { %v871_v2 = vpop.f32.mrf.mxu3  ;;  %v828_v5 = vpop.f32.mrf.mxu2 }
  0xec   : > { %v969_v6 = vsel %vm943_vm3, %v913_v1, %v956_v3  ;;  %v829_v8 = vadd.f32 %v828_v5, %v786_v4  ;;  %v788_v9 = vpop.f32.mrf.mxu1  ;;  %v917_v10 = vpop.f32.mrf.mxu0 }
  0xed   : > { %982 = vst [vmem:[%s1652_s30 + $0x10] sm:$0xff] %v969_v6  ;;  %v789_v19 = vadd.f32 %v788_v9, %v746_v12 }
  0xee   : > { %v872_v11 = vadd.f32 %v871_v2, %v829_v8 }
  0xf0   : > { %v915_v14 = vadd.f32 %v914_v62, %v872_v11 }
  0xf2   : > { %vm944_vm4 = vcmp.gt.f32.partialorder %v915_v14, 0.0  ;;  %v957_v17 = vmul.f32 0.01, %v915_v14 }
  0xf3   : > { %v874_v7 = vpop.f32.mrf.mxu3  ;;  %v831_v21 = vpop.f32.mrf.mxu2 }
  0xf4   : > { %v970_v23 = vsel %vm944_vm4, %v915_v14, %v957_v17  ;;  %v832_v25 = vadd.f32 %v831_v21, %v789_v19  ;;  %v790_v26 = vpop.f32.mrf.mxu1  ;;  %v919_v28 = vpop.f32.mrf.mxu0 }
  0xf5   : > { %983 = vst [vmem:[%s1652_s30 + $0x18] sm:$0xff] %v970_v23  ;;  %v791_v35 = vadd.f32 %v790_v26, %v748_v32 }
  0xf6   : > { %v875_v30 = vadd.f32 %v874_v7, %v832_v25 }
  0xf8   : > { %v918_v33 = vadd.f32 %v917_v10, %v875_v30 }
  0xfa   : > { %vm945_vm5 = vcmp.gt.f32.partialorder %v918_v33, 0.0  ;;  %v958_v13 = vmul.f32 0.01, %v918_v33 }
  0xfb   : > { %v876_v34 = vpop.f32.mrf.mxu3  ;;  %v833_v36 = vpop.f32.mrf.mxu2 }
  0xfc   : > { %v971_v37 = vsel %vm945_vm5, %v918_v33, %v958_v13  ;;  %v834_v38 = vadd.f32 %v833_v36, %v791_v35  ;;  %v793_v39 = vpop.f32.mrf.mxu1  ;;  %v922_v40 = vpop.f32.mrf.mxu0 }
  0xfd   : > { %984 = vst [vmem:[%s1652_s30 + $0x20] sm:$0xff] %v971_v37  ;;  %v794_v45 = vadd.f32 %v793_v39, %v751_v42 }
  0xfe   : > { %v877_v41 = vadd.f32 %v876_v34, %v834_v38 }
 0x100   : > { %v920_v43 = vadd.f32 %v919_v28, %v877_v41 }
 0x102   : > { %vm946_vm6 = vcmp.gt.f32.partialorder %v920_v43, 0.0  ;;  %v959_v18 = vmul.f32 0.01, %v920_v43 }
 0x103   : > { %v879_v44 = vpop.f32.mrf.mxu3  ;;  %v836_v46 = vpop.f32.mrf.mxu2 }
 0x104   : > { %v972_v47 = vsel %vm946_vm6, %v920_v43, %v959_v18  ;;  %v837_v48 = vadd.f32 %v836_v46, %v794_v45  ;;  %v795_v49 = vpop.f32.mrf.mxu1  ;;  %v924_v50 = vpop.f32.mrf.mxu0 }
 0x105   : > { %985 = vst [vmem:[%s1652_s30 + $0x28] sm:$0xff] %v972_v47  ;;  %v796_v55 = vadd.f32 %v795_v49, %v753_v52 }
 0x106   : > { %v880_v51 = vadd.f32 %v879_v44, %v837_v48 }
 0x108   : > { %v923_v53 = vadd.f32 %v922_v40, %v880_v51 }
 0x10a   : > { %vm947_vm7 = vcmp.gt.f32.partialorder %v923_v53, 0.0  ;;  %v960_v24 = vmul.f32 0.01, %v923_v53 }
 0x10b   : > { %v881_v54 = vpop.f32.mrf.mxu3  ;;  %v838_v56 = vpop.f32.mrf.mxu2 }
 0x10c   : > { %v973_v57 = vsel %vm947_vm7, %v923_v53, %v960_v24  ;;  %v839_v58 = vadd.f32 %v838_v56, %v796_v55  ;;  %v798_v59 = vpop.f32.mrf.mxu1  ;;  %v927_v60 = vpop.f32.mrf.mxu0 }
 0x10d   : > { %986 = vst [vmem:[%s1652_s30 + $0x30] sm:$0xff] %v973_v57  ;;  %v799_v1 = vadd.f32 %v798_v59, %v1626_v16 }
 0x10e   : > { %v882_v61 = vadd.f32 %v881_v54, %v839_v58 }
 0x110   : > { %v925_v62 = vadd.f32 %v924_v50, %v882_v61 }
 0x112   : > { %vm948_vm8 = vcmp.gt.f32.partialorder %v925_v62, 0.0  ;;  %v961_v0 = vmul.f32 0.01, %v925_v62 }
 0x113   : > { %v884_v63 = vpop.f32.mrf.mxu3  ;;  %v841_v15 = vpop.f32.mrf.mxu2 }
 0x114   : > { %v974_v29 = vsel %vm948_vm8, %v925_v62, %v961_v0  ;;  %v842_v2 = vadd.f32 %v841_v15, %v799_v1  ;;  %v800_v3 = vpop.f32.mrf.mxu1  ;;  %v929_v4 = vpop.f32.mrf.mxu0 }
 0x115   : > { %987 = vst [vmem:[%s1652_s30 + $0x38] sm:$0xff] %v974_v29  ;;  %v801_v10 = vadd.f32 %v800_v3, %v1634_v22 }
 0x116   : > { %v885_v5 = vadd.f32 %v884_v63, %v842_v2 }
 0x118   : > { %v928_v6 = vadd.f32 %v927_v60, %v885_v5 }
 0x11a   : > { %vm949_vm9 = vcmp.gt.f32.partialorder %v928_v6, 0.0  ;;  %v962_v9 = vmul.f32 0.01, %v928_v6 }
 0x11b   : > { %v886_v8 = vpop.f32.mrf.mxu3  ;;  %v843_v11 = vpop.f32.mrf.mxu2 }
 0x11c   : > { %v975_v12 = vsel %vm949_vm9, %v928_v6, %v962_v9  ;;  %v844_v14 = vadd.f32 %v843_v11, %v801_v10  ;;  %v803_v7 = vpop.f32.mrf.mxu1  ;;  %v932_v16 = vpop.f32.mrf.mxu0 }
 0x11d   : > { %988 = vst [vmem:[%s1652_s30 + $0x40] sm:$0xff] %v975_v12  ;;  %v804_v25 = vadd.f32 %v803_v7, %v1639_v27 }
 0x11e   : > { %v887_v17 = vadd.f32 %v886_v8, %v844_v14 }
 0x120   : > { %v930_v19 = vadd.f32 %v929_v4, %v887_v17 }
 0x122   : > { %vm950_vm10 = vcmp.gt.f32.partialorder %v930_v19, 0.0  ;;  %v963_v23 = vmul.f32 0.01, %v930_v19 }
 0x123   : > { %v889_v21 = vpop.f32.mrf.mxu3  ;;  %v846_v26 = vpop.f32.mrf.mxu2 }
 0x124   : > { %v976_v28 = vsel %vm950_vm10, %v930_v19, %v963_v23  ;;  %v847_v30 = vadd.f32 %v846_v26, %v804_v25  ;;  %v805_v32 = vpop.f32.mrf.mxu1  ;;  %v934_v22 = vpop.f32.mrf.mxu0 }
 0x125   : > { %989 = vst [vmem:[%s1652_s30 + $0x48] sm:$0xff] %v976_v28  ;;  %v806_v36 = vadd.f32 %v805_v32, %v1644_v31 }
 0x126   : > { %v890_v33 = vadd.f32 %v889_v21, %v847_v30 }
 0x128   : > { %v933_v34 = vadd.f32 %v932_v16, %v890_v33 }
 0x12a   : > { %vm951_vm11 = vcmp.gt.f32.partialorder %v933_v34, 0.0  ;;  %v964_v35 = vmul.f32 0.01, %v933_v34 }
 0x12b   : > { %v891_v13 = vpop.f32.mrf.mxu3  ;;  %v848_v37 = vpop.f32.mrf.mxu2 }
 0x12c   : > { %v977_v38 = vsel %vm951_vm11, %v933_v34, %v964_v35  ;;  %v849_v39 = vadd.f32 %v848_v37, %v806_v36  ;;  %v808_v40 = vpop.f32.mrf.mxu1  ;;  %v937_v27 = vpop.f32.mrf.mxu0 }
 0x12d   : > { %990 = vst [vmem:[%s1652_s30 + $0x50] sm:$0xff] %v977_v38  ;;  %v809_v18 = vadd.f32 %v808_v40, %v1631_v20 }
 0x12e   : > { %v892_v41 = vadd.f32 %v891_v13, %v849_v39 }
 0x130   : > { %v935_v42 = vadd.f32 %v934_v22, %v892_v41 }
 0x132   : > { %vm952_vm12 = vcmp.gt.f32.partialorder %v935_v42, 0.0  ;;  %v965_v44 = vmul.f32 0.01, %v935_v42 }
 0x133   : > { %v894_v43 = vpop.f32.mrf.mxu3  ;;  %v851_v45 = vpop.f32.mrf.mxu2 }
 0x134   : > { %v978_v46 = vsel %vm952_vm12, %v935_v42, %v965_v44  ;;  %v852_v47 = vadd.f32 %v851_v45, %v809_v18  ;;  %v810_v48 = vpop.f32.mrf.mxu1  ;;  %v939_v31 = vpop.f32.mrf.mxu0 }
 0x135   : > { %991 = vst [vmem:[%s1652_s30 + $0x58] sm:$0xff] %v978_v46 }
 0x136   : > { %v895_v49 = vadd.f32 %v894_v43, %v852_v47 }
 0x138   : > { %v938_v50 = vadd.f32 %v937_v27, %v895_v49 }
 0x13a   : > { %vm953_vm13 = vcmp.gt.f32.partialorder %v938_v50, 0.0  ;;  %v966_v52 = vmul.f32 0.01, %v938_v50 }
 0x13b   : > { %v896_v51 = vpop.f32.mrf.mxu3  ;;  %v853_v53 = vpop.f32.mrf.mxu2 }
 0x13c   : > { %v979_v54 = vsel %vm953_vm13, %v938_v50, %v966_v52 }
 0x13d   : > { %992 = vst [vmem:[%s1652_s30 + $0x60] sm:$0x3] %v979_v54 }
 0x13e PF: > { %s13_s12 = sadd.s32 1, %s1458_s12  }
 0x13f   : > { %p10_p4 = scmp.ge.s32.totalorder %s13_s12, 4  }
 0x141   :  { %12 = sbr.rel (!%p10_p4) target bundleno = 1 (0x1), region = 68 }

// kernel: rnd_forward.7
= control target key start
LH: loop header
LB: loop body
LE: loop exit
PB: predicated region body
PF: predicated region fallthrough
CT: control target
= control target key end

     0   :  { %17 = vsyncpa [#allocation5], 0  ;;  %s10579_s0 = inlined_call_operand.vmem [shape: f32[2,3200], index: 0, kind: input, shape index: {}]   ;;  %s10580_s1 = inlined_call_operand.vmem [shape: f32[2,3200], index: 1, kind: input, shape index: {}]   ;;  %s10581_s2 = inlined_call_operand.vmem [shape: bf16[3200,512], index: 2, kind: input, shape index: {}]   ;;  %s10582_s3 = inlined_call_operand.vmem [shape: f32[1,512], index: 3, kind: input, shape index: {}]   ;;  %s10583_s4 = inlined_call_operand.vmem [shape: bf16[3200,512], index: 4, kind: input, shape index: {}]   ;;  %s10584_s5 = inlined_call_operand.vmem [shape: f32[1,512], index: 5, kind: input, shape index: {}]   ;;  %s10585_s6 = inlined_call_operand.vmem [shape: bf16[512,512], index: 6, kind: input, shape index: {}]   ;;  %s10586_s7 = inlined_call_operand.vmem [shape: f32[1,512], index: 7, kind: input, shape index: {}]   ;;  %s10587_s8 = inlined_call_operand.vmem [shape: bf16[512,512], index: 8, kind: input, shape index: {}]   ;;  %s10588_s9 = inlined_call_operand.vmem [shape: f32[1,512], index: 9, kind: input, shape index: {}]   ;;  %s10589_s10 = inlined_call_operand.hbm [shape: f32[2,512], index: 10, kind: output, shape index: {0}]   ;;  %s10590_s11 = inlined_call_operand.hbm [shape: f32[2,512], index: 11, kind: output, shape index: {1}]  }
   0x1   :  { %18 = vsyncpa [#allocation7], 0  ;;  %s8175_s17 = smov 0  }
   0x2 LB: > { %s8181_s18 = sadd.s32 4294967295, %s8110_s17   ;;  %p5120_p0 = scmp.ge.s32.totalorder %s8110_s17, 1  ;;  %s8110_s17 = sphi %s8175_s17, %s24_s17  }
   0x3   : > { %p368_p1 = scmp.lt.s32.totalorder %s8110_s17, 6 }
   0x5   : > { %p369_p2 = pnand %p5120_p0, %p368_p1 }
   0x6   : > { %s420_s19 = smul.u32 (!%p369_p2), 5, %s8181_s18  ;;  %p5127_p5 = scmp.ne.s32.totalorder (!%p369_p2), %s8181_s18, 0 }
   0x7   : > { %372 = sbr.rel (%p369_p2) target bundleno = 980 (0x3d4), region = 60 }
   0x8   : > { %s432_s20 = smul.u32 (!%p369_p2), 80, %s8181_s18  ;;  %p421_p3 = scmp.lt.s32.totalorder (!%p369_p2), %s420_s19, 24 }
   0xa   : > { %p433_p4 = scmp.lt.s32.totalorder (!%p369_p2), %s432_s20, 399 }
   0xc   : > { %s10592_s19 = smov (!%p421_p3, %s420_s19), 24  ;;  %s10594_s20 = smov (!%p433_p4, %s432_s20), 399 }
   0xd   : > { %s5121_s21 = sshll.u32 %s10592_s19, 1  ;;  %s7439_s28 = sshll.u32 %s10594_s20, 4 }
   0xe   : > { %s8190_s24 = scalar_lea.vmem %s10579_s0, %s5121_s21  ;;  %s8195_s27 = scalar_lea.vmem %s10580_s1, %s5121_s21 }
   0xf   : > { %s8200_s12 = scalar_lea.vmem %s10581_s2, %s7439_s28  ;;  %s8205_s15 = scalar_lea.vmem %s10583_s4, %s7439_s28 }
  0x10   : > { %449 = sbr.rel (%p5127_p5) target bundleno = 24 (0x18), region = 64 }
  0x15   : > { %v8112_v0 = vmov 0.0  }
  0x16   : > { %450 = vst [vmem:[#allocation2] sm:$0xff] %v8112_v0 }
  0x17   : > { %451 = vst [vmem:[#allocation3] sm:$0xff] %v8112_v0 }
  0x18 PF: > { %v5242_v1 = vld [vmem:[%s8200_s12 + $0xe0] sm:$0xf]  ;;  %v7471_v2 = vld [vmem:[%s8200_s12 + $0xec] sm:$0xf0]  ;;  %vm1724_vm0 = vcmask 1041408   ;;  %vm1726_vm1 = vcmask 1045508  }
  0x19   : > { %v5370_v3 = vld [vmem:[%s8200_s12 + $0x1e0] sm:$0xf]  ;;  %v5243_v4 = vor.u32 %v7471_v2, %v5242_v1  ;;  %v7503_v5 = vld [vmem:[%s8200_s12 + $0x1ec] sm:$0xf0]  ;;  %vm1728_vm2 = vcmask 1043456   ;;  %p6408_p6 = scmp.ne.s32.totalorder %s8181_s18, 4 }
  0x1a   : > { %v5498_v6 = vld [vmem:[%s8200_s12 + $0x2e0] sm:$0xf]  ;;  %v7535_v7 = vld [vmem:[%s8200_s12 + $0x2ec] sm:$0xf0]  ;;  %v5371_v8 = vor.u32 %v7503_v5, %v5370_v3 }
  0x1b   : > { %v5499_v9 = vor.u32 %v7535_v7, %v5498_v6  ;;  %v5626_v10 = vld [vmem:[%s8200_s12 + $0x3e0] sm:$0xf]  ;;  %v7567_v11 = vld [vmem:[%s8200_s12 + $0x3ec] sm:$0xf0]  ;;  %1457 = vmatpush.bf16.msra.mxu0 %v5243_v4 }
  0x1c   : > { %v5226_v12 = vld [vmem:[%s8200_s12 + $0xc0] sm:$0xf]  ;;  %v5627_v13 = vor.u32 %v7567_v11, %v5626_v10  ;;  %v7467_v14 = vld [vmem:[%s8200_s12 + $0xcc] sm:$0xf0]  ;;  %1470 = vmatpush.bf16.msra.mxu1 %v5371_v8 }
  0x1d   : > { %v5354_v15 = vld [vmem:[%s8200_s12 + $0x1c0] sm:$0xf]  ;;  %v7499_v16 = vld [vmem:[%s8200_s12 + $0x1cc] sm:$0xf0]  ;;  %1483 = vmatpush.bf16.msra.mxu2 %v5499_v9  ;;  %v5227_v17 = vor.u32 %v7467_v14, %v5226_v12 }
  0x1e   : > { %v5355_v18 = vor.u32 %v7499_v16, %v5354_v15  ;;  %v5482_v19 = vld [vmem:[%s8200_s12 + $0x2c0] sm:$0xf]  ;;  %v7531_v20 = vld [vmem:[%s8200_s12 + $0x2cc] sm:$0xf0]  ;;  %1496 = vmatpush.bf16.msra.mxu3 %v5627_v13 }
  0x1f   : > { %v5610_v21 = vld [vmem:[%s8200_s12 + $0x3c0] sm:$0xf]  ;;  %v5483_v22 = vor.u32 %v7531_v20, %v5482_v19  ;;  %v7563_v23 = vld [vmem:[%s8200_s12 + $0x3cc] sm:$0xf0]  ;;  %1458 = vmatpush.bf16.msra.mxu0 %v5227_v17 }
  0x20   : > { %v5210_v24 = vld [vmem:[%s8200_s12 + $0xa0] sm:$0xf]  ;;  %v7463_v25 = vld [vmem:[%s8200_s12 + $0xac] sm:$0xf0]  ;;  %v5611_v26 = vor.u32 %v7563_v23, %v5610_v21  ;;  %1471 = vmatpush.bf16.msra.mxu1 %v5355_v18 }
  0x21   : > { %v5338_v27 = vld [vmem:[%s8200_s12 + $0x1a0] sm:$0xf]  ;;  %v7495_v28 = vld [vmem:[%s8200_s12 + $0x1ac] sm:$0xf0]  ;;  %v5211_v30 = vor.u32 %v7463_v25, %v5210_v24  ;;  %1484 = vmatpush.bf16.msra.mxu2 %v5483_v22 }
  0x22   : > { %v5466_v29 = vld [vmem:[%s8200_s12 + $0x2a0] sm:$0xf]  ;;  %v7527_v31 = vld [vmem:[%s8200_s12 + $0x2ac] sm:$0xf0]  ;;  %v5339_v34 = vor.u32 %v7495_v28, %v5338_v27  ;;  %1497 = vmatpush.bf16.msra.mxu3 %v5611_v26 }
  0x23   : > { %v5594_v32 = vld [vmem:[%s8200_s12 + $0x3a0] sm:$0xf]  ;;  %v7559_v33 = vld [vmem:[%s8200_s12 + $0x3ac] sm:$0xf0]  ;;  %v5467_v35 = vor.u32 %v7527_v31, %v5466_v29  ;;  %1459 = vmatpush.bf16.msra.mxu0 %v5211_v30  ;;  %v7469_v31 = vld [vmem:[%s8200_s12 + $0xe4] sm:$0xf] }
  0x24   : > { %v5194_v36 = vld [vmem:[%s8200_s12 + $0x80] sm:$0xf]  ;;  %v7459_v37 = vld [vmem:[%s8200_s12 + $0x8c] sm:$0xf0]  ;;  %v5595_v39 = vor.u32 %v7559_v33, %v5594_v32  ;;  %1472 = vmatpush.bf16.msra.mxu1 %v5339_v34  ;;  %v5244_v33 = vld [vmem:[%s8200_s12 + $0xf0] sm:$0xf0] }
  0x25   : > { %v5322_v38 = vld [vmem:[%s8200_s12 + $0x180] sm:$0xf]  ;;  %v7491_v40 = vld [vmem:[%s8200_s12 + $0x18c] sm:$0xf0]  ;;  %v5195_v45 = vor.u32 %v7459_v37, %v5194_v36  ;;  %1485 = vmatpush.bf16.msra.mxu2 %v5467_v35  ;;  %v7501_v34 = vld [vmem:[%s8200_s12 + $0x1e4] sm:$0xf] }
  0x26   : > { %v5450_v41 = vld [vmem:[%s8200_s12 + $0x280] sm:$0xf]  ;;  %v7523_v42 = vld [vmem:[%s8200_s12 + $0x28c] sm:$0xf0]  ;;  %v5323_v46 = vor.u32 %v7491_v40, %v5322_v38  ;;  %1498 = vmatpush.bf16.msra.mxu3 %v5595_v39  ;;  %v5372_v35 = vld [vmem:[%s8200_s12 + $0x1f0] sm:$0xf0] }
  0x27   : > { %v5578_v43 = vld [vmem:[%s8200_s12 + $0x380] sm:$0xf]  ;;  %v7555_v44 = vld [vmem:[%s8200_s12 + $0x38c] sm:$0xf0]  ;;  %v5451_v47 = vor.u32 %v7523_v42, %v5450_v41  ;;  %1460 = vmatpush.bf16.msra.mxu0 %v5195_v45  ;;  %v7533_v38 = vld [vmem:[%s8200_s12 + $0x2e4] sm:$0xf]  ;;  %v5247_v42 = vor.u32 %v7469_v31, %v5244_v33 }
  0x28   : > { %v5178_v48 = vld [vmem:[%s8200_s12 + $0x60] sm:$0xf]  ;;  %v7455_v49 = vld [vmem:[%s8200_s12 + $0x6c] sm:$0xf0]  ;;  %v5579_v51 = vor.u32 %v7555_v44, %v5578_v43  ;;  %1473 = vmatpush.bf16.msra.mxu1 %v5323_v46  ;;  %v5500_v39 = vld [vmem:[%s8200_s12 + $0x2f0] sm:$0xf0]  ;;  %v5375_v43 = vor.u32 %v7501_v34, %v5372_v35 }
  0x29   : > { %v5306_v50 = vld [vmem:[%s8200_s12 + $0x160] sm:$0xf]  ;;  %v7487_v52 = vld [vmem:[%s8200_s12 + $0x16c] sm:$0xf0]  ;;  %v5179_v57 = vor.u32 %v7455_v49, %v5178_v48  ;;  %1486 = vmatpush.bf16.msra.mxu2 %v5451_v47  ;;  %v7465_v46 = vld [vmem:[%s8200_s12 + $0xc4] sm:$0xf]  ;;  %v5503_v47 = vor.u32 %v7533_v38, %v5500_v39 }
  0x2a   : > { %v5434_v53 = vld [vmem:[%s8200_s12 + $0x260] sm:$0xf]  ;;  %v7519_v54 = vld [vmem:[%s8200_s12 + $0x26c] sm:$0xf0]  ;;  %v5307_v58 = vor.u32 %v7487_v52, %v5306_v50  ;;  %1499 = vmatpush.bf16.msra.mxu3 %v5579_v51  ;;  %v5228_v48 = vld [vmem:[%s8200_s12 + $0xd0] sm:$0xf0] }
  0x2b   : > { %v5562_v55 = vld [vmem:[%s8200_s12 + $0x360] sm:$0xf]  ;;  %v7551_v56 = vld [vmem:[%s8200_s12 + $0x36c] sm:$0xf0]  ;;  %v5435_v59 = vor.u32 %v7519_v54, %v5434_v53  ;;  %1461 = vmatpush.bf16.msra.mxu0 %v5179_v57  ;;  %v7497_v49 = vld [vmem:[%s8200_s12 + $0x1c4] sm:$0xf]  ;;  %v5231_v54 = vor.u32 %v7465_v46, %v5228_v48 }
  0x2c   : > { %v5162_v60 = vld [vmem:[%s8200_s12 + $0x40] sm:$0xf]  ;;  %v7451_v61 = vld [vmem:[%s8200_s12 + $0x4c] sm:$0xf0]  ;;  %v5563_v63 = vor.u32 %v7551_v56, %v5562_v55  ;;  %1474 = vmatpush.bf16.msra.mxu1 %v5307_v58  ;;  %v5356_v50 = vld [vmem:[%s8200_s12 + $0x1d0] sm:$0xf0] }
  0x2d   : > { %v5290_v62 = vld [vmem:[%s8200_s12 + $0x140] sm:$0xf]  ;;  %v7483_v0 = vld [vmem:[%s8200_s12 + $0x14c] sm:$0xf0]  ;;  %v5163_v5 = vor.u32 %v7451_v61, %v5162_v60  ;;  %1487 = vmatpush.bf16.msra.mxu2 %v5435_v59  ;;  %v7529_v51 = vld [vmem:[%s8200_s12 + $0x2c4] sm:$0xf]  ;;  %v5359_v55 = vor.u32 %v7497_v49, %v5356_v50 }
  0x2e   : > { %v5418_v1 = vld [vmem:[%s8200_s12 + $0x240] sm:$0xf]  ;;  %v7515_v2 = vld [vmem:[%s8200_s12 + $0x24c] sm:$0xf0]  ;;  %v5291_v6 = vor.u32 %v7483_v0, %v5290_v62  ;;  %1500 = vmatpush.bf16.msra.mxu3 %v5563_v63  ;;  %v5484_v52 = vld [vmem:[%s8200_s12 + $0x2d0] sm:$0xf0] }
  0x2f   : > { %v5546_v3 = vld [vmem:[%s8200_s12 + $0x340] sm:$0xf]  ;;  %v7547_v4 = vld [vmem:[%s8200_s12 + $0x34c] sm:$0xf0]  ;;  %v5419_v7 = vor.u32 %v7515_v2, %v5418_v1  ;;  %1462 = vmatpush.bf16.msra.mxu0 %v5163_v5  ;;  %v7461_v58 = vld [vmem:[%s8200_s12 + $0xa4] sm:$0xf]  ;;  %v5487_v59 = vor.u32 %v7529_v51, %v5484_v52 }
  0x30   : > { %v5146_v8 = vld [vmem:[%s8200_s12 + $0x20] sm:$0xf]  ;;  %v7447_v9 = vld [vmem:[%s8200_s12 + $0x2c] sm:$0xf0]  ;;  %v5547_v11 = vor.u32 %v7547_v4, %v5546_v3  ;;  %1475 = vmatpush.bf16.msra.mxu1 %v5291_v6  ;;  %v5212_v60 = vld [vmem:[%s8200_s12 + $0xb0] sm:$0xf0] }
  0x31   : > { %v5274_v10 = vld [vmem:[%s8200_s12 + $0x120] sm:$0xf]  ;;  %v7479_v12 = vld [vmem:[%s8200_s12 + $0x12c] sm:$0xf0]  ;;  %v5147_v17 = vor.u32 %v7447_v9, %v5146_v8  ;;  %1488 = vmatpush.bf16.msra.mxu2 %v5419_v7  ;;  %v7493_v61 = vld [vmem:[%s8200_s12 + $0x1a4] sm:$0xf]  ;;  %v5215_v4 = vor.u32 %v7461_v58, %v5212_v60 }
  0x32   : > { %v5402_v13 = vld [vmem:[%s8200_s12 + $0x220] sm:$0xf]  ;;  %v7511_v14 = vld [vmem:[%s8200_s12 + $0x22c] sm:$0xf0]  ;;  %v5275_v20 = vor.u32 %v7479_v12, %v5274_v10  ;;  %1501 = vmatpush.bf16.msra.mxu3 %v5547_v11  ;;  %v5340_v62 = vld [vmem:[%s8200_s12 + $0x1b0] sm:$0xf0] }
  0x33   : > { %v5530_v15 = vld [vmem:[%s8200_s12 + $0x320] sm:$0xf]  ;;  %v7543_v16 = vld [vmem:[%s8200_s12 + $0x32c] sm:$0xf0]  ;;  %v5403_v21 = vor.u32 %v7511_v14, %v5402_v13  ;;  %1463 = vmatpush.bf16.msra.mxu0 %v5147_v17  ;;  %v7525_v63 = vld [vmem:[%s8200_s12 + $0x2a4] sm:$0xf]  ;;  %v5343_v5 = vor.u32 %v7493_v61, %v5340_v62 }
  0x34   : > { %v5130_v18 = vld [vmem:[%s8200_s12] sm:$0xf]  ;;  %v7443_v19 = vld [vmem:[%s8200_s12 + $0xc] sm:$0xf0]  ;;  %v5531_v25 = vor.u32 %v7543_v16, %v5530_v15  ;;  %1476 = vmatpush.bf16.msra.mxu1 %v5275_v20  ;;  %v5468_v0 = vld [vmem:[%s8200_s12 + $0x2b0] sm:$0xf0] }
  0x35   : > { %v5258_v22 = vld [vmem:[%s8200_s12 + $0x100] sm:$0xf]  ;;  %v7475_v23 = vld [vmem:[%s8200_s12 + $0x10c] sm:$0xf0]  ;;  %v5131_v32 = vor.u32 %v7443_v19, %v5130_v18  ;;  %1489 = vmatpush.bf16.msra.mxu2 %v5403_v21  ;;  %v7457_v7 = vld [vmem:[%s8200_s12 + $0x84] sm:$0xf]  ;;  %v5471_v8 = vor.u32 %v7525_v63, %v5468_v0 }
  0x36   : > { %v5386_v24 = vld [vmem:[%s8200_s12 + $0x200] sm:$0xf]  ;;  %v7507_v26 = vld [vmem:[%s8200_s12 + $0x20c] sm:$0xf0]  ;;  %v5259_v36 = vor.u32 %v7475_v23, %v5258_v22  ;;  %1502 = vmatpush.bf16.msra.mxu3 %v5531_v25  ;;  %v5196_v9 = vld [vmem:[%s8200_s12 + $0x90] sm:$0xf0] }
  0x37   : > { %v5514_v27 = vld [vmem:[%s8200_s12 + $0x300] sm:$0xf]  ;;  %v7539_v28 = vld [vmem:[%s8200_s12 + $0x30c] sm:$0xf0]  ;;  %v5387_v37 = vor.u32 %v7507_v26, %v5386_v24  ;;  %1464 = vmatpush.bf16.msra.mxu0 %v5131_v32  ;;  %v7489_v10 = vld [vmem:[%s8200_s12 + $0x184] sm:$0xf]  ;;  %v5199_v17 = vor.u32 %v7457_v7, %v5196_v9 }
  0x38   : > { %v5754_v29 = vld [vmem:[%s8200_s12 + $0x4e0] sm:$0xf]  ;;  %v7599_v30 = vld [vmem:[%s8200_s12 + $0x4ec] sm:$0xf0]  ;;  %v5515_v40 = vor.u32 %v7539_v28, %v5514_v27  ;;  %1477 = vmatpush.bf16.msra.mxu1 %v5259_v36  ;;  %v5324_v11 = vld [vmem:[%s8200_s12 + $0x190] sm:$0xf0] }
  0x39   : > { %v5755_v41 = vor.u32 %v7599_v30, %v5754_v29  ;;  %v5738_v44 = vld [vmem:[%s8200_s12 + $0x4c0] sm:$0xf]  ;;  %v7595_v45 = vld [vmem:[%s8200_s12 + $0x4cc] sm:$0xf0]  ;;  %1490 = vmatpush.bf16.msra.mxu2 %v5387_v37  ;;  %v7521_v12 = vld [vmem:[%s8200_s12 + $0x284] sm:$0xf]  ;;  %v5327_v18 = vor.u32 %v7489_v10, %v5324_v11 }
  0x3a   : > { %1503 = vmatpush.bf16.msra.mxu3 %v5515_v40  ;;  %v5739_v53 = vor.u32 %v7595_v45, %v5738_v44  ;;  %v5722_v56 = vld [vmem:[%s8200_s12 + $0x4a0] sm:$0xf]  ;;  %v7591_v57 = vld [vmem:[%s8200_s12 + $0x4ac] sm:$0xf0]  ;;  %v5452_v13 = vld [vmem:[%s8200_s12 + $0x290] sm:$0xf0] }
  0x3b   : > { %1509 = vmatpush.bf16.msrb.mxu0 %v5755_v41  ;;  %v5723_v1 = vor.u32 %v7591_v57, %v5722_v56  ;;  %v5706_v2 = vld [vmem:[%s8200_s12 + $0x480] sm:$0xf]  ;;  %v7587_v6 = vld [vmem:[%s8200_s12 + $0x48c] sm:$0xf0]  ;;  %v7453_v19 = vld [vmem:[%s8200_s12 + $0x64] sm:$0xf]  ;;  %v5455_v22 = vor.u32 %v7521_v12, %v5452_v13 }
  0x3c   : > { %1522 = vmatpush.bf16.msrb.mxu1 %v5247_v42  ;;  %v452_v3 = vld [vmem:[%s8190_s24] sm:$0xff]  ;;  %v5707_v14 = vor.u32 %v7587_v6, %v5706_v2  ;;  %v7583_v16 = vld [vmem:[%s8200_s12 + $0x46c] sm:$0xf0]  ;;  %v5180_v20 = vld [vmem:[%s8200_s12 + $0x70] sm:$0xf0] }
  0x3d   : > { %1535 = vmatpush.bf16.msrb.mxu2 %v5375_v43  ;;  %456 = vst [vmem:[#allocation1] ss:$4 sm:$0xff] %v452_v3  ;;  %v5690_v15 = vld [vmem:[%s8200_s12 + $0x460] sm:$0xf]  ;;  %v7485_v21 = vld [vmem:[%s8200_s12 + $0x164] sm:$0xf]  ;;  %v5183_v30 = vor.u32 %v7453_v19, %v5180_v20 }
  0x3e   : > { %1548 = vmatpush.bf16.msrb.mxu3 %v5503_v47  ;;  %v5308_v23 = vld [vmem:[%s8200_s12 + $0x170] sm:$0xf0]  ;;  %v7517_v24 = vld [vmem:[%s8200_s12 + $0x264] sm:$0xf]  ;;  %v5674_v26 = vld [vmem:[%s8200_s12 + $0x440] sm:$0xf]  ;;  %v5691_v29 = vor.u32 %v7583_v16, %v5690_v15 }
  0x3f   : > { %1510 = vmatpush.bf16.msrb.mxu0 %v5739_v53  ;;  %v5436_v25 = vld [vmem:[%s8200_s12 + $0x270] sm:$0xf0]  ;;  %v7579_v27 = vld [vmem:[%s8200_s12 + $0x44c] sm:$0xf0]  ;;  %v474_v28 = vld [vmem:[%s8195_s27] sm:$0xff]  ;;  %v5311_v35 = vor.u32 %v7485_v21, %v5308_v23 }
  0x40   : > { %1523 = vmatpush.bf16.msrb.mxu1 %v5231_v54  ;;  %v7449_v31 = vld [vmem:[%s8200_s12 + $0x44] sm:$0xf]  ;;  %v5164_v32 = vld [vmem:[%s8200_s12 + $0x50] sm:$0xf0]  ;;  %v5439_v40 = vor.u32 %v7517_v24, %v5436_v25  ;;  %v5675_v47 = vor.u32 %v7579_v27, %v5674_v26  ;;  %v5658_v48 = vld [vmem:[%s8200_s12 + $0x420] sm:$0xf] }
  0x41   : > { %1536 = vmatpush.bf16.msrb.mxu2 %v5359_v55  ;;  %v7481_v41 = vld [vmem:[%s8200_s12 + $0x144] sm:$0xf]  ;;  %v5292_v42 = vld [vmem:[%s8200_s12 + $0x150] sm:$0xf0]  ;;  %v5167_v49 = vor.u32 %v7449_v31, %v5164_v32  ;;  %v7575_v51 = vld [vmem:[%s8200_s12 + $0x42c] sm:$0xf0] }
  0x42   : > { %1549 = vmatpush.bf16.msrb.mxu3 %v5487_v59  ;;  %v7513_v45 = vld [vmem:[%s8200_s12 + $0x244] sm:$0xf]  ;;  %v5420_v46 = vld [vmem:[%s8200_s12 + $0x250] sm:$0xf0]  ;;  %v5295_v50 = vor.u32 %v7481_v41, %v5292_v42  ;;  %v453_v57 = vld [vmem:[%s8190_s24 + $0x8] sm:$0x3]  ;;  %v5659_v60 = vor.u32 %v7575_v51, %v5658_v48 }
  0x43   : > { %1511 = vmatpush.bf16.msrb.mxu0 %v5723_v1  ;;  %v7445_v52 = vld [vmem:[%s8200_s12 + $0x24] sm:$0xf]  ;;  %v5148_v53 = vld [vmem:[%s8200_s12 + $0x30] sm:$0xf0]  ;;  %v5423_v54 = vor.u32 %v7513_v45, %v5420_v46  ;;  %458 = vst [vmem:[#allocation1 + $0x20] ss:$4 sm:$0xff] %v453_v57 }
  0x44   : > { %1524 = vmatpush.bf16.msrb.mxu1 %v5215_v4  ;;  %v459_v33 = vld.sshfl [vmem:[#allocation1] sm:$0xff pattern:$0x73625140]  ;;  %v461_v34 = vld.sshfl [vmem:[#allocation1 + $0x10] sm:$0xff pattern:$0x73625140]  ;;  %v5151_v0 = vor.u32 %v7445_v52, %v5148_v53 }
  0x45   : > { %1537 = vmatpush.bf16.msrb.mxu2 %v5343_v5  ;;  %v8318_v36 = vpack.c.bf16 %v459_v33, %v459_v33  ;;  %v8320_v37 = vpack.c.bf16 %v461_v34, %v461_v34  ;;  %v462_v38 = vld.sshfl [vmem:[#allocation1 + $0x18] sm:$0xff pattern:$0x73625140]  ;;  %v460_v39 = vld.sshfl [vmem:[#allocation1 + $0x8] sm:$0xff pattern:$0x73625140] }
  0x46   : > { %1550 = vmatpush.bf16.msrb.mxu3 %v5471_v8  ;;  %v8324_v43 = vpack.c.bf16 %v462_v38, %v462_v38  ;;  %v8326_v44 = vpack.c.bf16 %v460_v39, %v460_v39  ;;  %478 = vst [vmem:[#allocation1] ss:$4 sm:$0xff] %v474_v28  ;;  %v7477_v55 = vld [vmem:[%s8200_s12 + $0x124] sm:$0xf]  ;;  %v5276_v56 = vld [vmem:[%s8200_s12 + $0x130] sm:$0xf0] }
  0x47   : > { %1512 = vmatpush.bf16.msrb.mxu0 %v5707_v14  ;;  %1491 = vmatmul.bf16.vlgmr.msra.gmra.mxu2 %v8320_v37  ;;  %v7509_v58 = vld [vmem:[%s8200_s12 + $0x224] sm:$0xf]  ;;  %v5404_v59 = vld [vmem:[%s8200_s12 + $0x230] sm:$0xf0]  ;;  %v5642_v61 = vld [vmem:[%s8200_s12 + $0x400] sm:$0xf]  ;;  %v5279_v1 = vor.u32 %v7477_v55, %v5276_v56 }
  0x48   : > { %1525 = vmatpush.bf16.msrb.mxu1 %v5199_v17  ;;  %1465 = vmatmul.bf16.vlgmr.msra.gmra.mxu0 %v8318_v36  ;;  %v7571_v62 = vld [vmem:[%s8200_s12 + $0x40c] sm:$0xf0]  ;;  %v7441_v63 = vld [vmem:[%s8200_s12 + $0x4] sm:$0xf]  ;;  %v5132_v2 = vld [vmem:[%s8200_s12 + $0x10] sm:$0xf0]  ;;  %v5407_v5 = vor.u32 %v7509_v58, %v5404_v59 }
  0x49   : > { %1538 = vmatpush.bf16.msrb.mxu2 %v5327_v18  ;;  %1504 = vmatmul.bf16.vlgmr.msra.gmra.mxu3 %v8324_v43  ;;  %v7473_v3 = vld [vmem:[%s8200_s12 + $0x104] sm:$0xf]  ;;  %v5260_v4 = vld [vmem:[%s8200_s12 + $0x110] sm:$0xf0]  ;;  %v5643_v12 = vor.u32 %v7571_v62, %v5642_v61  ;;  %v5250_v13 = vld [vmem:[%s8200_s12 + $0xe8] sm:$0xf]  ;;  %v5135_v16 = vor.u32 %v7441_v63, %v5132_v2 }
  0x4a   : > { %1551 = vmatpush.bf16.msrb.mxu3 %v5455_v22  ;;  %1478 = vmatmul.bf16.vlgmr.msra.gmra.mxu1 %v8326_v44  ;;  %v7505_v6 = vld [vmem:[%s8200_s12 + $0x204] sm:$0xf]  ;;  %v5388_v7 = vld [vmem:[%s8200_s12 + $0x210] sm:$0xf0]  ;;  %v7472_v14 = vld [vmem:[%s8200_s12 + $0xf4] sm:$0xf0]  ;;  %v5263_v17 = vor.u32 %v7473_v3, %v5260_v4 }
  0x4b   : > { %1513 = vmatpush.bf16.msrb.mxu0 %v5691_v29  ;;  %v7565_v8 = vld [vmem:[%s8200_s12 + $0x3e4] sm:$0xf]  ;;  %v5628_v9 = vld [vmem:[%s8200_s12 + $0x3f0] sm:$0xf0]  ;;  %v475_v15 = vld [vmem:[%s8195_s27 + $0x8] sm:$0x3]  ;;  %v5391_v20 = vor.u32 %v7505_v6, %v5388_v7  ;;  %v5251_v25 = vor.u32 %v7472_v14, %v5250_v13 }
  0x4c   : > { %1526 = vmatpush.bf16.msrb.mxu1 %v5183_v30  ;;  %v7597_v10 = vld [vmem:[%s8200_s12 + $0x4e4] sm:$0xf]  ;;  %v5756_v11 = vld [vmem:[%s8200_s12 + $0x4f0] sm:$0xf0]  ;;  %v5378_v18 = vld [vmem:[%s8200_s12 + $0x1e8] sm:$0xf]  ;;  %v5631_v21 = vor.u32 %v7565_v8, %v5628_v9 }
  0x4d   : > { %1539 = vmatpush.bf16.msrb.mxu2 %v5311_v35  ;;  %v7504_v19 = vld [vmem:[%s8200_s12 + $0x1f4] sm:$0xf0]  ;;  %v7561_v22 = vld [vmem:[%s8200_s12 + $0x3c4] sm:$0xf]  ;;  %v5759_v24 = vor.u32 %v7597_v10, %v5756_v11  ;;  %v5612_v26 = vld [vmem:[%s8200_s12 + $0x3d0] sm:$0xf0] }
  0x4e   : > { %1552 = vmatpush.bf16.msrb.mxu3 %v5439_v40  ;;  %v463_v23 = vld.sshfl [vmem:[#allocation1 + $0x20] sm:$0xff pattern:$0x73625140]  ;;  %v5379_v28 = vor.u32 %v7504_v19, %v5378_v18  ;;  %v5740_v29 = vld [vmem:[%s8200_s12 + $0x4d0] sm:$0xf0]  ;;  %v5615_v35 = vor.u32 %v7561_v22, %v5612_v26 }
  0x4f   : > { %1514 = vmatpush.bf16.msrb.mxu0 %v5675_v47  ;;  %v7593_v27 = vld [vmem:[%s8200_s12 + $0x4c4] sm:$0xf]  ;;  %480 = vst [vmem:[#allocation1 + $0x20] ss:$4 sm:$0xff] %v475_v15  ;;  %v5234_v30 = vld [vmem:[%s8200_s12 + $0xc8] sm:$0xf]  ;;  %v8366_v32 = vpack.c.bf16 %v463_v23, %v463_v23 }
  0x50   : > { %1527 = vmatpush.bf16.msrb.mxu1 %v5167_v49  ;;  %v7468_v31 = vld [vmem:[%s8200_s12 + $0xd4] sm:$0xf0]  ;;  %v5362_v33 = vld [vmem:[%s8200_s12 + $0x1c8] sm:$0xf]  ;;  %v5743_v38 = vor.u32 %v7593_v27, %v5740_v29  ;;  %v7557_v40 = vld [vmem:[%s8200_s12 + $0x3a4] sm:$0xf] }
  0x51   : > { %1540 = vmatpush.bf16.msrb.mxu2 %v5295_v50  ;;  %v7500_v34 = vld [vmem:[%s8200_s12 + $0x1d4] sm:$0xf0]  ;;  %v5235_v39 = vor.u32 %v7468_v31, %v5234_v30  ;;  %v5596_v41 = vld [vmem:[%s8200_s12 + $0x3b0] sm:$0xf0]  ;;  %v7589_v42 = vld [vmem:[%s8200_s12 + $0x4a4] sm:$0xf] }
  0x52   : > { %1553 = vmatpush.bf16.msrb.mxu3 %v5423_v54  ;;  %v5363_v45 = vor.u32 %v7500_v34, %v5362_v33  ;;  %v5724_v46 = vld [vmem:[%s8200_s12 + $0x4b0] sm:$0xf0]  ;;  %v5218_v47 = vld [vmem:[%s8200_s12 + $0xa8] sm:$0xf]  ;;  %v7464_v48 = vld [vmem:[%s8200_s12 + $0xb4] sm:$0xf0]  ;;  %v5599_v51 = vor.u32 %v7557_v40, %v5596_v41 }
  0x53   : > { %1515 = vmatpush.bf16.msrb.mxu0 %v5659_v60  ;;  %v5346_v49 = vld [vmem:[%s8200_s12 + $0x1a8] sm:$0xf]  ;;  %v7496_v50 = vld [vmem:[%s8200_s12 + $0x1b4] sm:$0xf0]  ;;  %v5727_v52 = vor.u32 %v7589_v42, %v5724_v46  ;;  %v5219_v53 = vor.u32 %v7464_v48, %v5218_v47  ;;  %v7553_v54 = vld [vmem:[%s8200_s12 + $0x384] sm:$0xf] }
  0x54   : > { %1528 = vmatpush.bf16.msrb.mxu1 %v5151_v0  ;;  %v5580_v55 = vld [vmem:[%s8200_s12 + $0x390] sm:$0xf0]  ;;  %v7585_v56 = vld [vmem:[%s8200_s12 + $0x484] sm:$0xf]  ;;  %v5347_v57 = vor.u32 %v7496_v50, %v5346_v49  ;;  %v5202_v59 = vld [vmem:[%s8200_s12 + $0x88] sm:$0xf] }
  0x55   : > { %1541 = vmatpush.bf16.msrb.mxu2 %v5279_v1  ;;  %v5708_v58 = vld [vmem:[%s8200_s12 + $0x490] sm:$0xf0]  ;;  %v7460_v60 = vld [vmem:[%s8200_s12 + $0x94] sm:$0xf0]  ;;  %v5330_v61 = vld [vmem:[%s8200_s12 + $0x188] sm:$0xf]  ;;  %v5583_v63 = vor.u32 %v7553_v54, %v5580_v55 }
  0x56   : > { %1554 = vmatpush.bf16.msrb.mxu3 %v5407_v5  ;;  %v7492_v62 = vld [vmem:[%s8200_s12 + $0x194] sm:$0xf0]  ;;  %v5711_v0 = vor.u32 %v7585_v56, %v5708_v58  ;;  %v5203_v1 = vor.u32 %v7460_v60, %v5202_v59  ;;  %v7549_v2 = vld [vmem:[%s8200_s12 + $0x364] sm:$0xf]  ;;  %v5564_v3 = vld [vmem:[%s8200_s12 + $0x370] sm:$0xf0] }
  0x57   : > { %1516 = vmatpush.bf16.msrb.mxu0 %v5643_v12  ;;  %v7581_v4 = vld [vmem:[%s8200_s12 + $0x464] sm:$0xf]  ;;  %v5331_v5 = vor.u32 %v7492_v62, %v5330_v61  ;;  %v5692_v6 = vld [vmem:[%s8200_s12 + $0x470] sm:$0xf0]  ;;  %v5186_v7 = vld [vmem:[%s8200_s12 + $0x68] sm:$0xf]  ;;  %v5567_v11 = vor.u32 %v7549_v2, %v5564_v3 }
  0x58   : > { %1529 = vmatpush.bf16.msrb.mxu1 %v5135_v16  ;;  %v7456_v8 = vld [vmem:[%s8200_s12 + $0x74] sm:$0xf0]  ;;  %v5314_v9 = vld [vmem:[%s8200_s12 + $0x168] sm:$0xf]  ;;  %v5695_v12 = vor.u32 %v7581_v4, %v5692_v6  ;;  %v7545_v14 = vld [vmem:[%s8200_s12 + $0x344] sm:$0xf] }
  0x59   : > { %1542 = vmatpush.bf16.msrb.mxu2 %v5263_v17  ;;  %v7488_v10 = vld [vmem:[%s8200_s12 + $0x174] sm:$0xf0]  ;;  %v5187_v13 = vor.u32 %v7456_v8, %v5186_v7  ;;  %v5548_v15 = vld [vmem:[%s8200_s12 + $0x350] sm:$0xf0]  ;;  %v7577_v16 = vld [vmem:[%s8200_s12 + $0x444] sm:$0xf] }
  0x5a   : > { %1555 = vmatpush.bf16.msrb.mxu3 %v5391_v20  ;;  %1517 = vmatmul.bf16.vlgmr.msrb.gmra.mxu0 %v8366_v32  ;;  %v5315_v17 = vor.u32 %v7488_v10, %v5314_v9  ;;  %v5676_v18 = vld [vmem:[%s8200_s12 + $0x450] sm:$0xf0]  ;;  %v5170_v19 = vld [vmem:[%s8200_s12 + $0x48] sm:$0xf]  ;;  %v7452_v20 = vld [vmem:[%s8200_s12 + $0x54] sm:$0xf0]  ;;  %v5551_v23 = vor.u32 %v7545_v14, %v5548_v15 }
  0x5b   : > { %1561 = vmatpush.bf16.msra.mxu0 %v5631_v21  ;;  %1530 = vmatmul.bf16.vlgmr.msrb.gmra.mxu1 %v8318_v36  ;;  %v5298_v21 = vld [vmem:[%s8200_s12 + $0x148] sm:$0xf]  ;;  %v7484_v22 = vld [vmem:[%s8200_s12 + $0x154] sm:$0xf0]  ;;  %v7541_v26 = vld [vmem:[%s8200_s12 + $0x324] sm:$0xf] }
  0x5c   : > { %1574 = vmatpush.bf16.msra.mxu1 %v5759_v24  ;;  %1543 = vmatmul.bf16.vlgmr.msrb.gmra.mxu2 %v8326_v44  ;;  %v5679_v24 = vor.u32 %v7577_v16, %v5676_v18  ;;  %v5532_v27 = vld [vmem:[%s8200_s12 + $0x330] sm:$0xf0]  ;;  %v5299_v29 = vor.u32 %v7484_v22, %v5298_v21  ;;  %v5154_v31 = vld [vmem:[%s8200_s12 + $0x28] sm:$0xf]  ;;  %v7448_v33 = vld [vmem:[%s8200_s12 + $0x34] sm:$0xf0] }
  0x5d   : > { %1587 = vmatpush.bf16.msra.mxu2 %v5251_v25  ;;  %1556 = vmatmul.bf16.vlgmr.msrb.gmra.mxu3 %v8320_v37  ;;  %v5171_v25 = vor.u32 %v7452_v20, %v5170_v19  ;;  %v5660_v30 = vld [vmem:[%s8200_s12 + $0x430] sm:$0xf0]  ;;  %v5282_v34 = vld [vmem:[%s8200_s12 + $0x128] sm:$0xf]  ;;  %v5155_v42 = vor.u32 %v7448_v33, %v5154_v31  ;;  %v7444_v49 = vld [vmem:[%s8200_s12 + $0x14] sm:$0xf0] }
  0x5e   : > { %1600 = vmatpush.bf16.msra.mxu3 %v5379_v28  ;;  %v7573_v28 = vld [vmem:[%s8200_s12 + $0x424] sm:$0xf]  ;;  %v5516_v40 = vld [vmem:[%s8200_s12 + $0x310] sm:$0xf0]  ;;  %v5138_v47 = vld [vmem:[%s8200_s12 + $0x8] sm:$0xf] }
  0x5f   : > { %1562 = vmatpush.bf16.msra.mxu0 %v5615_v35  ;;  %v7480_v35 = vld [vmem:[%s8200_s12 + $0x134] sm:$0xf0]  ;;  %v5663_v41 = vor.u32 %v7573_v28, %v5660_v30  ;;  %v5644_v46 = vld [vmem:[%s8200_s12 + $0x410] sm:$0xf0]  ;;  %v5266_v50 = vld [vmem:[%s8200_s12 + $0x108] sm:$0xf]  ;;  %v5139_v60 = vor.u32 %v7444_v49, %v5138_v47 }
  0x60   : > { %1575 = vmatpush.bf16.msra.mxu1 %v5743_v38  ;;  %v5535_v38 = vor.u32 %v7541_v26, %v5532_v27  ;;  %v5283_v48 = vor.u32 %v7480_v35, %v5282_v34  ;;  %v5634_v54 = vld [vmem:[%s8200_s12 + $0x3e8] sm:$0xf]  ;;  %v7568_v56 = vld [vmem:[%s8200_s12 + $0x3f4] sm:$0xf0]  ;;  %v7470_v61 = vld [vmem:[%s8200_s12 + $0xec] sm:$0xf] }
  0x61   : > { %1588 = vmatpush.bf16.msra.mxu2 %v5235_v39  ;;  %v7537_v39 = vld [vmem:[%s8200_s12 + $0x304] sm:$0xf]  ;;  %v7600_v58 = vld [vmem:[%s8200_s12 + $0x4f4] sm:$0xf0]  ;;  %v5252_v62 = vld [vmem:[%s8200_s12 + $0xf8] sm:$0xf0] }
  0x62   : > { %1601 = vmatpush.bf16.msra.mxu3 %v5363_v45  ;;  %v7569_v45 = vld [vmem:[%s8200_s12 + $0x404] sm:$0xf]  ;;  %v5519_v55 = vor.u32 %v7537_v39, %v5516_v40  ;;  %v5490_v3 = vld [vmem:[%s8200_s12 + $0x2c8] sm:$0xf]  ;;  %v7532_v4 = vld [vmem:[%s8200_s12 + $0x2d4] sm:$0xf0]  ;;  %v5255_v6 = vor.u32 %v7470_v61, %v5252_v62 }
  0x63   : > { %1563 = vmatpush.bf16.msra.mxu0 %v5599_v51  ;;  %v7476_v51 = vld [vmem:[%s8200_s12 + $0x114] sm:$0xf0]  ;;  %v5647_v59 = vor.u32 %v7569_v45, %v5644_v46  ;;  %v5746_v8 = vld [vmem:[%s8200_s12 + $0x4c8] sm:$0xf]  ;;  %v7466_v10 = vld [vmem:[%s8200_s12 + $0xcc] sm:$0xf] }
  0x64   : > { %1576 = vmatpush.bf16.msra.mxu1 %v5727_v52  ;;  %v5506_v52 = vld [vmem:[%s8200_s12 + $0x2e8] sm:$0xf]  ;;  %v7564_v7 = vld [vmem:[%s8200_s12 + $0x3d4] sm:$0xf0]  ;;  %v7462_v22 = vld [vmem:[%s8200_s12 + $0xac] sm:$0xf] }
  0x65   : > { %1589 = vmatpush.bf16.msra.mxu2 %v5219_v53  ;;  %v7536_v53 = vld [vmem:[%s8200_s12 + $0x2f4] sm:$0xf0]  ;;  %v5474_v15 = vld [vmem:[%s8200_s12 + $0x2a8] sm:$0xf]  ;;  %v7458_v35 = vld [vmem:[%s8200_s12 + $0x8c] sm:$0xf] }
  0x66   : > { %1602 = vmatpush.bf16.msra.mxu3 %v5347_v57  ;;  %v5762_v57 = vld [vmem:[%s8200_s12 + $0x4e8] sm:$0xf]  ;;  %v7596_v9 = vld [vmem:[%s8200_s12 + $0x4d4] sm:$0xf0] }
  0x67   : > { %1564 = vmatpush.bf16.msra.mxu0 %v5583_v63  ;;  %v5267_v63 = vor.u32 %v7476_v51, %v5266_v50  ;;  %v5763_v2 = vor.u32 %v7600_v58, %v5762_v57  ;;  %v5747_v14 = vor.u32 %v7596_v9, %v5746_v8  ;;  %v7528_v16 = vld [vmem:[%s8200_s12 + $0x2b4] sm:$0xf0]  ;;  %v5730_v20 = vld [vmem:[%s8200_s12 + $0x4a8] sm:$0xf]  ;;  %v7454_v51 = vld [vmem:[%s8200_s12 + $0x6c] sm:$0xf] }
  0x68   : > { %1577 = vmatpush.bf16.msra.mxu1 %v5711_v0  ;;  %v5507_v0 = vor.u32 %v7536_v53, %v5506_v52  ;;  %v7560_v19 = vld [vmem:[%s8200_s12 + $0x3b4] sm:$0xf0]  ;;  %v5458_v27 = vld [vmem:[%s8200_s12 + $0x288] sm:$0xf]  ;;  %v5188_v52 = vld [vmem:[%s8200_s12 + $0x78] sm:$0xf0] }
  0x69   : > { %1590 = vmatpush.bf16.msra.mxu2 %v5203_v1  ;;  %v5635_v1 = vor.u32 %v7568_v56, %v5634_v54  ;;  %v7592_v21 = vld [vmem:[%s8200_s12 + $0x4b4] sm:$0xf0]  ;;  %v5714_v33 = vld [vmem:[%s8200_s12 + $0x488] sm:$0xf] }
  0x6a   : > { %1603 = vmatpush.bf16.msra.mxu3 %v5331_v5  ;;  %v5618_v5 = vld [vmem:[%s8200_s12 + $0x3c8] sm:$0xf]  ;;  %v5731_v26 = vor.u32 %v7592_v21, %v5730_v20  ;;  %v7524_v28 = vld [vmem:[%s8200_s12 + $0x294] sm:$0xf0] }
  0x6b   : > { %1565 = vmatpush.bf16.msra.mxu0 %v5567_v11  ;;  %v5236_v11 = vld [vmem:[%s8200_s12 + $0xd8] sm:$0xf0]  ;;  %v7556_v31 = vld [vmem:[%s8200_s12 + $0x394] sm:$0xf0]  ;;  %v5459_v39 = vor.u32 %v7524_v28, %v5458_v27  ;;  %v5570_v46 = vld [vmem:[%s8200_s12 + $0x368] sm:$0xf] }
  0x6c   : > { %1578 = vmatpush.bf16.msra.mxu1 %v5695_v12  ;;  %v5491_v12 = vor.u32 %v7532_v4, %v5490_v3  ;;  %v5239_v18 = vor.u32 %v7466_v10, %v5236_v11  ;;  %v7588_v34 = vld [vmem:[%s8200_s12 + $0x494] sm:$0xf0]  ;;  %v5698_v49 = vld [vmem:[%s8200_s12 + $0x468] sm:$0xf]  ;;  %v7446_v11 = vld [vmem:[%s8200_s12 + $0x2c] sm:$0xf] }
  0x6d   : > { %1591 = vmatpush.bf16.msra.mxu2 %v5187_v13  ;;  %v5619_v13 = vor.u32 %v7564_v7, %v5618_v5  ;;  %v7520_v45 = vld [vmem:[%s8200_s12 + $0x274] sm:$0xf0]  ;;  %v5426_v56 = vld [vmem:[%s8200_s12 + $0x248] sm:$0xf]  ;;  %v7534_v27 = vld [vmem:[%s8200_s12 + $0x2ec] sm:$0xf] }
  0x6e   : > { %1604 = vmatpush.bf16.msra.mxu3 %v5315_v17  ;;  %v5602_v17 = vld [vmem:[%s8200_s12 + $0x3a8] sm:$0xf]  ;;  %v7584_v50 = vld [vmem:[%s8200_s12 + $0x474] sm:$0xf0] }
  0x6f   : > { %1566 = vmatpush.bf16.msra.mxu0 %v5551_v23  ;;  %v5220_v23 = vld [vmem:[%s8200_s12 + $0xb8] sm:$0xf0]  ;;  %v7516_v57 = vld [vmem:[%s8200_s12 + $0x254] sm:$0xf0]  ;;  %v5554_v58 = vld [vmem:[%s8200_s12 + $0x348] sm:$0xf] }
  0x70   : > { %1579 = vmatpush.bf16.msra.mxu1 %v5679_v24  ;;  %v5475_v24 = vor.u32 %v7528_v16, %v5474_v15  ;;  %v5223_v30 = vor.u32 %v7462_v22, %v5220_v23  ;;  %v5682_v61 = vld [vmem:[%s8200_s12 + $0x448] sm:$0xf]  ;;  %v7580_v62 = vld [vmem:[%s8200_s12 + $0x454] sm:$0xf0]  ;;  %v7442_v23 = vld [vmem:[%s8200_s12 + $0xc] sm:$0xf] }
  0x71   : > { %1592 = vmatpush.bf16.msra.mxu2 %v5171_v25  ;;  %v5603_v25 = vor.u32 %v7560_v19, %v5602_v17  ;;  %v5683_v3 = vor.u32 %v7580_v62, %v5682_v61  ;;  %v5410_v4 = vld [vmem:[%s8200_s12 + $0x228] sm:$0xf]  ;;  %v7512_v5 = vld [vmem:[%s8200_s12 + $0x234] sm:$0xf0]  ;;  %v5476_v61 = vld [vmem:[%s8200_s12 + $0x2b8] sm:$0xf0] }
  0x72   : > { %1605 = vmatpush.bf16.msra.mxu3 %v5299_v29  ;;  %v5586_v29 = vld [vmem:[%s8200_s12 + $0x388] sm:$0xf]  ;;  %v7544_v8 = vld [vmem:[%s8200_s12 + $0x334] sm:$0xf0]  ;;  %v7558_v62 = vld [vmem:[%s8200_s12 + $0x3ac] sm:$0xf] }
  0x73   : > { %1567 = vmatpush.bf16.msra.mxu0 %v5535_v38  ;;  %v5204_v38 = vld [vmem:[%s8200_s12 + $0x98] sm:$0xf0]  ;;  %v5587_v40 = vor.u32 %v7556_v31, %v5586_v29  ;;  %v5666_v9 = vld [vmem:[%s8200_s12 + $0x428] sm:$0xf]  ;;  %v7576_v10 = vld [vmem:[%s8200_s12 + $0x434] sm:$0xf0] }
  0x74   : > { %1580 = vmatpush.bf16.msra.mxu1 %v5663_v41  ;;  %v5715_v41 = vor.u32 %v7588_v34, %v5714_v33  ;;  %v5207_v47 = vor.u32 %v7458_v35, %v5204_v38  ;;  %v7508_v15 = vld [vmem:[%s8200_s12 + $0x214] sm:$0xf0]  ;;  %v5667_v17 = vor.u32 %v7576_v10, %v5666_v9  ;;  %v5650_v20 = vld [vmem:[%s8200_s12 + $0x408] sm:$0xf]  ;;  %v5508_v29 = vld [vmem:[%s8200_s12 + $0x2f8] sm:$0xf0] }
  0x75   : > { %1593 = vmatpush.bf16.msra.mxu2 %v5155_v42  ;;  %v5442_v42 = vld [vmem:[%s8200_s12 + $0x268] sm:$0xf]  ;;  %v7540_v19 = vld [vmem:[%s8200_s12 + $0x314] sm:$0xf0]  ;;  %v5636_v31 = vld [vmem:[%s8200_s12 + $0x3f8] sm:$0xf0] }
  0x76   : > { %1606 = vmatpush.bf16.msra.mxu3 %v5283_v48  ;;  %v7552_v48 = vld [vmem:[%s8200_s12 + $0x374] sm:$0xf0]  ;;  %v5443_v53 = vor.u32 %v7520_v45, %v5442_v42  ;;  %v7598_v35 = vld [vmem:[%s8200_s12 + $0x4ec] sm:$0xf]  ;;  %v5764_v38 = vld [vmem:[%s8200_s12 + $0x4f8] sm:$0xf0] }
  0x77   : > { %1568 = vmatpush.bf16.msra.mxu0 %v5519_v55  ;;  %v5571_v54 = vor.u32 %v7552_v48, %v5570_v46  ;;  %v5699_v55 = vor.u32 %v7584_v50, %v5698_v49  ;;  %v7572_v22 = vld [vmem:[%s8200_s12 + $0x414] sm:$0xf0]  ;;  %v7498_v45 = vld [vmem:[%s8200_s12 + $0x1cc] sm:$0xf]  ;;  %v5364_v46 = vld [vmem:[%s8200_s12 + $0x1d8] sm:$0xf0]  ;;  %v5767_v48 = vor.u32 %v7598_v35, %v5764_v38 }
  0x78   : > { %1581 = vmatpush.bf16.msra.mxu1 %v5647_v59  ;;  %v5191_v59 = vor.u32 %v7454_v51, %v5188_v52  ;;  %v5651_v34 = vor.u32 %v7572_v22, %v5650_v20  ;;  %v5492_v49 = vld [vmem:[%s8200_s12 + $0x2d8] sm:$0xf0]  ;;  %v7562_v50 = vld [vmem:[%s8200_s12 + $0x3cc] sm:$0xf] }
  0x79   : > { %1594 = vmatpush.bf16.msra.mxu2 %v5139_v60  ;;  %v7548_v60 = vld [vmem:[%s8200_s12 + $0x354] sm:$0xf0]  ;;  %v5620_v51 = vld [vmem:[%s8200_s12 + $0x3d8] sm:$0xf0]  ;;  %v7594_v52 = vld [vmem:[%s8200_s12 + $0x4cc] sm:$0xf] }
  0x7a   : > { %1607 = vmatpush.bf16.msra.mxu3 %v5267_v63  ;;  %1569 = vmatmul.bf16.vlgmr.msra.gmra.mxu0 %v8324_v43  ;;  %v7450_v63 = vld [vmem:[%s8200_s12 + $0x4c] sm:$0xf]  ;;  %v5460_v9 = vld [vmem:[%s8200_s12 + $0x298] sm:$0xf0] }
  0x7b   : > { %1613 = vmatpush.bf16.msrb.mxu0 %v5507_v0  ;;  %1582 = vmatmul.bf16.vlgmr.msra.gmra.mxu1 %v8366_v32  ;;  %v5172_v0 = vld [vmem:[%s8200_s12 + $0x58] sm:$0xf0]  ;;  %v7554_v10 = vld [vmem:[%s8200_s12 + $0x38c] sm:$0xf] }
  0x7c   : > { %1626 = vmatpush.bf16.msrb.mxu1 %v5635_v1  ;;  %1595 = vmatmul.bf16.vlgmr.msra.gmra.mxu2 %v8318_v36  ;;  %v5427_v1 = vor.u32 %v7516_v57, %v5426_v56  ;;  %v5175_v7 = vor.u32 %v7450_v63, %v5172_v0  ;;  %v5623_v56 = vor.u32 %v7562_v50, %v5620_v51  ;;  %v7494_v57 = vld [vmem:[%s8200_s12 + $0x1ac] sm:$0xf]  ;;  %v5604_v63 = vld [vmem:[%s8200_s12 + $0x3b8] sm:$0xf0] }
  0x7d   : > { %1639 = vmatpush.bf16.msrb.mxu2 %v5763_v2  ;;  %1608 = vmatmul.bf16.vlgmr.msra.gmra.mxu3 %v8326_v44  ;;  %v5555_v2 = vor.u32 %v7548_v60, %v5554_v58  ;;  %v5348_v58 = vld [vmem:[%s8200_s12 + $0x1b8] sm:$0xf0]  ;;  %v7590_v0 = vld [vmem:[%s8200_s12 + $0x4ac] sm:$0xf] }
  0x7e   : > { %1652 = vmatpush.bf16.msrb.mxu3 %v5255_v6  ;;  %v5538_v6 = vld [vmem:[%s8200_s12 + $0x328] sm:$0xf]  ;;  %v5444_v20 = vld [vmem:[%s8200_s12 + $0x278] sm:$0xf0]  ;;  %v7578_v38 = vld [vmem:[%s8200_s12 + $0x44c] sm:$0xf] }
  0x7f   : > { %1614 = vmatpush.bf16.msrb.mxu0 %v5491_v12  ;;  %v5156_v12 = vld [vmem:[%s8200_s12 + $0x38] sm:$0xf0]  ;;  %v5539_v16 = vor.u32 %v7544_v8, %v5538_v6  ;;  %v7542_v50 = vld [vmem:[%s8200_s12 + $0x32c] sm:$0xf] }
  0x80   : > { %1627 = vmatpush.bf16.msrb.mxu1 %v5619_v13  ;;  %v5411_v13 = vor.u32 %v7512_v5, %v5410_v4  ;;  %v5159_v21 = vor.u32 %v7446_v11, %v5156_v12  ;;  %v5607_v4 = vor.u32 %v7558_v62, %v5604_v63  ;;  %v7490_v5 = vld [vmem:[%s8200_s12 + $0x18c] sm:$0xf]  ;;  %v5332_v6 = vld [vmem:[%s8200_s12 + $0x198] sm:$0xf0] }
  0x81   : > { %1640 = vmatpush.bf16.msrb.mxu2 %v5747_v14  ;;  %v5394_v14 = vld [vmem:[%s8200_s12 + $0x208] sm:$0xf]  ;;  %v5588_v11 = vld [vmem:[%s8200_s12 + $0x398] sm:$0xf0]  ;;  %v7586_v12 = vld [vmem:[%s8200_s12 + $0x48c] sm:$0xf] }
  0x82   : > { %1653 = vmatpush.bf16.msrb.mxu3 %v5239_v18  ;;  %v5522_v18 = vld [vmem:[%s8200_s12 + $0x308] sm:$0xf]  ;;  %v5395_v28 = vor.u32 %v7508_v15, %v5394_v14  ;;  %v5591_v15 = vor.u32 %v7554_v10, %v5588_v11  ;;  %v5572_v22 = vld [vmem:[%s8200_s12 + $0x378] sm:$0xf0]  ;;  %v6266_v11 = vld [vmem:[%s8205_s15 + $0x3e0] sm:$0xf] }
  0x83   : > { %1615 = vmatpush.bf16.msrb.mxu0 %v5475_v24  ;;  %v5140_v24 = vld [vmem:[%s8200_s12 + $0x18] sm:$0xf0]  ;;  %v5523_v33 = vor.u32 %v7540_v19, %v5522_v18  ;;  %v7518_v18 = vld [vmem:[%s8200_s12 + $0x26c] sm:$0xf] }
  0x84   : > { %1628 = vmatpush.bf16.msrb.mxu1 %v5603_v25  ;;  %v7502_v25 = vld [vmem:[%s8200_s12 + $0x1ec] sm:$0xf]  ;;  %v5556_v35 = vld [vmem:[%s8200_s12 + $0x358] sm:$0xf0] }
  0x85   : > { %1641 = vmatpush.bf16.msrb.mxu2 %v5731_v26  ;;  %v5380_v26 = vld [vmem:[%s8200_s12 + $0x1f8] sm:$0xf0] }
  0x86   : > { %1654 = vmatpush.bf16.msrb.mxu3 %v5223_v30  ;;  %v7566_v30 = vld [vmem:[%s8200_s12 + $0x3ec] sm:$0xf]  ;;  %v5540_v51 = vld [vmem:[%s8200_s12 + $0x338] sm:$0xf0] }
  0x87   : > { %1616 = vmatpush.bf16.msrb.mxu0 %v5459_v39  ;;  %v5143_v39 = vor.u32 %v7442_v23, %v5140_v24  ;;  %v5639_v42 = vor.u32 %v7566_v30, %v5636_v31  ;;  %v7582_v23 = vld [vmem:[%s8200_s12 + $0x46c] sm:$0xf]  ;;  %v5700_v24 = vld [vmem:[%s8200_s12 + $0x478] sm:$0xf0] }
  0x88   : > { %1629 = vmatpush.bf16.msrb.mxu1 %v5587_v40  ;;  %v5383_v40 = vor.u32 %v7502_v25, %v5380_v26  ;;  %v5447_v26 = vor.u32 %v7518_v18, %v5444_v20  ;;  %v7514_v30 = vld [vmem:[%s8200_s12 + $0x24c] sm:$0xf]  ;;  %v5703_v31 = vor.u32 %v7582_v23, %v5700_v24  ;;  %v5524_v63 = vld [vmem:[%s8200_s12 + $0x318] sm:$0xf0]  ;;  %v5994_v18 = vld [vmem:[%s8205_s15 + $0x1c0] sm:$0xf] }
  0x89   : > { %1642 = vmatpush.bf16.msrb.mxu2 %v5715_v41  ;;  %v5511_v41 = vor.u32 %v7534_v27, %v5508_v29  ;;  %v5300_v29 = vld [vmem:[%s8200_s12 + $0x158] sm:$0xf0]  ;;  %v7659_v20 = vld [vmem:[%s8205_s15 + $0x1cc] sm:$0xf0]  ;;  %v6250_v23 = vld [vmem:[%s8205_s15 + $0x3c0] sm:$0xf] }
  0x8a   : > { %1655 = vmatpush.bf16.msrb.mxu3 %v5207_v47  ;;  %v7530_v47 = vld [vmem:[%s8200_s12 + $0x2cc] sm:$0xf]  ;;  %v7723_v24 = vld [vmem:[%s8205_s15 + $0x3cc] sm:$0xf0] }
  0x8b   : > { %1617 = vmatpush.bf16.msrb.mxu0 %v5443_v53  ;;  %v5748_v53 = vld [vmem:[%s8200_s12 + $0x4d8] sm:$0xf0] }
  0x8c   : > { %1630 = vmatpush.bf16.msrb.mxu1 %v5571_v54  ;;  %v5367_v54 = vor.u32 %v7498_v45, %v5364_v46  ;;  %v5751_v60 = vor.u32 %v7594_v52, %v5748_v53  ;;  %v7478_v45 = vld [vmem:[%s8200_s12 + $0x12c] sm:$0xf]  ;;  %v5284_v46 = vld [vmem:[%s8200_s12 + $0x138] sm:$0xf0] }
  0x8d   : > { %1643 = vmatpush.bf16.msrb.mxu2 %v5699_v55  ;;  %v5495_v55 = vor.u32 %v7530_v47, %v5492_v49  ;;  %v7510_v47 = vld [vmem:[%s8200_s12 + $0x22c] sm:$0xf]  ;;  %v5412_v49 = vld [vmem:[%s8200_s12 + $0x238] sm:$0xf0] }
  0x8e   : > { %1656 = vmatpush.bf16.msrb.mxu3 %v5191_v59  ;;  %v7526_v59 = vld [vmem:[%s8200_s12 + $0x2ac] sm:$0xf]  ;;  %v5668_v53 = vld [vmem:[%s8200_s12 + $0x438] sm:$0xf0] }
  0x8f   : > { %1618 = vmatpush.bf16.msrb.mxu0 %v5427_v1  ;;  %v5732_v1 = vld [vmem:[%s8200_s12 + $0x4b8] sm:$0xf0]  ;;  %v7574_v52 = vld [vmem:[%s8200_s12 + $0x42c] sm:$0xf] }
  0x90   : > { %1631 = vmatpush.bf16.msrb.mxu1 %v5555_v2  ;;  %v5351_v2 = vor.u32 %v7494_v57, %v5348_v58  ;;  %v5735_v8 = vor.u32 %v7590_v0, %v5732_v1  ;;  %v5415_v57 = vor.u32 %v7510_v47, %v5412_v49  ;;  %v5543_v58 = vor.u32 %v7542_v50, %v5540_v51  ;;  %v7570_v0 = vld [vmem:[%s8200_s12 + $0x40c] sm:$0xf]  ;;  %v5652_v1 = vld [vmem:[%s8200_s12 + $0x418] sm:$0xf0]  ;;  %v6090_v47 = vld [vmem:[%s8205_s15 + $0x280] sm:$0xf] }
  0x91   : > { %1644 = vmatpush.bf16.msrb.mxu2 %v5683_v3  ;;  %v5479_v3 = vor.u32 %v7526_v59, %v5476_v61  ;;  %v7506_v59 = vld [vmem:[%s8200_s12 + $0x20c] sm:$0xf]  ;;  %v5671_v62 = vor.u32 %v7574_v52, %v5668_v53  ;;  %v7715_v49 = vld [vmem:[%s8205_s15 + $0x38c] sm:$0xf0]  ;;  %v5818_v53 = vld [vmem:[%s8205_s15 + $0x60] sm:$0xf] }
  0x92   : > { %1657 = vmatpush.bf16.msrb.mxu3 %v5175_v7  ;;  %v7522_v7 = vld [vmem:[%s8200_s12 + $0x28c] sm:$0xf] }
  0x93   : > { %1619 = vmatpush.bf16.msrb.mxu0 %v5411_v13  ;;  %v5335_v13 = vor.u32 %v7490_v5, %v5332_v6  ;;  %v5463_v14 = vor.u32 %v7522_v7, %v5460_v9  ;;  %v7538_v61 = vld [vmem:[%s8200_s12 + $0x30c] sm:$0xf]  ;;  %v7663_v6 = vld [vmem:[%s8205_s15 + $0x1ec] sm:$0xf0]  ;;  %v6138_v7 = vld [vmem:[%s8205_s15 + $0x2e0] sm:$0xf] }
  0x94   : > { %1632 = vmatpush.bf16.msrb.mxu1 %v5539_v16  ;;  %v7486_v16 = vld [vmem:[%s8200_s12 + $0x16c] sm:$0xf]  ;;  %v5527_v10 = vor.u32 %v7538_v61, %v5524_v63  ;;  %v7711_v61 = vld [vmem:[%s8205_s15 + $0x36c] sm:$0xf0] }
  0x95   : > { %1645 = vmatpush.bf16.msrb.mxu2 %v5667_v17  ;;  %v5316_v17 = vld [vmem:[%s8200_s12 + $0x178] sm:$0xf0] }
  0x96   : > { %1658 = vmatpush.bf16.msrb.mxu3 %v5159_v21  ;;  %v7550_v21 = vld [vmem:[%s8200_s12 + $0x36c] sm:$0xf]  ;;  %v5319_v25 = vor.u32 %v7486_v16, %v5316_v17  ;;  %v5866_v16 = vld [vmem:[%s8205_s15 + $0xc0] sm:$0xf]  ;;  %v7627_v17 = vld [vmem:[%s8205_s15 + $0xcc] sm:$0xf0] }
  0x97   : > { %1620 = vmatpush.bf16.msrb.mxu0 %v5395_v28  ;;  %v5575_v27 = vor.u32 %v7550_v21, %v5572_v22  ;;  %v7482_v28 = vld [vmem:[%s8200_s12 + $0x14c] sm:$0xf]  ;;  %v6122_v21 = vld [vmem:[%s8205_s15 + $0x2c0] sm:$0xf]  ;;  %v7691_v22 = vld [vmem:[%s8205_s15 + $0x2cc] sm:$0xf0] }
  0x98   : > { %1633 = vmatpush.bf16.msrb.mxu1 %v5523_v33  ;;  %v5428_v33 = vld [vmem:[%s8200_s12 + $0x258] sm:$0xf0] }
  0x99   : > { %1646 = vmatpush.bf16.msrb.mxu2 %v5651_v34  ;;  %v7546_v34 = vld [vmem:[%s8200_s12 + $0x34c] sm:$0xf] }
  0x9a   : > { %1659 = vmatpush.bf16.msrb.mxu3 %v5143_v39  ;;  %1621 = vmatmul.bf16.vlgmr.msrb.gmra.mxu0 %v8320_v37  ;;  %v5684_v39 = vld [vmem:[%s8200_s12 + $0x458] sm:$0xf0] }
  0x9b   : > { %1665 = vmatpush.bf16.msra.mxu0 %v5383_v40  ;;  %1634 = vmatmul.bf16.vlgmr.msrb.gmra.mxu1 %v8324_v43  ;;  %v5303_v40 = vor.u32 %v7482_v28, %v5300_v29  ;;  %v5850_v28 = vld [vmem:[%s8205_s15 + $0xa0] sm:$0xf]  ;;  %v7623_v29 = vld [vmem:[%s8205_s15 + $0xac] sm:$0xf0] }
  0x9c   : > { %1678 = vmatpush.bf16.msra.mxu1 %v5511_v41  ;;  %1647 = vmatmul.bf16.vlgmr.msrb.gmra.mxu2 %v8366_v32  ;;  %v5431_v41 = vor.u32 %v7514_v30, %v5428_v33  ;;  %v5978_v30 = vld [vmem:[%s8205_s15 + $0x1a0] sm:$0xf]  ;;  %v7655_v33 = vld [vmem:[%s8205_s15 + $0x1ac] sm:$0xf0] }
  0x9d   : > { %1691 = vmatpush.bf16.msra.mxu2 %v5639_v42  ;;  %1660 = vmatmul.bf16.vlgmr.msrb.gmra.mxu3 %v8318_v36  ;;  %v5716_v36 = vld [vmem:[%s8200_s12 + $0x498] sm:$0xf0]  ;;  %v5559_v42 = vor.u32 %v7546_v34, %v5556_v35  ;;  %v6106_v34 = vld [vmem:[%s8205_s15 + $0x2a0] sm:$0xf]  ;;  %v7687_v35 = vld [vmem:[%s8205_s15 + $0x2ac] sm:$0xf0] }
  0x9e   : > { %1704 = vmatpush.bf16.msra.mxu3 %v5767_v48  ;;  %v5719_v19 = vor.u32 %v7586_v12, %v5716_v36  ;;  %v5687_v48 = vor.u32 %v7578_v38, %v5684_v39  ;;  %v7727_v12 = vld [vmem:[%s8205_s15 + $0x3ec] sm:$0xf0]  ;;  %v5655_v36 = vor.u32 %v7570_v0, %v5652_v1  ;;  %v6234_v38 = vld [vmem:[%s8205_s15 + $0x3a0] sm:$0xf] }
  0x9f   : > { %1666 = vmatpush.bf16.msra.mxu0 %v5367_v54  ;;  %v5287_v54 = vor.u32 %v7478_v45, %v5284_v46  ;;  %v7719_v39 = vld [vmem:[%s8205_s15 + $0x3ac] sm:$0xf0]  ;;  %v5962_v45 = vld [vmem:[%s8205_s15 + $0x180] sm:$0xf] }
  0xa0   : > { %1679 = vmatpush.bf16.msra.mxu1 %v5495_v55  ;;  %v7474_v55 = vld [vmem:[%s8200_s12 + $0x10c] sm:$0xf]  ;;  %v7651_v46 = vld [vmem:[%s8205_s15 + $0x18c] sm:$0xf0]  ;;  %v5802_v1 = vld [vmem:[%s8205_s15 + $0x40] sm:$0xf] }
  0xa1   : > { %1692 = vmatpush.bf16.msra.mxu2 %v5623_v56  ;;  %v5268_v56 = vld [vmem:[%s8200_s12 + $0x118] sm:$0xf0]  ;;  %v5963_v51 = vor.u32 %v7651_v46, %v5962_v45  ;;  %v7693_v45 = vld [vmem:[%s8205_s15 + $0x2e4] sm:$0xf] }
  0xa2   : > { %1705 = vmatpush.bf16.msra.mxu3 %v5751_v60  ;;  %v5396_v60 = vld [vmem:[%s8200_s12 + $0x218] sm:$0xf0]  ;;  %v5271_v5 = vor.u32 %v7474_v55, %v5268_v56  ;;  %v5946_v55 = vld [vmem:[%s8205_s15 + $0x160] sm:$0xf] }
  0xa3   : > { %1667 = vmatpush.bf16.msra.mxu0 %v5351_v2  ;;  %v5882_v2 = vld [vmem:[%s8205_s15 + $0xe0] sm:$0xf]  ;;  %v5399_v9 = vor.u32 %v7506_v59, %v5396_v60  ;;  %v7679_v59 = vld [vmem:[%s8205_s15 + $0x26c] sm:$0xf0] }
  0xa4   : > { %1680 = vmatpush.bf16.msra.mxu1 %v5479_v3  ;;  %v7631_v3 = vld [vmem:[%s8205_s15 + $0xec] sm:$0xf0]  ;;  %v6202_v60 = vld [vmem:[%s8205_s15 + $0x360] sm:$0xf] }
  0xa5   : > { %1693 = vmatpush.bf16.msra.mxu2 %v5607_v4  ;;  %v6010_v4 = vld [vmem:[%s8205_s15 + $0x1e0] sm:$0xf] }
  0xa6   : > { %1706 = vmatpush.bf16.msra.mxu3 %v5735_v8  ;;  %v7695_v8 = vld [vmem:[%s8205_s15 + $0x2ec] sm:$0xf0] }
  0xa7   : > { %1668 = vmatpush.bf16.msra.mxu0 %v5335_v13  ;;  %v5883_v13 = vor.u32 %v7631_v3, %v5882_v2  ;;  %v7611_v2 = vld [vmem:[%s8205_s15 + $0x4c] sm:$0xf0]  ;;  %v5930_v3 = vld [vmem:[%s8205_s15 + $0x140] sm:$0xf] }
  0xa8   : > { %1681 = vmatpush.bf16.msra.mxu1 %v5463_v14  ;;  %v6011_v14 = vor.u32 %v7663_v6, %v6010_v4  ;;  %v6203_v4 = vor.u32 %v7711_v61, %v6202_v60  ;;  %v6058_v6 = vld [vmem:[%s8205_s15 + $0x240] sm:$0xf]  ;;  %v482_v61 = vld.sshfl [vmem:[#allocation1 + $0x8] sm:$0xff pattern:$0x73625140] }
  0xa9   : > { %1694 = vmatpush.bf16.msra.mxu2 %v5591_v15  ;;  %v6139_v15 = vor.u32 %v7695_v8, %v6138_v7  ;;  %v7675_v7 = vld [vmem:[%s8205_s15 + $0x24c] sm:$0xf0]  ;;  %v6186_v8 = vld [vmem:[%s8205_s15 + $0x340] sm:$0xf] }
  0xaa   : > { %1707 = vmatpush.bf16.msra.mxu3 %v5719_v19  ;;  %v6267_v19 = vor.u32 %v7727_v12, %v6266_v11  ;;  %v6059_v12 = vor.u32 %v7675_v7, %v6058_v6 }
  0xab   : > { %1669 = vmatpush.bf16.msra.mxu0 %v5319_v25  ;;  %v5867_v25 = vor.u32 %v7627_v17, %v5866_v16  ;;  %v7639_v16 = vld [vmem:[%s8205_s15 + $0x12c] sm:$0xf0]  ;;  %v6042_v17 = vld [vmem:[%s8205_s15 + $0x220] sm:$0xf] }
  0xac   : > { %1682 = vmatpush.bf16.msra.mxu1 %v5447_v26  ;;  %v5995_v26 = vor.u32 %v7659_v20, %v5994_v18  ;;  %v7671_v18 = vld [vmem:[%s8205_s15 + $0x22c] sm:$0xf0] }
  0xad   : > { %1695 = vmatpush.bf16.msra.mxu2 %v5575_v27  ;;  %v6123_v27 = vor.u32 %v7691_v22, %v6122_v21  ;;  %v7703_v20 = vld [vmem:[%s8205_s15 + $0x32c] sm:$0xf0]  ;;  %v5770_v21 = vld [vmem:[%s8205_s15] sm:$0xf] }
  0xae   : > { %1708 = vmatpush.bf16.msra.mxu3 %v5703_v31  ;;  %v6251_v31 = vor.u32 %v7723_v24, %v6250_v23  ;;  %v7603_v23 = vld [vmem:[%s8205_s15 + $0xc] sm:$0xf0]  ;;  %v5898_v24 = vld [vmem:[%s8205_s15 + $0x100] sm:$0xf] }
  0xaf   : > { %1670 = vmatpush.bf16.msra.mxu0 %v5303_v40  ;;  %v5979_v40 = vor.u32 %v7655_v33, %v5978_v30  ;;  %v7667_v30 = vld [vmem:[%s8205_s15 + $0x20c] sm:$0xf0] }
  0xb0   : > { %1683 = vmatpush.bf16.msra.mxu1 %v5431_v41  ;;  %v6107_v41 = vor.u32 %v7687_v35, %v6106_v34  ;;  %v7699_v34 = vld [vmem:[%s8205_s15 + $0x30c] sm:$0xf0]  ;;  %v6394_v35 = vld [vmem:[%s8205_s15 + $0x4e0] sm:$0xf] }
  0xb1   : > { %1696 = vmatpush.bf16.msra.mxu2 %v5559_v42  ;;  %v5834_v42 = vld [vmem:[%s8205_s15 + $0x80] sm:$0xf] }
  0xb2   : > { %1709 = vmatpush.bf16.msra.mxu3 %v5687_v48  ;;  %v7683_v48 = vld [vmem:[%s8205_s15 + $0x28c] sm:$0xf0] }
  0xb3   : > { %1671 = vmatpush.bf16.msra.mxu0 %v5287_v54  ;;  %v6091_v52 = vor.u32 %v7683_v48, %v6090_v47  ;;  %v7615_v54 = vld [vmem:[%s8205_s15 + $0x6c] sm:$0xf0] }
  0xb4   : > { %1684 = vmatpush.bf16.msra.mxu1 %v5415_v57  ;;  %v7647_v57 = vld [vmem:[%s8205_s15 + $0x16c] sm:$0xf0] }
  0xb5   : > { %1697 = vmatpush.bf16.msra.mxu2 %v5543_v58  ;;  %v6074_v58 = vld [vmem:[%s8205_s15 + $0x260] sm:$0xf]  ;;  %v5947_v63 = vor.u32 %v7647_v57, %v5946_v55  ;;  %v484_v55 = vld.sshfl [vmem:[#allocation1 + $0x18] sm:$0xff pattern:$0x73625140] }
  0xb6   : > { %1710 = vmatpush.bf16.msra.mxu3 %v5671_v62  ;;  %v5819_v62 = vor.u32 %v7615_v54, %v5818_v53  ;;  %v6075_v0 = vor.u32 %v7679_v59, %v6074_v58  ;;  %v483_v54 = vld.sshfl [vmem:[#allocation1 + $0x10] sm:$0xff pattern:$0x73625140]  ;;  %v7625_v58 = vld [vmem:[%s8205_s15 + $0xc4] sm:$0xf] }
  0xb7   : > { %1672 = vmatpush.bf16.msra.mxu0 %v5271_v5  ;;  %v7643_v5 = vld [vmem:[%s8205_s15 + $0x14c] sm:$0xf0]  ;;  %v8644_v7 = vpack.c.bf16 %v483_v54, %v483_v54 }
  0xb8   : > { %1685 = vmatpush.bf16.msra.mxu1 %v5399_v9  ;;  %v7707_v9 = vld [vmem:[%s8205_s15 + $0x34c] sm:$0xf0]  ;;  %v5931_v11 = vor.u32 %v7643_v5, %v5930_v3  ;;  %v6124_v5 = vld [vmem:[%s8205_s15 + $0x2d0] sm:$0xf0] }
  0xb9   : > { %1698 = vmatpush.bf16.msra.mxu2 %v5527_v10  ;;  %v5803_v10 = vor.u32 %v7611_v2, %v5802_v1  ;;  %v5996_v1 = vld [vmem:[%s8205_s15 + $0x1d0] sm:$0xf0] }
  0xba   : > { %1711 = vmatpush.bf16.msra.mxu3 %v5655_v36  ;;  %1673 = vmatmul.bf16.vlgmr.msra.gmra.mxu0 %v8326_v44  ;;  %v7619_v44 = vld [vmem:[%s8205_s15 + $0x8c] sm:$0xf0]  ;;  %v5786_v36 = vld [vmem:[%s8205_s15 + $0x20] sm:$0xf] }
  0xbb   : > { %2694 = vmatpush.bf16.msrb.mxu0 %v5883_v13  ;;  %1686 = vmatmul.bf16.vlgmr.msra.gmra.mxu1 %v8320_v37  ;;  %v6218_v37 = vld [vmem:[%s8205_s15 + $0x380] sm:$0xf]  ;;  %v5835_v50 = vor.u32 %v7619_v44, %v5834_v42  ;;  %v7607_v13 = vld [vmem:[%s8205_s15 + $0x2c] sm:$0xf0]  ;;  %v5771_v42 = vor.u32 %v7603_v23, %v5770_v21  ;;  %v6012_v44 = vld [vmem:[%s8205_s15 + $0x1f0] sm:$0xf0] }
  0xbc   : > { %2707 = vmatpush.bf16.msrb.mxu1 %v6011_v14  ;;  %1699 = vmatmul.bf16.vlgmr.msra.gmra.mxu2 %v8324_v43  ;;  %v5851_v43 = vor.u32 %v7623_v29, %v5850_v28  ;;  %v6219_v56 = vor.u32 %v7715_v49, %v6218_v37  ;;  %v5914_v14 = vld [vmem:[%s8205_s15 + $0x120] sm:$0xf]  ;;  %v5787_v22 = vor.u32 %v7607_v13, %v5786_v36  ;;  %v7755_v49 = vld [vmem:[%s8205_s15 + $0x4cc] sm:$0xf0]  ;;  %v6108_v21 = vld [vmem:[%s8205_s15 + $0x2b0] sm:$0xf0] }
  0xbd   : > { %2720 = vmatpush.bf16.msrb.mxu2 %v6139_v15  ;;  %1712 = vmatmul.bf16.vlgmr.msra.gmra.mxu3 %v8366_v32  ;;  %v6235_v32 = vor.u32 %v7719_v39, %v6234_v38  ;;  %v6187_v15 = vor.u32 %v7707_v9, %v6186_v8  ;;  %v6043_v28 = vor.u32 %v7671_v18, %v6042_v17  ;;  %v6026_v29 = vld [vmem:[%s8205_s15 + $0x200] sm:$0xf]  ;;  %v7759_v38 = vld [vmem:[%s8205_s15 + $0x4ec] sm:$0xf0]  ;;  %v7629_v39 = vld [vmem:[%s8205_s15 + $0xe4] sm:$0xf] }
  0xbe   : > { %2733 = vmatpush.bf16.msrb.mxu3 %v6267_v19  ;;  %v6170_v19 = vld [vmem:[%s8205_s15 + $0x320] sm:$0xf]  ;;  %v6027_v48 = vor.u32 %v7667_v30, %v6026_v29  ;;  %v8646_v8 = vpack.c.bf16 %v484_v55, %v484_v55  ;;  %v7751_v13 = vld [vmem:[%s8205_s15 + $0x4ac] sm:$0xf0]  ;;  %v5852_v17 = vld [vmem:[%s8205_s15 + $0xb0] sm:$0xf0] }
  0xbf   : > { %2695 = vmatpush.bf16.msrb.mxu0 %v5867_v25  ;;  %v7635_v25 = vld [vmem:[%s8205_s15 + $0x10c] sm:$0xf0]  ;;  %v6171_v33 = vor.u32 %v7703_v20, %v6170_v19  ;;  %v6378_v37 = vld [vmem:[%s8205_s15 + $0x4c0] sm:$0xf]  ;;  %v7653_v18 = vld [vmem:[%s8205_s15 + $0x1a4] sm:$0xf] }
  0xc0   : > { %2708 = vmatpush.bf16.msrb.mxu1 %v5995_v26  ;;  %v5899_v47 = vor.u32 %v7635_v25, %v5898_v24  ;;  %v6379_v9 = vor.u32 %v7755_v49, %v6378_v37  ;;  %v6362_v36 = vld [vmem:[%s8205_s15 + $0x4a0] sm:$0xf]  ;;  %v5980_v19 = vld [vmem:[%s8205_s15 + $0x1b0] sm:$0xf0]  ;;  %v7685_v20 = vld [vmem:[%s8205_s15 + $0x2a4] sm:$0xf] }
  0xc1   : > { %2721 = vmatpush.bf16.msrb.mxu2 %v6123_v27  ;;  %v5915_v27 = vor.u32 %v7639_v16, %v5914_v14  ;;  %v7621_v14 = vld [vmem:[%s8205_s15 + $0xa4] sm:$0xf]  ;;  %v5983_v25 = vor.u32 %v7653_v18, %v5980_v19  ;;  %v6111_v30 = vor.u32 %v7685_v20, %v6108_v21  ;;  %v5948_v49 = vld [vmem:[%s8205_s15 + $0x170] sm:$0xf0]  ;;  %v6314_v55 = vld [vmem:[%s8205_s15 + $0x440] sm:$0xf] }
  0xc2   : > { %2734 = vmatpush.bf16.msrb.mxu3 %v6251_v31  ;;  %v6154_v31 = vld [vmem:[%s8205_s15 + $0x300] sm:$0xf]  ;;  %v5855_v24 = vor.u32 %v7621_v14, %v5852_v17  ;;  %v7645_v37 = vld [vmem:[%s8205_s15 + $0x164] sm:$0xf]  ;;  %v5916_v18 = vld [vmem:[%s8205_s15 + $0x130] sm:$0xf0] }
  0xc3   : > { %2696 = vmatpush.bf16.msrb.mxu0 %v5851_v43  ;;  %v5884_v43 = vld [vmem:[%s8205_s15 + $0xf0] sm:$0xf0]  ;;  %v5951_v54 = vor.u32 %v7645_v37, %v5948_v49  ;;  %v7637_v17 = vld [vmem:[%s8205_s15 + $0x124] sm:$0xf] }
  0xc4   : > { %2709 = vmatpush.bf16.msrb.mxu1 %v5979_v40  ;;  %v7661_v40 = vld [vmem:[%s8205_s15 + $0x1e4] sm:$0xf]  ;;  %v6044_v20 = vld [vmem:[%s8205_s15 + $0x230] sm:$0xf0] }
  0xc5   : > { %2722 = vmatpush.bf16.msrb.mxu2 %v6107_v41  ;;  %v1466_v26 = vpop.f32.mrf.mxu0  ;;  %v6015_v57 = vor.u32 %v7661_v40, %v6012_v44  ;;  %v6330_v44 = vld [vmem:[%s8205_s15 + $0x460] sm:$0xf]  ;;  %v7669_v19 = vld [vmem:[%s8205_s15 + $0x224] sm:$0xf] }
  0xc6   : > { %2735 = vmatpush.bf16.msrb.mxu3 %v6235_v32  ;;  %v6140_v32 = vld [vmem:[%s8205_s15 + $0x2f0] sm:$0xf0]  ;;  %v485_v37 = vld.sshfl [vmem:[#allocation1 + $0x20] sm:$0xff pattern:$0x73625140] }
  0xc7   : > { %2697 = vmatpush.bf16.msrb.mxu0 %v5835_v50  ;;  %v1479_v41 = vpop.f32.mrf.mxu1  ;;  %v481_v50 = vld.sshfl [vmem:[#allocation1] sm:$0xff pattern:$0x73625140] }
  0xc8   : > { %2710 = vmatpush.bf16.msrb.mxu1 %v5963_v51  ;;  %v1480_v46 = vadd.f32 %v1479_v41, %v1466_v26  ;;  %v6155_v51 = vor.u32 %v7699_v34, %v6154_v31  ;;  %v8640_v3 = vpack.c.bf16 %v481_v50, %v481_v50  ;;  %v6346_v26 = vld [vmem:[%s8205_s15 + $0x480] sm:$0xf]  ;;  %v5836_v31 = vld [vmem:[%s8205_s15 + $0x90] sm:$0xf0]  ;;  %v7677_v50 = vld [vmem:[%s8205_s15 + $0x264] sm:$0xf] }
  0xc9   : > { %2723 = vmatpush.bf16.msrb.mxu2 %v6091_v52  ;;  %v6395_v52 = vor.u32 %v7759_v38, %v6394_v35  ;;  %v5964_v34 = vld [vmem:[%s8205_s15 + $0x190] sm:$0xf0]  ;;  %v7681_v35 = vld [vmem:[%s8205_s15 + $0x284] sm:$0xf] }
  0xca   : > { %2736 = vmatpush.bf16.msrb.mxu3 %v6219_v56  ;;  %v1492_v53 = vpop.f32.mrf.mxu2  ;;  %v5887_v56 = vor.u32 %v7629_v39, %v5884_v43  ;;  %v6092_v38 = vld [vmem:[%s8205_s15 + $0x290] sm:$0xf0] }
  0xcb   : > { %2698 = vmatpush.bf16.msrb.mxu0 %v5819_v62  ;;  %v1493_v59 = vadd.f32 %v1492_v53, %v1480_v46  ;;  %v6143_v62 = vor.u32 %v7693_v45, %v6140_v32  ;;  %v7743_v45 = vld [vmem:[%s8205_s15 + $0x46c] sm:$0xf0]  ;;  %v7613_v32 = vld [vmem:[%s8205_s15 + $0x64] sm:$0xf] }
  0xcc   : > { %2711 = vmatpush.bf16.msrb.mxu1 %v5947_v63  ;;  %v1505_v60 = vpop.f32.mrf.mxu3  ;;  %v5868_v63 = vld [vmem:[%s8205_s15 + $0xd0] sm:$0xf0] }
  0xcd   : > { %2724 = vmatpush.bf16.msrb.mxu2 %v6075_v0  ;;  %v7657_v0 = vld [vmem:[%s8205_s15 + $0x1c4] sm:$0xf]  ;;  %v1468_v2 = vpop.f32.mrf.mxu0  ;;  %v1506_v6 = vadd.f32 %v1505_v60, %v1493_v59  ;;  %v5804_v59 = vld [vmem:[%s8205_s15 + $0x50] sm:$0xf0] }
  0xce   : > { %2737 = vmatpush.bf16.msrb.mxu3 %v6203_v4  ;;  %v7689_v4 = vld [vmem:[%s8205_s15 + $0x2c4] sm:$0xf] }
  0xcf   : > { %2699 = vmatpush.bf16.msrb.mxu0 %v5803_v10  ;;  %v8648_v10 = vpack.c.bf16 %v482_v61, %v482_v61  ;;  %v6127_v16 = vor.u32 %v7689_v4, %v6124_v5  ;;  %v7641_v60 = vld [vmem:[%s8205_s15 + $0x144] sm:$0xf]  ;;  %v5932_v61 = vld [vmem:[%s8205_s15 + $0x150] sm:$0xf0] }
  0xd0   : > { %2712 = vmatpush.bf16.msrb.mxu1 %v5931_v11  ;;  %v5871_v11 = vor.u32 %v7625_v58, %v5868_v63 }
  0xd1   : > { %2725 = vmatpush.bf16.msrb.mxu2 %v6059_v12  ;;  %v5999_v12 = vor.u32 %v7657_v0, %v5996_v1  ;;  %v7673_v0 = vld [vmem:[%s8205_s15 + $0x244] sm:$0xf]  ;;  %v6060_v1 = vld [vmem:[%s8205_s15 + $0x250] sm:$0xf0] }
  0xd2   : > { %2738 = vmatpush.bf16.msrb.mxu3 %v6187_v15  ;;  %v1481_v15 = vpop.f32.mrf.mxu1  ;;  %v1494_v23 = vpop.f32.mrf.mxu2 }
  0xd3   : > { %2700 = vmatpush.bf16.msrb.mxu0 %v5787_v22  ;;  %v6363_v22 = vor.u32 %v7751_v13, %v6362_v36  ;;  %v7605_v36 = vld [vmem:[%s8205_s15 + $0x24] sm:$0xf]  ;;  %v6063_v15 = vor.u32 %v7673_v0, %v6060_v1  ;;  %v7731_v23 = vld [vmem:[%s8205_s15 + $0x40c] sm:$0xf0] }
  0xd4   : > { %2713 = vmatpush.bf16.msrb.mxu1 %v5915_v27  ;;  %v7747_v27 = vld [vmem:[%s8205_s15 + $0x48c] sm:$0xf0]  ;;  %v1507_v29 = vpop.f32.mrf.mxu3 }
  0xd5   : > { %2726 = vmatpush.bf16.msrb.mxu2 %v6043_v28  ;;  %v7617_v28 = vld [vmem:[%s8205_s15 + $0x84] sm:$0xf]  ;;  %v6347_v43 = vor.u32 %v7747_v27, %v6346_v26  ;;  %v5919_v26 = vor.u32 %v7637_v17, %v5916_v18  ;;  %v5772_v27 = vld [vmem:[%s8205_s15 + $0x10] sm:$0xf0] }
  0xd6   : > { %2739 = vmatpush.bf16.msrb.mxu3 %v6171_v33  ;;  %v7649_v33 = vld [vmem:[%s8205_s15 + $0x184] sm:$0xf]  ;;  %v5839_v41 = vor.u32 %v7617_v28, %v5836_v31  ;;  %v5900_v29 = vld [vmem:[%s8205_s15 + $0x110] sm:$0xf0] }
  0xd7   : > { %2701 = vmatpush.bf16.msrb.mxu0 %v5771_v42  ;;  %v1518_v39 = vpop.f32.mrf.mxu0  ;;  %v5967_v42 = vor.u32 %v7649_v33, %v5964_v34  ;;  %v7633_v28 = vld [vmem:[%s8205_s15 + $0x104] sm:$0xf]  ;;  %v6028_v33 = vld [vmem:[%s8205_s15 + $0x210] sm:$0xf0] }
  0xd8   : > { %2714 = vmatpush.bf16.msrb.mxu1 %v5899_v47  ;;  %v8670_v40 = vadd.f32 %v1518_v39, %v1506_v6  ;;  %v6095_v47 = vor.u32 %v7681_v35, %v6092_v38  ;;  %v7665_v31 = vld [vmem:[%s8205_s15 + $0x204] sm:$0xf]  ;;  %v6268_v39 = vld [vmem:[%s8205_s15 + $0x3f0] sm:$0xf0] }
  0xd9   : > { %2727 = vmatpush.bf16.msrb.mxu2 %v6027_v48  ;;  %v5820_v48 = vld [vmem:[%s8205_s15 + $0x70] sm:$0xf0]  ;;  %v7725_v34 = vld [vmem:[%s8205_s15 + $0x3e4] sm:$0xf]  ;;  %v6031_v49 = vor.u32 %v7665_v31, %v6028_v33 }
  0xda   : > { %2740 = vmatpush.bf16.msrb.mxu3 %v6155_v51  ;;  %2702 = vmatmul.bf16.vlgmr.msrb.gmra.mxu0 %v8640_v3  ;;  %v1531_v46 = vpop.f32.mrf.mxu1  ;;  %v6076_v51 = vld [vmem:[%s8205_s15 + $0x270] sm:$0xf0]  ;;  %v5823_v53 = vor.u32 %v7613_v32, %v5820_v48  ;;  %v6018_v32 = vld [vmem:[%s8205_s15 + $0x1e8] sm:$0xf]  ;;  %v7664_v48 = vld [vmem:[%s8205_s15 + $0x1f4] sm:$0xf0] }
  0xdb   : > { %2746 = vmatpush.bf16.msra.mxu0 %v6395_v52  ;;  %2715 = vmatmul.bf16.vlgmr.msrb.gmra.mxu1 %v8648_v10  ;;  %v6331_v52 = vor.u32 %v7743_v45, %v6330_v44  ;;  %v6079_v58 = vor.u32 %v7677_v50, %v6076_v51  ;;  %v5890_v44 = vld [vmem:[%s8205_s15 + $0xe8] sm:$0xf]  ;;  %v7632_v45 = vld [vmem:[%s8205_s15 + $0xf4] sm:$0xf0]  ;;  %v6271_v50 = vor.u32 %v7725_v34, %v6268_v39  ;;  %v7713_v18 = vld [vmem:[%s8205_s15 + $0x384] sm:$0xf] }
  0xdc   : > { %2759 = vmatpush.bf16.msra.mxu1 %v5887_v56  ;;  %2728 = vmatmul.bf16.vlgmr.msrb.gmra.mxu2 %v8644_v7  ;;  %v7739_v56 = vld [vmem:[%s8205_s15 + $0x44c] sm:$0xf0]  ;;  %v7709_v34 = vld [vmem:[%s8205_s15 + $0x364] sm:$0xf] }
  0xdd   : > { %2772 = vmatpush.bf16.msra.mxu2 %v6015_v57  ;;  %2741 = vmatmul.bf16.vlgmr.msrb.gmra.mxu3 %v8646_v8  ;;  %v7609_v57 = vld [vmem:[%s8205_s15 + $0x44] sm:$0xf]  ;;  %v6315_v5 = vor.u32 %v7739_v56, %v6314_v55  ;;  %v6019_v56 = vor.u32 %v7664_v48, %v6018_v32 }
  0xde   : > { %2785 = vmatpush.bf16.msra.mxu3 %v6143_v62  ;;  %v5807_v6 = vor.u32 %v7609_v57, %v5804_v59  ;;  %v7753_v55 = vld [vmem:[%s8205_s15 + $0x4c4] sm:$0xf]  ;;  %v6380_v57 = vld [vmem:[%s8205_s15 + $0x4d0] sm:$0xf0]  ;;  %v7628_v59 = vld [vmem:[%s8205_s15 + $0xd4] sm:$0xf0] }
  0xdf   : > { %2747 = vmatpush.bf16.msra.mxu0 %v6379_v9  ;;  %v1544_v62 = vpop.f32.mrf.mxu2  ;;  %v1520_v2 = vpop.f32.mrf.mxu0  ;;  %v5935_v9 = vor.u32 %v7641_v60, %v5932_v61  ;;  %v8720_v60 = vpack.c.bf16 %v485_v37, %v485_v37  ;;  %v6002_v61 = vld [vmem:[%s8205_s15 + $0x1c8] sm:$0xf]  ;;  %v6383_v0 = vor.u32 %v7753_v55, %v6380_v57  ;;  %v7705_v37 = vld [vmem:[%s8205_s15 + $0x344] sm:$0xf]  ;;  %v7612_v55 = vld [vmem:[%s8205_s15 + $0x54] sm:$0xf0] }
  0xe0   : > { %2760 = vmatpush.bf16.msra.mxu1 %v5871_v11  ;;  %v1557_v63 = vpop.f32.mrf.mxu3  ;;  %v1545_v4 = vadd.f32 %v1544_v62, %v1531_v46  ;;  %v6298_v11 = vld [vmem:[%s8205_s15 + $0x420] sm:$0xf]  ;;  %v7660_v62 = vld [vmem:[%s8205_s15 + $0x1d4] sm:$0xf0]  ;;  %v7717_v2 = vld [vmem:[%s8205_s15 + $0x3a4] sm:$0xf] }
  0xe1   : > { %2773 = vmatpush.bf16.msra.mxu2 %v5999_v12  ;;  %v7735_v12 = vld [vmem:[%s8205_s15 + $0x42c] sm:$0xf0]  ;;  %v5938_v57 = vld [vmem:[%s8205_s15 + $0x148] sm:$0xf] }
  0xe2   : > { %2786 = vmatpush.bf16.msra.mxu3 %v6127_v16  ;;  %v1533_v13 = vpop.f32.mrf.mxu1  ;;  %v8691_v14 = vadd.f32 %v1557_v63, %v1545_v4  ;;  %v5788_v16 = vld [vmem:[%s8205_s15 + $0x30] sm:$0xf0]  ;;  %v6299_v21 = vor.u32 %v7735_v12, %v6298_v11  ;;  %v5858_v11 = vld [vmem:[%s8205_s15 + $0xa8] sm:$0xf]  ;;  %v7624_v12 = vld [vmem:[%s8205_s15 + $0xb4] sm:$0xf0] }
  0xe3   : > { %2748 = vmatpush.bf16.msra.mxu0 %v6363_v22  ;;  %v6282_v22 = vld [vmem:[%s8205_s15 + $0x400] sm:$0xf]  ;;  %v6236_v4 = vld [vmem:[%s8205_s15 + $0x3b0] sm:$0xf0]  ;;  %v7656_v13 = vld [vmem:[%s8205_s15 + $0x1b4] sm:$0xf0]  ;;  %v5859_v17 = vor.u32 %v7624_v12, %v5858_v11 }
  0xe4   : > { %2761 = vmatpush.bf16.msra.mxu1 %v5855_v24  ;;  %v7601_v24 = vld [vmem:[%s8205_s15 + $0x4] sm:$0xf]  ;;  %v7608_v11 = vld [vmem:[%s8205_s15 + $0x34] sm:$0xf0]  ;;  %v5922_v12 = vld [vmem:[%s8205_s15 + $0x128] sm:$0xf] }
  0xe5   : > { %2774 = vmatpush.bf16.msra.mxu2 %v5983_v25  ;;  %v5791_v25 = vor.u32 %v7605_v36, %v5788_v16  ;;  %v5775_v46 = vor.u32 %v7601_v24, %v5772_v27  ;;  %v5986_v36 = vld [vmem:[%s8205_s15 + $0x1a8] sm:$0xf]  ;;  %v7620_v24 = vld [vmem:[%s8205_s15 + $0x94] sm:$0xf0] }
  0xe6   : > { %2787 = vmatpush.bf16.msra.mxu3 %v6111_v30  ;;  %v6047_v30 = vor.u32 %v7669_v19, %v6044_v20  ;;  %v6220_v19 = vld [vmem:[%s8205_s15 + $0x390] sm:$0xf0]  ;;  %v7745_v20 = vld [vmem:[%s8205_s15 + $0x484] sm:$0xf]  ;;  %v7652_v27 = vld [vmem:[%s8205_s15 + $0x194] sm:$0xf0] }
  0xe7   : > { %2749 = vmatpush.bf16.msra.mxu0 %v6347_v43  ;;  %v1546_v35 = vpop.f32.mrf.mxu2  ;;  %v7757_v43 = vld [vmem:[%s8205_s15 + $0x4e4] sm:$0xf] }
  0xe8   : > { %2762 = vmatpush.bf16.msra.mxu1 %v5839_v41  ;;  %v1559_v38 = vpop.f32.mrf.mxu3  ;;  %v6396_v41 = vld [vmem:[%s8205_s15 + $0x4f0] sm:$0xf0] }
  0xe9   : > { %2775 = vmatpush.bf16.msra.mxu2 %v5967_v42  ;;  %v6283_v42 = vor.u32 %v7731_v23, %v6282_v22  ;;  %v6399_v51 = vor.u32 %v7757_v43, %v6396_v41  ;;  %v6348_v22 = vld [vmem:[%s8205_s15 + $0x490] sm:$0xf0]  ;;  %v5842_v23 = vld [vmem:[%s8205_s15 + $0x88] sm:$0xf]  ;;  %v7741_v38 = vld [vmem:[%s8205_s15 + $0x464] sm:$0xf] }
  0xea   : > { %2788 = vmatpush.bf16.msra.mxu3 %v6095_v47  ;;  %v5903_v47 = vor.u32 %v7633_v28, %v5900_v29  ;;  %v6223_v29 = vor.u32 %v7713_v18, %v6220_v19  ;;  %v6351_v31 = vor.u32 %v7745_v20, %v6348_v22  ;;  %v5843_v33 = vor.u32 %v7620_v24, %v5842_v23  ;;  %v6204_v35 = vld [vmem:[%s8205_s15 + $0x370] sm:$0xf0]  ;;  %v7729_v19 = vld [vmem:[%s8205_s15 + $0x404] sm:$0xf]  ;;  %v7604_v23 = vld [vmem:[%s8205_s15 + $0x14] sm:$0xf0] }
  0xeb   : > { %2750 = vmatpush.bf16.msra.mxu0 %v6331_v52  ;;  %v5891_v52 = vor.u32 %v7632_v45, %v5890_v44  ;;  %v6332_v41 = vld [vmem:[%s8205_s15 + $0x470] sm:$0xf0]  ;;  %v5954_v44 = vld [vmem:[%s8205_s15 + $0x168] sm:$0xf]  ;;  %v7648_v45 = vld [vmem:[%s8205_s15 + $0x174] sm:$0xf0] }
  0xec   : > { %2763 = vmatpush.bf16.msra.mxu1 %v5823_v53  ;;  %v7721_v53 = vld [vmem:[%s8205_s15 + $0x3c4] sm:$0xf]  ;;  %v6284_v20 = vld [vmem:[%s8205_s15 + $0x410] sm:$0xf0]  ;;  %v5906_v24 = vld [vmem:[%s8205_s15 + $0x108] sm:$0xf] }
  0xed   : > { %2776 = vmatpush.bf16.msra.mxu2 %v5951_v54  ;;  %v6252_v54 = vld [vmem:[%s8205_s15 + $0x3d0] sm:$0xf0] }
  0xee   : > { %2789 = vmatpush.bf16.msra.mxu3 %v6079_v58  ;;  %v5874_v58 = vld [vmem:[%s8205_s15 + $0xc8] sm:$0xf]  ;;  %v6255_v63 = vor.u32 %v7721_v53, %v6252_v54  ;;  %v6316_v53 = vld [vmem:[%s8205_s15 + $0x450] sm:$0xf0] }
  0xef   : > { %2751 = vmatpush.bf16.msra.mxu0 %v6315_v5  ;;  %v5875_v1 = vor.u32 %v7628_v59, %v5874_v58  ;;  %v7749_v5 = vld [vmem:[%s8205_s15 + $0x4a4] sm:$0xf]  ;;  %v5810_v54 = vld [vmem:[%s8205_s15 + $0x48] sm:$0xf]  ;;  %v7644_v58 = vld [vmem:[%s8205_s15 + $0x154] sm:$0xf0] }
  0xf0   : > { %2764 = vmatpush.bf16.msra.mxu1 %v5807_v6  ;;  %v6003_v6 = vor.u32 %v7660_v62, %v6002_v61 }
  0xf1   : > { %2777 = vmatpush.bf16.msra.mxu2 %v5935_v9  ;;  %v6364_v9 = vld [vmem:[%s8205_s15 + $0x4b0] sm:$0xf0] }
  0xf2   : > { %2790 = vmatpush.bf16.msra.mxu3 %v6063_v15  ;;  %v6239_v15 = vor.u32 %v7717_v2, %v6236_v4  ;;  %v6367_v16 = vor.u32 %v7749_v5, %v6364_v9  ;;  %v6172_v2 = vld [vmem:[%s8205_s15 + $0x330] sm:$0xf0]  ;;  %v7733_v4 = vld [vmem:[%s8205_s15 + $0x424] sm:$0xf]  ;;  %v5939_v5 = vor.u32 %v7644_v58, %v5938_v57  ;;  %v5794_v9 = vld [vmem:[%s8205_s15 + $0x28] sm:$0xf] }
  0xf3   : > { %2752 = vmatpush.bf16.msra.mxu0 %v6299_v21  ;;  %v5987_v21 = vor.u32 %v7656_v13, %v5986_v36  ;;  %v7640_v36 = vld [vmem:[%s8205_s15 + $0x134] sm:$0xf0]  ;;  %v5795_v18 = vor.u32 %v7608_v11, %v5794_v9  ;;  %v6114_v58 = vld [vmem:[%s8205_s15 + $0x2a8] sm:$0xf] }
  0xf4   : > { %2765 = vmatpush.bf16.msra.mxu1 %v5791_v25  ;;  %v5923_v22 = vor.u32 %v7640_v36, %v5922_v12  ;;  %v6098_v11 = vld [vmem:[%s8205_s15 + $0x288] sm:$0xf]  ;;  %v7684_v12 = vld [vmem:[%s8205_s15 + $0x294] sm:$0xf0] }
  0xf5   : > { %2778 = vmatpush.bf16.msra.mxu2 %v5919_v26  ;;  %v5970_v26 = vld [vmem:[%s8205_s15 + $0x188] sm:$0xf] }
  0xf6   : > { %2791 = vmatpush.bf16.msra.mxu3 %v6047_v30  ;;  %v5971_v39 = vor.u32 %v7652_v27, %v5970_v26  ;;  %v6146_v27 = vld [vmem:[%s8205_s15 + $0x2e8] sm:$0xf] }
  0xf7   : > { %2753 = vmatpush.bf16.msra.mxu0 %v6283_v42  ;;  %v1570_v25 = vpop.f32.mrf.mxu0  ;;  %v5826_v42 = vld [vmem:[%s8205_s15 + $0x68] sm:$0xf] }
  0xf8   : > { %2766 = vmatpush.bf16.msra.mxu1 %v5775_v46  ;;  %v1571_v28 = vadd.f32 %v1570_v25, %v8691_v14  ;;  %v1583_v30 = vpop.f32.mrf.mxu1  ;;  %v7616_v14 = vld [vmem:[%s8205_s15 + $0x74] sm:$0xf0]  ;;  %v6207_v46 = vor.u32 %v7709_v34, %v6204_v35  ;;  %v6402_v34 = vld [vmem:[%s8205_s15 + $0x4e8] sm:$0xf] }
  0xf9   : > { %2779 = vmatpush.bf16.msra.mxu2 %v5903_v47  ;;  %v6335_v47 = vor.u32 %v7741_v38, %v6332_v41  ;;  %v5827_v48 = vor.u32 %v7616_v14, %v5826_v42  ;;  %v7636_v25 = vld [vmem:[%s8205_s15 + $0x114] sm:$0xf0]  ;;  %v6287_v38 = vor.u32 %v7729_v19, %v6284_v20  ;;  %v5892_v41 = vld [vmem:[%s8205_s15 + $0xf8] sm:$0xf0]  ;;  %v6226_v36 = vld [vmem:[%s8205_s15 + $0x388] sm:$0xf]  ;;  %v6099_v20 = vor.u32 %v7684_v12, %v6098_v11 }
  0xfa   : > { %2792 = vmatpush.bf16.msra.mxu3 %v6031_v49  ;;  %2754 = vmatmul.bf16.vlgmr.msra.gmra.mxu0 %v8720_v60  ;;  %v1584_v43 = vadd.f32 %v1583_v30, %v1571_v28  ;;  %v6188_v49 = vld [vmem:[%s8205_s15 + $0x350] sm:$0xf0]  ;;  %v7696_v28 = vld [vmem:[%s8205_s15 + $0x2f4] sm:$0xf0]  ;;  %v5907_v42 = vor.u32 %v7636_v25, %v5906_v24  ;;  %v5844_v19 = vld [vmem:[%s8205_s15 + $0x98] sm:$0xf0] }
  0xfb   : > { %2798 = vmatpush.bf16.msrb.mxu0 %v6271_v50  ;;  %2767 = vmatmul.bf16.vlgmr.msra.gmra.mxu1 %v8640_v3  ;;  %v7737_v50 = vld [vmem:[%s8205_s15 + $0x444] sm:$0xf]  ;;  %v7760_v35 = vld [vmem:[%s8205_s15 + $0x4f4] sm:$0xf0]  ;;  %v6147_v14 = vor.u32 %v7696_v28, %v6146_v27  ;;  %v6082_v25 = vld [vmem:[%s8205_s15 + $0x268] sm:$0xf] }
  0xfc   : > { %2811 = vmatpush.bf16.msrb.mxu1 %v6399_v51  ;;  %2780 = vmatmul.bf16.vlgmr.msra.gmra.mxu2 %v8648_v10  ;;  %v1721_v32 = vrot.slane %v1584_v43, 6  ;;  %v7630_v43 = vld [vmem:[%s8205_s15 + $0xec] sm:$0xf]  ;;  %v6210_v27 = vld [vmem:[%s8205_s15 + $0x368] sm:$0xf] }
  0xfd   : > { %2824 = vmatpush.bf16.msrb.mxu2 %v5891_v52  ;;  %2793 = vmatmul.bf16.vlgmr.msra.gmra.mxu3 %v8644_v7  ;;  %v5955_v52 = vor.u32 %v7648_v45, %v5954_v44  ;;  %v6403_v45 = vor.u32 %v7760_v35, %v6402_v34  ;;  %v5828_v34 = vld [vmem:[%s8205_s15 + $0x78] sm:$0xf0]  ;;  %v6162_v11 = vld [vmem:[%s8205_s15 + $0x308] sm:$0xf]  ;;  %v7700_v12 = vld [vmem:[%s8205_s15 + $0x314] sm:$0xf0] }
  0xfe   : > { %2837 = vmatpush.bf16.msrb.mxu3 %v6019_v56  ;;  %v8758_v51 = vsel %vm1724_vm0, %v8670_v40, %v1721_v32  ;;  %v6191_v40 = vor.u32 %v7705_v37, %v6188_v49  ;;  %v6130_v32 = vld [vmem:[%s8205_s15 + $0x2c8] sm:$0xf]  ;;  %v7724_v37 = vld [vmem:[%s8205_s15 + $0x3d4] sm:$0xf0] }
  0xff   : > { %2799 = vmatpush.bf16.msrb.mxu0 %v6255_v63  ;;  %v8763_v56 = vpop.f32.mrf.mxu2  ;;  %v1572_v59 = vpop.f32.mrf.mxu0  ;;  %v6319_v63 = vor.u32 %v7737_v50, %v6316_v53  ;;  %v6386_v49 = vld [vmem:[%s8205_s15 + $0x4c8] sm:$0xf]  ;;  %v7756_v50 = vld [vmem:[%s8205_s15 + $0x4d4] sm:$0xf0]  ;;  %v5876_v53 = vld [vmem:[%s8205_s15 + $0xd8] sm:$0xf0] }
 0x100   : > { %2812 = vmatpush.bf16.msrb.mxu1 %v6383_v0  ;;  %v8767_v61 = vpop.f32.mrf.mxu3  ;;  %v1585_v62 = vpop.f32.mrf.mxu1  ;;  %v5811_v0 = vor.u32 %v7612_v55, %v5810_v54  ;;  %v6387_v57 = vor.u32 %v7756_v50, %v6386_v49  ;;  %v7688_v59 = vld [vmem:[%s8205_s15 + $0x2b4] sm:$0xf0] }
 0x101   : > { %2825 = vmatpush.bf16.msrb.mxu2 %v5875_v1  ;;  %v7701_v1 = vld [vmem:[%s8205_s15 + $0x324] sm:$0xf] }
 0x102   : > { %2838 = vmatpush.bf16.msrb.mxu3 %v6003_v6  ;;  %v6300_v6 = vld [vmem:[%s8205_s15 + $0x430] sm:$0xf0]  ;;  %v6175_v13 = vor.u32 %v7701_v1, %v6172_v2  ;;  %v7752_v1 = vld [vmem:[%s8205_s15 + $0x4b4] sm:$0xf0]  ;;  %v7622_v2 = vld [vmem:[%s8205_s15 + $0xac] sm:$0xf] }
 0x103   : > { %2800 = vmatpush.bf16.msrb.mxu0 %v6239_v15  ;;  %v7697_v15 = vld [vmem:[%s8205_s15 + $0x304] sm:$0xf] }
 0x104   : > { %2813 = vmatpush.bf16.msrb.mxu1 %v6367_v16  ;;  %v6156_v16 = vld [vmem:[%s8205_s15 + $0x310] sm:$0xf0] }
 0x105   : > { %2826 = vmatpush.bf16.msrb.mxu2 %v5859_v17  ;;  %v6303_v17 = vor.u32 %v7733_v4, %v6300_v6  ;;  %v5860_v4 = vld [vmem:[%s8205_s15 + $0xb8] sm:$0xf0] }
 0x106   : > { %2839 = vmatpush.bf16.msrb.mxu3 %v5987_v21  ;;  %v5778_v21 = vld [vmem:[%s8205_s15 + $0x8] sm:$0xf] }
 0x107   : > { %2801 = vmatpush.bf16.msrb.mxu0 %v6223_v29  ;;  %v1598_v26 = vpop.f32.mrf.mxu2  ;;  %v6274_v29 = vld [vmem:[%s8205_s15 + $0x3e8] sm:$0xf] }
 0x108   : > { %2814 = vmatpush.bf16.msrb.mxu1 %v6351_v31  ;;  %v1611_v30 = vpop.f32.mrf.mxu3  ;;  %v6159_v31 = vor.u32 %v7697_v15, %v6156_v16  ;;  %v7716_v15 = vld [vmem:[%s8205_s15 + $0x394] sm:$0xf0]  ;;  %v6354_v16 = vld [vmem:[%s8205_s15 + $0x488] sm:$0xf] }
 0x109   : > { %2827 = vmatpush.bf16.msrb.mxu2 %v5843_v33  ;;  %v7728_v33 = vld [vmem:[%s8205_s15 + $0x3f4] sm:$0xf0]  ;;  %v6338_v30 = vld [vmem:[%s8205_s15 + $0x468] sm:$0xf] }
 0x10a   : > { %2840 = vmatpush.bf16.msrb.mxu3 %v5971_v39  ;;  %v5779_v39 = vor.u32 %v7604_v23, %v5778_v21  ;;  %v6275_v44 = vor.u32 %v7728_v33, %v6274_v29  ;;  %v6227_v23 = vor.u32 %v7716_v15, %v6226_v36  ;;  %v7680_v26 = vld [vmem:[%s8205_s15 + $0x274] sm:$0xf0]  ;;  %v7614_v33 = vld [vmem:[%s8205_s15 + $0x6c] sm:$0xf]  ;;  %v6290_v36 = vld [vmem:[%s8205_s15 + $0x408] sm:$0xf] }
 0x10b   : > { %2802 = vmatpush.bf16.msrb.mxu0 %v6207_v46  ;;  %v7692_v46 = vld [vmem:[%s8205_s15 + $0x2d4] sm:$0xf0]  ;;  %v6083_v35 = vor.u32 %v7680_v26, %v6082_v25  ;;  %v6148_v26 = vld [vmem:[%s8205_s15 + $0x2f8] sm:$0xf0] }
 0x10c   : > { %2815 = vmatpush.bf16.msrb.mxu1 %v6335_v47  ;;  %v6258_v47 = vld [vmem:[%s8205_s15 + $0x3c8] sm:$0xf]  ;;  %v6131_v54 = vor.u32 %v7692_v46, %v6130_v32  ;;  %v7712_v29 = vld [vmem:[%s8205_s15 + $0x374] sm:$0xf0] }
 0x10d   : > { %2828 = vmatpush.bf16.msrb.mxu2 %v5827_v48  ;;  %v5895_v48 = vor.u32 %v7630_v43, %v5892_v41  ;;  %v6259_v55 = vor.u32 %v7724_v37, %v6258_v47  ;;  %v6066_v43 = vld [vmem:[%s8205_s15 + $0x248] sm:$0xf]  ;;  %v7676_v41 = vld [vmem:[%s8205_s15 + $0x254] sm:$0xf0]  ;;  %v7610_v47 = vld [vmem:[%s8205_s15 + $0x4c] sm:$0xf] }
 0x10e   : > { %2841 = vmatpush.bf16.msrb.mxu3 %v5955_v52  ;;  %v7626_v52 = vld [vmem:[%s8205_s15 + $0xcc] sm:$0xf]  ;;  %v6322_v32 = vld [vmem:[%s8205_s15 + $0x448] sm:$0xf]  ;;  %v7740_v46 = vld [vmem:[%s8205_s15 + $0x454] sm:$0xf0]  ;;  %v6067_v49 = vor.u32 %v7676_v41, %v6066_v43 }
 0x10f   : > { %2803 = vmatpush.bf16.msrb.mxu0 %v6191_v40  ;;  %v6242_v40 = vld [vmem:[%s8205_s15 + $0x3a8] sm:$0xf]  ;;  %v5879_v62 = vor.u32 %v7626_v52, %v5876_v53  ;;  %v7658_v43 = vld [vmem:[%s8205_s15 + $0x1cc] sm:$0xf]  ;;  %v6004_v41 = vld [vmem:[%s8205_s15 + $0x1d8] sm:$0xf0] }
 0x110   : > { %2816 = vmatpush.bf16.msrb.mxu1 %v6319_v63  ;;  %v7720_v63 = vld [vmem:[%s8205_s15 + $0x3b4] sm:$0xf0] }
 0x111   : > { %2829 = vmatpush.bf16.msrb.mxu2 %v5811_v0  ;;  %v6370_v0 = vld [vmem:[%s8205_s15 + $0x4a8] sm:$0xf]  ;;  %v6243_v6 = vor.u32 %v7720_v63, %v6242_v40  ;;  %v7704_v40 = vld [vmem:[%s8205_s15 + $0x334] sm:$0xf0] }
 0x112   : > { %2842 = vmatpush.bf16.msrb.mxu3 %v5939_v5  ;;  %v6115_v5 = vor.u32 %v7688_v59, %v6114_v58  ;;  %v6371_v9 = vor.u32 %v7752_v1, %v6370_v0  ;;  %v6178_v58 = vld [vmem:[%s8205_s15 + $0x328] sm:$0xf]  ;;  %v7736_v63 = vld [vmem:[%s8205_s15 + $0x434] sm:$0xf0]  ;;  %v7606_v0 = vld [vmem:[%s8205_s15 + $0x2c] sm:$0xf] }
 0x113   : > { %2804 = vmatpush.bf16.msrb.mxu0 %v6175_v13  ;;  %v5863_v13 = vor.u32 %v7622_v2, %v5860_v4  ;;  %v5796_v1 = vld [vmem:[%s8205_s15 + $0x38] sm:$0xf0]  ;;  %v6034_v4 = vld [vmem:[%s8205_s15 + $0x208] sm:$0xf] }
 0x114   : > { %2817 = vmatpush.bf16.msrb.mxu1 %v6303_v17  ;;  %v7748_v17 = vld [vmem:[%s8205_s15 + $0x494] sm:$0xf0]  ;;  %v5799_v15 = vor.u32 %v7606_v0, %v5796_v1 }
 0x115   : > { %2830 = vmatpush.bf16.msrb.mxu2 %v5795_v18  ;;  %v7618_v18 = vld [vmem:[%s8205_s15 + $0x8c] sm:$0xf]  ;;  %v6355_v24 = vor.u32 %v7748_v17, %v6354_v16  ;;  %v7732_v16 = vld [vmem:[%s8205_s15 + $0x414] sm:$0xf0] }
 0x116   : > { %2843 = vmatpush.bf16.msrb.mxu3 %v5923_v22  ;;  %v5847_v28 = vor.u32 %v7618_v18, %v5844_v19  ;;  %v7602_v17 = vld [vmem:[%s8205_s15 + $0xc] sm:$0xf]  ;;  %v5780_v18 = vld [vmem:[%s8205_s15 + $0x18] sm:$0xf0] }
 0x117   : > { %2805 = vmatpush.bf16.msrb.mxu0 %v6159_v31  ;;  %v8821_v21 = vpop.f32.mrf.mxu0  ;;  %v7744_v31 = vld [vmem:[%s8205_s15 + $0x474] sm:$0xf0]  ;;  %v7662_v19 = vld [vmem:[%s8205_s15 + $0x1ec] sm:$0xf] }
 0x118   : > { %2818 = vmatpush.bf16.msrb.mxu1 %v6287_v38  ;;  %v8823_v22 = vpop.f32.mrf.mxu1  ;;  %v6211_v38 = vor.u32 %v7712_v29, %v6210_v27  ;;  %v7726_v27 = vld [vmem:[%s8205_s15 + $0x3ec] sm:$0xf]  ;;  %v6163_v29 = vor.u32 %v7700_v12, %v6162_v11  ;;  %v6100_v11 = vld [vmem:[%s8205_s15 + $0x298] sm:$0xf0] }
 0x119   : > { %2831 = vmatpush.bf16.msrb.mxu2 %v5779_v39  ;;  %v6339_v39 = vor.u32 %v7744_v31, %v6338_v30  ;;  %v6291_v30 = vor.u32 %v7732_v16, %v6290_v36  ;;  %v7758_v31 = vld [vmem:[%s8205_s15 + $0x4ec] sm:$0xf] }
 0x11a   : > { %2844 = vmatpush.bf16.msrb.mxu3 %v5907_v42  ;;  %2806 = vmatmul.bf16.vlgmr.msrb.gmra.mxu0 %v8646_v8  ;;  %v6194_v42 = vld [vmem:[%s8205_s15 + $0x348] sm:$0xf]  ;;  %v7714_v12 = vld [vmem:[%s8205_s15 + $0x38c] sm:$0xf] }
 0x11b   : > { %2850 = vmatpush.bf16.msra.mxu0 %v6147_v14  ;;  %2819 = vmatmul.bf16.vlgmr.msrb.gmra.mxu1 %v8720_v60  ;;  %v7746_v36 = vld [vmem:[%s8205_s15 + $0x48c] sm:$0xf] }
 0x11c   : > { %2863 = vmatpush.bf16.msra.mxu1 %v6275_v44  ;;  %2832 = vmatmul.bf16.vlgmr.msrb.gmra.mxu2 %v8640_v3  ;;  %v5831_v44 = vor.u32 %v7614_v33, %v5828_v34  ;;  %v6404_v33 = vld [vmem:[%s8205_s15 + $0x4f8] sm:$0xf0]  ;;  %v5783_v34 = vor.u32 %v7602_v17, %v5780_v18 }
 0x11d   : > { %2876 = vmatpush.bf16.msra.mxu2 %v6403_v45  ;;  %2845 = vmatmul.bf16.vlgmr.msrb.gmra.mxu3 %v8648_v10  ;;  %v7708_v45 = vld [vmem:[%s8205_s15 + $0x354] sm:$0xf0] }
 0x11e   : > { %2889 = vmatpush.bf16.msra.mxu3 %v5895_v48  ;;  %v5812_v48 = vld [vmem:[%s8205_s15 + $0x58] sm:$0xf0]  ;;  %v6195_v53 = vor.u32 %v7708_v45, %v6194_v42  ;;  %v7690_v42 = vld [vmem:[%s8205_s15 + $0x2cc] sm:$0xf] }
 0x11f   : > { %2851 = vmatpush.bf16.msra.mxu0 %v6131_v54  ;;  %v8836_v14 = vpop.f32.mrf.mxu2  ;;  %v1624_v50 = vpop.f32.mrf.mxu0  ;;  %v6323_v54 = vor.u32 %v7740_v46, %v6322_v32  ;;  %v5815_v59 = vor.u32 %v7610_v47, %v5812_v48  ;;  %v6132_v45 = vld [vmem:[%s8205_s15 + $0x2d8] sm:$0xf0]  ;;  %v7722_v32 = vld [vmem:[%s8205_s15 + $0x3cc] sm:$0xf] }
 0x120   : > { %2864 = vmatpush.bf16.msra.mxu1 %v6259_v55  ;;  %v8843_v37 = vpop.f32.mrf.mxu3  ;;  %v1637_v52 = vpop.f32.mrf.mxu1  ;;  %v6050_v55 = vld [vmem:[%s8205_s15 + $0x228] sm:$0xf]  ;;  %v6260_v46 = vld [vmem:[%s8205_s15 + $0x3d8] sm:$0xf0]  ;;  %v7754_v47 = vld [vmem:[%s8205_s15 + $0x4cc] sm:$0xf]  ;;  %v6007_v50 = vor.u32 %v7658_v43, %v6004_v41 }
 0x121   : > { %2877 = vmatpush.bf16.msra.mxu2 %v6387_v57  ;;  %v7672_v57 = vld [vmem:[%s8205_s15 + $0x234] sm:$0xf0]  ;;  %v6388_v48 = vld [vmem:[%s8205_s15 + $0x4d8] sm:$0xf0]  ;;  %v6135_v52 = vor.u32 %v7690_v42, %v6132_v45  ;;  %v7674_v41 = vld [vmem:[%s8205_s15 + $0x24c] sm:$0xf] }
 0x122   : > { %2890 = vmatpush.bf16.msra.mxu3 %v5879_v62  ;;  %v6306_v62 = vld [vmem:[%s8205_s15 + $0x428] sm:$0xf]  ;;  %v6051_v2 = vor.u32 %v7672_v57, %v6050_v55  ;;  %v5988_v55 = vld [vmem:[%s8205_s15 + $0x1b8] sm:$0xf0]  ;;  %v7686_v57 = vld [vmem:[%s8205_s15 + $0x2ac] sm:$0xf] }
 0x123   : > { %2852 = vmatpush.bf16.msra.mxu0 %v6115_v5  ;;  %v7668_v5 = vld [vmem:[%s8205_s15 + $0x214] sm:$0xf0]  ;;  %v5940_v43 = vld [vmem:[%s8205_s15 + $0x158] sm:$0xf0] }
 0x124   : > { %2865 = vmatpush.bf16.msra.mxu1 %v6243_v6  ;;  %v6179_v6 = vor.u32 %v7704_v40, %v6178_v58  ;;  %v6035_v25 = vor.u32 %v7668_v5, %v6034_v4  ;;  %v6391_v58 = vor.u32 %v7754_v47, %v6388_v48  ;;  %v7750_v40 = vld [vmem:[%s8205_s15 + $0x4ac] sm:$0xf]  ;;  %v5972_v5 = vld [vmem:[%s8205_s15 + $0x198] sm:$0xf0] }
 0x125   : > { %2878 = vmatpush.bf16.msra.mxu2 %v6371_v9  ;;  %v6307_v9 = vor.u32 %v7736_v63, %v6306_v62  ;;  %v6372_v62 = vld [vmem:[%s8205_s15 + $0x4b8] sm:$0xf0]  ;;  %v7650_v4 = vld [vmem:[%s8205_s15 + $0x18c] sm:$0xf] }
 0x126   : > { %2891 = vmatpush.bf16.msra.mxu3 %v5863_v13  ;;  %v7738_v47 = vld [vmem:[%s8205_s15 + $0x44c] sm:$0xf]  ;;  %v6324_v48 = vld [vmem:[%s8205_s15 + $0x458] sm:$0xf0] }
 0x127   : > { %2853 = vmatpush.bf16.msra.mxu0 %v6099_v20  ;;  %v1650_v13 = vpop.f32.mrf.mxu2  ;;  %v6020_v20 = vld [vmem:[%s8205_s15 + $0x1f8] sm:$0xf0] }
 0x128   : > { %2866 = vmatpush.bf16.msra.mxu1 %v6227_v23  ;;  %v7694_v23 = vld [vmem:[%s8205_s15 + $0x2ec] sm:$0xf]  ;;  %v6356_v13 = vld [vmem:[%s8205_s15 + $0x498] sm:$0xf0] }
 0x129   : > { %2879 = vmatpush.bf16.msra.mxu2 %v6355_v24  ;;  %v1663_v24 = vpop.f32.mrf.mxu3 }
 0x12a   : > { %2892 = vmatpush.bf16.msra.mxu3 %v5847_v28  ;;  %v6276_v28 = vld [vmem:[%s8205_s15 + $0x3f8] sm:$0xf0] }
 0x12b   : > { %2854 = vmatpush.bf16.msra.mxu0 %v6083_v35  ;;  %v6023_v35 = vor.u32 %v7662_v19, %v6020_v20  ;;  %v5956_v24 = vld [vmem:[%s8205_s15 + $0x178] sm:$0xf0] }
 0x12c   : > { %2867 = vmatpush.bf16.msra.mxu1 %v6211_v38  ;;  %v6151_v38 = vor.u32 %v7694_v23, %v6148_v26  ;;  %v7646_v23 = vld [vmem:[%s8205_s15 + $0x16c] sm:$0xf]  ;;  %v6084_v26 = vld [vmem:[%s8205_s15 + $0x278] sm:$0xf0] }
 0x12d   : > { %2880 = vmatpush.bf16.msra.mxu2 %v6339_v39  ;;  %v6279_v39 = vor.u32 %v7726_v27, %v6276_v28  ;;  %v7710_v27 = vld [vmem:[%s8205_s15 + $0x36c] sm:$0xf]  ;;  %v6212_v28 = vld [vmem:[%s8205_s15 + $0x378] sm:$0xf0] }
 0x12e   : > { %2893 = vmatpush.bf16.msra.mxu3 %v5831_v44  ;;  %v6407_v44 = vor.u32 %v7758_v31, %v6404_v33  ;;  %v6340_v31 = vld [vmem:[%s8205_s15 + $0x478] sm:$0xf0] }
 0x12f   : > { %2855 = vmatpush.bf16.msra.mxu0 %v6067_v49  ;;  %v1610_v49 = vadd.f32 %v8767_v61, %v8763_v56  ;;  %v7718_v56 = vld [vmem:[%s8205_s15 + $0x3ac] sm:$0xf]  ;;  %v6244_v61 = vld [vmem:[%s8205_s15 + $0x3b8] sm:$0xf0] }
 0x130   : > { %2868 = vmatpush.bf16.msra.mxu1 %v6195_v53  ;;  %v6263_v53 = vor.u32 %v7722_v32, %v6260_v46  ;;  %v7706_v32 = vld [vmem:[%s8205_s15 + $0x34c] sm:$0xf]  ;;  %v6196_v46 = vld [vmem:[%s8205_s15 + $0x358] sm:$0xf0] }
 0x131   : > { %2881 = vmatpush.bf16.msra.mxu2 %v6323_v54  ;;  %v7654_v54 = vld [vmem:[%s8205_s15 + $0x1ac] sm:$0xf]  ;;  %v1623_v63 = vadd.f32 %v8821_v21, %v1610_v49  ;;  %v6228_v21 = vld [vmem:[%s8205_s15 + $0x398] sm:$0xf0] }
 0x132   : > { %2894 = vmatpush.bf16.msra.mxu3 %v5815_v59  ;;  %v6116_v59 = vld [vmem:[%s8205_s15 + $0x2b8] sm:$0xf0]  ;;  %v5991_v0 = vor.u32 %v7654_v54, %v5988_v55  ;;  %v6231_v18 = vor.u32 %v7714_v12, %v6228_v21  ;;  %v7634_v21 = vld [vmem:[%s8205_s15 + $0x10c] sm:$0xf] }
 0x133   : > { %2856 = vmatpush.bf16.msra.mxu0 %v6051_v2  ;;  %v6119_v1 = vor.u32 %v7686_v57, %v6116_v59  ;;  %v6247_v2 = vor.u32 %v7718_v56, %v6244_v61  ;;  %v6199_v57 = vor.u32 %v7706_v32, %v6196_v46  ;;  %v7670_v59 = vld [vmem:[%s8205_s15 + $0x22c] sm:$0xf]  ;;  %v6052_v56 = vld [vmem:[%s8205_s15 + $0x238] sm:$0xf0] }
 0x134   : > { %2869 = vmatpush.bf16.msra.mxu1 %v6179_v6  ;;  %v7682_v6 = vld [vmem:[%s8205_s15 + $0x28c] sm:$0xf] }
 0x135   : > { %2882 = vmatpush.bf16.msra.mxu2 %v6307_v9  ;;  %v6375_v9 = vor.u32 %v7750_v40, %v6372_v62  ;;  %v6103_v17 = vor.u32 %v7682_v6, %v6100_v11  ;;  %v6327_v62 = vor.u32 %v7738_v47, %v6324_v48  ;;  %v6055_v11 = vor.u32 %v7670_v59, %v6052_v56 }
 0x136   : > { %2895 = vmatpush.bf16.msra.mxu3 %v5799_v15  ;;  %v5975_v15 = vor.u32 %v7650_v4, %v5972_v5  ;;  %v6308_v4 = vld [vmem:[%s8205_s15 + $0x438] sm:$0xf0] }
 0x137   : > { %2857 = vmatpush.bf16.msra.mxu0 %v6035_v25  ;;  %v1674_v16 = vpop.f32.mrf.mxu0  ;;  %v7678_v25 = vld [vmem:[%s8205_s15 + $0x26c] sm:$0xf] }
 0x138   : > { %2870 = vmatpush.bf16.msra.mxu1 %v6163_v29  ;;  %v1675_v19 = vadd.f32 %v1674_v16, %v8843_v37  ;;  %v1687_v20 = vpop.f32.mrf.mxu1  ;;  %v5959_v37 = vor.u32 %v7646_v23, %v5956_v24  ;;  %v7730_v23 = vld [vmem:[%s8205_s15 + $0x40c] sm:$0xf]  ;;  %v6292_v24 = vld [vmem:[%s8205_s15 + $0x418] sm:$0xf0] }
 0x139   : > { %2883 = vmatpush.bf16.msra.mxu2 %v6291_v30  ;;  %v7742_v30 = vld [vmem:[%s8205_s15 + $0x46c] sm:$0xf] }
 0x13a   : > { %2896 = vmatpush.bf16.msra.mxu3 %v5783_v34  ;;  %2858 = vmatmul.bf16.vlgmr.msra.gmra.mxu0 %v8644_v7  ;;  %v1688_v29 = vadd.f32 %v1687_v20, %v1675_v19  ;;  %v6087_v34 = vor.u32 %v7678_v25, %v6084_v26  ;;  %v6343_v42 = vor.u32 %v7742_v30, %v6340_v31  ;;  %v6164_v19 = vld [vmem:[%s8205_s15 + $0x318] sm:$0xf0] }
 0x13b   : > { %2902 = vmatpush.bf16.msrb.mxu0 %v6023_v35  ;;  %2871 = vmatmul.bf16.vlgmr.msra.gmra.mxu1 %v8646_v8  ;;  %v6215_v35 = vor.u32 %v7710_v27, %v6212_v28  ;;  %v6295_v26 = vor.u32 %v7730_v23, %v6292_v24  ;;  %v1733_v23 = vld [vmem:[#allocation3] sm:$0xff] }
 0x13c   : > { %2915 = vmatpush.bf16.msrb.mxu1 %v6151_v38  ;;  %2884 = vmatmul.bf16.vlgmr.msra.gmra.mxu2 %v8720_v60 }
 0x13d   : > { %2928 = vmatpush.bf16.msrb.mxu2 %v6279_v39  ;;  %2897 = vmatmul.bf16.vlgmr.msra.gmra.mxu3 %v8640_v3  ;;  %v1636_v3 = vadd.f32 %v8823_v22, %v1623_v63  ;;  %v6359_v22 = vor.u32 %v7746_v36, %v6356_v13  ;;  %v7642_v39 = vld [vmem:[%s8205_s15 + $0x14c] sm:$0xf]  ;;  %v5908_v36 = vld [vmem:[%s8205_s15 + $0x118] sm:$0xf0] }
 0x13e   : > { %2941 = vmatpush.bf16.msrb.mxu3 %v6407_v44  ;;  %v7702_v63 = vld [vmem:[%s8205_s15 + $0x32c] sm:$0xf] }
 0x13f   : > { %2903 = vmatpush.bf16.msrb.mxu0 %v6007_v50  ;;  %v1649_v33 = vadd.f32 %v8836_v14, %v1636_v3  ;;  %v1700_v38 = vpop.f32.mrf.mxu2  ;;  %v6068_v14 = vld [vmem:[%s8205_s15 + $0x258] sm:$0xf0]  ;;  %v1676_v54 = vpop.f32.mrf.mxu0  ;;  %v7666_v13 = vld [vmem:[%s8205_s15 + $0x20c] sm:$0xf] }
 0x140   : > { %2916 = vmatpush.bf16.msrb.mxu1 %v6135_v52  ;;  %v1701_v44 = vadd.f32 %v1700_v38, %v1688_v29  ;;  %v1713_v45 = vpop.f32.mrf.mxu3  ;;  %v5943_v52 = vor.u32 %v7642_v39, %v5940_v43  ;;  %v6071_v55 = vor.u32 %v7674_v41, %v6068_v14  ;;  %v1689_v61 = vpop.f32.mrf.mxu1 }
 0x141   : > { %2929 = vmatpush.bf16.msrb.mxu2 %v6263_v53  ;;  %v1722_v49 = vrot.slane %v1649_v33, 4  ;;  %v7638_v53 = vld [vmem:[%s8205_s15 + $0x12c] sm:$0xf] }
 0x142   : > { %2942 = vmatpush.bf16.msrb.mxu3 %v6391_v58  ;;  %v1714_v50 = vadd.f32 %v1713_v45, %v1701_v44  ;;  %v5924_v58 = vld [vmem:[%s8205_s15 + $0x138] sm:$0xf0] }
 0x143   : > { %2904 = vmatpush.bf16.msrb.mxu0 %v5991_v0  ;;  %v6180_v0 = vld [vmem:[%s8205_s15 + $0x338] sm:$0xf0]  ;;  %v5927_v6 = vor.u32 %v7638_v53, %v5924_v58 }
 0x144   : > { %2917 = vmatpush.bf16.msrb.mxu1 %v6119_v1  ;;  %v1723_v40 = vrot.slane %v1714_v50, 2  ;;  %v496_v1 = vld [vmem:[#allocation2] sm:$0xff]  ;;  %v6183_v12 = vor.u32 %v7702_v63, %v6180_v0 }
 0x145   : > { %2930 = vmatpush.bf16.msrb.mxu2 %v6247_v2  ;;  %v7734_v2 = vld [vmem:[%s8205_s15 + $0x42c] sm:$0xf] }
 0x146   : > { %2943 = vmatpush.bf16.msrb.mxu3 %v6375_v9  ;;  %v1727_v5 = vsel %vm1726_vm1, %v1722_v49, %v1723_v40  ;;  %v6311_v16 = vor.u32 %v7734_v2, %v6308_v4 }
 0x147   : > { %2905 = vmatpush.bf16.msrb.mxu0 %v5975_v15  ;;  %v1729_v9 = vsel %vm1728_vm2, %v8758_v51, %v1727_v5  ;;  %v1702_v3 = vpop.f32.mrf.mxu2  ;;  %v5911_v51 = vor.u32 %v7634_v21, %v5908_v36 }
 0x148   : > { %2918 = vmatpush.bf16.msrb.mxu1 %v6103_v17  ;;  %v1731_v15 = vadd.f32 %v1729_v9, %v496_v1  ;;  %v6036_v17 = vld [vmem:[%s8205_s15 + $0x218] sm:$0xf0]  ;;  %v1715_v20 = vpop.f32.mrf.mxu3 }
 0x149   : > { %2931 = vmatpush.bf16.msrb.mxu2 %v6231_v18  ;;  %v7698_v18 = vld [vmem:[%s8205_s15 + $0x30c] sm:$0xf]  ;;  %v6039_v25 = vor.u32 %v7666_v13, %v6036_v17 }
 0x14a   : > { %2944 = vmatpush.bf16.msrb.mxu3 %v6359_v22  ;;  %1732 = vst [vmem:[#allocation2] sm:$0xff] %v1731_v15  ;;  %v6167_v22 = vor.u32 %v7698_v18, %v6164_v19 }
 0x14b   : > { %2906 = vmatpush.bf16.msrb.mxu0 %v5959_v37 }
 0x14c   : > { %2919 = vmatpush.bf16.msrb.mxu1 %v6087_v34 }
 0x14d   : > { %2932 = vmatpush.bf16.msrb.mxu2 %v6215_v35 }
 0x14e   : > { %2945 = vmatpush.bf16.msrb.mxu3 %v6343_v42 }
 0x14f   : > { %2907 = vmatpush.bf16.msrb.mxu0 %v5943_v52 }
 0x150   : > { %2920 = vmatpush.bf16.msrb.mxu1 %v6071_v55 }
 0x151   : > { %2933 = vmatpush.bf16.msrb.mxu2 %v6199_v57 }
 0x152   : > { %2946 = vmatpush.bf16.msrb.mxu3 %v6327_v62 }
 0x153   : > { %2908 = vmatpush.bf16.msrb.mxu0 %v5927_v6 }
 0x154   : > { %2921 = vmatpush.bf16.msrb.mxu1 %v6055_v11 }
 0x155   : > { %2934 = vmatpush.bf16.msrb.mxu2 %v6183_v12 }
 0x156   : > { %2947 = vmatpush.bf16.msrb.mxu3 %v6311_v16 }
 0x157   : > { %2909 = vmatpush.bf16.msrb.mxu0 %v5911_v51  ;;  %v2703_v27 = vpop.f32.mrf.mxu0 }
 0x158   : > { %2922 = vmatpush.bf16.msrb.mxu1 %v6039_v25  ;;  %v2716_v28 = vpop.f32.mrf.mxu1 }
 0x159   : > { %2935 = vmatpush.bf16.msrb.mxu2 %v6167_v22  ;;  %v2717_v29 = vadd.f32 %v2716_v28, %v2703_v27 }
 0x15a   : > { %2948 = vmatpush.bf16.msrb.mxu3 %v6295_v26  ;;  %2910 = vmatmul.bf16.vlgmr.msrb.gmra.mxu0 %v8648_v10 }
 0x15b   : > { %2923 = vmatmul.bf16.vlgmr.msrb.gmra.mxu1 %v8644_v7 }
 0x15c   : > { %2936 = vmatmul.bf16.vlgmr.msrb.gmra.mxu2 %v8646_v8 }
 0x15d   : > { %2949 = vmatmul.bf16.vlgmr.msrb.gmra.mxu3 %v8720_v60 }
 0x15f   : > { %v2729_v30 = vpop.f32.mrf.mxu2  ;;  %v2705_v37 = vpop.f32.mrf.mxu0 }
 0x160   : > { %v2742_v31 = vpop.f32.mrf.mxu3  ;;  %v2730_v33 = vadd.f32 %v2729_v30, %v2717_v29  ;;  %v2718_v35 = vpop.f32.mrf.mxu1 }
 0x162   : > { %v2743_v34 = vadd.f32 %v2742_v31, %v2730_v33 }
 0x167   : > { %v2731_v38 = vpop.f32.mrf.mxu2 }
 0x168   : > { %v2744_v39 = vpop.f32.mrf.mxu3 }
 0x177   : > { %v2755_v43 = vpop.f32.mrf.mxu0 }
 0x178   : > { %v2756_v41 = vadd.f32 %v2755_v43, %v2743_v34  ;;  %v2768_v10 = vpop.f32.mrf.mxu1 }
 0x17f   : > { %v2781_v42 = vpop.f32.mrf.mxu2  ;;  %v2757_v7 = vpop.f32.mrf.mxu0 }
 0x180   : > { %v2782_v44 = vadd.f32 %v2781_v42, %v2768_v10  ;;  %v2794_v8 = vpop.f32.mrf.mxu3  ;;  %v2770_v45 = vpop.f32.mrf.mxu1 }
 0x182   : > { %v2795_v60 = vadd.f32 %v2794_v8, %v2782_v44 }
 0x187   : > { %v2783_v14 = vpop.f32.mrf.mxu2 }
 0x188   : > { %v2796_v32 = vpop.f32.mrf.mxu3 }
 0x197   : > { %v2807_v46 = vpop.f32.mrf.mxu0 }
 0x198   : > { %v2808_v47 = vadd.f32 %v2807_v46, %v2795_v60  ;;  %v2820_v48 = vpop.f32.mrf.mxu1 }
 0x19a   : > { %v2821_v49 = vadd.f32 %v2820_v48, %v2808_v47 }
 0x19c   : > { %v2958_v50 = vrot.slane %v2821_v49, 6 }
 0x19e   : > { %v2961_v52 = vsel %vm1724_vm0, %v2756_v41, %v2958_v50 }
 0x19f   : > { %v2833_v53 = vpop.f32.mrf.mxu2  ;;  %v2809_v54 = vpop.f32.mrf.mxu0 }
 0x1a0   : > { %v2846_v55 = vpop.f32.mrf.mxu3  ;;  %v2822_v57 = vpop.f32.mrf.mxu1 }
 0x1a1   : > { %v2847_v4 = vadd.f32 %v2846_v55, %v2833_v53 }
 0x1a7   : > { %v2835_v58 = vpop.f32.mrf.mxu2 }
 0x1a8   : > { %v2848_v59 = vpop.f32.mrf.mxu3 }
 0x1b7   : > { %v2859_v56 = vpop.f32.mrf.mxu0 }
 0x1b8   : > { %v2872_v61 = vpop.f32.mrf.mxu1  ;;  %v2860_v5 = vadd.f32 %v2859_v56, %v2847_v4 }
 0x1ba   : > { %v2873_v12 = vadd.f32 %v2872_v61, %v2860_v5 }
 0x1bf   : > { %v2885_v40 = vpop.f32.mrf.mxu2  ;;  %v2861_v63 = vpop.f32.mrf.mxu0 }
 0x1c0   : > { %v2898_v62 = vpop.f32.mrf.mxu3  ;;  %v2874_v0 = vpop.f32.mrf.mxu1  ;;  %v2886_v13 = vadd.f32 %v2885_v40, %v2873_v12 }
 0x1c2   : > { %v2959_v19 = vrot.slane %v2886_v13, 4 }
 0x1c7   : > { %v2887_v1 = vpop.f32.mrf.mxu2 }
 0x1c8   : > { %v2900_v2 = vpop.f32.mrf.mxu3 }
 0x1d7   : > { %v2911_v6 = vpop.f32.mrf.mxu0 }
 0x1d8   : > { %v2924_v9 = vpop.f32.mrf.mxu1  ;;  %v2912_v11 = vadd.f32 %v2911_v6, %v2898_v62 }
 0x1da   : > { %v2925_v21 = vadd.f32 %v2924_v9, %v2912_v11 }
 0x1df   : > { %v2937_v36 = vpop.f32.mrf.mxu2  ;;  %v2913_v16 = vpop.f32.mrf.mxu0 }
 0x1e0   : > { %v2938_v3 = vadd.f32 %v2937_v36, %v2925_v21  ;;  %v2950_v15 = vpop.f32.mrf.mxu3  ;;  %v2926_v17 = vpop.f32.mrf.mxu1 }
 0x1e2   : > { %v2951_v18 = vadd.f32 %v2950_v15, %v2938_v3 }
 0x1e4   : > { %v2960_v20 = vrot.slane %v2951_v18, 2 }
 0x1e6   : > { %v2962_v24 = vsel %vm1726_vm1, %v2959_v19, %v2960_v20  ;;  %2970 = sbr.rel (%p6408_p6) target bundleno = 970 (0x3ca), region = 68 }
 0x1e7   : > { %v2963_v51 = vsel %vm1728_vm2, %v2961_v52, %v2962_v24  ;;  %v2939_v25 = vpop.f32.mrf.mxu2 }
 0x1e8   : > { %v2965_v22 = vadd.f32 %v2963_v51, %v1733_v23  ;;  %v2952_v26 = vpop.f32.mrf.mxu3 }
 0x1ea   : > { %2966 = vst [vmem:[#allocation3] sm:$0xff] %v2965_v22 }
 0x1eb   : > { %v2972_v27 = vld [vmem:[%s10582_s3] sm:$0xf]  ;;  %v7791_v37 = vld [vmem:[%s10585_s6 + $0xec] sm:$0xf0]  ;;  %v2971_v43 = vld [vmem:[#allocation2] sm:$0xff] }
 0x1ec   : > { %v6523_v28 = vld [vmem:[%s10585_s6 + $0xe0] sm:$0xf]  ;;  %v2974_v29 = vperm.slane %v2972_v27, 0  ;;  %v2975_v30 = vperm.slane %v2972_v27, 1  ;;  %v2976_v31 = vperm.slane %v2972_v27, 2  ;;  %v2977_v33 = vperm.slane %v2972_v27, 3 }
 0x1ed   : > { %v6524_v34 = vor.u32 %v7791_v37, %v6523_v28  ;;  %v6651_v35 = vld [vmem:[%s10585_s6 + $0x1e0] sm:$0xf]  ;;  %v7823_v38 = vld [vmem:[%s10585_s6 + $0x1ec] sm:$0xf0] }
 0x1ee   : > { %v6779_v39 = vld [vmem:[%s10585_s6 + $0x2e0] sm:$0xf]  ;;  %v2978_v41 = vrot.slane %v2975_v30, 6  ;;  %v2979_v10 = vrot.slane %v2976_v31, 4  ;;  %v2980_v42 = vrot.slane %v2977_v33, 2  ;;  %v6652_v7 = vor.u32 %v7823_v38, %v6651_v35 }
 0x1ef   : > { %v7855_v44 = vld [vmem:[%s10585_s6 + $0x2ec] sm:$0xf0]  ;;  %3795 = vmatpush.bf16.msra.mxu0 %v6524_v34  ;;  %v6907_v45 = vld [vmem:[%s10585_s6 + $0x3e0] sm:$0xf] }
 0x1f0   : > { %v6780_v8 = vor.u32 %v7855_v44, %v6779_v39  ;;  %v7887_v60 = vld [vmem:[%s10585_s6 + $0x3ec] sm:$0xf0]  ;;  %v6507_v14 = vld [vmem:[%s10585_s6 + $0xc0] sm:$0xf]  ;;  %v2981_v32 = vsel %vm1724_vm0, %v2974_v29, %v2978_v41  ;;  %v2982_v46 = vsel %vm1726_vm1, %v2979_v10, %v2980_v42  ;;  %3808 = vmatpush.bf16.msra.mxu1 %v6652_v7 }
 0x1f1   : > { %v6908_v47 = vor.u32 %v7887_v60, %v6907_v45  ;;  %v7787_v48 = vld [vmem:[%s10585_s6 + $0xcc] sm:$0xf0]  ;;  %v6635_v49 = vld [vmem:[%s10585_s6 + $0x1c0] sm:$0xf]  ;;  %v2983_v52 = vsel %vm1728_vm2, %v2981_v32, %v2982_v46 }
 0x1f2   : > { %v7819_v50 = vld [vmem:[%s10585_s6 + $0x1cc] sm:$0xf0]  ;;  %3821 = vmatpush.bf16.msra.mxu2 %v6780_v8  ;;  %v6508_v53 = vor.u32 %v7787_v48, %v6507_v14  ;;  %v6763_v55 = vld [vmem:[%s10585_s6 + $0x2c0] sm:$0xf]  ;;  %v2985_v59 = vadd.f32 %v2983_v52, %v2971_v43 }
 0x1f3   : > { %v6636_v54 = vor.u32 %v7819_v50, %v6635_v49  ;;  %v7851_v57 = vld [vmem:[%s10585_s6 + $0x2cc] sm:$0xf0]  ;;  %v6891_v58 = vld [vmem:[%s10585_s6 + $0x3c0] sm:$0xf]  ;;  %3834 = vmatpush.bf16.msra.mxu3 %v6908_v47 }
 0x1f4   : > { %v6764_v56 = vor.u32 %v7851_v57, %v6763_v55  ;;  %v7883_v61 = vld [vmem:[%s10585_s6 + $0x3cc] sm:$0xf0]  ;;  %v6491_v40 = vld [vmem:[%s10585_s6 + $0xa0] sm:$0xf]  ;;  %3796 = vmatpush.bf16.msra.mxu0 %v6508_v53  ;;  %2986 = vst [vmem:[#allocation4] sm:$0xff] %v2985_v59 }
 0x1f5   : > { %v7783_v62 = vld [vmem:[%s10585_s6 + $0xac] sm:$0xf0]  ;;  %v6892_v63 = vor.u32 %v7883_v61, %v6891_v58  ;;  %v6619_v1 = vld [vmem:[%s10585_s6 + $0x1a0] sm:$0xf]  ;;  %3809 = vmatpush.bf16.msra.mxu1 %v6636_v54 }
 0x1f6   : > { %v6492_v0 = vor.u32 %v7783_v62, %v6491_v40  ;;  %v7815_v2 = vld [vmem:[%s10585_s6 + $0x1ac] sm:$0xf0]  ;;  %v6747_v4 = vld [vmem:[%s10585_s6 + $0x2a0] sm:$0xf]  ;;  %3822 = vmatpush.bf16.msra.mxu2 %v6764_v56  ;;  %v7789_v62 = vld [vmem:[%s10585_s6 + $0xe4] sm:$0xf] }
 0x1f7   : > { %v6620_v5 = vor.u32 %v7815_v2, %v6619_v1  ;;  %v7847_v6 = vld [vmem:[%s10585_s6 + $0x2ac] sm:$0xf0]  ;;  %v6875_v9 = vld [vmem:[%s10585_s6 + $0x3a0] sm:$0xf]  ;;  %3835 = vmatpush.bf16.msra.mxu3 %v6892_v63  ;;  %v6525_v2 = vld [vmem:[%s10585_s6 + $0xf0] sm:$0xf0] }
 0x1f8   : > { %v6748_v11 = vor.u32 %v7847_v6, %v6747_v4  ;;  %v7879_v12 = vld [vmem:[%s10585_s6 + $0x3ac] sm:$0xf0]  ;;  %v6475_v21 = vld [vmem:[%s10585_s6 + $0x80] sm:$0xf]  ;;  %3797 = vmatpush.bf16.msra.mxu0 %v6492_v0  ;;  %v7821_v4 = vld [vmem:[%s10585_s6 + $0x1e4] sm:$0xf] }
 0x1f9   : > { %v7779_v36 = vld [vmem:[%s10585_s6 + $0x8c] sm:$0xf0]  ;;  %v6876_v13 = vor.u32 %v7879_v12, %v6875_v9  ;;  %v6603_v3 = vld [vmem:[%s10585_s6 + $0x180] sm:$0xf]  ;;  %3810 = vmatpush.bf16.msra.mxu1 %v6620_v5  ;;  %v6653_v9 = vld [vmem:[%s10585_s6 + $0x1f0] sm:$0xf0] }
 0x1fa   : > { %v7811_v15 = vld [vmem:[%s10585_s6 + $0x18c] sm:$0xf0]  ;;  %v6731_v16 = vld [vmem:[%s10585_s6 + $0x280] sm:$0xf]  ;;  %v6476_v17 = vor.u32 %v7779_v36, %v6475_v21  ;;  %3823 = vmatpush.bf16.msra.mxu2 %v6748_v11 }
 0x1fb   : > { %v7843_v18 = vld [vmem:[%s10585_s6 + $0x28c] sm:$0xf0]  ;;  %v6859_v19 = vld [vmem:[%s10585_s6 + $0x380] sm:$0xf]  ;;  %v6604_v23 = vor.u32 %v7811_v15, %v6603_v3  ;;  %3836 = vmatpush.bf16.msra.mxu3 %v6876_v13  ;;  %v7853_v13 = vld [vmem:[%s10585_s6 + $0x2e4] sm:$0xf] }
 0x1fc   : > { %v7875_v20 = vld [vmem:[%s10585_s6 + $0x38c] sm:$0xf0]  ;;  %v6459_v24 = vld [vmem:[%s10585_s6 + $0x60] sm:$0xf]  ;;  %v6732_v25 = vor.u32 %v7843_v18, %v6731_v16  ;;  %3798 = vmatpush.bf16.msra.mxu0 %v6476_v17  ;;  %v6781_v3 = vld [vmem:[%s10585_s6 + $0x2f0] sm:$0xf0]  ;;  %v6528_v17 = vor.u32 %v7789_v62, %v6525_v2 }
 0x1fd   : > { %v7775_v51 = vld [vmem:[%s10585_s6 + $0x6c] sm:$0xf0]  ;;  %v6587_v22 = vld [vmem:[%s10585_s6 + $0x160] sm:$0xf]  ;;  %v6860_v27 = vor.u32 %v7875_v20, %v6859_v19  ;;  %3811 = vmatpush.bf16.msra.mxu1 %v6604_v23  ;;  %v7885_v18 = vld [vmem:[%s10585_s6 + $0x3e4] sm:$0xf] }
 0x1fe   : > { %v7807_v26 = vld [vmem:[%s10585_s6 + $0x16c] sm:$0xf0]  ;;  %v6715_v28 = vld [vmem:[%s10585_s6 + $0x260] sm:$0xf]  ;;  %v6460_v30 = vor.u32 %v7775_v51, %v6459_v24  ;;  %3824 = vmatpush.bf16.msra.mxu2 %v6732_v25  ;;  %v6909_v19 = vld [vmem:[%s10585_s6 + $0x3f0] sm:$0xf0]  ;;  %v6656_v51 = vor.u32 %v7821_v4, %v6653_v9 }
 0x1ff   : > { %v7839_v29 = vld [vmem:[%s10585_s6 + $0x26c] sm:$0xf0]  ;;  %v6843_v31 = vld [vmem:[%s10585_s6 + $0x360] sm:$0xf]  ;;  %v6588_v37 = vor.u32 %v7807_v26, %v6587_v22  ;;  %3837 = vmatpush.bf16.msra.mxu3 %v6860_v27  ;;  %v7785_v22 = vld [vmem:[%s10585_s6 + $0xc4] sm:$0xf] }
 0x200   : > { %v7871_v33 = vld [vmem:[%s10585_s6 + $0x36c] sm:$0xf0]  ;;  %v6443_v34 = vld [vmem:[%s10585_s6 + $0x40] sm:$0xf]  ;;  %v6716_v38 = vor.u32 %v7839_v29, %v6715_v28  ;;  %3799 = vmatpush.bf16.msra.mxu0 %v6460_v30  ;;  %v6509_v26 = vld [vmem:[%s10585_s6 + $0xd0] sm:$0xf0]  ;;  %v6784_v28 = vor.u32 %v7853_v13, %v6781_v3 }
 0x201   : > { %v7771_v35 = vld [vmem:[%s10585_s6 + $0x4c] sm:$0xf0]  ;;  %v6571_v39 = vld [vmem:[%s10585_s6 + $0x140] sm:$0xf]  ;;  %v6844_v41 = vor.u32 %v7871_v33, %v6843_v31  ;;  %3812 = vmatpush.bf16.msra.mxu1 %v6588_v37  ;;  %v7817_v31 = vld [vmem:[%s10585_s6 + $0x1c4] sm:$0xf]  ;;  %v6912_v37 = vor.u32 %v7885_v18, %v6909_v19 }
 0x202   : > { %v7803_v43 = vld [vmem:[%s10585_s6 + $0x14c] sm:$0xf0]  ;;  %v6699_v10 = vld [vmem:[%s10585_s6 + $0x240] sm:$0xf]  ;;  %v6444_v7 = vor.u32 %v7771_v35, %v6443_v34  ;;  %3825 = vmatpush.bf16.msra.mxu2 %v6716_v38  ;;  %v6637_v33 = vld [vmem:[%s10585_s6 + $0x1d0] sm:$0xf0] }
 0x203   : > { %v7835_v42 = vld [vmem:[%s10585_s6 + $0x24c] sm:$0xf0]  ;;  %v6827_v44 = vld [vmem:[%s10585_s6 + $0x340] sm:$0xf]  ;;  %v6572_v45 = vor.u32 %v7803_v43, %v6571_v39  ;;  %3838 = vmatpush.bf16.msra.mxu3 %v6844_v41  ;;  %v7849_v35 = vld [vmem:[%s10585_s6 + $0x2c4] sm:$0xf]  ;;  %v6512_v43 = vor.u32 %v7785_v22, %v6509_v26 }
 0x204   : > { %v7867_v8 = vld [vmem:[%s10585_s6 + $0x34c] sm:$0xf0]  ;;  %v6427_v60 = vld [vmem:[%s10585_s6 + $0x20] sm:$0xf]  ;;  %v6700_v46 = vor.u32 %v7835_v42, %v6699_v10  ;;  %3800 = vmatpush.bf16.msra.mxu0 %v6444_v7  ;;  %v6765_v38 = vld [vmem:[%s10585_s6 + $0x2d0] sm:$0xf0]  ;;  %v6640_v7 = vor.u32 %v7817_v31, %v6637_v33 }
 0x205   : > { %v7767_v14 = vld [vmem:[%s10585_s6 + $0x2c] sm:$0xf0]  ;;  %v6555_v32 = vld [vmem:[%s10585_s6 + $0x120] sm:$0xf]  ;;  %v6828_v50 = vor.u32 %v7867_v8, %v6827_v44  ;;  %3813 = vmatpush.bf16.msra.mxu1 %v6572_v45  ;;  %v7881_v41 = vld [vmem:[%s10585_s6 + $0x3c4] sm:$0xf]  ;;  %v6768_v45 = vor.u32 %v7849_v35, %v6765_v38 }
 0x206   : > { %v7799_v47 = vld [vmem:[%s10585_s6 + $0x12c] sm:$0xf0]  ;;  %v6683_v48 = vld [vmem:[%s10585_s6 + $0x220] sm:$0xf]  ;;  %v6428_v55 = vor.u32 %v7767_v14, %v6427_v60  ;;  %3826 = vmatpush.bf16.msra.mxu2 %v6700_v46  ;;  %v6893_v10 = vld [vmem:[%s10585_s6 + $0x3d0] sm:$0xf0] }
 0x207   : > { %v7831_v49 = vld [vmem:[%s10585_s6 + $0x22c] sm:$0xf0]  ;;  %v6811_v52 = vld [vmem:[%s10585_s6 + $0x320] sm:$0xf]  ;;  %v6556_v56 = vor.u32 %v7799_v47, %v6555_v32  ;;  %3839 = vmatpush.bf16.msra.mxu3 %v6828_v50  ;;  %v7781_v44 = vld [vmem:[%s10585_s6 + $0xa4] sm:$0xf]  ;;  %v6896_v46 = vor.u32 %v7881_v41, %v6893_v10 }
 0x208   : > { %v7863_v53 = vld [vmem:[%s10585_s6 + $0x32c] sm:$0xf0]  ;;  %v6411_v54 = vld [vmem:[%s10585_s6] sm:$0xf]  ;;  %v6684_v63 = vor.u32 %v7831_v49, %v6683_v48  ;;  %3801 = vmatpush.bf16.msra.mxu0 %v6428_v55  ;;  %v6493_v8 = vld [vmem:[%s10585_s6 + $0xb0] sm:$0xf0] }
 0x209   : > { %v7763_v57 = vld [vmem:[%s10585_s6 + $0xc] sm:$0xf0]  ;;  %v6539_v58 = vld [vmem:[%s10585_s6 + $0x100] sm:$0xf]  ;;  %v6812_v6 = vor.u32 %v7863_v53, %v6811_v52  ;;  %3814 = vmatpush.bf16.msra.mxu1 %v6556_v56  ;;  %v7813_v60 = vld [vmem:[%s10585_s6 + $0x1a4] sm:$0xf]  ;;  %v6496_v49 = vor.u32 %v7781_v44, %v6493_v8 }
 0x20a   : > { %v7795_v59 = vld [vmem:[%s10585_s6 + $0x10c] sm:$0xf0]  ;;  %v6667_v61 = vld [vmem:[%s10585_s6 + $0x200] sm:$0xf]  ;;  %v6412_v36 = vor.u32 %v7763_v57, %v6411_v54  ;;  %3827 = vmatpush.bf16.msra.mxu2 %v6684_v63  ;;  %v6621_v14 = vld [vmem:[%s10585_s6 + $0x1b0] sm:$0xf0] }
 0x20b   : > { %v7827_v40 = vld [vmem:[%s10585_s6 + $0x20c] sm:$0xf0]  ;;  %v6795_v0 = vld [vmem:[%s10585_s6 + $0x300] sm:$0xf]  ;;  %v6540_v16 = vor.u32 %v7795_v59, %v6539_v58  ;;  %3840 = vmatpush.bf16.msra.mxu3 %v6812_v6  ;;  %v7845_v47 = vld [vmem:[%s10585_s6 + $0x2a4] sm:$0xf]  ;;  %v6624_v53 = vor.u32 %v7813_v60, %v6621_v14 }
 0x20c   : > { %v7859_v1 = vld [vmem:[%s10585_s6 + $0x30c] sm:$0xf0]  ;;  %v2988_v5 = vld [vmem:[%s10584_s5] sm:$0xf]  ;;  %v6668_v24 = vor.u32 %v7827_v40, %v6667_v61  ;;  %3802 = vmatpush.bf16.msra.mxu0 %v6412_v36  ;;  %v6749_v48 = vld [vmem:[%s10585_s6 + $0x2b0] sm:$0xf0] }
 0x20d   : > { %v2990_v11 = vperm.slane %v2988_v5, 0  ;;  %v2991_v12 = vperm.slane %v2988_v5, 1  ;;  %v2992_v21 = vperm.slane %v2988_v5, 2  ;;  %v2993_v15 = vperm.slane %v2988_v5, 3  ;;  %v2987_v29 = vld [vmem:[#allocation3] sm:$0xff]  ;;  %3815 = vmatpush.bf16.msra.mxu1 %v6540_v16 }
 0x20e   : > { %v6796_v27 = vor.u32 %v7859_v1, %v6795_v0  ;;  %3828 = vmatpush.bf16.msra.mxu2 %v6668_v24  ;;  %v7877_v50 = vld [vmem:[%s10585_s6 + $0x3a4] sm:$0xf]  ;;  %v6877_v52 = vld [vmem:[%s10585_s6 + $0x3b0] sm:$0xf0]  ;;  %v6752_v57 = vor.u32 %v7845_v47, %v6749_v48 }
 0x20f   : > { %v2994_v20 = vrot.slane %v2991_v12, 6  ;;  %v2995_v23 = vrot.slane %v2992_v21, 4  ;;  %v2996_v25 = vrot.slane %v2993_v15, 2  ;;  %v7777_v54 = vld [vmem:[%s10585_s6 + $0x84] sm:$0xf]  ;;  %v6880_v56 = vor.u32 %v7877_v50, %v6877_v52 }
 0x210   : > { %3847 = vmatpush.bf16.msrb.mxu0 %v6528_v17  ;;  %3841 = vmatpush.bf16.msra.mxu3 %v6796_v27  ;;  %v6477_v55 = vld [vmem:[%s10585_s6 + $0x90] sm:$0xf0]  ;;  %v7809_v58 = vld [vmem:[%s10585_s6 + $0x184] sm:$0xf] }
 0x211   : > { %v2997_v30 = vsel %vm1724_vm0, %v2990_v11, %v2994_v20  ;;  %v2998_v34 = vsel %vm1726_vm1, %v2995_v23, %v2996_v25  ;;  %3860 = vmatpush.bf16.msrb.mxu1 %v6656_v51  ;;  %v6605_v59 = vld [vmem:[%s10585_s6 + $0x190] sm:$0xf0]  ;;  %v7841_v61 = vld [vmem:[%s10585_s6 + $0x284] sm:$0xf]  ;;  %v6480_v62 = vor.u32 %v7777_v54, %v6477_v55  ;;  %v7792_v54 = vld [vmem:[%s10585_s6 + $0xf4] sm:$0xf0] }
 0x212   : > { %v2999_v39 = vsel %vm1728_vm2, %v2997_v30, %v2998_v34  ;;  %3873 = vmatpush.bf16.msrb.mxu2 %v6784_v28  ;;  %v6733_v40 = vld [vmem:[%s10585_s6 + $0x290] sm:$0xf0]  ;;  %v6608_v63 = vor.u32 %v7809_v58, %v6605_v59  ;;  %v7873_v0 = vld [vmem:[%s10585_s6 + $0x384] sm:$0xf]  ;;  %v6659_v55 = vld [vmem:[%s10585_s6 + $0x1e8] sm:$0xf] }
 0x213   : > { %v3001_v42 = vadd.f32 %v2999_v39, %v2987_v29  ;;  %v6861_v1 = vld [vmem:[%s10585_s6 + $0x390] sm:$0xf0]  ;;  %v6736_v2 = vor.u32 %v7841_v61, %v6733_v40  ;;  %v7773_v4 = vld [vmem:[%s10585_s6 + $0x64] sm:$0xf]  ;;  %v7856_v61 = vld [vmem:[%s10585_s6 + $0x2f4] sm:$0xf0] }
 0x214   : > { %3886 = vmatpush.bf16.msrb.mxu3 %v6912_v37  ;;  %3848 = vmatpush.bf16.msrb.mxu0 %v6512_v43  ;;  %v6461_v5 = vld [vmem:[%s10585_s6 + $0x70] sm:$0xf0]  ;;  %v7805_v6 = vld [vmem:[%s10585_s6 + $0x164] sm:$0xf]  ;;  %v6864_v19 = vor.u32 %v7873_v0, %v6861_v1 }
 0x215   : > { %v3002_v32 = vmax.f32 %v3001_v42, 0.0  ;;  %3861 = vmatpush.bf16.msrb.mxu1 %v6640_v7  ;;  %v6589_v9 = vld [vmem:[%s10585_s6 + $0x170] sm:$0xf0]  ;;  %v7837_v11 = vld [vmem:[%s10585_s6 + $0x264] sm:$0xf]  ;;  %v6464_v20 = vor.u32 %v7773_v4, %v6461_v5 }
 0x216   : > { %3874 = vmatpush.bf16.msrb.mxu2 %v6768_v45  ;;  %v6717_v12 = vld [vmem:[%s10585_s6 + $0x270] sm:$0xf0]  ;;  %v7869_v13 = vld [vmem:[%s10585_s6 + $0x364] sm:$0xf]  ;;  %v6592_v51 = vor.u32 %v7805_v6, %v6589_v9  ;;  %v6915_v4 = vld [vmem:[%s10585_s6 + $0x3e8] sm:$0xf] }
 0x217   : > { %3004 = vst [vmem:[#allocation1] ss:$4 sm:$0xff] %v3002_v32  ;;  %v6845_v3 = vld [vmem:[%s10585_s6 + $0x370] sm:$0xf0]  ;;  %v6720_v25 = vor.u32 %v7837_v11, %v6717_v12  ;;  %v7769_v22 = vld [vmem:[%s10585_s6 + $0x44] sm:$0xf] }
 0x218   : > { %3887 = vmatpush.bf16.msrb.mxu3 %v6896_v46  ;;  %3849 = vmatpush.bf16.msrb.mxu0 %v6496_v49  ;;  %v6445_v26 = vld [vmem:[%s10585_s6 + $0x50] sm:$0xf0]  ;;  %v7801_v27 = vld [vmem:[%s10585_s6 + $0x144] sm:$0xf]  ;;  %v6848_v31 = vor.u32 %v7869_v13, %v6845_v3  ;;  %v7888_v5 = vld [vmem:[%s10585_s6 + $0x3f4] sm:$0xf0] }
 0x219   : > { %3862 = vmatpush.bf16.msrb.mxu1 %v6624_v53  ;;  %v6573_v28 = vld [vmem:[%s10585_s6 + $0x150] sm:$0xf0]  ;;  %v7833_v29 = vld [vmem:[%s10585_s6 + $0x244] sm:$0xf]  ;;  %v6448_v33 = vor.u32 %v7769_v22, %v6445_v26  ;;  %v6531_v53 = vld [vmem:[%s10585_s6 + $0xe8] sm:$0xf] }
 0x21a   : > { %3875 = vmatpush.bf16.msrb.mxu2 %v6752_v57  ;;  %v6701_v30 = vld [vmem:[%s10585_s6 + $0x250] sm:$0xf0]  ;;  %v7865_v37 = vld [vmem:[%s10585_s6 + $0x344] sm:$0xf]  ;;  %v6576_v35 = vor.u32 %v7801_v27, %v6573_v28  ;;  %v7824_v57 = vld [vmem:[%s10585_s6 + $0x1f4] sm:$0xf0]  ;;  %v6532_v1 = vor.u32 %v7792_v54, %v6531_v53 }
 0x21b   : > { %v6829_v34 = vld [vmem:[%s10585_s6 + $0x350] sm:$0xf0]  ;;  %v6704_v38 = vor.u32 %v7833_v29, %v6701_v30  ;;  %v7765_v39 = vld [vmem:[%s10585_s6 + $0x24] sm:$0xf]  ;;  %v6515_v6 = vld [vmem:[%s10585_s6 + $0xc8] sm:$0xf] }
 0x21c   : > { %3888 = vmatpush.bf16.msrb.mxu3 %v6880_v56  ;;  %3850 = vmatpush.bf16.msrb.mxu0 %v6480_v62  ;;  %v6429_v43 = vld [vmem:[%s10585_s6 + $0x30] sm:$0xf0]  ;;  %v7797_v41 = vld [vmem:[%s10585_s6 + $0x124] sm:$0xf]  ;;  %v6832_v44 = vor.u32 %v7865_v37, %v6829_v34  ;;  %v6787_v56 = vld [vmem:[%s10585_s6 + $0x2e8] sm:$0xf] }
 0x21d   : > { %3863 = vmatpush.bf16.msrb.mxu1 %v6608_v63  ;;  %v6557_v10 = vld [vmem:[%s10585_s6 + $0x130] sm:$0xf0]  ;;  %v7829_v42 = vld [vmem:[%s10585_s6 + $0x224] sm:$0xf]  ;;  %v6432_v8 = vor.u32 %v7765_v39, %v6429_v43  ;;  %v6788_v9 = vor.u32 %v7856_v61, %v6787_v56  ;;  %v7788_v11 = vld [vmem:[%s10585_s6 + $0xd4] sm:$0xf0] }
 0x21e   : > { %v3007_v21 = vld.sshfl [vmem:[#allocation1 + $0x10] sm:$0xff pattern:$0x73625140]  ;;  %v3005_v36 = vld.sshfl [vmem:[#allocation1] sm:$0xff pattern:$0x73625140]  ;;  %3876 = vmatpush.bf16.msrb.mxu2 %v6736_v2  ;;  %v6560_v32 = vor.u32 %v7797_v41, %v6557_v10  ;;  %v6660_v2 = vor.u32 %v7824_v57, %v6659_v55 }
 0x21f   : > { %v9270_v15 = vpack.c.bf16 %v3007_v21, %v3007_v21  ;;  %v9272_v16 = vpack.c.bf16 %v3005_v36, %v3005_v36  ;;  %v3008_v17 = vld.sshfl [vmem:[#allocation1 + $0x18] sm:$0xff pattern:$0x73625140]  ;;  %v3006_v18 = vld.sshfl [vmem:[#allocation1 + $0x8] sm:$0xff pattern:$0x73625140] }
 0x220   : > { %v9274_v23 = vpack.c.bf16 %v3008_v17, %v3008_v17  ;;  %v9276_v24 = vpack.c.bf16 %v3006_v18, %v3006_v18  ;;  %3889 = vmatpush.bf16.msrb.mxu3 %v6864_v19  ;;  %3851 = vmatpush.bf16.msrb.mxu0 %v6464_v20  ;;  %v6685_v7 = vld [vmem:[%s10585_s6 + $0x230] sm:$0xf0]  ;;  %v7861_v45 = vld [vmem:[%s10585_s6 + $0x324] sm:$0xf]  ;;  %v6643_v12 = vld [vmem:[%s10585_s6 + $0x1c8] sm:$0xf]  ;;  %v6916_v17 = vor.u32 %v7888_v5, %v6915_v4 }
 0x221   : > { %3829 = vmatmul.bf16.vlgmr.msra.gmra.mxu2 %v9270_v15  ;;  %3803 = vmatmul.bf16.vlgmr.msra.gmra.mxu0 %v9272_v16  ;;  %v6813_v60 = vld [vmem:[%s10585_s6 + $0x330] sm:$0xf0]  ;;  %v7761_v14 = vld [vmem:[%s10585_s6 + $0x4] sm:$0xf]  ;;  %v6688_v46 = vor.u32 %v7829_v42, %v6685_v7  ;;  %v7820_v21 = vld [vmem:[%s10585_s6 + $0x1d4] sm:$0xf0]  ;;  %v6516_v18 = vor.u32 %v7788_v11, %v6515_v6 }
 0x222   : > { %3842 = vmatmul.bf16.vlgmr.msra.gmra.mxu3 %v9274_v23  ;;  %3816 = vmatmul.bf16.vlgmr.msra.gmra.mxu1 %v9276_v24  ;;  %v6413_v47 = vld [vmem:[%s10585_s6 + $0x10] sm:$0xf0]  ;;  %v7793_v48 = vld [vmem:[%s10585_s6 + $0x104] sm:$0xf]  ;;  %v6816_v58 = vor.u32 %v7861_v45, %v6813_v60  ;;  %v6771_v13 = vld [vmem:[%s10585_s6 + $0x2c8] sm:$0xf]  ;;  %v6644_v19 = vor.u32 %v7820_v21, %v6643_v12 }
 0x223   : > { %3864 = vmatpush.bf16.msrb.mxu1 %v6592_v51  ;;  %3877 = vmatpush.bf16.msrb.mxu2 %v6720_v25  ;;  %v6541_v49 = vld [vmem:[%s10585_s6 + $0x110] sm:$0xf0]  ;;  %v7825_v50 = vld [vmem:[%s10585_s6 + $0x204] sm:$0xf]  ;;  %v6416_v59 = vor.u32 %v7761_v14, %v6413_v47  ;;  %v7852_v3 = vld [vmem:[%s10585_s6 + $0x2d4] sm:$0xf0] }
 0x224   : > { %3890 = vmatpush.bf16.msrb.mxu3 %v6848_v31  ;;  %3852 = vmatpush.bf16.msrb.mxu0 %v6448_v33  ;;  %v6669_v52 = vld [vmem:[%s10585_s6 + $0x210] sm:$0xf0]  ;;  %v6544_v40 = vor.u32 %v7793_v48, %v6541_v49  ;;  %v7857_v63 = vld [vmem:[%s10585_s6 + $0x304] sm:$0xf]  ;;  %v6899_v20 = vld [vmem:[%s10585_s6 + $0x3c8] sm:$0xf]  ;;  %v6772_v22 = vor.u32 %v7852_v3, %v6771_v13 }
 0x225   : > { %v6672_v62 = vor.u32 %v7825_v50, %v6669_v52  ;;  %v6797_v0 = vld [vmem:[%s10585_s6 + $0x310] sm:$0xf0]  ;;  %v7884_v51 = vld [vmem:[%s10585_s6 + $0x3d4] sm:$0xf0]  ;;  %v6499_v25 = vld [vmem:[%s10585_s6 + $0xa8] sm:$0xf] }
 0x226   : > { %v6800_v36 = vor.u32 %v7857_v63, %v6797_v0  ;;  %v7784_v26 = vld [vmem:[%s10585_s6 + $0xb4] sm:$0xf0]  ;;  %v6627_v27 = vld [vmem:[%s10585_s6 + $0x1a8] sm:$0xf]  ;;  %v6900_v31 = vor.u32 %v7884_v51, %v6899_v20 }
 0x227   : > { %3865 = vmatpush.bf16.msrb.mxu1 %v6576_v35  ;;  %3878 = vmatpush.bf16.msrb.mxu2 %v6704_v38  ;;  %v7816_v28 = vld [vmem:[%s10585_s6 + $0x1b4] sm:$0xf0]  ;;  %v6755_v29 = vld [vmem:[%s10585_s6 + $0x2a8] sm:$0xf]  ;;  %v6500_v33 = vor.u32 %v7784_v26, %v6499_v25 }
 0x228   : > { %3891 = vmatpush.bf16.msrb.mxu3 %v6832_v44  ;;  %3853 = vmatpush.bf16.msrb.mxu0 %v6432_v8  ;;  %v7848_v30 = vld [vmem:[%s10585_s6 + $0x2b4] sm:$0xf0]  ;;  %v6628_v37 = vor.u32 %v7816_v28, %v6627_v27  ;;  %v6883_v34 = vld [vmem:[%s10585_s6 + $0x3a8] sm:$0xf] }
 0x229   : > { %v7880_v35 = vld [vmem:[%s10585_s6 + $0x3b4] sm:$0xf0]  ;;  %v6483_v38 = vld [vmem:[%s10585_s6 + $0x88] sm:$0xf]  ;;  %v6756_v39 = vor.u32 %v7848_v30, %v6755_v29 }
 0x22a   : > { %v7780_v43 = vld [vmem:[%s10585_s6 + $0x94] sm:$0xf0]  ;;  %v6611_v41 = vld [vmem:[%s10585_s6 + $0x188] sm:$0xf]  ;;  %v6884_v44 = vor.u32 %v7880_v35, %v6883_v34  ;;  %v6661_v35 = vld [vmem:[%s10585_s6 + $0x1f8] sm:$0xf0] }
 0x22b   : > { %3866 = vmatpush.bf16.msrb.mxu1 %v6560_v32  ;;  %3879 = vmatpush.bf16.msrb.mxu2 %v6688_v46  ;;  %v7812_v10 = vld [vmem:[%s10585_s6 + $0x194] sm:$0xf0]  ;;  %v6739_v42 = vld [vmem:[%s10585_s6 + $0x288] sm:$0xf]  ;;  %v6484_v8 = vor.u32 %v7780_v43, %v6483_v38  ;;  %v7854_v38 = vld [vmem:[%s10585_s6 + $0x2ec] sm:$0xf] }
 0x22c   : > { %3892 = vmatpush.bf16.msrb.mxu3 %v6816_v58  ;;  %3854 = vmatpush.bf16.msrb.mxu0 %v6416_v59  ;;  %v7844_v7 = vld [vmem:[%s10585_s6 + $0x294] sm:$0xf0]  ;;  %v6612_v45 = vor.u32 %v7812_v10, %v6611_v41  ;;  %v6867_v60 = vld [vmem:[%s10585_s6 + $0x388] sm:$0xf] }
 0x22d   : > { %v7876_v14 = vld [vmem:[%s10585_s6 + $0x394] sm:$0xf0]  ;;  %v6467_v32 = vld [vmem:[%s10585_s6 + $0x68] sm:$0xf]  ;;  %v6740_v46 = vor.u32 %v7844_v7, %v6739_v42 }
 0x22e   : > { %v7776_v47 = vld [vmem:[%s10585_s6 + $0x74] sm:$0xf0]  ;;  %v6595_v48 = vld [vmem:[%s10585_s6 + $0x168] sm:$0xf]  ;;  %v6868_v53 = vor.u32 %v7876_v14, %v6867_v60 }
 0x22f   : > { %3867 = vmatpush.bf16.msrb.mxu1 %v6544_v40  ;;  %3880 = vmatpush.bf16.msrb.mxu2 %v6672_v62  ;;  %v7808_v49 = vld [vmem:[%s10585_s6 + $0x174] sm:$0xf0]  ;;  %v6723_v50 = vld [vmem:[%s10585_s6 + $0x268] sm:$0xf]  ;;  %v6468_v54 = vor.u32 %v7776_v47, %v6467_v32  ;;  %v7786_v32 = vld [vmem:[%s10585_s6 + $0xcc] sm:$0xf] }
 0x230   : > { %3899 = vmatpush.bf16.msra.mxu0 %v6532_v1  ;;  %3893 = vmatpush.bf16.msrb.mxu3 %v6800_v36  ;;  %v7840_v52 = vld [vmem:[%s10585_s6 + $0x274] sm:$0xf0]  ;;  %v6596_v55 = vor.u32 %v7808_v49, %v6595_v48  ;;  %v6851_v57 = vld [vmem:[%s10585_s6 + $0x368] sm:$0xf]  ;;  %v7818_v48 = vld [vmem:[%s10585_s6 + $0x1cc] sm:$0xf] }
 0x231   : > { %3855 = vmatmul.bf16.vlgmr.msrb.gmra.mxu0 %v9272_v16  ;;  %v7872_v58 = vld [vmem:[%s10585_s6 + $0x374] sm:$0xf0]  ;;  %v6451_v59 = vld [vmem:[%s10585_s6 + $0x48] sm:$0xf]  ;;  %v6724_v56 = vor.u32 %v7840_v52, %v6723_v50  ;;  %v6645_v49 = vld [vmem:[%s10585_s6 + $0x1d8] sm:$0xf0] }
 0x232   : > { %3881 = vmatmul.bf16.vlgmr.msrb.gmra.mxu2 %v9270_v15  ;;  %3868 = vmatmul.bf16.vlgmr.msrb.gmra.mxu1 %v9276_v24  ;;  %v7772_v61 = vld [vmem:[%s10585_s6 + $0x54] sm:$0xf0]  ;;  %v6579_v40 = vld [vmem:[%s10585_s6 + $0x148] sm:$0xf]  ;;  %v6852_v1 = vor.u32 %v7872_v58, %v6851_v57  ;;  %v7850_v52 = vld [vmem:[%s10585_s6 + $0x2cc] sm:$0xf]  ;;  %v6648_v58 = vor.u32 %v7818_v48, %v6645_v49 }
 0x233   : > { %3912 = vmatpush.bf16.msra.mxu1 %v6660_v2  ;;  %3925 = vmatpush.bf16.msra.mxu2 %v6788_v9  ;;  %v7804_v62 = vld [vmem:[%s10585_s6 + $0x154] sm:$0xf0]  ;;  %v6707_v63 = vld [vmem:[%s10585_s6 + $0x248] sm:$0xf]  ;;  %v6452_v2 = vor.u32 %v7772_v61, %v6451_v59  ;;  %v6901_v57 = vld [vmem:[%s10585_s6 + $0x3d8] sm:$0xf0] }
 0x234   : > { %3938 = vmatpush.bf16.msra.mxu3 %v6916_v17  ;;  %3900 = vmatpush.bf16.msra.mxu0 %v6516_v18  ;;  %v7836_v0 = vld [vmem:[%s10585_s6 + $0x254] sm:$0xf0]  ;;  %v6580_v4 = vor.u32 %v7804_v62, %v6579_v40  ;;  %v6835_v5 = vld [vmem:[%s10585_s6 + $0x348] sm:$0xf]  ;;  %v7782_v59 = vld [vmem:[%s10585_s6 + $0xac] sm:$0xf] }
 0x235   : > { %3894 = vmatmul.bf16.vlgmr.msrb.gmra.mxu3 %v9274_v23  ;;  %v7868_v6 = vld [vmem:[%s10585_s6 + $0x354] sm:$0xf0]  ;;  %v6435_v9 = vld [vmem:[%s10585_s6 + $0x28] sm:$0xf]  ;;  %v6708_v11 = vor.u32 %v7836_v0, %v6707_v63  ;;  %v7814_v40 = vld [vmem:[%s10585_s6 + $0x1ac] sm:$0xf] }
 0x236   : > { %v7768_v12 = vld [vmem:[%s10585_s6 + $0x34] sm:$0xf0]  ;;  %v6563_v21 = vld [vmem:[%s10585_s6 + $0x128] sm:$0xf]  ;;  %v6836_v17 = vor.u32 %v7868_v6, %v6835_v5  ;;  %v6629_v62 = vld [vmem:[%s10585_s6 + $0x1b8] sm:$0xf0] }
 0x237   : > { %3913 = vmatpush.bf16.msra.mxu1 %v6644_v19  ;;  %3926 = vmatpush.bf16.msra.mxu2 %v6772_v22  ;;  %v7800_v36 = vld [vmem:[%s10585_s6 + $0x134] sm:$0xf0]  ;;  %v6691_v13 = vld [vmem:[%s10585_s6 + $0x228] sm:$0xf]  ;;  %v6436_v20 = vor.u32 %v7768_v12, %v6435_v9  ;;  %v7846_v0 = vld [vmem:[%s10585_s6 + $0x2ac] sm:$0xf]  ;;  %v6632_v6 = vor.u32 %v7814_v40, %v6629_v62 }
 0x238   : > { %3939 = vmatpush.bf16.msra.mxu3 %v6900_v31  ;;  %3901 = vmatpush.bf16.msra.mxu0 %v6500_v33  ;;  %v7832_v3 = vld [vmem:[%s10585_s6 + $0x234] sm:$0xf0]  ;;  %v6819_v18 = vld [vmem:[%s10585_s6 + $0x328] sm:$0xf]  ;;  %v6564_v51 = vor.u32 %v7800_v36, %v6563_v21  ;;  %v7790_v31 = vld [vmem:[%s10585_s6 + $0xec] sm:$0xf] }
 0x239   : > { %v7864_v19 = vld [vmem:[%s10585_s6 + $0x334] sm:$0xf0]  ;;  %v6419_v25 = vld [vmem:[%s10585_s6 + $0x8] sm:$0xf]  ;;  %v6692_v27 = vor.u32 %v7832_v3, %v6691_v13  ;;  %v6533_v33 = vld [vmem:[%s10585_s6 + $0xf8] sm:$0xf0] }
 0x23a   : > { %v7764_v22 = vld [vmem:[%s10585_s6 + $0x14] sm:$0xf0]  ;;  %v6547_v26 = vld [vmem:[%s10585_s6 + $0x108] sm:$0xf]  ;;  %v6820_v34 = vor.u32 %v7864_v19, %v6819_v18  ;;  %v6885_v5 = vld [vmem:[%s10585_s6 + $0x3b8] sm:$0xf0] }
 0x23b   : > { %3914 = vmatpush.bf16.msra.mxu1 %v6628_v37  ;;  %3927 = vmatpush.bf16.msra.mxu2 %v6756_v39  ;;  %v7796_v28 = vld [vmem:[%s10585_s6 + $0x114] sm:$0xf0]  ;;  %v6675_v29 = vld [vmem:[%s10585_s6 + $0x208] sm:$0xf]  ;;  %v7822_v37 = vld [vmem:[%s10585_s6 + $0x1ec] sm:$0xf]  ;;  %v6420_v43 = vor.u32 %v7764_v22, %v6419_v25 }
 0x23c   : > { %3940 = vmatpush.bf16.msra.mxu3 %v6884_v44  ;;  %3902 = vmatpush.bf16.msra.mxu0 %v6484_v8  ;;  %v7828_v30 = vld [vmem:[%s10585_s6 + $0x214] sm:$0xf0]  ;;  %v6789_v39 = vld [vmem:[%s10585_s6 + $0x2f8] sm:$0xf0]  ;;  %v6548_v41 = vor.u32 %v7796_v28, %v6547_v26  ;;  %v6803_v10 = vld [vmem:[%s10585_s6 + $0x308] sm:$0xf]  ;;  %v6536_v44 = vor.u32 %v7790_v31, %v6533_v33  ;;  %v6664_v60 = vor.u32 %v7822_v37, %v6661_v35 }
 0x23d   : > { %v7860_v42 = vld [vmem:[%s10585_s6 + $0x314] sm:$0xf0]  ;;  %v6676_v7 = vor.u32 %v7828_v30, %v6675_v29  ;;  %v7886_v8 = vld [vmem:[%s10585_s6 + $0x3ec] sm:$0xf]  ;;  %v6792_v14 = vor.u32 %v7854_v38, %v6789_v39  ;;  %v6613_v36 = vld [vmem:[%s10585_s6 + $0x198] sm:$0xf0] }
 0x23e   : > { %v6804_v47 = vor.u32 %v7860_v42, %v6803_v10  ;;  %v7778_v9 = vld [vmem:[%s10585_s6 + $0x8c] sm:$0xf]  ;;  %v6469_v22 = vld [vmem:[%s10585_s6 + $0x78] sm:$0xf0] }
 0x23f   : > { %3915 = vmatpush.bf16.msra.mxu1 %v6612_v45  ;;  %3928 = vmatpush.bf16.msra.mxu2 %v6740_v46  ;;  %v6917_v45 = vld [vmem:[%s10585_s6 + $0x3f8] sm:$0xf0]  ;;  %v7810_v21 = vld [vmem:[%s10585_s6 + $0x18c] sm:$0xf] }
 0x240   : > { %3941 = vmatpush.bf16.msra.mxu3 %v6868_v53  ;;  %3903 = vmatpush.bf16.msra.mxu0 %v6468_v54  ;;  %v6517_v46 = vld [vmem:[%s10585_s6 + $0xd8] sm:$0xf0]  ;;  %v6920_v50 = vor.u32 %v7886_v8, %v6917_v45  ;;  %v7842_v3 = vld [vmem:[%s10585_s6 + $0x28c] sm:$0xf] }
 0x241   : > { %v6773_v53 = vld [vmem:[%s10585_s6 + $0x2d8] sm:$0xf0]  ;;  %v6520_v54 = vor.u32 %v7786_v32, %v6517_v46  ;;  %v7874_v19 = vld [vmem:[%s10585_s6 + $0x38c] sm:$0xf] }
 0x242   : > { %v6776_v61 = vor.u32 %v7850_v52, %v6773_v53  ;;  %v7774_v25 = vld [vmem:[%s10585_s6 + $0x6c] sm:$0xf]  ;;  %v6597_v28 = vld [vmem:[%s10585_s6 + $0x178] sm:$0xf0] }
 0x243   : > { %3916 = vmatpush.bf16.msra.mxu1 %v6596_v55  ;;  %3929 = vmatpush.bf16.msra.mxu2 %v6724_v56  ;;  %v7882_v55 = vld [vmem:[%s10585_s6 + $0x3cc] sm:$0xf]  ;;  %v6501_v56 = vld [vmem:[%s10585_s6 + $0xb8] sm:$0xf0]  ;;  %v6472_v33 = vor.u32 %v7774_v25, %v6469_v22  ;;  %v7003_v22 = vld [vmem:[%s10587_s8 + $0xa0] sm:$0xf] }
 0x244   : > { %3942 = vmatpush.bf16.msra.mxu3 %v6852_v1  ;;  %3904 = vmatpush.bf16.msra.mxu0 %v6452_v2  ;;  %v6904_v63 = vor.u32 %v7882_v55, %v6901_v57  ;;  %v6757_v1 = vld [vmem:[%s10585_s6 + $0x2b8] sm:$0xf0]  ;;  %v6504_v2 = vor.u32 %v7782_v59, %v6501_v56  ;;  %v7838_v30 = vld [vmem:[%s10585_s6 + $0x26c] sm:$0xf] }
 0x245   : > { %v6760_v12 = vor.u32 %v7846_v0, %v6757_v1  ;;  %v6725_v31 = vld [vmem:[%s10585_s6 + $0x278] sm:$0xf0]  ;;  %v7870_v37 = vld [vmem:[%s10585_s6 + $0x36c] sm:$0xf]  ;;  %v7035_v0 = vld [vmem:[%s10587_s8 + $0xe0] sm:$0xf] }
 0x246   : > { %v7770_v38 = vld [vmem:[%s10585_s6 + $0x4c] sm:$0xf]  ;;  %v6453_v39 = vld [vmem:[%s10585_s6 + $0x58] sm:$0xf0]  ;;  %v7919_v1 = vld [vmem:[%s10587_s8 + $0xec] sm:$0xf0] }
 0x247   : > { %3917 = vmatpush.bf16.msra.mxu1 %v6580_v4  ;;  %3930 = vmatpush.bf16.msra.mxu2 %v6708_v11  ;;  %v7878_v4 = vld [vmem:[%s10585_s6 + $0x3ac] sm:$0xf]  ;;  %v6485_v11 = vld [vmem:[%s10585_s6 + $0x98] sm:$0xf0]  ;;  %v6456_v8 = vor.u32 %v7770_v38, %v6453_v39  ;;  %v7099_v38 = vld [vmem:[%s10587_s8 + $0x160] sm:$0xf] }
 0x248   : > { %3943 = vmatpush.bf16.msra.mxu3 %v6836_v17  ;;  %3905 = vmatpush.bf16.msra.mxu0 %v6436_v20  ;;  %v6888_v13 = vor.u32 %v7878_v4, %v6885_v5  ;;  %v6741_v17 = vld [vmem:[%s10585_s6 + $0x298] sm:$0xf0]  ;;  %v6488_v18 = vor.u32 %v7778_v9, %v6485_v11  ;;  %v7866_v45 = vld [vmem:[%s10585_s6 + $0x34c] sm:$0xf]  ;;  %v7163_v5 = vld [vmem:[%s10587_s8 + $0x1e0] sm:$0xf] }
 0x249   : > { %v6869_v20 = vld [vmem:[%s10585_s6 + $0x398] sm:$0xf0]  ;;  %v6744_v26 = vor.u32 %v7842_v3, %v6741_v17  ;;  %v7766_v32 = vld [vmem:[%s10585_s6 + $0x2c] sm:$0xf]  ;;  %v7019_v3 = vld [vmem:[%s10587_s8 + $0xc0] sm:$0xf] }
 0x24a   : > { %v6872_v29 = vor.u32 %v7874_v19, %v6869_v20  ;;  %v6581_v10 = vld [vmem:[%s10585_s6 + $0x158] sm:$0xf0]  ;;  %v7798_v48 = vld [vmem:[%s10585_s6 + $0x12c] sm:$0xf]  ;;  %v7915_v17 = vld [vmem:[%s10587_s8 + $0xcc] sm:$0xf0] }
 0x24b   : > { %3918 = vmatpush.bf16.msra.mxu1 %v6564_v51  ;;  %3931 = vmatpush.bf16.msra.mxu2 %v6692_v27  ;;  %v6616_v51 = vor.u32 %v7810_v21, %v6613_v36  ;;  %v7806_v27 = vld [vmem:[%s10585_s6 + $0x16c] sm:$0xf]  ;;  %v6437_v46 = vld [vmem:[%s10585_s6 + $0x38] sm:$0xf0]  ;;  %v7036_v36 = vor.u32 %v7919_v1, %v7035_v0  ;;  %v7147_v20 = vld [vmem:[%s10587_s8 + $0x1c0] sm:$0xf]  ;;  %v7020_v25 = vor.u32 %v7915_v17, %v7019_v3 }
 0x24c   : > { %3944 = vmatpush.bf16.msra.mxu3 %v6820_v34  ;;  %3906 = vmatpush.bf16.msra.mxu0 %v6420_v43  ;;  %v6853_v34 = vld [vmem:[%s10585_s6 + $0x378] sm:$0xf0]  ;;  %v6600_v35 = vor.u32 %v7806_v27, %v6597_v28  ;;  %v6728_v43 = vor.u32 %v7838_v30, %v6725_v31  ;;  %v7830_v52 = vld [vmem:[%s10585_s6 + $0x22c] sm:$0xf]  ;;  %v7131_v28 = vld [vmem:[%s10587_s8 + $0x1a0] sm:$0xf] }
 0x24d   : > { %v6856_v42 = vor.u32 %v7870_v37, %v6853_v34  ;;  %v6565_v49 = vld [vmem:[%s10585_s6 + $0x138] sm:$0xf0]  ;;  %v7862_v55 = vld [vmem:[%s10585_s6 + $0x32c] sm:$0xf]  ;;  %v7907_v31 = vld [vmem:[%s10587_s8 + $0x8c] sm:$0xf0] }
 0x24e   : > { %v6693_v53 = vld [vmem:[%s10585_s6 + $0x238] sm:$0xf0]  ;;  %v6568_v59 = vor.u32 %v7798_v48, %v6565_v49  ;;  %v7858_v11 = vld [vmem:[%s10585_s6 + $0x30c] sm:$0xf]  ;;  %v6971_v37 = vld [vmem:[%s10587_s8 + $0x60] sm:$0xf] }
 0x24f   : > { %3919 = vmatpush.bf16.msra.mxu1 %v6548_v41  ;;  %3932 = vmatpush.bf16.msra.mxu2 %v6676_v7  ;;  %v7802_v41 = vld [vmem:[%s10585_s6 + $0x14c] sm:$0xf]  ;;  %v6821_v57 = vld [vmem:[%s10585_s6 + $0x338] sm:$0xf0]  ;;  %v6696_v62 = vor.u32 %v7830_v52, %v6693_v53  ;;  %v7903_v34 = vld [vmem:[%s10587_s8 + $0x6c] sm:$0xf0] }
 0x250   : > { %3951 = vmatpush.bf16.msrb.mxu0 %v6536_v44  ;;  %3945 = vmatpush.bf16.msra.mxu3 %v6804_v47  ;;  %v7834_v7 = vld [vmem:[%s10585_s6 + $0x24c] sm:$0xf]  ;;  %v6709_v44 = vld [vmem:[%s10585_s6 + $0x258] sm:$0xf0]  ;;  %v7935_v39 = vld [vmem:[%s10587_s8 + $0x16c] sm:$0xf0] }
 0x251   : > { %3907 = vmatmul.bf16.vlgmr.msra.gmra.mxu0 %v9272_v16  ;;  %v6712_v47 = vor.u32 %v7834_v7, %v6709_v44  ;;  %v6421_v56 = vld [vmem:[%s10585_s6 + $0x18] sm:$0xf0]  ;;  %v6939_v44 = vld [vmem:[%s10587_s8 + $0x20] sm:$0xf]  ;;  %v7917_v48 = vld [vmem:[%s10587_s8 + $0xe4] sm:$0xf] }
 0x252   : > { %3933 = vmatmul.bf16.vlgmr.msra.gmra.mxu2 %v9270_v15  ;;  %3920 = vmatmul.bf16.vlgmr.msra.gmra.mxu1 %v9276_v24  ;;  %v6549_v40 = vld [vmem:[%s10585_s6 + $0x118] sm:$0xf0]  ;;  %v7037_v49 = vld [vmem:[%s10587_s8 + $0xf0] sm:$0xf0]  ;;  %v7067_v52 = vld [vmem:[%s10587_s8 + $0x120] sm:$0xf] }
 0x253   : > { %3964 = vmatpush.bf16.msrb.mxu1 %v6664_v60  ;;  %3977 = vmatpush.bf16.msrb.mxu2 %v6792_v14  ;;  %v6837_v60 = vld [vmem:[%s10585_s6 + $0x358] sm:$0xf0]  ;;  %v6584_v14 = vor.u32 %v7802_v41, %v6581_v10  ;;  %v6955_v41 = vld [vmem:[%s10587_s8 + $0x40] sm:$0xf]  ;;  %v7899_v10 = vld [vmem:[%s10587_s8 + $0x4c] sm:$0xf0] }
 0x254   : > { %3990 = vmatpush.bf16.msrb.mxu3 %v6920_v50  ;;  %3952 = vmatpush.bf16.msrb.mxu0 %v6520_v54  ;;  %v6840_v50 = vor.u32 %v7866_v45, %v6837_v60  ;;  %v6440_v54 = vor.u32 %v7766_v32, %v6437_v46  ;;  %v6677_v4 = vld [vmem:[%s10585_s6 + $0x218] sm:$0xf0]  ;;  %v6956_v7 = vor.u32 %v7899_v10, %v6955_v41  ;;  %v7083_v60 = vld [vmem:[%s10587_s8 + $0x140] sm:$0xf]  ;;  %v7891_v46 = vld [vmem:[%s10587_s8 + $0xc] sm:$0xf0] }
 0x255   : > { %3946 = vmatmul.bf16.vlgmr.msra.gmra.mxu3 %v9274_v23  ;;  %v6923_v32 = vld [vmem:[%s10587_s8] sm:$0xf]  ;;  %v7927_v53 = vld [vmem:[%s10587_s8 + $0x12c] sm:$0xf0]  ;;  %v7949_v0 = vld [vmem:[%s10587_s8 + $0x1e4] sm:$0xf] }
 0x256   : > { %v7909_v1 = vld [vmem:[%s10587_s8 + $0xa4] sm:$0xf]  ;;  %v7149_v17 = vld [vmem:[%s10587_s8 + $0x1d0] sm:$0xf0] }
 0x257   : > { %3965 = vmatpush.bf16.msrb.mxu1 %v6648_v58  ;;  %3978 = vmatpush.bf16.msrb.mxu2 %v6776_v61  ;;  %v7762_v58 = vld [vmem:[%s10585_s6 + $0xc] sm:$0xf]  ;;  %v7933_v41 = vld [vmem:[%s10587_s8 + $0x164] sm:$0xf] }
 0x258   : > { %3991 = vmatpush.bf16.msrb.mxu3 %v6904_v63  ;;  %3953 = vmatpush.bf16.msrb.mxu0 %v6504_v2  ;;  %v7794_v61 = vld [vmem:[%s10585_s6 + $0x10c] sm:$0xf]  ;;  %v6824_v2 = vor.u32 %v7862_v55, %v6821_v57  ;;  %v6424_v9 = vor.u32 %v7762_v58, %v6421_v56  ;;  %v7068_v55 = vor.u32 %v7927_v53, %v7067_v52  ;;  %v7913_v57 = vld [vmem:[%s10587_s8 + $0xc4] sm:$0xf]  ;;  %v7021_v58 = vld [vmem:[%s10587_s8 + $0xd0] sm:$0xf0] }
 0x259   : > { %v7826_v63 = vld [vmem:[%s10585_s6 + $0x20c] sm:$0xf]  ;;  %v6552_v21 = vor.u32 %v7794_v61, %v6549_v40  ;;  %v7923_v56 = vld [vmem:[%s10587_s8 + $0x10c] sm:$0xf0]  ;;  %v7024_v61 = vor.u32 %v7913_v57, %v7021_v58  ;;  %v7893_v10 = vld [vmem:[%s10587_s8 + $0x24] sm:$0xf] }
 0x25a   : > { %v7195_v58 = vld [vmem:[%s10587_s8 + $0x220] sm:$0xf] }
 0x25b   : > { %3966 = vmatpush.bf16.msrb.mxu1 %v6632_v6  ;;  %3979 = vmatpush.bf16.msrb.mxu2 %v6760_v12  ;;  %v7951_v6 = vld [vmem:[%s10587_s8 + $0x1ec] sm:$0xf0]  ;;  %v6805_v12 = vld [vmem:[%s10585_s6 + $0x318] sm:$0xf0] }
 0x25c   : > { %3992 = vmatpush.bf16.msrb.mxu3 %v6888_v13  ;;  %3954 = vmatpush.bf16.msrb.mxu0 %v6488_v18  ;;  %v6680_v13 = vor.u32 %v7826_v63, %v6677_v4  ;;  %v7164_v18 = vor.u32 %v7951_v6, %v7163_v5  ;;  %v6808_v19 = vor.u32 %v7858_v11, %v6805_v12  ;;  %v7983_v63 = vld [vmem:[%s10587_s8 + $0x2ec] sm:$0xf0]  ;;  %v7165_v5 = vld [vmem:[%s10587_s8 + $0x1f0] sm:$0xf0]  ;;  %v7275_v11 = vld [vmem:[%s10587_s8 + $0x2c0] sm:$0xf] }
 0x25d   : > { %v7168_v6 = vor.u32 %v7949_v0, %v7165_v5  ;;  %v7979_v12 = vld [vmem:[%s10587_s8 + $0x2cc] sm:$0xf0] }
 0x25e   : > { %v7276_v3 = vor.u32 %v7979_v12, %v7275_v11  ;;  %v7053_v11 = vld [vmem:[%s10587_s8 + $0x110] sm:$0xf0]  ;;  %v7419_v12 = vld [vmem:[%s10587_s8 + $0x3e0] sm:$0xf] }
 0x25f   : > { %3967 = vmatpush.bf16.msrb.mxu1 %v6616_v51  ;;  %3980 = vmatpush.bf16.msrb.mxu2 %v6744_v26  ;;  %v7947_v51 = vld [vmem:[%s10587_s8 + $0x1cc] sm:$0xf0] }
 0x260   : > { %3993 = vmatpush.bf16.msrb.mxu3 %v6872_v29  ;;  %3955 = vmatpush.bf16.msrb.mxu0 %v6472_v33  ;;  %v7911_v26 = vld [vmem:[%s10587_s8 + $0xac] sm:$0xf0]  ;;  %v7148_v27 = vor.u32 %v7947_v51, %v7147_v20  ;;  %v7259_v20 = vld [vmem:[%s10587_s8 + $0x2a0] sm:$0xf] }
 0x261   : > { %v7943_v29 = vld [vmem:[%s10587_s8 + $0x1ac] sm:$0xf0]  ;;  %v7004_v30 = vor.u32 %v7911_v26, %v7003_v22  ;;  %v7901_v22 = vld [vmem:[%s10587_s8 + $0x64] sm:$0xf]  ;;  %v6973_v26 = vld [vmem:[%s10587_s8 + $0x70] sm:$0xf0] }
 0x262   : > { %v7132_v33 = vor.u32 %v7943_v29, %v7131_v28  ;;  %v7975_v51 = vld [vmem:[%s10587_s8 + $0x2ac] sm:$0xf0]  ;;  %v7133_v28 = vld [vmem:[%s10587_s8 + $0x1b0] sm:$0xf0] }
 0x263   : > { %3968 = vmatpush.bf16.msrb.mxu1 %v6600_v35  ;;  %3981 = vmatpush.bf16.msrb.mxu2 %v6728_v43  ;;  %v6972_v43 = vor.u32 %v7903_v34, %v6971_v37  ;;  %v7117_v37 = vld [vmem:[%s10587_s8 + $0x190] sm:$0xf0] }
 0x264   : > { %3994 = vmatpush.bf16.msrb.mxu3 %v6856_v42  ;;  %3956 = vmatpush.bf16.msrb.mxu0 %v6456_v8  ;;  %v7100_v42 = vor.u32 %v7935_v39, %v7099_v38  ;;  %v7895_v8 = vld [vmem:[%s10587_s8 + $0x2c] sm:$0xf0]  ;;  %v7227_v39 = vld [vmem:[%s10587_s8 + $0x260] sm:$0xf] }
 0x265   : > { %v6940_v45 = vor.u32 %v7895_v8, %v6939_v44  ;;  %v7101_v44 = vld [vmem:[%s10587_s8 + $0x170] sm:$0xf0] }
 0x266   : > { %v7104_v8 = vor.u32 %v7933_v41, %v7101_v44  ;;  %v7973_v41 = vld [vmem:[%s10587_s8 + $0x2a4] sm:$0xf]  ;;  %v7011_v44 = vld [vmem:[%s10587_s8 + $0xa8] sm:$0xf] }
 0x267   : > { %3969 = vmatpush.bf16.msrb.mxu1 %v6584_v14  ;;  %3982 = vmatpush.bf16.msrb.mxu2 %v6712_v47  ;;  %v7931_v14 = vld [vmem:[%s10587_s8 + $0x14c] sm:$0xf0] }
 0x268   : > { %3995 = vmatpush.bf16.msrb.mxu3 %v6840_v50  ;;  %3957 = vmatpush.bf16.msrb.mxu0 %v6440_v54  ;;  %v7084_v47 = vor.u32 %v7931_v14, %v7083_v60  ;;  %v6924_v50 = vor.u32 %v7891_v46, %v6923_v32  ;;  %v7040_v54 = vor.u32 %v7917_v48, %v7037_v49  ;;  %v7211_v14 = vld [vmem:[%s10587_s8 + $0x240] sm:$0xf]  ;;  %v7963_v32 = vld [vmem:[%s10587_s8 + $0x24c] sm:$0xf0]  ;;  %v7929_v46 = vld [vmem:[%s10587_s8 + $0x144] sm:$0xf] }
 0x269   : > { %v6925_v48 = vld [vmem:[%s10587_s8 + $0x10] sm:$0xf0]  ;;  %v7212_v49 = vor.u32 %v7963_v32, %v7211_v14 }
 0x26b   : > { %3970 = vmatpush.bf16.msrb.mxu1 %v6568_v59  ;;  %3983 = vmatpush.bf16.msrb.mxu2 %v6696_v62  ;;  %v7051_v59 = vld [vmem:[%s10587_s8 + $0x100] sm:$0xf] }
 0x26c   : > { %3996 = vmatpush.bf16.msrb.mxu3 %v6824_v2  ;;  %3958 = vmatpush.bf16.msrb.mxu0 %v6424_v9  ;;  %v7052_v40 = vor.u32 %v7923_v56, %v7051_v59  ;;  %v7291_v62 = vld [vmem:[%s10587_s8 + $0x2e0] sm:$0xf]  ;;  %v7005_v2 = vld [vmem:[%s10587_s8 + $0xb0] sm:$0xf0]  ;;  %v7959_v59 = vld [vmem:[%s10587_s8 + $0x22c] sm:$0xf0] }
 0x26d   : > { %v7292_v4 = vor.u32 %v7983_v63, %v7291_v62  ;;  %v7008_v9 = vor.u32 %v7909_v1, %v7005_v2  ;;  %v7925_v56 = vld [vmem:[%s10587_s8 + $0x124] sm:$0xf]  ;;  %v7069_v62 = vld [vmem:[%s10587_s8 + $0x130] sm:$0xf0]  ;;  %v7179_v1 = vld [vmem:[%s10587_s8 + $0x200] sm:$0xf] }
 0x26e   : > { %v7072_v63 = vor.u32 %v7925_v56, %v7069_v62  ;;  %v7955_v2 = vld [vmem:[%s10587_s8 + $0x20c] sm:$0xf0]  ;;  %v7965_v56 = vld [vmem:[%s10587_s8 + $0x264] sm:$0xf] }
 0x26f   : > { %3971 = vmatpush.bf16.msrb.mxu1 %v6552_v21  ;;  %3984 = vmatpush.bf16.msrb.mxu2 %v6680_v13  ;;  %v7945_v21 = vld [vmem:[%s10587_s8 + $0x1c4] sm:$0xf]  ;;  %v6989_v13 = vld [vmem:[%s10587_s8 + $0x90] sm:$0xf0] }
 0x270   : > { %4789 = vmatpush.bf16.msra.mxu0 %v7036_v36  ;;  %3997 = vmatpush.bf16.msrb.mxu3 %v6808_v19  ;;  %v7905_v36 = vld [vmem:[%s10587_s8 + $0x84] sm:$0xf] }
 0x271   : > { %3959 = vmatmul.bf16.vlgmr.msrb.gmra.mxu0 %v9272_v16  ;;  %v6987_v16 = vld [vmem:[%s10587_s8 + $0x80] sm:$0xf]  ;;  %v6992_v19 = vor.u32 %v7905_v36, %v6989_v13 }
 0x272   : > { %3972 = vmatmul.bf16.vlgmr.msrb.gmra.mxu1 %v9276_v24  ;;  %3985 = vmatmul.bf16.vlgmr.msrb.gmra.mxu2 %v9270_v15  ;;  %v7115_v24 = vld [vmem:[%s10587_s8 + $0x180] sm:$0xf]  ;;  %v7939_v15 = vld [vmem:[%s10587_s8 + $0x18c] sm:$0xf0] }
 0x273   : > { %4802 = vmatpush.bf16.msra.mxu1 %v7164_v18  ;;  %3998 = vmatmul.bf16.vlgmr.msrb.gmra.mxu3 %v9274_v23  ;;  %v6988_v23 = vor.u32 %v7907_v31, %v6987_v16  ;;  %v7116_v35 = vor.u32 %v7939_v15, %v7115_v24  ;;  %v7152_v18 = vor.u32 %v7945_v21, %v7149_v17  ;;  %v7243_v16 = vld [vmem:[%s10587_s8 + $0x280] sm:$0xf]  ;;  %v7971_v31 = vld [vmem:[%s10587_s8 + $0x28c] sm:$0xf0]  ;;  %v7897_v24 = vld [vmem:[%s10587_s8 + $0x44] sm:$0xf] }
 0x274   : > { %4790 = vmatpush.bf16.msra.mxu0 %v7020_v25  ;;  %4815 = vmatpush.bf16.msra.mxu2 %v7292_v4  ;;  %v7941_v25 = vld [vmem:[%s10587_s8 + $0x1a4] sm:$0xf]  ;;  %v6957_v15 = vld [vmem:[%s10587_s8 + $0x50] sm:$0xf0]  ;;  %v8015_v21 = vld [vmem:[%s10587_s8 + $0x3ec] sm:$0xf0] }
 0x275   : > { %v7136_v29 = vor.u32 %v7941_v25, %v7133_v28  ;;  %v6960_v38 = vor.u32 %v7897_v24, %v6957_v15  ;;  %v7921_v4 = vld [vmem:[%s10587_s8 + $0x104] sm:$0xf]  ;;  %v8011_v28 = vld [vmem:[%s10587_s8 + $0x3cc] sm:$0xf0]  ;;  %v7027_v24 = vld [vmem:[%s10587_s8 + $0xc8] sm:$0xf] }
 0x276   : > { %v7056_v13 = vor.u32 %v7921_v4, %v7053_v11  ;;  %v7981_v17 = vld [vmem:[%s10587_s8 + $0x2e4] sm:$0xf]  ;;  %v7916_v15 = vld [vmem:[%s10587_s8 + $0xd4] sm:$0xf0]  ;;  %v7339_v11 = vld [vmem:[%s10587_s8 + $0x340] sm:$0xf] }
 0x277   : > { %4803 = vmatpush.bf16.msra.mxu1 %v7148_v27  ;;  %v7260_v27 = vor.u32 %v7975_v51, %v7259_v20  ;;  %v7043_v20 = vld [vmem:[%s10587_s8 + $0xe8] sm:$0xf]  ;;  %v7920_v51 = vld [vmem:[%s10587_s8 + $0xf4] sm:$0xf0] }
 0x278   : > { %4791 = vmatpush.bf16.msra.mxu0 %v7004_v30  ;;  %4816 = vmatpush.bf16.msra.mxu2 %v7276_v3  ;;  %v6976_v30 = vor.u32 %v7901_v22, %v6973_v26  ;;  %v7420_v3 = vor.u32 %v8015_v21, %v7419_v12  ;;  %v7995_v12 = vld [vmem:[%s10587_s8 + $0x34c] sm:$0xf0]  ;;  %v7961_v21 = vld [vmem:[%s10587_s8 + $0x244] sm:$0xf] }
 0x27a   : > { %4828 = vmatpush.bf16.msra.mxu3 %v7420_v3  ;;  %v7171_v3 = vld [vmem:[%s10587_s8 + $0x1e8] sm:$0xf] }
 0x27b   : > { %4804 = vmatpush.bf16.msra.mxu1 %v7132_v33  ;;  %v7937_v33 = vld [vmem:[%s10587_s8 + $0x184] sm:$0xf] }
 0x27c   : > { %4792 = vmatpush.bf16.msra.mxu0 %v6988_v23  ;;  %4817 = vmatpush.bf16.msra.mxu2 %v7260_v27  ;;  %v7244_v23 = vor.u32 %v7971_v31, %v7243_v16  ;;  %v7120_v34 = vor.u32 %v7937_v33, %v7117_v37  ;;  %v7403_v27 = vld [vmem:[%s10587_s8 + $0x3c0] sm:$0xf]  ;;  %v7977_v16 = vld [vmem:[%s10587_s8 + $0x2c4] sm:$0xf]  ;;  %v7277_v31 = vld [vmem:[%s10587_s8 + $0x2d0] sm:$0xf0] }
 0x27f   : > { %4805 = vmatpush.bf16.msra.mxu1 %v7116_v35  ;;  %v9933_v35 = vld [vmem:[%s10586_s7] sm:$0xf] }
 0x280   : > { %4793 = vmatpush.bf16.msra.mxu0 %v6972_v43  ;;  %4818 = vmatpush.bf16.msra.mxu2 %v7244_v23  ;;  %v7967_v43 = vld [vmem:[%s10587_s8 + $0x26c] sm:$0xf0]  ;;  %v7280_v23 = vor.u32 %v7977_v16, %v7277_v31  ;;  %v7155_v31 = vld [vmem:[%s10587_s8 + $0x1c8] sm:$0xf] }
 0x283   : > { %4806 = vmatpush.bf16.msra.mxu1 %v7100_v42  ;;  %v6941_v42 = vld [vmem:[%s10587_s8 + $0x30] sm:$0xf0] }
 0x284   : > { %4794 = vmatpush.bf16.msra.mxu0 %v6956_v7  ;;  %v7228_v7 = vor.u32 %v7967_v43, %v7227_v39  ;;  %v6944_v60 = vor.u32 %v7893_v10, %v6941_v42  ;;  %v7387_v39 = vld [vmem:[%s10587_s8 + $0x3a0] sm:$0xf]  ;;  %v8007_v43 = vld [vmem:[%s10587_s8 + $0x3ac] sm:$0xf0]  ;;  %v7028_v10 = vor.u32 %v7916_v15, %v7027_v24  ;;  %v7948_v24 = vld [vmem:[%s10587_s8 + $0x1d4] sm:$0xf0] }
 0x285   : > { %v7388_v42 = vor.u32 %v8007_v43, %v7387_v39  ;;  %v6931_v43 = vld [vmem:[%s10587_s8 + $0x8] sm:$0xf] }
 0x286   : > { %4819 = vmatpush.bf16.msra.mxu2 %v7228_v7  ;;  %v7261_v7 = vld [vmem:[%s10587_s8 + $0x2b0] sm:$0xf0] }
 0x287   : > { %4807 = vmatpush.bf16.msra.mxu1 %v7084_v47  ;;  %v7889_v47 = vld [vmem:[%s10587_s8 + $0x4] sm:$0xf] }
 0x288   : > { %4795 = vmatpush.bf16.msra.mxu0 %v6940_v45  ;;  %v3147_v45 = vperm.slane %v9933_v35, 0  ;;  %v6928_v57 = vor.u32 %v7889_v47, %v6925_v48  ;;  %v8003_v47 = vld [vmem:[%s10587_s8 + $0x38c] sm:$0xf0]  ;;  %v7969_v48 = vld [vmem:[%s10587_s8 + $0x284] sm:$0xf] }
 0x28a   : > { %4820 = vmatpush.bf16.msra.mxu2 %v7212_v49 }
 0x28b   : > { %4808 = vmatpush.bf16.msra.mxu1 %v7068_v55 }
 0x28c   : > { %4796 = vmatpush.bf16.msra.mxu0 %v6924_v50  ;;  %v7085_v50 = vld [vmem:[%s10587_s8 + $0x150] sm:$0xf0] }
 0x28d   : > { %v7088_v53 = vor.u32 %v7929_v46, %v7085_v50  ;;  %v7371_v46 = vld [vmem:[%s10587_s8 + $0x380] sm:$0xf] }
 0x28e   : > { %v7372_v50 = vor.u32 %v8003_v47, %v7371_v46  ;;  %v7892_v46 = vld [vmem:[%s10587_s8 + $0x14] sm:$0xf0] }
 0x28f   : > { %4809 = vmatpush.bf16.msra.mxu1 %v7052_v40  ;;  %v7196_v40 = vor.u32 %v7959_v59, %v7195_v58  ;;  %v7355_v58 = vld [vmem:[%s10587_s8 + $0x360] sm:$0xf]  ;;  %v7999_v59 = vld [vmem:[%s10587_s8 + $0x36c] sm:$0xf0] }
 0x290   : > { %4841 = vmatpush.bf16.msrb.mxu0 %v7040_v54  ;;  %v7356_v62 = vor.u32 %v7999_v59, %v7355_v58  ;;  %v7940_v58 = vld [vmem:[%s10587_s8 + $0x194] sm:$0xf0]  ;;  %v8009_v59 = vld [vmem:[%s10587_s8 + $0x3c4] sm:$0xf] }
 0x291   : > { %4821 = vmatpush.bf16.msra.mxu2 %v7196_v40 }
 0x293   : > { %4854 = vmatpush.bf16.msrb.mxu1 %v7168_v6 }
 0x294   : > { %4842 = vmatpush.bf16.msrb.mxu0 %v7024_v61 }
 0x297   : > { %4855 = vmatpush.bf16.msrb.mxu1 %v7152_v18  ;;  %v7293_v18 = vld [vmem:[%s10587_s8 + $0x2f0] sm:$0xf0] }
 0x298   : > { %4843 = vmatpush.bf16.msrb.mxu0 %v7008_v9  ;;  %v7180_v9 = vor.u32 %v7955_v2, %v7179_v1  ;;  %v7296_v22 = vor.u32 %v7981_v17, %v7293_v18  ;;  %v7904_v1 = vld [vmem:[%s10587_s8 + $0x74] sm:$0xf0]  ;;  %v7340_v18 = vor.u32 %v7995_v12, %v7339_v11  ;;  %v7910_v11 = vld [vmem:[%s10587_s8 + $0xac] sm:$0xf] }
 0x299   : > { %v7952_v17 = vld [vmem:[%s10587_s8 + $0x1f4] sm:$0xf0] }
 0x29a   : > { %4822 = vmatpush.bf16.msra.mxu2 %v7180_v9 }
 0x29b   : > { %4856 = vmatpush.bf16.msrb.mxu1 %v7136_v29  ;;  %v7044_v29 = vor.u32 %v7920_v51, %v7043_v20  ;;  %v6963_v20 = vld [vmem:[%s10587_s8 + $0x48] sm:$0xf]  ;;  %v7900_v51 = vld [vmem:[%s10587_s8 + $0x54] sm:$0xf0] }
 0x29c   : > { %4844 = vmatpush.bf16.msrb.mxu0 %v6992_v19  ;;  %v6964_v16 = vor.u32 %v7900_v51, %v6963_v20  ;;  %v7932_v20 = vld [vmem:[%s10587_s8 + $0x154] sm:$0xf0] }
 0x29e   : > { %v3804_v52 = vpop.f32.mrf.mxu0  ;;  %4867 = vmatpush.bf16.msrb.mxu2 %v7296_v22 }
 0x29f   : > { %4857 = vmatpush.bf16.msrb.mxu1 %v7120_v34  ;;  %v3805_v54 = vadd.f32 %v3804_v52, %v3147_v45  ;;  %v3817_v55 = vpop.f32.mrf.mxu1  ;;  %v3148_v34 = vperm.slane %v9933_v35, 1  ;;  %v7245_v52 = vld [vmem:[%s10587_s8 + $0x290] sm:$0xf0] }
 0x2a0   : > { %4845 = vmatpush.bf16.msrb.mxu0 %v6976_v30  ;;  %v7404_v30 = vor.u32 %v8011_v28, %v7403_v27  ;;  %v7323_v27 = vld [vmem:[%s10587_s8 + $0x320] sm:$0xf]  ;;  %v7991_v28 = vld [vmem:[%s10587_s8 + $0x32c] sm:$0xf0] }
 0x2a1   : > { %v3818_v61 = vadd.f32 %v3817_v55, %v3805_v54  ;;  %v7908_v54 = vld [vmem:[%s10587_s8 + $0x94] sm:$0xf0] }
 0x2a2   : > { %4829 = vmatpush.bf16.msra.mxu3 %v7404_v30  ;;  %4868 = vmatpush.bf16.msrb.mxu2 %v7280_v23  ;;  %v7324_v23 = vor.u32 %v7991_v28, %v7323_v27  ;;  %v7357_v27 = vld [vmem:[%s10587_s8 + $0x370] sm:$0xf0]  ;;  %v7906_v28 = vld [vmem:[%s10587_s8 + $0x8c] sm:$0xf] }
 0x2a3   : > { %4858 = vmatpush.bf16.msrb.mxu1 %v7104_v8  ;;  %v7912_v8 = vld [vmem:[%s10587_s8 + $0xb4] sm:$0xf0] }
 0x2a4   : > { %4846 = vmatpush.bf16.msrb.mxu0 %v6960_v38  ;;  %v3830_v0 = vpop.f32.mrf.mxu2  ;;  %v7012_v49 = vor.u32 %v7912_v8, %v7011_v44  ;;  %v7953_v44 = vld [vmem:[%s10587_s8 + $0x204] sm:$0xf] }
 0x2a5   : > { %v3831_v5 = vadd.f32 %v3830_v0, %v3818_v61  ;;  %v3843_v6 = vpop.f32.mrf.mxu3  ;;  %v6979_v0 = vld [vmem:[%s10587_s8 + $0x68] sm:$0xf] }
 0x2a6   : > { %v3806_v36 = vpop.f32.mrf.mxu0  ;;  %4830 = vmatpush.bf16.msra.mxu3 %v7388_v42  ;;  %v7307_v42 = vld [vmem:[%s10587_s8 + $0x300] sm:$0xf] }
 0x2a7   : > { %4859 = vmatpush.bf16.msrb.mxu1 %v7088_v53  ;;  %v3844_v19 = vadd.f32 %v3843_v6, %v3831_v5  ;;  %v3819_v25 = vpop.f32.mrf.mxu1  ;;  %v6995_v53 = vld [vmem:[%s10587_s8 + $0x88] sm:$0xf]  ;;  %v6980_v36 = vor.u32 %v7904_v1, %v6979_v0 }
 0x2a8   : > { %4847 = vmatpush.bf16.msrb.mxu0 %v6944_v60  ;;  %v7264_v60 = vor.u32 %v7973_v41, %v7261_v7  ;;  %v6996_v61 = vor.u32 %v7908_v54, %v6995_v53  ;;  %v7156_v41 = vor.u32 %v7948_v24, %v7155_v31  ;;  %v7987_v7 = vld [vmem:[%s10587_s8 + $0x30c] sm:$0xf0]  ;;  %v7107_v1 = vld [vmem:[%s10587_s8 + $0x168] sm:$0xf] }
 0x2a9   : > { %v4003_v26 = vmax.f32 %v3844_v19, 0.0  ;;  %v7213_v19 = vld [vmem:[%s10587_s8 + $0x250] sm:$0xf0]  ;;  %v7075_v24 = vld [vmem:[%s10587_s8 + $0x128] sm:$0xf] }
 0x2aa   : > { %4869 = vmatpush.bf16.msrb.mxu2 %v7264_v60  ;;  %4831 = vmatpush.bf16.msra.mxu3 %v7372_v50  ;;  %v7216_v25 = vor.u32 %v7961_v21, %v7213_v19  ;;  %v7944_v60 = vld [vmem:[%s10587_s8 + $0x1b4] sm:$0xf0]  ;;  %v7918_v50 = vld [vmem:[%s10587_s8 + $0xec] sm:$0xf]  ;;  %v7013_v21 = vld [vmem:[%s10587_s8 + $0xb8] sm:$0xf0] }
 0x2ab   : > { %4860 = vmatpush.bf16.msrb.mxu1 %v7072_v63  ;;  %v10026_v33 = vpack.c.bf16 %v4003_v26, %v4003_v26  ;;  %v7229_v63 = vld [vmem:[%s10587_s8 + $0x270] sm:$0xf0]  ;;  %v7172_v26 = vor.u32 %v7952_v17, %v7171_v3  ;;  %v7091_v19 = vld [vmem:[%s10587_s8 + $0x148] sm:$0xf] }
 0x2ac   : > { %4848 = vmatpush.bf16.msrb.mxu0 %v6928_v57  ;;  %v3832_v37 = vpop.f32.mrf.mxu2  ;;  %v7248_v57 = vor.u32 %v7969_v48, %v7245_v52  ;;  %v7232_v5 = vor.u32 %v7965_v56, %v7229_v63  ;;  %v8013_v48 = vld [vmem:[%s10587_s8 + $0x3e4] sm:$0xf]  ;;  %v7045_v52 = vld [vmem:[%s10587_s8 + $0xf8] sm:$0xf0]  ;;  %v7405_v56 = vld [vmem:[%s10587_s8 + $0x3d0] sm:$0xf0]  ;;  %v7092_v31 = vor.u32 %v7932_v20, %v7091_v19 }
 0x2ad   : > { %4797 = vmatmul.bf16.vlgmr.msra.gmra.mxu0 %v10026_v33  ;;  %v3845_v38 = vpop.f32.mrf.mxu3  ;;  %v7197_v37 = vld [vmem:[%s10587_s8 + $0x230] sm:$0xf0]  ;;  %v7029_v63 = vld [vmem:[%s10587_s8 + $0xd8] sm:$0xf0] }
 0x2ae   : > { %v3856_v45 = vpop.f32.mrf.mxu0  ;;  %4870 = vmatpush.bf16.msrb.mxu2 %v7248_v57  ;;  %4832 = vmatpush.bf16.msra.mxu3 %v7356_v62  ;;  %v7896_v38 = vld [vmem:[%s10587_s8 + $0x34] sm:$0xf0]  ;;  %v6932_v57 = vor.u32 %v7892_v46, %v6931_v43  ;;  %v7914_v62 = vld [vmem:[%s10587_s8 + $0xcc] sm:$0xf]  ;;  %v7141_v19 = vld [vmem:[%s10587_s8 + $0x1b8] sm:$0xf0] }
 0x2af   : > { %4861 = vmatpush.bf16.msrb.mxu1 %v7056_v13  ;;  %v3857_v14 = vadd.f32 %v3856_v45, %v3148_v34  ;;  %v3869_v32 = vpop.f32.mrf.mxu1  ;;  %v6947_v34 = vld [vmem:[%s10587_s8 + $0x28] sm:$0xf]  ;;  %v7984_v46 = vld [vmem:[%s10587_s8 + $0x2f4] sm:$0xf0] }
 0x2b0   : > { %4893 = vmatpush.bf16.msra.mxu0 %v7044_v29  ;;  %v7957_v29 = vld [vmem:[%s10587_s8 + $0x224] sm:$0xf]  ;;  %v6948_v8 = vor.u32 %v7896_v38, %v6947_v34  ;;  %v7139_v45 = vld [vmem:[%s10587_s8 + $0x1a8] sm:$0xf]  ;;  %v7902_v34 = vld [vmem:[%s10587_s8 + $0x6c] sm:$0xf] }
 0x2b1   : > { %v3870_v55 = vadd.f32 %v3869_v32, %v3857_v14  ;;  %v7200_v39 = vor.u32 %v7957_v29, %v7197_v37  ;;  %v7308_v14 = vor.u32 %v7987_v7, %v7307_v42  ;;  %v7181_v32 = vld [vmem:[%s10587_s8 + $0x210] sm:$0xf0]  ;;  %v7140_v54 = vor.u32 %v7944_v60, %v7139_v45  ;;  %v6997_v29 = vld [vmem:[%s10587_s8 + $0x98] sm:$0xf0]  ;;  %v7924_v42 = vld [vmem:[%s10587_s8 + $0x114] sm:$0xf0] }
 0x2b2   : > { %4871 = vmatpush.bf16.msrb.mxu2 %v7232_v5  ;;  %4833 = vmatpush.bf16.msra.mxu3 %v7340_v18  ;;  %v7184_v47 = vor.u32 %v7953_v44, %v7181_v32  ;;  %v8005_v5 = vld [vmem:[%s10587_s8 + $0x3a4] sm:$0xf]  ;;  %v7000_v37 = vor.u32 %v7906_v28, %v6997_v29  ;;  %v6981_v38 = vld [vmem:[%s10587_s8 + $0x78] sm:$0xf0]  ;;  %v7341_v60 = vld [vmem:[%s10587_s8 + $0x350] sm:$0xf0] }
 0x2b3   : > { %v7993_v45 = vld [vmem:[%s10587_s8 + $0x344] sm:$0xf]  ;;  %v7251_v28 = vld [vmem:[%s10587_s8 + $0x288] sm:$0xf]  ;;  %v7972_v29 = vld [vmem:[%s10587_s8 + $0x294] sm:$0xf0] }
 0x2b4   : > { %4894 = vmatpush.bf16.msra.mxu0 %v7028_v10 }
 0x2b5   : > { %v3882_v40 = vpop.f32.mrf.mxu2 }
 0x2b6   : > { %v3883_v2 = vadd.f32 %v3882_v40, %v3870_v55  ;;  %v3858_v4 = vpop.f32.mrf.mxu0  ;;  %4872 = vmatpush.bf16.msrb.mxu2 %v7216_v25  ;;  %4834 = vmatpush.bf16.msra.mxu3 %v7324_v23  ;;  %v7123_v55 = vld [vmem:[%s10587_s8 + $0x188] sm:$0xf]  ;;  %v7408_v40 = vor.u32 %v8009_v59, %v7405_v56  ;;  %v7016_v25 = vor.u32 %v7910_v11, %v7013_v21  ;;  %v7894_v59 = vld [vmem:[%s10587_s8 + $0x2c] sm:$0xf]  ;;  %v7309_v11 = vld [vmem:[%s10587_s8 + $0x310] sm:$0xf0] }
 0x2b7   : > { %v3871_v9 = vpop.f32.mrf.mxu1  ;;  %v7124_v0 = vor.u32 %v7940_v58, %v7123_v55  ;;  %v3149_v4 = vperm.slane %v9933_v35, 2  ;;  %v7325_v58 = vld [vmem:[%s10587_s8 + $0x330] sm:$0xf0] }
 0x2b8   : > { %4895 = vmatpush.bf16.msra.mxu0 %v7012_v49  ;;  %v3895_v6 = vpop.f32.mrf.mxu3  ;;  %v7421_v49 = vld [vmem:[%s10587_s8 + $0x3f0] sm:$0xf0]  ;;  %v7032_v9 = vor.u32 %v7914_v62, %v7029_v63 }
 0x2b9   : > { %v3896_v13 = vadd.f32 %v3895_v6, %v3883_v2  ;;  %v7424_v53 = vor.u32 %v8013_v48, %v7421_v49  ;;  %v7936_v2 = vld [vmem:[%s10587_s8 + $0x174] sm:$0xf0]  ;;  %v7389_v6 = vld [vmem:[%s10587_s8 + $0x3b0] sm:$0xf0]  ;;  %v7173_v48 = vld [vmem:[%s10587_s8 + $0x1f8] sm:$0xf0] }
 0x2ba   : > { %4873 = vmatpush.bf16.msrb.mxu2 %v7200_v39  ;;  %4835 = vmatpush.bf16.msra.mxu3 %v7308_v14  ;;  %v7392_v12 = vor.u32 %v8005_v5, %v7389_v6  ;;  %v7108_v17 = vor.u32 %v7936_v2, %v7107_v1  ;;  %v6984_v14 = vor.u32 %v7902_v34, %v6981_v38  ;;  %v7946_v1 = vld [vmem:[%s10587_s8 + $0x1cc] sm:$0xf]  ;;  %v7157_v2 = vld [vmem:[%s10587_s8 + $0x1d8] sm:$0xf0]  ;;  %v7968_v34 = vld [vmem:[%s10587_s8 + $0x274] sm:$0xf0] }
 0x2bb   : > { %v4004_v22 = vmax.f32 %v3896_v13, 0.0  ;;  %v7373_v13 = vld [vmem:[%s10587_s8 + $0x390] sm:$0xf0]  ;;  %v6949_v5 = vld [vmem:[%s10587_s8 + $0x38] sm:$0xf0]  ;;  %v7160_v21 = vor.u32 %v7946_v1, %v7157_v2 }
 0x2bc   : > { %4896 = vmatpush.bf16.msra.mxu0 %v6996_v61  ;;  %v7048_v61 = vor.u32 %v7918_v50, %v7045_v52  ;;  %v7344_v50 = vor.u32 %v7993_v45, %v7341_v60  ;;  %v7898_v52 = vld [vmem:[%s10587_s8 + $0x4c] sm:$0xf]  ;;  %v7301_v2 = vld [vmem:[%s10587_s8 + $0x2f8] sm:$0xf0] }
 0x2bd   : > { %4849 = vmatmul.bf16.vlgmr.msrb.gmra.mxu0 %v10026_v33  ;;  %v10124_v30 = vpack.c.bf16 %v4004_v22, %v4004_v22  ;;  %v3884_v15 = vpop.f32.mrf.mxu2  ;;  %v7934_v38 = vld [vmem:[%s10587_s8 + $0x16c] sm:$0xf] }
 0x2be   : > { %4874 = vmatpush.bf16.msrb.mxu2 %v7184_v47  ;;  %4880 = vmatpush.bf16.msrb.mxu3 %v7424_v53  ;;  %v7928_v15 = vld [vmem:[%s10587_s8 + $0x134] sm:$0xf0]  ;;  %v7950_v47 = vld [vmem:[%s10587_s8 + $0x1ec] sm:$0xf]  ;;  %v6965_v53 = vld [vmem:[%s10587_s8 + $0x58] sm:$0xf0] }
 0x2bf   : > { %4810 = vmatmul.bf16.vlgmr.msra.gmra.mxu1 %v10124_v30  ;;  %v6968_v63 = vor.u32 %v7898_v52, %v6965_v53  ;;  %v7982_v1 = vld [vmem:[%s10587_s8 + $0x2ec] sm:$0xf] }
 0x2c0   : > { %4897 = vmatpush.bf16.msra.mxu0 %v6980_v36  ;;  %4906 = vmatpush.bf16.msra.mxu1 %v7172_v26  ;;  %v3897_v10 = vpop.f32.mrf.mxu3  ;;  %v8001_v36 = vld [vmem:[%s10587_s8 + $0x384] sm:$0xf] }
 0x2c1   : > { %v7376_v51 = vor.u32 %v8001_v36, %v7373_v13  ;;  %v7997_v26 = vld [vmem:[%s10587_s8 + $0x364] sm:$0xf]  ;;  %v7059_v10 = vld [vmem:[%s10587_s8 + $0x108] sm:$0xf] }
 0x2c2   : > { %4881 = vmatpush.bf16.msrb.mxu3 %v7408_v40  ;;  %v7360_v23 = vor.u32 %v7997_v26, %v7357_v27  ;;  %v7060_v55 = vor.u32 %v7924_v42, %v7059_v10  ;;  %v7283_v40 = vld [vmem:[%s10587_s8 + $0x2c8] sm:$0xf] }
 0x2c3   : > { %v7267_v13 = vld [vmem:[%s10587_s8 + $0x2a8] sm:$0xf] }
 0x2c4   : > { %4898 = vmatpush.bf16.msra.mxu0 %v6964_v16  ;;  %4907 = vmatpush.bf16.msra.mxu1 %v7156_v41  ;;  %v7076_v41 = vor.u32 %v7928_v15, %v7075_v24  ;;  %v7252_v24 = vor.u32 %v7972_v29, %v7251_v28  ;;  %v7379_v29 = vld [vmem:[%s10587_s8 + $0x388] sm:$0xf] }
 0x2c6   : > { %4882 = vmatpush.bf16.msrb.mxu3 %v7392_v12 }
 0x2c8   : > { %4899 = vmatpush.bf16.msra.mxu0 %v6948_v8  ;;  %4908 = vmatpush.bf16.msra.mxu1 %v7140_v54  ;;  %v7299_v8 = vld [vmem:[%s10587_s8 + $0x2e8] sm:$0xf] }
 0x2c9   : > { %v7300_v56 = vor.u32 %v7984_v46, %v7299_v8  ;;  %v7930_v8 = vld [vmem:[%s10587_s8 + $0x14c] sm:$0xf]  ;;  %v7960_v46 = vld [vmem:[%s10587_s8 + $0x234] sm:$0xf0] }
 0x2ca   : > { %4883 = vmatpush.bf16.msrb.mxu3 %v7376_v51  ;;  %v7890_v51 = vld [vmem:[%s10587_s8 + $0xc] sm:$0xf] }
 0x2cc   : > { %4900 = vmatpush.bf16.msra.mxu0 %v6932_v57  ;;  %4909 = vmatpush.bf16.msra.mxu1 %v7124_v0  ;;  %v7989_v57 = vld [vmem:[%s10587_s8 + $0x324] sm:$0xf]  ;;  %v7980_v0 = vld [vmem:[%s10587_s8 + $0x2d4] sm:$0xf0] }
 0x2cd   : > { %v7284_v12 = vor.u32 %v7980_v0, %v7283_v40  ;;  %v7427_v40 = vld [vmem:[%s10587_s8 + $0x3e8] sm:$0xf]  ;;  %v8016_v0 = vld [vmem:[%s10587_s8 + $0x3f4] sm:$0xf0] }
 0x2ce   : > { %v3908_v3 = vpop.f32.mrf.mxu0  ;;  %4884 = vmatpush.bf16.msrb.mxu3 %v7360_v23  ;;  %v3150_v23 = vperm.slane %v9933_v35, 3 }
 0x2cf   : > { %4901 = vmatmul.bf16.vlgmr.msra.gmra.mxu0 %v10026_v33  ;;  %v3909_v18 = vadd.f32 %v3908_v3, %v3149_v4  ;;  %v3921_v22 = vpop.f32.mrf.mxu1  ;;  %4862 = vmatmul.bf16.vlgmr.msrb.gmra.mxu1 %v10124_v30  ;;  %v7328_v4 = vor.u32 %v7989_v57, %v7325_v58  ;;  %v6952_v3 = vor.u32 %v7894_v59, %v6949_v5  ;;  %v7187_v58 = vld [vmem:[%s10587_s8 + $0x208] sm:$0xf]  ;;  %v7956_v59 = vld [vmem:[%s10587_s8 + $0x214] sm:$0xf0] }
 0x2d0   : > { %4945 = vmatpush.bf16.msrb.mxu0 %v7048_v61  ;;  %4910 = vmatpush.bf16.msra.mxu1 %v7108_v17  ;;  %v7176_v61 = vor.u32 %v7950_v47, %v7173_v48  ;;  %v7976_v17 = vld [vmem:[%s10587_s8 + $0x2b4] sm:$0xf0]  ;;  %v7926_v47 = vld [vmem:[%s10587_s8 + $0x12c] sm:$0xf]  ;;  %v7077_v48 = vld [vmem:[%s10587_s8 + $0x138] sm:$0xf0] }
 0x2d1   : > { %v3922_v16 = vadd.f32 %v3921_v22, %v3909_v18  ;;  %v7942_v18 = vld [vmem:[%s10587_s8 + $0x1ac] sm:$0xf]  ;;  %v7268_v22 = vor.u32 %v7976_v17, %v7267_v13  ;;  %v7080_v57 = vor.u32 %v7926_v47, %v7077_v48  ;;  %v7988_v47 = vld [vmem:[%s10587_s8 + $0x314] sm:$0xf0] }
 0x2d2   : > { %4885 = vmatpush.bf16.msrb.mxu3 %v7344_v50  ;;  %v7144_v26 = vor.u32 %v7942_v18, %v7141_v19  ;;  %v7978_v13 = vld [vmem:[%s10587_s8 + $0x2cc] sm:$0xf] }
 0x2d3   : > { %v7954_v48 = vld [vmem:[%s10587_s8 + $0x20c] sm:$0xf] }
 0x2d4   : > { %4946 = vmatpush.bf16.msrb.mxu0 %v7032_v9  ;;  %4911 = vmatpush.bf16.msra.mxu1 %v7092_v31  ;;  %v7985_v9 = vld [vmem:[%s10587_s8 + $0x304] sm:$0xf]  ;;  %v7125_v31 = vld [vmem:[%s10587_s8 + $0x198] sm:$0xf0] }
 0x2d5   : > { %v3934_v39 = vpop.f32.mrf.mxu2  ;;  %v7312_v20 = vor.u32 %v7985_v9, %v7309_v11  ;;  %v7428_v9 = vor.u32 %v8016_v0, %v7427_v40  ;;  %v7304_v11 = vor.u32 %v7982_v1, %v7301_v2  ;;  %v7381_v0 = vld [vmem:[%s10587_s8 + $0x398] sm:$0xf0]  ;;  %v7998_v2 = vld [vmem:[%s10587_s8 + $0x36c] sm:$0xf] }
 0x2d6   : > { %v3935_v43 = vadd.f32 %v3934_v39, %v3922_v16  ;;  %v3910_v7 = vpop.f32.mrf.mxu0  ;;  %4886 = vmatpush.bf16.msrb.mxu3 %v7328_v4  ;;  %v7938_v16 = vld [vmem:[%s10587_s8 + $0x18c] sm:$0xf]  ;;  %v7109_v39 = vld [vmem:[%s10587_s8 + $0x178] sm:$0xf0]  ;;  %v7188_v4 = vor.u32 %v7956_v59, %v7187_v58 }
 0x2d7   : > { %v3923_v49 = vpop.f32.mrf.mxu1  ;;  %v7128_v15 = vor.u32 %v7938_v16, %v7125_v31  ;;  %v7112_v42 = vor.u32 %v7934_v38, %v7109_v39  ;;  %v7219_v7 = vld [vmem:[%s10587_s8 + $0x248] sm:$0xf]  ;;  %v8004_v16 = vld [vmem:[%s10587_s8 + $0x394] sm:$0xf0]  ;;  %v7970_v31 = vld [vmem:[%s10587_s8 + $0x28c] sm:$0xf] }
 0x2d8   : > { %4947 = vmatpush.bf16.msrb.mxu0 %v7016_v25  ;;  %v3947_v44 = vpop.f32.mrf.mxu3  ;;  %4912 = vmatpush.bf16.msra.mxu1 %v7076_v41  ;;  %v6933_v25 = vld [vmem:[%s10587_s8 + $0x18] sm:$0xf0] }
 0x2d9   : > { %v3948_v32 = vadd.f32 %v3947_v44, %v3935_v43  ;;  %v6936_v27 = vor.u32 %v7890_v51, %v6933_v25  ;;  %v7964_v44 = vld [vmem:[%s10587_s8 + $0x254] sm:$0xf0]  ;;  %v7395_v51 = vld [vmem:[%s10587_s8 + $0x3a8] sm:$0xf]  ;;  %v7237_v38 = vld [vmem:[%s10587_s8 + $0x278] sm:$0xf0] }
 0x2da   : > { %4887 = vmatpush.bf16.msrb.mxu3 %v7312_v20  ;;  %v7220_v45 = vor.u32 %v7964_v44, %v7219_v7  ;;  %v8008_v25 = vld [vmem:[%s10587_s8 + $0x3b4] sm:$0xf0]  ;;  %v7413_v58 = vld [vmem:[%s10587_s8 + $0x3d8] sm:$0xf0] }
 0x2db   : > { %v4005_v54 = vmax.f32 %v3948_v32, 0.0  ;;  %v7203_v32 = vld [vmem:[%s10587_s8 + $0x228] sm:$0xf] }
 0x2dc   : > { %4948 = vmatpush.bf16.msrb.mxu0 %v7000_v37  ;;  %4913 = vmatpush.bf16.msra.mxu1 %v7060_v55  ;;  %v7235_v37 = vld [vmem:[%s10587_s8 + $0x268] sm:$0xf]  ;;  %v7204_v52 = vor.u32 %v7960_v46, %v7203_v32 }
 0x2dd   : > { %v10295_v62 = vpack.c.bf16 %v4005_v54, %v4005_v54  ;;  %v3936_v6 = vpop.f32.mrf.mxu2  ;;  %v7236_v43 = vor.u32 %v7968_v34, %v7235_v37  ;;  %v8000_v37 = vld [vmem:[%s10587_s8 + $0x374] sm:$0xf0]  ;;  %v7966_v34 = vld [vmem:[%s10587_s8 + $0x26c] sm:$0xf]  ;;  %v7315_v46 = vld [vmem:[%s10587_s8 + $0x308] sm:$0xf] }
 0x2df   : > { %4823 = vmatmul.bf16.vlgmr.msra.gmra.mxu2 %v10295_v62  ;;  %4914 = vmatmul.bf16.vlgmr.msra.gmra.mxu1 %v10124_v30 }
 0x2e0   : > { %4949 = vmatpush.bf16.msrb.mxu0 %v6984_v14  ;;  %4919 = vmatpush.bf16.msra.mxu2 %v7300_v56  ;;  %v3949_v36 = vpop.f32.mrf.mxu3  ;;  %v7922_v56 = vld [vmem:[%s10587_s8 + $0x10c] sm:$0xf] }
 0x2e1   : > { %4958 = vmatpush.bf16.msrb.mxu1 %v7176_v61  ;;  %v7061_v61 = vld [vmem:[%s10587_s8 + $0x118] sm:$0xf0]  ;;  %v8012_v36 = vld [vmem:[%s10587_s8 + $0x3d4] sm:$0xf0] }
 0x2e2   : > { %v7064_v6 = vor.u32 %v7922_v56, %v7061_v61  ;;  %v8006_v56 = vld [vmem:[%s10587_s8 + $0x3ac] sm:$0xf]  ;;  %v7397_v61 = vld [vmem:[%s10587_s8 + $0x3b8] sm:$0xf0] }
 0x2e3   : > { %v7400_v40 = vor.u32 %v8006_v56, %v7397_v61 }
 0x2e4   : > { %4950 = vmatpush.bf16.msrb.mxu0 %v6968_v63  ;;  %4920 = vmatpush.bf16.msra.mxu2 %v7284_v12  ;;  %v7411_v12 = vld [vmem:[%s10587_s8 + $0x3c8] sm:$0xf] }
 0x2e5   : > { %4959 = vmatpush.bf16.msrb.mxu1 %v7160_v21  ;;  %v7412_v19 = vor.u32 %v8012_v36, %v7411_v12  ;;  %v7990_v12 = vld [vmem:[%s10587_s8 + $0x32c] sm:$0xf]  ;;  %v7333_v36 = vld [vmem:[%s10587_s8 + $0x338] sm:$0xf0] }
 0x2e8   : > { %4951 = vmatpush.bf16.msrb.mxu0 %v6952_v3  ;;  %4921 = vmatpush.bf16.msra.mxu2 %v7268_v22  ;;  %v7285_v3 = vld [vmem:[%s10587_s8 + $0x2d8] sm:$0xf0]  ;;  %v7974_v22 = vld [vmem:[%s10587_s8 + $0x2ac] sm:$0xf] }
 0x2e9   : > { %4960 = vmatpush.bf16.msrb.mxu1 %v7144_v26  ;;  %v7288_v20 = vor.u32 %v7978_v13, %v7285_v3  ;;  %v7269_v26 = vld [vmem:[%s10587_s8 + $0x2b8] sm:$0xf0]  ;;  %v7336_v13 = vor.u32 %v7990_v12, %v7333_v36  ;;  %v7986_v3 = vld [vmem:[%s10587_s8 + $0x30c] sm:$0xf] }
 0x2ea   : > { %v7272_v28 = vor.u32 %v7974_v22, %v7269_v26 }
 0x2ec   : > { %4952 = vmatpush.bf16.msrb.mxu0 %v6936_v27  ;;  %4922 = vmatpush.bf16.msra.mxu2 %v7252_v24  ;;  %v7396_v27 = vor.u32 %v8008_v25, %v7395_v51  ;;  %v7380_v24 = vor.u32 %v8004_v16, %v7379_v29 }
 0x2ed   : > { %4961 = vmatpush.bf16.msrb.mxu1 %v7128_v15 }
 0x2ee   : > { %v3960_v35 = vpop.f32.mrf.mxu0 }
 0x2ef   : > { %4953 = vmatmul.bf16.vlgmr.msrb.gmra.mxu0 %v10026_v33  ;;  %v3961_v41 = vadd.f32 %v3960_v35, %v3150_v23  ;;  %v3973_v10 = vpop.f32.mrf.mxu1  ;;  %v7093_v33 = vld [vmem:[%s10587_s8 + $0x158] sm:$0xf0]  ;;  %4875 = vmatmul.bf16.vlgmr.msrb.gmra.mxu2 %v10295_v62  ;;  %v7363_v23 = vld [vmem:[%s10587_s8 + $0x368] sm:$0xf]  ;;  %v7240_v35 = vor.u32 %v7966_v34, %v7237_v38 }
 0x2f0   : > { %4923 = vmatpush.bf16.msra.mxu2 %v7236_v43  ;;  %v7096_v14 = vor.u32 %v7930_v8, %v7093_v33  ;;  %v7364_v39 = vor.u32 %v8000_v37, %v7363_v23  ;;  %v7347_v43 = vld [vmem:[%s10587_s8 + $0x348] sm:$0xf]  ;;  %v7992_v33 = vld [vmem:[%s10587_s8 + $0x334] sm:$0xf0] }
 0x2f1   : > { %v3974_v60 = vadd.f32 %v3973_v10, %v3961_v41  ;;  %4962 = vmatpush.bf16.msrb.mxu1 %v7112_v42  ;;  %v7996_v41 = vld [vmem:[%s10587_s8 + $0x354] sm:$0xf0]  ;;  %v7962_v10 = vld [vmem:[%s10587_s8 + $0x24c] sm:$0xf]  ;;  %v7221_v42 = vld [vmem:[%s10587_s8 + $0x258] sm:$0xf0] }
 0x2f2   : > { %v7348_v7 = vor.u32 %v7996_v41, %v7347_v43  ;;  %v7224_v44 = vor.u32 %v7962_v10, %v7221_v42  ;;  %v7331_v8 = vld [vmem:[%s10587_s8 + $0x328] sm:$0xf] }
 0x2f4   : > { %4924 = vmatpush.bf16.msra.mxu2 %v7220_v45  ;;  %v7958_v45 = vld [vmem:[%s10587_s8 + $0x22c] sm:$0xf] }
 0x2f5   : > { %v3986_v49 = vpop.f32.mrf.mxu2  ;;  %4963 = vmatpush.bf16.msrb.mxu1 %v7096_v14  ;;  %v7332_v14 = vor.u32 %v7992_v33, %v7331_v8 }
 0x2f6   : > { %v3962_v50 = vpop.f32.mrf.mxu0  ;;  %v3987_v53 = vadd.f32 %v3986_v49, %v3974_v60  ;;  %v3999_v54 = vpop.f32.mrf.mxu3  ;;  %v7205_v60 = vld [vmem:[%s10587_s8 + $0x238] sm:$0xf0] }
 0x2f7   : > { %v3975_v55 = vpop.f32.mrf.mxu1  ;;  %v7208_v32 = vor.u32 %v7958_v45, %v7205_v60  ;;  %v7189_v49 = vld [vmem:[%s10587_s8 + $0x218] sm:$0xf0]  ;;  %v8014_v50 = vld [vmem:[%s10587_s8 + $0x3ec] sm:$0xf] }
 0x2f8   : > { %v4000_v63 = vadd.f32 %v3999_v54, %v3987_v53  ;;  %4925 = vmatpush.bf16.msra.mxu2 %v7204_v52  ;;  %v7429_v52 = vld [vmem:[%s10587_s8 + $0x3f8] sm:$0xf0]  ;;  %v7316_v53 = vor.u32 %v7988_v47, %v7315_v46  ;;  %v7192_v54 = vor.u32 %v7954_v48, %v7189_v49 }
 0x2f9   : > { %4964 = vmatpush.bf16.msrb.mxu1 %v7080_v57  ;;  %v7432_v55 = vor.u32 %v8014_v50, %v7429_v52  ;;  %v8010_v57 = vld [vmem:[%s10587_s8 + $0x3cc] sm:$0xf] }
 0x2fa   : > { %v4006_v5 = vmax.f32 %v4000_v63, 0.0  ;;  %v7416_v59 = vor.u32 %v8010_v57, %v7413_v58  ;;  %v8002_v63 = vld [vmem:[%s10587_s8 + $0x38c] sm:$0xf] }
 0x2fb   : > { %v7384_v1 = vor.u32 %v8002_v63, %v7381_v0 }
 0x2fc   : > { %v10413_v21 = vpack.c.bf16 %v4006_v5, %v4006_v5  ;;  %4926 = vmatpush.bf16.msra.mxu2 %v7188_v4  ;;  %v7994_v5 = vld [vmem:[%s10587_s8 + $0x34c] sm:$0xf] }
 0x2fd   : > { %v3988_v17 = vpop.f32.mrf.mxu2  ;;  %4965 = vmatpush.bf16.msrb.mxu1 %v7064_v6  ;;  %v7349_v6 = vld [vmem:[%s10587_s8 + $0x358] sm:$0xf0] }
 0x2fe   : > { %v4001_v18 = vpop.f32.mrf.mxu3  ;;  %4836 = vmatmul.bf16.vlgmr.msra.gmra.mxu3 %v10413_v21  ;;  %v7317_v17 = vld [vmem:[%s10587_s8 + $0x318] sm:$0xf0] }
 0x2ff   : > { %4932 = vmatpush.bf16.msra.mxu3 %v7428_v9  ;;  %4927 = vmatmul.bf16.vlgmr.msra.gmra.mxu2 %v10295_v62  ;;  %v7352_v9 = vor.u32 %v7994_v5, %v7349_v6  ;;  %v7320_v18 = vor.u32 %v7986_v3, %v7317_v17 }
 0x300   : > { %4971 = vmatpush.bf16.msrb.mxu2 %v7304_v11  ;;  %4966 = vmatmul.bf16.vlgmr.msrb.gmra.mxu1 %v10124_v30  ;;  %v7253_v30 = vld [vmem:[%s10587_s8 + $0x298] sm:$0xf0] }
 0x301   : > { %v7256_v15 = vor.u32 %v7970_v31, %v7253_v30 }
 0x303   : > { %4933 = vmatpush.bf16.msra.mxu3 %v7412_v19 }
 0x304   : > { %4972 = vmatpush.bf16.msrb.mxu2 %v7288_v20  ;;  %v4139_v20 = vld [vmem:[%s10588_s9] sm:$0xf] }
 0x305   : > { %v4141_v51 = vperm.slane %v4139_v20, 0  ;;  %v4142_v16 = vperm.slane %v4139_v20, 1  ;;  %v4143_v34 = vperm.slane %v4139_v20, 2  ;;  %v4144_v56 = vperm.slane %v4139_v20, 3 }
 0x307   : > { %4934 = vmatpush.bf16.msra.mxu3 %v7396_v27 }
 0x308   : > { %4973 = vmatpush.bf16.msrb.mxu2 %v7272_v28 }
 0x30b   : > { %4935 = vmatpush.bf16.msra.mxu3 %v7380_v24 }
 0x30c   : > { %4974 = vmatpush.bf16.msrb.mxu2 %v7256_v15 }
 0x30e   : > { %4888 = vmatmul.bf16.vlgmr.msrb.gmra.mxu3 %v10413_v21 }
 0x30f   : > { %4936 = vmatpush.bf16.msra.mxu3 %v7364_v39 }
 0x310   : > { %4975 = vmatpush.bf16.msrb.mxu2 %v7240_v35 }
 0x313   : > { %4937 = vmatpush.bf16.msra.mxu3 %v7348_v7 }
 0x314   : > { %4976 = vmatpush.bf16.msrb.mxu2 %v7224_v44 }
 0x317   : > { %4938 = vmatpush.bf16.msra.mxu3 %v7332_v14 }
 0x318   : > { %4977 = vmatpush.bf16.msrb.mxu2 %v7208_v32 }
 0x31b   : > { %4939 = vmatpush.bf16.msra.mxu3 %v7316_v53 }
 0x31c   : > { %4978 = vmatpush.bf16.msrb.mxu2 %v7192_v54 }
 0x31e   : > { %4940 = vmatmul.bf16.vlgmr.msra.gmra.mxu3 %v10413_v21 }
 0x31f   : > { %4984 = vmatpush.bf16.msrb.mxu3 %v7432_v55  ;;  %4979 = vmatmul.bf16.vlgmr.msrb.gmra.mxu2 %v10295_v62  ;;  %v7365_v62 = vld [vmem:[%s10587_s8 + $0x378] sm:$0xf0] }
 0x320   : > { %v7368_v4 = vor.u32 %v7998_v2, %v7365_v62 }
 0x323   : > { %4985 = vmatpush.bf16.msrb.mxu3 %v7416_v59 }
 0x327   : > { %4986 = vmatpush.bf16.msrb.mxu3 %v7400_v40 }
 0x32a   : > { %v4798_v11 = vpop.f32.mrf.mxu0 }
 0x32b   : > { %4987 = vmatpush.bf16.msrb.mxu3 %v7384_v1  ;;  %v4799_v25 = vadd.f32 %v4798_v11, %v4141_v51 }
 0x32f   : > { %4988 = vmatpush.bf16.msrb.mxu3 %v7368_v4 }
 0x332   : > { %v4800_v19 = vpop.f32.mrf.mxu0 }
 0x333   : > { %4989 = vmatpush.bf16.msrb.mxu3 %v7352_v9 }
 0x337   : > { %4990 = vmatpush.bf16.msrb.mxu3 %v7336_v13 }
 0x33a   : > { %v4850_v22 = vpop.f32.mrf.mxu0 }
 0x33b   : > { %4991 = vmatpush.bf16.msrb.mxu3 %v7320_v18  ;;  %v4851_v30 = vadd.f32 %v4850_v22, %v4142_v16 }
 0x33c   : > { %v4811_v26 = vpop.f32.mrf.mxu1 }
 0x33d   : > { %v4812_v27 = vadd.f32 %v4811_v26, %v4799_v25 }
 0x33e   : > { %4992 = vmatmul.bf16.vlgmr.msrb.gmra.mxu3 %v10413_v21 }
 0x342   : > { %v4852_v28 = vpop.f32.mrf.mxu0 }
 0x344   : > { %v4813_v29 = vpop.f32.mrf.mxu1 }
 0x34c   : > { %v4902_v31 = vpop.f32.mrf.mxu0  ;;  %v4863_v24 = vpop.f32.mrf.mxu1 }
 0x34d   : > { %v4864_v15 = vadd.f32 %v4863_v24, %v4851_v30  ;;  %v4903_v38 = vadd.f32 %v4902_v31, %v4143_v34 }
 0x354   : > { %v4904_v23 = vpop.f32.mrf.mxu0  ;;  %v4865_v37 = vpop.f32.mrf.mxu1 }
 0x35c   : > { %v4915_v39 = vpop.f32.mrf.mxu1 }
 0x35d   : > { %v4916_v35 = vadd.f32 %v4915_v39, %v4903_v38 }
 0x362   : > { %v4824_v43 = vpop.f32.mrf.mxu2 }
 0x363   : > { %v4825_v41 = vadd.f32 %v4824_v43, %v4812_v27 }
 0x364   : > { %v4917_v21 = vpop.f32.mrf.mxu1 }
 0x36a   : > { %v4826_v42 = vpop.f32.mrf.mxu2 }
 0x36c   : > { %v4954_v10 = vpop.f32.mrf.mxu0 }
 0x36d   : > { %v4955_v61 = vadd.f32 %v4954_v10, %v4144_v56 }
 0x372   : > { %v4876_v44 = vpop.f32.mrf.mxu2 }
 0x373   : > { %v4877_v8 = vadd.f32 %v4876_v44, %v4864_v15 }
 0x374   : > { %v4956_v7 = vpop.f32.mrf.mxu0 }
 0x37a   : > { %v4878_v33 = vpop.f32.mrf.mxu2 }
 0x37d   : > { %v4967_v45 = vpop.f32.mrf.mxu1 }
 0x37e   : > { %v4968_v40 = vadd.f32 %v4967_v45, %v4955_v61 }
 0x381   : > { %v4837_v60 = vpop.f32.mrf.mxu3 }
 0x382   : > { %v4928_v14 = vpop.f32.mrf.mxu2  ;;  %v4838_v50 = vadd.f32 %v4837_v60, %v4825_v41 }
 0x383   : > { %v4929_v63 = vadd.f32 %v4928_v14, %v4916_v35 }
 0x385   : > { %v4969_v32 = vpop.f32.mrf.mxu1 }
 0x389   : > { %v4839_v46 = vpop.f32.mrf.mxu3 }
 0x38a   : > { %v4930_v47 = vpop.f32.mrf.mxu2 }
 0x391   : > { %v4889_v48 = vpop.f32.mrf.mxu3 }
 0x392   : > { %v4890_v49 = vadd.f32 %v4889_v48, %v4877_v8 }
 0x394   : > { %v5001_v52 = vrot.slane %v4890_v49, 6 }
 0x396   : > { %v5004_v53 = vsel %vm1724_vm0, %v4838_v50, %v5001_v52 }
 0x399   : > { %v4891_v54 = vpop.f32.mrf.mxu3 }
 0x3a1   : > { %v4941_v57 = vpop.f32.mrf.mxu3 }
 0x3a2   : > { %v4980_v55 = vpop.f32.mrf.mxu2  ;;  %v4942_v1 = vadd.f32 %v4941_v57, %v4929_v63 }
 0x3a3   : > { %v4981_v0 = vadd.f32 %v4980_v55, %v4968_v40 }
 0x3a4   : > { %v5002_v4 = vrot.slane %v4942_v1, 4 }
 0x3a9   : > { %v4943_v59 = vpop.f32.mrf.mxu3 }
 0x3aa   : > { %v4982_v58 = vpop.f32.mrf.mxu2 }
 0x3c1   : > { %v4993_v2 = vpop.f32.mrf.mxu3 }
 0x3c2   : > { %v4994_v62 = vadd.f32 %v4993_v2, %v4981_v0 }
 0x3c4   : > { %v5003_v5 = vrot.slane %v4994_v62, 2 }
 0x3c6   : > { %v5005_v6 = vsel %vm1726_vm1, %v5002_v4, %v5003_v5 }
 0x3c7   : > { %v5006_v9 = vsel %vm1728_vm2, %v5004_v53, %v5005_v6 }
 0x3c8   : > { %5008 = vst [vmem:[#allocation6] sm:$0xff] %v5006_v9 }
 0x3c9   : > { %v4995_v11 = vpop.f32.mrf.mxu3 }
 0x3ca PF: > { %p8025_p7 = scmp.eq.s32.totalorder %s8181_s18, 4  ;;  %s8113_s30 = smov [#allocation4]  }
 0x3cb   : > { %s5015_s12 = sshll.u32 %s8113_s30, 4  ;;  %s5017_s15 = sshll.u32 %s10589_s10, 4  ;;  %s5016_s12 = int_to_ptr.vmem [resolvable:$true] %s5015_s12  ;;  %s5018_s15 = int_to_ptr.hbm [resolvable:$true] %s5017_s15 }
 0x3cc   : > { %8018 = dma.vmem_to_hbm [thread:$0]  (%p8025_p7), %s5016_s12, 128, %s5018_s15, [#allocation5]  }
 0x3cd   : > { %s5029_s20 = sshll.u32 %s10590_s11, 4  ;;  %s8114_s21 = smov [#allocation6]   ;;  %s5030_s20 = int_to_ptr.hbm [resolvable:$true] %s5029_s20 }
 0x3ce   : > { %s5027_s22 = sshll.u32 %s8114_s21, 4  ;;  %s5028_s22 = int_to_ptr.vmem [resolvable:$true] %s5027_s22 }
 0x3cf   : > { %8020 = dma.vmem_to_hbm [thread:$0]  (%p8025_p7), %s5028_s22, 128, %s5030_s20, [#allocation7]  }
 0x3d0   : > { %8101 = dma.done.wait (%p8025_p7), [#allocation5], 128  }
 0x3d1   : > { %8103 = vsyncadd (%p8025_p7), [#allocation5], 4294967168 }
 0x3d2   : > { %8105 = dma.done.wait (%p8025_p7), [#allocation7], 128  }
 0x3d3   : > { %8107 = vsyncadd (%p8025_p7), [#allocation7], 4294967168 }
 0x3d4 PF: > { %s24_s17 = sadd.s32 1, %s8110_s17  }
 0x3d5   : > { %p21_p8 = scmp.ge.s32.totalorder %s24_s17, 7  }
 0x3d7   :  { %23 = sbr.rel (!%p21_p8) target bundleno = 2 (0x2), region = 114 }
 0x3dc   :  { %5048 = vsyncpa [#allocation5], 1 }
 0x3dd   :  { %5050 = vsyncpa [#allocation5 + $0x1], 1 }
 0x3de   :  { %5051 = vsyncpa [#allocation7], 1 }

</bundles_post_ra>
